<compile_context>
chip_gen: v7x
topology: tpu7x:2x2x1
jax: 0.10.0
libtpu: 0.0.40
codegen_flags: <defaults>
</compile_context>

<pallas_src>
import jax
import jax.numpy as jnp
from jax.experimental import pallas as pl
from jax.experimental.pallas import tpu as pltpu

NEG_BIG = -9.0e15
MXU_BF16 = True   # bf16 operands / f32 accumulation on threshold-free matmuls


def _pick_bb(batch, cap=8):
    """Largest divisor of `batch` that is <= cap (graphs per grid step)."""
    bb = min(batch, cap)
    while batch % bb:
        bb -= 1
    return bb


def _mxu(v):
    return v.astype(jnp.bfloat16) if MXU_BF16 else v


# ----------------------------------------------------------------------------
# Forward pass: one fused pallas_call over batch blocks
# ----------------------------------------------------------------------------
def gcn_frequency_forward(params, x, adj_0, scale=1000.0):
    B, N, Din = x.shape
    D = params["W"][1][0].shape[0]          # feat_dim
    Dout = params["out"][0].shape[1]
    M1 = params["match"][0][0].shape[0]     # 18
    M2 = params["match"][1][0].shape[0]     # 43
    assert N == M2, "x_2 + x_0 residual requires N == second coarse size (43)"

    BB = _pick_bb(B)
    scale = float(scale)

    # ---- consolidated parameter tensors (fewer refs / BlockSpecs / DMAs) ----
    a1c = params["a1"].reshape(D, 1)        # column -> flat wh1 projection
    a2r = params["a2"].reshape(1, D)        # row    -> per-graph wh2 projection
    w0, b0 = params["W"][0]                                      # (Din,D),(1,D)
    wrest = jnp.stack([params["W"][i][0] for i in range(1, 6)])  # (5, D, D)
    brest = jnp.stack([params["W"][i][1] for i in range(1, 6)])  # (5, 1, D)
    wo, bo = params["out"]                                       # (D,Dout),(1,Dout)
    wmc1 = jnp.concatenate([params["match"][0][0], params["corr"][0][0]], 0)  # (2*M1,D)
    bmc1 = jnp.concatenate([params["match"][0][1], params["corr"][0][1]], 0)  # (2*M1,1)
    wmc2 = jnp.concatenate([params["match"][1][0], params["corr"][1][0]], 0)  # (2*M2,D)
    bmc2 = jnp.concatenate([params["match"][1][1], params["corr"][1][1]], 0)  # (2*M2,1)

    # ---- packed, lane-dense output slab (one out ref, dense writeback) ----
    # rows [0:N)                 : output (0:Dout)   | adj_2 (Dout:Dout+M2)
    # rows [N:N+M2)              : mm_2   (0:M1)     | cg_2  (M1:2*M1)
    # rows [N+M2:N+M2+M1)        : x_1    (0:D)      | adj_1 (D:D+M1)
    # rows [N+M2+M1:N+M2+2*M1)   : mm_1   (0:N)      | cg_1  (N:2*N)
    RO_OUT, RO_MM2, RO_X1, RO_MM1 = 0, N, N + M2, N + M2 + M1
    SLAB_R = -(-(N + M2 + 2 * M1) // 8) * 8
    SLAB_C = -(-max(Dout + M2, 2 * M1, D + M1, 2 * N) // 128) * 128

    def kernel(x_ref, adj0_ref, a1c_ref, a2r_ref,
               w0_ref, b0_ref, wr_ref, br_ref, wo_ref, bo_ref,
               wmc1_ref, bmc1_ref, wmc2_ref, bmc2_ref,
               out_ref, x0buf, bufA, bufB):
        a1c_v = a1c_ref[...]
        a2r_v = a2r_ref[...]

        def softmax_lanes(logits):
            m = jnp.max(logits, axis=-1, keepdims=True)
            p = jnp.exp(logits - m)
            return p / jnp.sum(p, axis=-1, keepdims=True)   # exact division

        def gcn_level(src_ref, din, adj_list, wa, ba, wb, bb_, dst_ref, Ng):
            """_GCN_loop over BB graphs.  src_ref[:BB*Ng, :din] holds flat feats."""
            rows = BB * Ng
            h_flat = src_ref[0:rows, 0:din]
            # attention: wh1 for all graphs in ONE flat matmul; wh2 per graph
            # (lane-major), one tiny matmul each.
            wh1 = jnp.dot(_mxu(h_flat), _mxu(a1c_v),
                          preferred_element_type=jnp.float32)          # (rows,1)
            adj_soft = []
            for g in range(BB):
                h_g = h_flat[g * Ng:(g + 1) * Ng, :]
                wh2 = jnp.einsum("kd,nd->kn", _mxu(a2r_v), _mxu(h_g),
                                 preferred_element_type=jnp.float32)   # (1,Ng)
                e = wh1[g * Ng:(g + 1) * Ng, :] + wh2                  # (Ng,Ng)
                masked = jnp.where(adj_list[g] > 0.0, e,
                                   jnp.full_like(e, NEG_BIG))
                adj_soft.append(softmax_lanes(masked))
            # Two GCN layers.  (A h)W + hW + 2b == A(hW) + hW + 2b, so the
            # weight matmul runs once on the flat (BB*Ng, D) block and only the
            # adjacency aggregation stays per graph.  Softmaxed-adjacency rows
            # sum to 1 => denom = rowsum + 1 == 2 => multiply by 0.5.
            for (w, b) in ((wa, ba), (wb, bb_)):
                dcur = w.shape[1]
                u_flat = jnp.dot(_mxu(h_flat), _mxu(w),
                                 preferred_element_type=jnp.float32)   # (rows,dcur)
                two_b = 2.0 * b
                for g in range(BB):
                    u_g = u_flat[g * Ng:(g + 1) * Ng, :]
                    z = jnp.dot(_mxu(adj_soft[g]), _mxu(u_g),
                                preferred_element_type=jnp.float32) + u_g
                    dst_ref[g * Ng:(g + 1) * Ng, 0:dcur] = jnp.maximum(
                        (z + two_b) * 0.5, 0.0)
                h_flat = dst_ref[0:rows, 0:dcur]
            return h_flat

        def matching(h_flat, adj_list, wmc, bmc, M, Ng, dst_ref,
                     row_mm, col_cg, row_adj, col_adj):
            """_matching_gen (per graph), fused match+corr projection.

            Everything is produced directly in the (M, nodes) transposed
            orientation, so x_coarse / adj_pred are plain matmuls and the
            mm / cg outputs need no transpose.  Kept f32: the corr half feeds
            sigmoid(1000*x) and the adj_pred > 0.1 threshold.
            """
            adj_new = []
            for g in range(BB):
                h_g = h_flat[g * Ng:(g + 1) * Ng, :]
                proj = jnp.einsum("md,nd->mn", wmc, h_g,
                                  preferred_element_type=jnp.float32) + bmc
                ml = proj[0:M, :]                   # match logits   (M, Ng)
                cl = proj[M:2 * M, :]               # corr logits    (M, Ng)
                match_t = softmax_lanes(ml)          # softmax over nodes (dim=1)
                x_c = jnp.dot(_mxu(match_t), _mxu(h_g),
                              preferred_element_type=jnp.float32)        # (M, D)
                corr_t = jax.nn.sigmoid(scale * cl)                      # (M, Ng)
                tmp = jnp.einsum("nk,mk->nm", adj_list[g], corr_t,
                                 preferred_element_type=jnp.float32)     # adj @ corr
                adj_pred = jnp.dot(corr_t, tmp,
                                   preferred_element_type=jnp.float32)   # (M, M)
                a_new = jnp.where(adj_pred > 0.1,
                                  jnp.ones_like(adj_pred),
                                  jnp.full_like(adj_pred, NEG_BIG))
                adj_new.append(a_new)
                dst_ref[g * M:(g + 1) * M, 0:x_c.shape[1]] = x_c
                out_ref[g, row_mm:row_mm + M, 0:Ng] = match_t
                out_ref[g, row_mm:row_mm + M, col_cg:col_cg + Ng] = corr_t
                out_ref[g, row_adj:row_adj + M, col_adj:col_adj + M] = a_new
            return adj_new

        # ---- assemble the BB graphs into a flat (BB*N, Din) block ----
        adj0_list = [adj0_ref[g] for g in range(BB)]
        for g in range(BB):
            bufA[g * N:(g + 1) * N, 0:Din] = x_ref[g]

        # level 0
        x0_flat = gcn_level(bufA, Din, adj0_list,
                            w0_ref[...], b0_ref[...], wr_ref[0], br_ref[0],
                            x0buf, N)
        adj1_list = matching(x0_flat, adj0_list, wmc1_ref[...], bmc1_ref[...],
                             M1, N, bufA,
                             row_mm=RO_MM1, col_cg=N,
                             row_adj=RO_X1, col_adj=D)
        # level 1
        x1_flat = gcn_level(bufA, D, adj1_list,
                            wr_ref[1], br_ref[1], wr_ref[2], br_ref[2],
                            bufB, M1)
        for g in range(BB):       # output_intermediate = x_1 (post level-1 GCN)
            out_ref[g, RO_X1:RO_X1 + M1, 0:D] = x1_flat[g * M1:(g + 1) * M1, :]
        adj2_list = matching(x1_flat, adj1_list, wmc2_ref[...], bmc2_ref[...],
                             M2, M1, bufA,
                             row_mm=RO_MM2, col_cg=M1,
                             row_adj=RO_OUT, col_adj=Dout)
        # level 2
        x2_flat = gcn_level(bufA, D, adj2_list,
                            wr_ref[3], br_ref[3], wr_ref[4], br_ref[4],
                            bufB, M2)

        # residual + output MLP + tanh (flat over all BB graphs)
        y = jnp.tanh(
            jnp.dot(_mxu(x2_flat + x0buf[0:BB * N, 0:D]), _mxu(wo_ref[...]),
                    preferred_element_type=jnp.float32) + bo_ref[...])
        for g in range(BB):
            out_ref[g, RO_OUT:RO_OUT + N, 0:Dout] = y[g * N:(g + 1) * N, :]

    # ---- specs --------------------------------------------------------------
    def _const_spec(arr):
        nd = arr.ndim
        # constant index map => loaded once, no per-step re-DMA
        return pl.BlockSpec(arr.shape, lambda b, _n=nd: (0,) * _n)

    in_specs = [
        pl.BlockSpec((BB, N, Din), lambda b: (b, 0, 0)),
        pl.BlockSpec((BB, N, N), lambda b: (b, 0, 0)),
        _const_spec(a1c), _const_spec(a2r),
        _const_spec(w0), _const_spec(b0),
        _const_spec(wrest), _const_spec(brest),
        _const_spec(wo), _const_spec(bo),
        _const_spec(wmc1), _const_spec(bmc1),
        _const_spec(wmc2), _const_spec(bmc2),
    ]
    out_spec = pl.BlockSpec((BB, SLAB_R, SLAB_C), lambda b: (b, 0, 0))

    def _mmf(m, k, n):
        return 2 * m * k * n
    per_graph_flops = (
        _mmf(N, Din, D) + _mmf(N, D, D)
        + 2 * _mmf(M1, D, D) + 2 * _mmf(M2, D, D)
        + 2 * _mmf(N, N, D) + 2 * _mmf(M1, M1, D) + 2 * _mmf(M2, M2, D)
        + _mmf(2 * M1, D, N) + _mmf(2 * M2, D, M1)
        + _mmf(M1, N, D) + _mmf(M2, M1, D)
        + _mmf(N, N, M1) + _mmf(M1, N, M1) + _mmf(M1, M1, M2) + _mmf(M2, M1, M2)
        + _mmf(N, D, Dout))
    per_graph_transc = (N * N + M1 * M1 + M2 * M2
                        + 2 * (M1 * N + M2 * M1) + N * Dout)
    cost = pl.CostEstimate(
        flops=B * per_graph_flops,
        transcendentals=B * per_graph_transc,
        bytes_accessed=int(x.size + adj_0.size + B * SLAB_R * SLAB_C) * 4)

    out_slab = pl.pallas_call(
        kernel,
        out_shape=jax.ShapeDtypeStruct((B, SLAB_R, SLAB_C), jnp.float32),
        grid=(B // BB,),
        in_specs=in_specs,
        out_specs=out_spec,
        scratch_shapes=[
            pltpu.VMEM((BB * N, D), jnp.float32),               # x0 (residual)
            pltpu.VMEM((BB * N, max(Din, D)), jnp.float32),     # working A
            pltpu.VMEM((BB * N, D), jnp.float32),               # working B
        ],
        compiler_params=pltpu.CompilerParams(
            # batch-block axis is independent; on v7x, pltpu.CORE_PARALLEL here
            # shards it across the two TensorCores.
            dimension_semantics=("parallel",)),
        cost_estimate=cost,
    )(x, adj_0, a1c, a2r, w0, b0, wrest, brest, wo, bo,
      wmc1, bmc1, wmc2, bmc2)

    # ---- unpack the lane-dense slab -----------------------------------------
    output = out_slab[:, RO_OUT:RO_OUT + N, 0:Dout]
    adj_2 = out_slab[:, RO_OUT:RO_OUT + N, Dout:Dout + M2]
    mm_2 = out_slab[:, RO_MM2:RO_MM2 + M2, 0:M1]
    cg_2 = out_slab[:, RO_MM2:RO_MM2 + M2, M1:2 * M1]
    x_1 = out_slab[:, RO_X1:RO_X1 + M1, 0:D]
    adj_1 = out_slab[:, RO_X1:RO_X1 + M1, D:D + M1]
    mm_1 = out_slab[:, RO_MM1:RO_MM1 + M1, 0:N]
    cg_1 = out_slab[:, RO_MM1:RO_MM1 + M1, N:2 * N]
    return output, x_1, [mm_1, mm_2, cg_1, cg_2], [adj_0, adj_1, adj_2]


# ----------------------------------------------------------------------------
# Parameter init (deterministic, synthetic)
# ----------------------------------------------------------------------------
def init_params(key, in_dim=64, feat_dim=64, output_dim=64):
    keys = jax.random.split(key, 12)

    def lin_xw(k, din, dout):
        # stored (in, out) for "x @ W" use, bias as a row (1, out)
        kw, kb = jax.random.split(k)
        bound = 1.0 / jnp.sqrt(din)
        w = jax.random.uniform(kw, (din, dout), jnp.float32, -bound, bound)
        b = jax.random.uniform(kb, (1, dout), jnp.float32, -bound, bound)
        return w, b

    def lin_wx(k, din, dout):
        # stored (out, in) (PyTorch Linear layout), bias as a column (out, 1)
        kw, kb = jax.random.split(k)
        bound = 1.0 / jnp.sqrt(din)
        w = jax.random.uniform(kw, (dout, din), jnp.float32, -bound, bound)
        b = jax.random.uniform(kb, (dout, 1), jnp.float32, -bound, bound)
        return w, b

    params = {}
    params["W"] = [lin_xw(keys[i], in_dim if i == 0 else feat_dim, feat_dim)
                   for i in range(6)]
    params["out"] = lin_xw(keys[6], feat_dim, output_dim)
    params["match"] = [lin_wx(keys[7], feat_dim, 18),
                       lin_wx(keys[8], feat_dim, 43)]
    params["corr"] = [lin_wx(keys[9], feat_dim, 18),
                      lin_wx(keys[10], feat_dim, 43)]
    limit = 1.414 * jnp.sqrt(6.0 / (2 * output_dim + 1))
    a = jax.random.uniform(keys[11], (2 * output_dim, 1), jnp.float32,
                           -limit, limit)
    params["a1"] = a[:output_dim, :].reshape(1, output_dim)
    params["a2"] = a[output_dim:, :].reshape(1, output_dim)
    return params


if __name__ == "__main__":
    B, N, D = 2, 43, 64   # N must be 43 so the x_2 + x_0 residual is well-formed
    key = jax.random.PRNGKey(0)
    k_p, k_x, k_a = jax.random.split(key, 3)

    params = init_params(k_p, in_dim=D, feat_dim=D, output_dim=D)
    x = jax.random.normal(k_x, (B, N, D), jnp.float32)
    adj_0 = (jax.random.uniform(k_a, (B, N, N)) > 0.5).astype(jnp.float32)
    adj_0 = jnp.maximum(adj_0, jnp.eye(N, dtype=jnp.float32)[None])  # self-loops

    out, out_inter, mats, adjs = gcn_frequency_forward(params, x, adj_0)
    jax.block_until_ready(out)
    jax.block_until_ready(out_inter)
    for m in mats:
        jax.block_until_ready(m)
    for a in adjs:
        jax.block_until_ready(a)

    assert out.shape == (B, N, D)
    assert out_inter.shape == (B, 18, D)
    assert mats[0].shape == (B, 18, N) and mats[1].shape == (B, 43, 18)
    assert mats[2].shape == (B, 18, N) and mats[3].shape == (B, 43, 18)
    assert adjs[1].shape == (B, 18, 18) and adjs[2].shape == (B, 43, 43)
    assert bool(jnp.isfinite(out).all())
    assert bool(jnp.isfinite(out_inter).all())
    assert bool(jnp.isfinite(mats[0]).all()) and bool(jnp.isfinite(mats[1]).all())
    print("KERNEL_OK")
</pallas_src>

<mosaic_0001>
module attributes {stable_mosaic.version = 11 : i64} {
  func.func @kernel(%arg0: i32, %arg1: memref<2x43x64xf32, #tpu.memory_space<vmem>>, %arg2: memref<2x43x43xf32, #tpu.memory_space<vmem>>, %arg3: memref<64x1xf32, #tpu.memory_space<vmem>>, %arg4: memref<1x64xf32, #tpu.memory_space<vmem>>, %arg5: memref<64x64xf32, #tpu.memory_space<vmem>>, %arg6: memref<1x64xf32, #tpu.memory_space<vmem>>, %arg7: memref<5x64x64xf32, #tpu.memory_space<vmem>>, %arg8: memref<5x1x64xf32, #tpu.memory_space<vmem>>, %arg9: memref<64x64xf32, #tpu.memory_space<vmem>>, %arg10: memref<1x64xf32, #tpu.memory_space<vmem>>, %arg11: memref<36x64xf32, #tpu.memory_space<vmem>>, %arg12: memref<36x1xf32, #tpu.memory_space<vmem>>, %arg13: memref<86x64xf32, #tpu.memory_space<vmem>>, %arg14: memref<86x1xf32, #tpu.memory_space<vmem>>, %arg15: memref<2x128x128xf32, #tpu.memory_space<vmem>>, %arg16: memref<86x64xf32, #tpu.memory_space<vmem>>, %arg17: memref<86x64xf32, #tpu.memory_space<vmem>>, %arg18: memref<86x64xf32, #tpu.memory_space<vmem>>) attributes {dimension_semantics = [#tpu.dimension_semantics<parallel>], iteration_bounds = array<i64: 1>, scalar_prefetch = 0 : i64, scratch_operands = 3 : i64, tpu.core_type = #tpu.core_type<tc>, window_params = [{transform_indices = @transform_0, window_bounds = array<i64: 2, 43, 64>}, {transform_indices = @transform_1, window_bounds = array<i64: 2, 43, 43>}, {pipeline_mode = #tpu.pipeline_mode<synchronous>, transform_indices = @transform_2, window_bounds = array<i64: 64, 1>}, {pipeline_mode = #tpu.pipeline_mode<synchronous>, transform_indices = @transform_3, window_bounds = array<i64: 1, 64>}, {pipeline_mode = #tpu.pipeline_mode<synchronous>, transform_indices = @transform_4, window_bounds = array<i64: 64, 64>}, {pipeline_mode = #tpu.pipeline_mode<synchronous>, transform_indices = @transform_5, window_bounds = array<i64: 1, 64>}, {pipeline_mode = #tpu.pipeline_mode<synchronous>, transform_indices = @transform_6, window_bounds = array<i64: 5, 64, 64>}, {pipeline_mode = #tpu.pipeline_mode<synchronous>, transform_indices = @transform_7, window_bounds = array<i64: 5, 1, 64>}, {pipeline_mode = #tpu.pipeline_mode<synchronous>, transform_indices = @transform_8, window_bounds = array<i64: 64, 64>}, {pipeline_mode = #tpu.pipeline_mode<synchronous>, transform_indices = @transform_9, window_bounds = array<i64: 1, 64>}, {pipeline_mode = #tpu.pipeline_mode<synchronous>, transform_indices = @transform_10, window_bounds = array<i64: 36, 64>}, {pipeline_mode = #tpu.pipeline_mode<synchronous>, transform_indices = @transform_11, window_bounds = array<i64: 36, 1>}, {pipeline_mode = #tpu.pipeline_mode<synchronous>, transform_indices = @transform_12, window_bounds = array<i64: 86, 64>}, {pipeline_mode = #tpu.pipeline_mode<synchronous>, transform_indices = @transform_13, window_bounds = array<i64: 86, 1>}, {transform_indices = @transform_14, window_bounds = array<i64: 2, 128, 128>}]} {
    %c0 = arith.constant 0 : index
    %c0_0 = arith.constant 0 : index
    %0 = vector.load %arg3[%c0, %c0_0] : memref<64x1xf32, #tpu.memory_space<vmem>>, vector<64x1xf32>
    %c0_1 = arith.constant 0 : index
    %c0_2 = arith.constant 0 : index
    %1 = vector.load %arg4[%c0_1, %c0_2] : memref<1x64xf32, #tpu.memory_space<vmem>>, vector<1x64xf32>
    %c0_3 = arith.constant 0 : index
    %c0_4 = arith.constant 0 : index
    %c0_5 = arith.constant 0 : index
    %2 = vector.load %arg2[%c0_3, %c0_4, %c0_5] : memref<2x43x43xf32, #tpu.memory_space<vmem>>, vector<1x43x43xf32>
    %3 = vector.shape_cast %2 : vector<1x43x43xf32> to vector<43x43xf32>
    %c1 = arith.constant 1 : index
    %c0_6 = arith.constant 0 : index
    %c0_7 = arith.constant 0 : index
    %4 = vector.load %arg2[%c1, %c0_6, %c0_7] : memref<2x43x43xf32, #tpu.memory_space<vmem>>, vector<1x43x43xf32>
    %5 = vector.shape_cast %4 : vector<1x43x43xf32> to vector<43x43xf32>
    %c0_8 = arith.constant 0 : index
    %c0_9 = arith.constant 0 : index
    %c0_10 = arith.constant 0 : index
    %6 = vector.load %arg1[%c0_8, %c0_9, %c0_10] : memref<2x43x64xf32, #tpu.memory_space<vmem>>, vector<1x43x64xf32>
    %7 = vector.shape_cast %6 : vector<1x43x64xf32> to vector<43x64xf32>
    %c0_11 = arith.constant 0 : index
    %c0_12 = arith.constant 0 : index
    %8 = vector.load %arg17[%c0_11, %c0_12] : memref<86x64xf32, #tpu.memory_space<vmem>>, vector<43x64xf32>
    tpu.vector_store %arg17[%c0_11, %c0_12], %7 {strides = array<i32>} : memref<86x64xf32, #tpu.memory_space<vmem>>, vector<43x64xf32>,
    %c1_13 = arith.constant 1 : index
    %c0_14 = arith.constant 0 : index
    %c0_15 = arith.constant 0 : index
    %9 = vector.load %arg1[%c1_13, %c0_14, %c0_15] : memref<2x43x64xf32, #tpu.memory_space<vmem>>, vector<1x43x64xf32>
    %10 = vector.shape_cast %9 : vector<1x43x64xf32> to vector<43x64xf32>
    %c43 = arith.constant 43 : index
    %c0_16 = arith.constant 0 : index
    %11 = vector.load %arg17[%c43, %c0_16] : memref<86x64xf32, #tpu.memory_space<vmem>>, vector<43x64xf32>
    tpu.vector_store %arg17[%c43, %c0_16], %10 {strides = array<i32>} : memref<86x64xf32, #tpu.memory_space<vmem>>, vector<43x64xf32>,
    %c0_17 = arith.constant 0 : index
    %c0_18 = arith.constant 0 : index
    %12 = vector.load %arg5[%c0_17, %c0_18] : memref<64x64xf32, #tpu.memory_space<vmem>>, vector<64x64xf32>
    %c0_19 = arith.constant 0 : index
    %c0_20 = arith.constant 0 : index
    %13 = vector.load %arg6[%c0_19, %c0_20] : memref<1x64xf32, #tpu.memory_space<vmem>>, vector<1x64xf32>
    %c0_21 = arith.constant 0 : index
    %c0_22 = arith.constant 0 : index
    %c0_23 = arith.constant 0 : index
    %14 = vector.load %arg7[%c0_21, %c0_22, %c0_23] : memref<5x64x64xf32, #tpu.memory_space<vmem>>, vector<1x64x64xf32>
    %15 = vector.shape_cast %14 : vector<1x64x64xf32> to vector<64x64xf32>
    %c0_24 = arith.constant 0 : index
    %c0_25 = arith.constant 0 : index
    %c0_26 = arith.constant 0 : index
    %16 = vector.load %arg8[%c0_24, %c0_25, %c0_26] : memref<5x1x64xf32, #tpu.memory_space<vmem>>, vector<1x1x64xf32>
    %17 = vector.shape_cast %16 : vector<1x1x64xf32> to vector<1x64xf32>
    %c0_27 = arith.constant 0 : index
    %c0_28 = arith.constant 0 : index
    %18 = vector.load %arg17[%c0_27, %c0_28] : memref<86x64xf32, #tpu.memory_space<vmem>>, vector<86x64xf32>
    %19 = arith.truncf %18 : vector<86x64xf32> to vector<86x64xbf16>
    %20 = arith.truncf %0 : vector<64x1xf32> to vector<64x1xbf16>
    %cst = arith.constant dense<0.000000e+00> : vector<86x1xf32>
    %21 = tpu.matmul %19, %20, %cst {dimension_numbers = #tpu.dot_dimension_numbers<[1], [0], [0], [1], [0, 0, 1, 1], [], []>} : vector<86x64xbf16>, vector<64x1xbf16>, vector<86x1xf32> -> vector<86x1xf32>
    %22 = vector.extract_strided_slice %18 {offsets = [0, 0], sizes = [43, 64], strides = [1, 1]} : vector<86x64xf32> to vector<43x64xf32>
    %23 = arith.truncf %1 : vector<1x64xf32> to vector<1x64xbf16>
    %24 = arith.truncf %22 : vector<43x64xf32> to vector<43x64xbf16>
    "tpu.trace_start"() <{level = 10 : i32, message = "kd,nd->kn"}> : () -> ()
    %cst_29 = arith.constant dense<0.000000e+00> : vector<1x43xf32>
    %25 = tpu.matmul %23, %24, %cst_29 {dimension_numbers = #tpu.dot_dimension_numbers<[1], [1], [0], [0], [0, 0, 1, 0], [], []>} : vector<1x64xbf16>, vector<43x64xbf16>, vector<1x43xf32> -> vector<1x43xf32>
    "tpu.trace_stop"() : () -> ()
    %26 = vector.extract_strided_slice %21 {offsets = [0, 0], sizes = [43, 1], strides = [1, 1]} : vector<86x1xf32> to vector<43x1xf32>
    %27 = vector.broadcast %26 : vector<43x1xf32> to vector<43x43xf32>
    %28 = vector.broadcast %25 : vector<1x43xf32> to vector<43x43xf32>
    %29 = arith.addf %27, %28 : vector<43x43xf32>
    %cst_30 = arith.constant 0.000000e+00 : f32
    %30 = vector.broadcast %cst_30 : f32 to vector<43x43xf32>
    %31 = arith.cmpf ogt, %3, %30 : vector<43x43xf32>
    %cst_31 = arith.constant -9.000000e+15 : f32
    %32 = vector.broadcast %cst_31 : f32 to vector<43x43xf32>
    %33 = arith.select %31, %29, %32 : vector<43x43xi1>, vector<43x43xf32>
    %cst_32 = arith.constant dense<0xFF800000> : vector<43xf32>
    %34 = vector.multi_reduction <maximumf>, %33, %cst_32 [1] : vector<43x43xf32> to vector<43xf32>
    %35 = vector.shape_cast %34 : vector<43xf32> to vector<43x1xf32>
    %36 = vector.broadcast %35 : vector<43x1xf32> to vector<43x43xf32>
    %37 = arith.subf %33, %36 : vector<43x43xf32>
    %38 = math.exp %37 : vector<43x43xf32>
    %cst_33 = arith.constant dense<0.000000e+00> : vector<43xf32>
    %39 = vector.multi_reduction <add>, %38, %cst_33 [1] : vector<43x43xf32> to vector<43xf32>
    %40 = vector.shape_cast %39 : vector<43xf32> to vector<43x1xf32>
    %41 = vector.broadcast %40 : vector<43x1xf32> to vector<43x43xf32>
    %42 = arith.divf %38, %41 : vector<43x43xf32>
    %43 = vector.extract_strided_slice %18 {offsets = [43, 0], sizes = [43, 64], strides = [1, 1]} : vector<86x64xf32> to vector<43x64xf32>
    %44 = arith.truncf %1 : vector<1x64xf32> to vector<1x64xbf16>
    %45 = arith.truncf %43 : vector<43x64xf32> to vector<43x64xbf16>
    "tpu.trace_start"() <{level = 10 : i32, message = "kd,nd->kn"}> : () -> ()
    %cst_34 = arith.constant dense<0.000000e+00> : vector<1x43xf32>
    %46 = tpu.matmul %44, %45, %cst_34 {dimension_numbers = #tpu.dot_dimension_numbers<[1], [1], [0], [0], [0, 0, 1, 0], [], []>} : vector<1x64xbf16>, vector<43x64xbf16>, vector<1x43xf32> -> vector<1x43xf32>
    "tpu.trace_stop"() : () -> ()
    %47 = vector.extract_strided_slice %21 {offsets = [43, 0], sizes = [43, 1], strides = [1, 1]} : vector<86x1xf32> to vector<43x1xf32>
    %48 = vector.broadcast %47 : vector<43x1xf32> to vector<43x43xf32>
    %49 = vector.broadcast %46 : vector<1x43xf32> to vector<43x43xf32>
    %50 = arith.addf %48, %49 : vector<43x43xf32>
    %cst_35 = arith.constant 0.000000e+00 : f32
    %51 = vector.broadcast %cst_35 : f32 to vector<43x43xf32>
    %52 = arith.cmpf ogt, %5, %51 : vector<43x43xf32>
    %cst_36 = arith.constant -9.000000e+15 : f32
    %53 = vector.broadcast %cst_36 : f32 to vector<43x43xf32>
    %54 = arith.select %52, %50, %53 : vector<43x43xi1>, vector<43x43xf32>
    %cst_37 = arith.constant dense<0xFF800000> : vector<43xf32>
    %55 = vector.multi_reduction <maximumf>, %54, %cst_37 [1] : vector<43x43xf32> to vector<43xf32>
    %56 = vector.shape_cast %55 : vector<43xf32> to vector<43x1xf32>
    %57 = vector.broadcast %56 : vector<43x1xf32> to vector<43x43xf32>
    %58 = arith.subf %54, %57 : vector<43x43xf32>
    %59 = math.exp %58 : vector<43x43xf32>
    %cst_38 = arith.constant dense<0.000000e+00> : vector<43xf32>
    %60 = vector.multi_reduction <add>, %59, %cst_38 [1] : vector<43x43xf32> to vector<43xf32>
    %61 = vector.shape_cast %60 : vector<43xf32> to vector<43x1xf32>
    %62 = vector.broadcast %61 : vector<43x1xf32> to vector<43x43xf32>
    %63 = arith.divf %59, %62 : vector<43x43xf32>
    %64 = arith.truncf %18 : vector<86x64xf32> to vector<86x64xbf16>
    %65 = arith.truncf %12 : vector<64x64xf32> to vector<64x64xbf16>
    %cst_39 = arith.constant dense<0.000000e+00> : vector<86x64xf32>
    %66 = tpu.matmul %64, %65, %cst_39 {dimension_numbers = #tpu.dot_dimension_numbers<[1], [0], [0], [1], [0, 0, 1, 1], [], []>} : vector<86x64xbf16>, vector<64x64xbf16>, vector<86x64xf32> -> vector<86x64xf32>
    %cst_40 = arith.constant 2.000000e+00 : f32
    %67 = vector.broadcast %cst_40 : f32 to vector<1x64xf32>
    %68 = arith.mulf %67, %13 : vector<1x64xf32>
    %69 = vector.extract_strided_slice %66 {offsets = [0, 0], sizes = [43, 64], strides = [1, 1]} : vector<86x64xf32> to vector<43x64xf32>
    %70 = arith.truncf %42 : vector<43x43xf32> to vector<43x43xbf16>
    %71 = arith.truncf %69 : vector<43x64xf32> to vector<43x64xbf16>
    %cst_41 = arith.constant dense<0.000000e+00> : vector<43x64xf32>
    %72 = tpu.matmul %70, %71, %cst_41 {dimension_numbers = #tpu.dot_dimension_numbers<[1], [0], [0], [1], [0, 0, 1, 1], [], []>} : vector<43x43xbf16>, vector<43x64xbf16>, vector<43x64xf32> -> vector<43x64xf32>
    %73 = arith.addf %72, %69 : vector<43x64xf32>
    %74 = vector.broadcast %68 : vector<1x64xf32> to vector<43x64xf32>
    %75 = arith.addf %73, %74 : vector<43x64xf32>
    %cst_42 = arith.constant 5.000000e-01 : f32
    %76 = vector.broadcast %cst_42 : f32 to vector<43x64xf32>
    %77 = arith.mulf %75, %76 : vector<43x64xf32>
    %cst_43 = arith.constant 0.000000e+00 : f32
    %78 = vector.broadcast %cst_43 : f32 to vector<43x64xf32>
    %79 = arith.maximumf %77, %78 : vector<43x64xf32>
    %c0_44 = arith.constant 0 : index
    %c0_45 = arith.constant 0 : index
    %80 = vector.load %arg16[%c0_44, %c0_45] : memref<86x64xf32, #tpu.memory_space<vmem>>, vector<43x64xf32>
    tpu.vector_store %arg16[%c0_44, %c0_45], %79 {strides = array<i32>} : memref<86x64xf32, #tpu.memory_space<vmem>>, vector<43x64xf32>,
    %81 = vector.extract_strided_slice %66 {offsets = [43, 0], sizes = [43, 64], strides = [1, 1]} : vector<86x64xf32> to vector<43x64xf32>
    %82 = arith.truncf %63 : vector<43x43xf32> to vector<43x43xbf16>
    %83 = arith.truncf %81 : vector<43x64xf32> to vector<43x64xbf16>
    %cst_46 = arith.constant dense<0.000000e+00> : vector<43x64xf32>
    %84 = tpu.matmul %82, %83, %cst_46 {dimension_numbers = #tpu.dot_dimension_numbers<[1], [0], [0], [1], [0, 0, 1, 1], [], []>} : vector<43x43xbf16>, vector<43x64xbf16>, vector<43x64xf32> -> vector<43x64xf32>
    %85 = arith.addf %84, %81 : vector<43x64xf32>
    %86 = vector.broadcast %68 : vector<1x64xf32> to vector<43x64xf32>
    %87 = arith.addf %85, %86 : vector<43x64xf32>
    %cst_47 = arith.constant 5.000000e-01 : f32
    %88 = vector.broadcast %cst_47 : f32 to vector<43x64xf32>
    %89 = arith.mulf %87, %88 : vector<43x64xf32>
    %cst_48 = arith.constant 0.000000e+00 : f32
    %90 = vector.broadcast %cst_48 : f32 to vector<43x64xf32>
    %91 = arith.maximumf %89, %90 : vector<43x64xf32>
    %c43_49 = arith.constant 43 : index
    %c0_50 = arith.constant 0 : index
    %92 = vector.load %arg16[%c43_49, %c0_50] : memref<86x64xf32, #tpu.memory_space<vmem>>, vector<43x64xf32>
    tpu.vector_store %arg16[%c43_49, %c0_50], %91 {strides = array<i32>} : memref<86x64xf32, #tpu.memory_space<vmem>>, vector<43x64xf32>,
    %c0_51 = arith.constant 0 : index
    %c0_52 = arith.constant 0 : index
    %93 = vector.load %arg16[%c0_51, %c0_52] : memref<86x64xf32, #tpu.memory_space<vmem>>, vector<86x64xf32>
    %94 = arith.truncf %93 : vector<86x64xf32> to vector<86x64xbf16>
    %95 = arith.truncf %15 : vector<64x64xf32> to vector<64x64xbf16>
    %cst_53 = arith.constant dense<0.000000e+00> : vector<86x64xf32>
    %96 = tpu.matmul %94, %95, %cst_53 {dimension_numbers = #tpu.dot_dimension_numbers<[1], [0], [0], [1], [0, 0, 1, 1], [], []>} : vector<86x64xbf16>, vector<64x64xbf16>, vector<86x64xf32> -> vector<86x64xf32>
    %cst_54 = arith.constant 2.000000e+00 : f32
    %97 = vector.broadcast %cst_54 : f32 to vector<1x64xf32>
    %98 = arith.mulf %97, %17 : vector<1x64xf32>
    %99 = vector.extract_strided_slice %96 {offsets = [0, 0], sizes = [43, 64], strides = [1, 1]} : vector<86x64xf32> to vector<43x64xf32>
    %100 = arith.truncf %42 : vector<43x43xf32> to vector<43x43xbf16>
    %101 = arith.truncf %99 : vector<43x64xf32> to vector<43x64xbf16>
    %cst_55 = arith.constant dense<0.000000e+00> : vector<43x64xf32>
    %102 = tpu.matmul %100, %101, %cst_55 {dimension_numbers = #tpu.dot_dimension_numbers<[1], [0], [0], [1], [0, 0, 1, 1], [], []>} : vector<43x43xbf16>, vector<43x64xbf16>, vector<43x64xf32> -> vector<43x64xf32>
    %103 = arith.addf %102, %99 : vector<43x64xf32>
    %104 = vector.broadcast %98 : vector<1x64xf32> to vector<43x64xf32>
    %105 = arith.addf %103, %104 : vector<43x64xf32>
    %cst_56 = arith.constant 5.000000e-01 : f32
    %106 = vector.broadcast %cst_56 : f32 to vector<43x64xf32>
    %107 = arith.mulf %105, %106 : vector<43x64xf32>
    %cst_57 = arith.constant 0.000000e+00 : f32
    %108 = vector.broadcast %cst_57 : f32 to vector<43x64xf32>
    %109 = arith.maximumf %107, %108 : vector<43x64xf32>
    %c0_58 = arith.constant 0 : index
    %c0_59 = arith.constant 0 : index
    %110 = vector.load %arg16[%c0_58, %c0_59] : memref<86x64xf32, #tpu.memory_space<vmem>>, vector<43x64xf32>
    tpu.vector_store %arg16[%c0_58, %c0_59], %109 {strides = array<i32>} : memref<86x64xf32, #tpu.memory_space<vmem>>, vector<43x64xf32>,
    %111 = vector.extract_strided_slice %96 {offsets = [43, 0], sizes = [43, 64], strides = [1, 1]} : vector<86x64xf32> to vector<43x64xf32>
    %112 = arith.truncf %63 : vector<43x43xf32> to vector<43x43xbf16>
    %113 = arith.truncf %111 : vector<43x64xf32> to vector<43x64xbf16>
    %cst_60 = arith.constant dense<0.000000e+00> : vector<43x64xf32>
    %114 = tpu.matmul %112, %113, %cst_60 {dimension_numbers = #tpu.dot_dimension_numbers<[1], [0], [0], [1], [0, 0, 1, 1], [], []>} : vector<43x43xbf16>, vector<43x64xbf16>, vector<43x64xf32> -> vector<43x64xf32>
    %115 = arith.addf %114, %111 : vector<43x64xf32>
    %116 = vector.broadcast %98 : vector<1x64xf32> to vector<43x64xf32>
    %117 = arith.addf %115, %116 : vector<43x64xf32>
    %cst_61 = arith.constant 5.000000e-01 : f32
    %118 = vector.broadcast %cst_61 : f32 to vector<43x64xf32>
    %119 = arith.mulf %117, %118 : vector<43x64xf32>
    %cst_62 = arith.constant 0.000000e+00 : f32
    %120 = vector.broadcast %cst_62 : f32 to vector<43x64xf32>
    %121 = arith.maximumf %119, %120 : vector<43x64xf32>
    %c43_63 = arith.constant 43 : index
    %c0_64 = arith.constant 0 : index
    %122 = vector.load %arg16[%c43_63, %c0_64] : memref<86x64xf32, #tpu.memory_space<vmem>>, vector<43x64xf32>
    tpu.vector_store %arg16[%c43_63, %c0_64], %121 {strides = array<i32>} : memref<86x64xf32, #tpu.memory_space<vmem>>, vector<43x64xf32>,
    %c0_65 = arith.constant 0 : index
    %c0_66 = arith.constant 0 : index
    %123 = vector.load %arg16[%c0_65, %c0_66] : memref<86x64xf32, #tpu.memory_space<vmem>>, vector<86x64xf32>
    %c0_67 = arith.constant 0 : index
    %c0_68 = arith.constant 0 : index
    %124 = vector.load %arg11[%c0_67, %c0_68] : memref<36x64xf32, #tpu.memory_space<vmem>>, vector<36x64xf32>
    %c0_69 = arith.constant 0 : index
    %c0_70 = arith.constant 0 : index
    %125 = vector.load %arg12[%c0_69, %c0_70] : memref<36x1xf32, #tpu.memory_space<vmem>>, vector<36x1xf32>
    %126 = vector.extract_strided_slice %123 {offsets = [0, 0], sizes = [43, 64], strides = [1, 1]} : vector<86x64xf32> to vector<43x64xf32>
    "tpu.trace_start"() <{level = 10 : i32, message = "md,nd->mn"}> : () -> ()
    %cst_71 = arith.constant dense<0.000000e+00> : vector<36x43xf32>
    %127 = tpu.matmul %124, %126, %cst_71 {dimension_numbers = #tpu.dot_dimension_numbers<[1], [1], [0], [0], [0, 0, 1, 0], [], []>} : vector<36x64xf32>, vector<43x64xf32>, vector<36x43xf32> -> vector<36x43xf32>
    "tpu.trace_stop"() : () -> ()
    %128 = vector.broadcast %125 : vector<36x1xf32> to vector<36x43xf32>
    %129 = arith.addf %127, %128 : vector<36x43xf32>
    %130 = vector.extract_strided_slice %129 {offsets = [0, 0], sizes = [18, 43], strides = [1, 1]} : vector<36x43xf32> to vector<18x43xf32>
    %131 = vector.extract_strided_slice %129 {offsets = [18, 0], sizes = [18, 43], strides = [1, 1]} : vector<36x43xf32> to vector<18x43xf32>
    %cst_72 = arith.constant dense<0xFF800000> : vector<18xf32>
    %132 = vector.multi_reduction <maximumf>, %130, %cst_72 [1] : vector<18x43xf32> to vector<18xf32>
    %133 = vector.shape_cast %132 : vector<18xf32> to vector<18x1xf32>
    %134 = vector.broadcast %133 : vector<18x1xf32> to vector<18x43xf32>
    %135 = arith.subf %130, %134 : vector<18x43xf32>
    %136 = math.exp %135 : vector<18x43xf32>
    %cst_73 = arith.constant dense<0.000000e+00> : vector<18xf32>
    %137 = vector.multi_reduction <add>, %136, %cst_73 [1] : vector<18x43xf32> to vector<18xf32>
    %138 = vector.shape_cast %137 : vector<18xf32> to vector<18x1xf32>
    %139 = vector.broadcast %138 : vector<18x1xf32> to vector<18x43xf32>
    %140 = arith.divf %136, %139 : vector<18x43xf32>
    %141 = arith.truncf %140 : vector<18x43xf32> to vector<18x43xbf16>
    %142 = arith.truncf %126 : vector<43x64xf32> to vector<43x64xbf16>
    %cst_74 = arith.constant dense<0.000000e+00> : vector<18x64xf32>
    %143 = tpu.matmul %141, %142, %cst_74 {dimension_numbers = #tpu.dot_dimension_numbers<[1], [0], [0], [1], [0, 0, 1, 1], [], []>} : vector<18x43xbf16>, vector<43x64xbf16>, vector<18x64xf32> -> vector<18x64xf32>
    %cst_75 = arith.constant 1.000000e+03 : f32
    %144 = vector.broadcast %cst_75 : f32 to vector<18x43xf32>
    %145 = arith.mulf %144, %131 : vector<18x43xf32>
    %146 = arith.negf %145 : vector<18x43xf32>
    %147 = math.exp %146 : vector<18x43xf32>
    %cst_76 = arith.constant 1.000000e+00 : f32
    %148 = vector.broadcast %cst_76 : f32 to vector<18x43xf32>
    %149 = arith.addf %148, %147 : vector<18x43xf32>
    %150 = arith.divf %148, %149 : vector<18x43xf32>
    "tpu.trace_start"() <{level = 10 : i32, message = "nk,mk->nm"}> : () -> ()
    %cst_77 = arith.constant dense<0.000000e+00> : vector<43x18xf32>
    %151 = tpu.matmul %3, %150, %cst_77 {dimension_numbers = #tpu.dot_dimension_numbers<[1], [1], [0], [0], [0, 0, 1, 0], [], []>} : vector<43x43xf32>, vector<18x43xf32>, vector<43x18xf32> -> vector<43x18xf32>
    "tpu.trace_stop"() : () -> ()
    %cst_78 = arith.constant dense<0.000000e+00> : vector<18x18xf32>
    %152 = tpu.matmul %150, %151, %cst_78 {dimension_numbers = #tpu.dot_dimension_numbers<[1], [0], [0], [1], [0, 0, 1, 1], [], []>} : vector<18x43xf32>, vector<43x18xf32>, vector<18x18xf32> -> vector<18x18xf32>
    %cst_79 = arith.constant 1.000000e-01 : f32
    %153 = vector.broadcast %cst_79 : f32 to vector<18x18xf32>
    %154 = arith.cmpf ogt, %152, %153 : vector<18x18xf32>
    %cst_80 = arith.constant 1.000000e+00 : f32
    %155 = vector.broadcast %cst_80 : f32 to vector<18x18xf32>
    %cst_81 = arith.constant -9.000000e+15 : f32
    %156 = vector.broadcast %cst_81 : f32 to vector<18x18xf32>
    %157 = arith.select %154, %155, %156 : vector<18x18xi1>, vector<18x18xf32>
    %c0_82 = arith.constant 0 : index
    %c0_83 = arith.constant 0 : index
    %158 = vector.load %arg17[%c0_82, %c0_83] : memref<86x64xf32, #tpu.memory_space<vmem>>, vector<18x64xf32>
    tpu.vector_store %arg17[%c0_82, %c0_83], %143 {strides = array<i32>} : memref<86x64xf32, #tpu.memory_space<vmem>>, vector<18x64xf32>,
    %c0_84 = arith.constant 0 : index
    %c104 = arith.constant 104 : index
    %c0_85 = arith.constant 0 : index
    %159 = vector.load %arg15[%c0_84, %c104, %c0_85] : memref<2x128x128xf32, #tpu.memory_space<vmem>>, vector<1x18x43xf32>
    %160 = vector.shape_cast %159 : vector<1x18x43xf32> to vector<18x43xf32>
    %161 = vector.shape_cast %140 : vector<18x43xf32> to vector<1x18x43xf32>
    tpu.vector_store %arg15[%c0_84, %c104, %c0_85], %161 {strides = array<i32>} : memref<2x128x128xf32, #tpu.memory_space<vmem>>, vector<1x18x43xf32>,
    %c0_86 = arith.constant 0 : index
    %c104_87 = arith.constant 104 : index
    %c43_88 = arith.constant 43 : index
    %162 = vector.load %arg15[%c0_86, %c104_87, %c43_88] : memref<2x128x128xf32, #tpu.memory_space<vmem>>, vector<1x18x43xf32>
    %163 = vector.shape_cast %162 : vector<1x18x43xf32> to vector<18x43xf32>
    %164 = vector.shape_cast %150 : vector<18x43xf32> to vector<1x18x43xf32>
    tpu.vector_store %arg15[%c0_86, %c104_87, %c43_88], %164 {strides = array<i32>} : memref<2x128x128xf32, #tpu.memory_space<vmem>>, vector<1x18x43xf32>,
    %c0_89 = arith.constant 0 : index
    %c86 = arith.constant 86 : index
    %c64 = arith.constant 64 : index
    %165 = vector.load %arg15[%c0_89, %c86, %c64] : memref<2x128x128xf32, #tpu.memory_space<vmem>>, vector<1x18x18xf32>
    %166 = vector.shape_cast %165 : vector<1x18x18xf32> to vector<18x18xf32>
    %167 = vector.shape_cast %157 : vector<18x18xf32> to vector<1x18x18xf32>
    tpu.vector_store %arg15[%c0_89, %c86, %c64], %167 {strides = array<i32>} : memref<2x128x128xf32, #tpu.memory_space<vmem>>, vector<1x18x18xf32>,
    %168 = vector.extract_strided_slice %123 {offsets = [43, 0], sizes = [43, 64], strides = [1, 1]} : vector<86x64xf32> to vector<43x64xf32>
    "tpu.trace_start"() <{level = 10 : i32, message = "md,nd->mn"}> : () -> ()
    %cst_90 = arith.constant dense<0.000000e+00> : vector<36x43xf32>
    %169 = tpu.matmul %124, %168, %cst_90 {dimension_numbers = #tpu.dot_dimension_numbers<[1], [1], [0], [0], [0, 0, 1, 0], [], []>} : vector<36x64xf32>, vector<43x64xf32>, vector<36x43xf32> -> vector<36x43xf32>
    "tpu.trace_stop"() : () -> ()
    %170 = vector.broadcast %125 : vector<36x1xf32> to vector<36x43xf32>
    %171 = arith.addf %169, %170 : vector<36x43xf32>
    %172 = vector.extract_strided_slice %171 {offsets = [0, 0], sizes = [18, 43], strides = [1, 1]} : vector<36x43xf32> to vector<18x43xf32>
    %173 = vector.extract_strided_slice %171 {offsets = [18, 0], sizes = [18, 43], strides = [1, 1]} : vector<36x43xf32> to vector<18x43xf32>
    %cst_91 = arith.constant dense<0xFF800000> : vector<18xf32>
    %174 = vector.multi_reduction <maximumf>, %172, %cst_91 [1] : vector<18x43xf32> to vector<18xf32>
    %175 = vector.shape_cast %174 : vector<18xf32> to vector<18x1xf32>
    %176 = vector.broadcast %175 : vector<18x1xf32> to vector<18x43xf32>
    %177 = arith.subf %172, %176 : vector<18x43xf32>
    %178 = math.exp %177 : vector<18x43xf32>
    %cst_92 = arith.constant dense<0.000000e+00> : vector<18xf32>
    %179 = vector.multi_reduction <add>, %178, %cst_92 [1] : vector<18x43xf32> to vector<18xf32>
    %180 = vector.shape_cast %179 : vector<18xf32> to vector<18x1xf32>
    %181 = vector.broadcast %180 : vector<18x1xf32> to vector<18x43xf32>
    %182 = arith.divf %178, %181 : vector<18x43xf32>
    %183 = arith.truncf %182 : vector<18x43xf32> to vector<18x43xbf16>
    %184 = arith.truncf %168 : vector<43x64xf32> to vector<43x64xbf16>
    %cst_93 = arith.constant dense<0.000000e+00> : vector<18x64xf32>
    %185 = tpu.matmul %183, %184, %cst_93 {dimension_numbers = #tpu.dot_dimension_numbers<[1], [0], [0], [1], [0, 0, 1, 1], [], []>} : vector<18x43xbf16>, vector<43x64xbf16>, vector<18x64xf32> -> vector<18x64xf32>
    %cst_94 = arith.constant 1.000000e+03 : f32
    %186 = vector.broadcast %cst_94 : f32 to vector<18x43xf32>
    %187 = arith.mulf %186, %173 : vector<18x43xf32>
    %188 = arith.negf %187 : vector<18x43xf32>
    %189 = math.exp %188 : vector<18x43xf32>
    %cst_95 = arith.constant 1.000000e+00 : f32
    %190 = vector.broadcast %cst_95 : f32 to vector<18x43xf32>
    %191 = arith.addf %190, %189 : vector<18x43xf32>
    %192 = arith.divf %190, %191 : vector<18x43xf32>
    "tpu.trace_start"() <{level = 10 : i32, message = "nk,mk->nm"}> : () -> ()
    %cst_96 = arith.constant dense<0.000000e+00> : vector<43x18xf32>
    %193 = tpu.matmul %5, %192, %cst_96 {dimension_numbers = #tpu.dot_dimension_numbers<[1], [1], [0], [0], [0, 0, 1, 0], [], []>} : vector<43x43xf32>, vector<18x43xf32>, vector<43x18xf32> -> vector<43x18xf32>
    "tpu.trace_stop"() : () -> ()
    %cst_97 = arith.constant dense<0.000000e+00> : vector<18x18xf32>
    %194 = tpu.matmul %192, %193, %cst_97 {dimension_numbers = #tpu.dot_dimension_numbers<[1], [0], [0], [1], [0, 0, 1, 1], [], []>} : vector<18x43xf32>, vector<43x18xf32>, vector<18x18xf32> -> vector<18x18xf32>
    %cst_98 = arith.constant 1.000000e-01 : f32
    %195 = vector.broadcast %cst_98 : f32 to vector<18x18xf32>
    %196 = arith.cmpf ogt, %194, %195 : vector<18x18xf32>
    %cst_99 = arith.constant 1.000000e+00 : f32
    %197 = vector.broadcast %cst_99 : f32 to vector<18x18xf32>
    %cst_100 = arith.constant -9.000000e+15 : f32
    %198 = vector.broadcast %cst_100 : f32 to vector<18x18xf32>
    %199 = arith.select %196, %197, %198 : vector<18x18xi1>, vector<18x18xf32>
    %c18 = arith.constant 18 : index
    %c0_101 = arith.constant 0 : index
    %200 = vector.load %arg17[%c18, %c0_101] : memref<86x64xf32, #tpu.memory_space<vmem>>, vector<18x64xf32>
    tpu.vector_store %arg17[%c18, %c0_101], %185 {strides = array<i32>} : memref<86x64xf32, #tpu.memory_space<vmem>>, vector<18x64xf32>,
    %c1_102 = arith.constant 1 : index
    %c104_103 = arith.constant 104 : index
    %c0_104 = arith.constant 0 : index
    %201 = vector.load %arg15[%c1_102, %c104_103, %c0_104] : memref<2x128x128xf32, #tpu.memory_space<vmem>>, vector<1x18x43xf32>
    %202 = vector.shape_cast %201 : vector<1x18x43xf32> to vector<18x43xf32>
    %203 = vector.shape_cast %182 : vector<18x43xf32> to vector<1x18x43xf32>
    tpu.vector_store %arg15[%c1_102, %c104_103, %c0_104], %203 {strides = array<i32>} : memref<2x128x128xf32, #tpu.memory_space<vmem>>, vector<1x18x43xf32>,
    %c1_105 = arith.constant 1 : index
    %c104_106 = arith.constant 104 : index
    %c43_107 = arith.constant 43 : index
    %204 = vector.load %arg15[%c1_105, %c104_106, %c43_107] : memref<2x128x128xf32, #tpu.memory_space<vmem>>, vector<1x18x43xf32>
    %205 = vector.shape_cast %204 : vector<1x18x43xf32> to vector<18x43xf32>
    %206 = vector.shape_cast %192 : vector<18x43xf32> to vector<1x18x43xf32>
    tpu.vector_store %arg15[%c1_105, %c104_106, %c43_107], %206 {strides = array<i32>} : memref<2x128x128xf32, #tpu.memory_space<vmem>>, vector<1x18x43xf32>,
    %c1_108 = arith.constant 1 : index
    %c86_109 = arith.constant 86 : index
    %c64_110 = arith.constant 64 : index
    %207 = vector.load %arg15[%c1_108, %c86_109, %c64_110] : memref<2x128x128xf32, #tpu.memory_space<vmem>>, vector<1x18x18xf32>
    %208 = vector.shape_cast %207 : vector<1x18x18xf32> to vector<18x18xf32>
    %209 = vector.shape_cast %199 : vector<18x18xf32> to vector<1x18x18xf32>
    tpu.vector_store %arg15[%c1_108, %c86_109, %c64_110], %209 {strides = array<i32>} : memref<2x128x128xf32, #tpu.memory_space<vmem>>, vector<1x18x18xf32>,
    %c1_111 = arith.constant 1 : index
    %c0_112 = arith.constant 0 : index
    %c0_113 = arith.constant 0 : index
    %210 = vector.load %arg7[%c1_111, %c0_112, %c0_113] : memref<5x64x64xf32, #tpu.memory_space<vmem>>, vector<1x64x64xf32>
    %211 = vector.shape_cast %210 : vector<1x64x64xf32> to vector<64x64xf32>
    %c1_114 = arith.constant 1 : index
    %c0_115 = arith.constant 0 : index
    %c0_116 = arith.constant 0 : index
    %212 = vector.load %arg8[%c1_114, %c0_115, %c0_116] : memref<5x1x64xf32, #tpu.memory_space<vmem>>, vector<1x1x64xf32>
    %213 = vector.shape_cast %212 : vector<1x1x64xf32> to vector<1x64xf32>
    %c2 = arith.constant 2 : index
    %c0_117 = arith.constant 0 : index
    %c0_118 = arith.constant 0 : index
    %214 = vector.load %arg7[%c2, %c0_117, %c0_118] : memref<5x64x64xf32, #tpu.memory_space<vmem>>, vector<1x64x64xf32>
    %215 = vector.shape_cast %214 : vector<1x64x64xf32> to vector<64x64xf32>
    %c2_119 = arith.constant 2 : index
    %c0_120 = arith.constant 0 : index
    %c0_121 = arith.constant 0 : index
    %216 = vector.load %arg8[%c2_119, %c0_120, %c0_121] : memref<5x1x64xf32, #tpu.memory_space<vmem>>, vector<1x1x64xf32>
    %217 = vector.shape_cast %216 : vector<1x1x64xf32> to vector<1x64xf32>
    %c0_122 = arith.constant 0 : index
    %c0_123 = arith.constant 0 : index
    %218 = vector.load %arg17[%c0_122, %c0_123] : memref<86x64xf32, #tpu.memory_space<vmem>>, vector<36x64xf32>
    %219 = arith.truncf %218 : vector<36x64xf32> to vector<36x64xbf16>
    %220 = arith.truncf %0 : vector<64x1xf32> to vector<64x1xbf16>
    %cst_124 = arith.constant dense<0.000000e+00> : vector<36x1xf32>
    %221 = tpu.matmul %219, %220, %cst_124 {dimension_numbers = #tpu.dot_dimension_numbers<[1], [0], [0], [1], [0, 0, 1, 1], [], []>} : vector<36x64xbf16>, vector<64x1xbf16>, vector<36x1xf32> -> vector<36x1xf32>
    %222 = vector.extract_strided_slice %218 {offsets = [0, 0], sizes = [18, 64], strides = [1, 1]} : vector<36x64xf32> to vector<18x64xf32>
    %223 = arith.truncf %1 : vector<1x64xf32> to vector<1x64xbf16>
    %224 = arith.truncf %222 : vector<18x64xf32> to vector<18x64xbf16>
    "tpu.trace_start"() <{level = 10 : i32, message = "kd,nd->kn"}> : () -> ()
    %cst_125 = arith.constant dense<0.000000e+00> : vector<1x18xf32>
    %225 = tpu.matmul %223, %224, %cst_125 {dimension_numbers = #tpu.dot_dimension_numbers<[1], [1], [0], [0], [0, 0, 1, 0], [], []>} : vector<1x64xbf16>, vector<18x64xbf16>, vector<1x18xf32> -> vector<1x18xf32>
    "tpu.trace_stop"() : () -> ()
    %226 = vector.extract_strided_slice %221 {offsets = [0, 0], sizes = [18, 1], strides = [1, 1]} : vector<36x1xf32> to vector<18x1xf32>
    %227 = vector.broadcast %226 : vector<18x1xf32> to vector<18x18xf32>
    %228 = vector.broadcast %225 : vector<1x18xf32> to vector<18x18xf32>
    %229 = arith.addf %227, %228 : vector<18x18xf32>
    %cst_126 = arith.constant 0.000000e+00 : f32
    %230 = vector.broadcast %cst_126 : f32 to vector<18x18xf32>
    %231 = arith.cmpf ogt, %157, %230 : vector<18x18xf32>
    %cst_127 = arith.constant -9.000000e+15 : f32
    %232 = vector.broadcast %cst_127 : f32 to vector<18x18xf32>
    %233 = arith.select %231, %229, %232 : vector<18x18xi1>, vector<18x18xf32>
    %cst_128 = arith.constant dense<0xFF800000> : vector<18xf32>
    %234 = vector.multi_reduction <maximumf>, %233, %cst_128 [1] : vector<18x18xf32> to vector<18xf32>
    %235 = vector.shape_cast %234 : vector<18xf32> to vector<18x1xf32>
    %236 = vector.broadcast %235 : vector<18x1xf32> to vector<18x18xf32>
    %237 = arith.subf %233, %236 : vector<18x18xf32>
    %238 = math.exp %237 : vector<18x18xf32>
    %cst_129 = arith.constant dense<0.000000e+00> : vector<18xf32>
    %239 = vector.multi_reduction <add>, %238, %cst_129 [1] : vector<18x18xf32> to vector<18xf32>
    %240 = vector.shape_cast %239 : vector<18xf32> to vector<18x1xf32>
    %241 = vector.broadcast %240 : vector<18x1xf32> to vector<18x18xf32>
    %242 = arith.divf %238, %241 : vector<18x18xf32>
    %243 = vector.extract_strided_slice %218 {offsets = [18, 0], sizes = [18, 64], strides = [1, 1]} : vector<36x64xf32> to vector<18x64xf32>
    %244 = arith.truncf %1 : vector<1x64xf32> to vector<1x64xbf16>
    %245 = arith.truncf %243 : vector<18x64xf32> to vector<18x64xbf16>
    "tpu.trace_start"() <{level = 10 : i32, message = "kd,nd->kn"}> : () -> ()
    %cst_130 = arith.constant dense<0.000000e+00> : vector<1x18xf32>
    %246 = tpu.matmul %244, %245, %cst_130 {dimension_numbers = #tpu.dot_dimension_numbers<[1], [1], [0], [0], [0, 0, 1, 0], [], []>} : vector<1x64xbf16>, vector<18x64xbf16>, vector<1x18xf32> -> vector<1x18xf32>
    "tpu.trace_stop"() : () -> ()
    %247 = vector.extract_strided_slice %221 {offsets = [18, 0], sizes = [18, 1], strides = [1, 1]} : vector<36x1xf32> to vector<18x1xf32>
    %248 = vector.broadcast %247 : vector<18x1xf32> to vector<18x18xf32>
    %249 = vector.broadcast %246 : vector<1x18xf32> to vector<18x18xf32>
    %250 = arith.addf %248, %249 : vector<18x18xf32>
    %cst_131 = arith.constant 0.000000e+00 : f32
    %251 = vector.broadcast %cst_131 : f32 to vector<18x18xf32>
    %252 = arith.cmpf ogt, %199, %251 : vector<18x18xf32>
    %cst_132 = arith.constant -9.000000e+15 : f32
    %253 = vector.broadcast %cst_132 : f32 to vector<18x18xf32>
    %254 = arith.select %252, %250, %253 : vector<18x18xi1>, vector<18x18xf32>
    %cst_133 = arith.constant dense<0xFF800000> : vector<18xf32>
    %255 = vector.multi_reduction <maximumf>, %254, %cst_133 [1] : vector<18x18xf32> to vector<18xf32>
    %256 = vector.shape_cast %255 : vector<18xf32> to vector<18x1xf32>
    %257 = vector.broadcast %256 : vector<18x1xf32> to vector<18x18xf32>
    %258 = arith.subf %254, %257 : vector<18x18xf32>
    %259 = math.exp %258 : vector<18x18xf32>
    %cst_134 = arith.constant dense<0.000000e+00> : vector<18xf32>
    %260 = vector.multi_reduction <add>, %259, %cst_134 [1] : vector<18x18xf32> to vector<18xf32>
    %261 = vector.shape_cast %260 : vector<18xf32> to vector<18x1xf32>
    %262 = vector.broadcast %261 : vector<18x1xf32> to vector<18x18xf32>
    %263 = arith.divf %259, %262 : vector<18x18xf32>
    %264 = arith.truncf %218 : vector<36x64xf32> to vector<36x64xbf16>
    %265 = arith.truncf %211 : vector<64x64xf32> to vector<64x64xbf16>
    %cst_135 = arith.constant dense<0.000000e+00> : vector<36x64xf32>
    %266 = tpu.matmul %264, %265, %cst_135 {dimension_numbers = #tpu.dot_dimension_numbers<[1], [0], [0], [1], [0, 0, 1, 1], [], []>} : vector<36x64xbf16>, vector<64x64xbf16>, vector<36x64xf32> -> vector<36x64xf32>
    %cst_136 = arith.constant 2.000000e+00 : f32
    %267 = vector.broadcast %cst_136 : f32 to vector<1x64xf32>
    %268 = arith.mulf %267, %213 : vector<1x64xf32>
    %269 = vector.extract_strided_slice %266 {offsets = [0, 0], sizes = [18, 64], strides = [1, 1]} : vector<36x64xf32> to vector<18x64xf32>
    %270 = arith.truncf %242 : vector<18x18xf32> to vector<18x18xbf16>
    %271 = arith.truncf %269 : vector<18x64xf32> to vector<18x64xbf16>
    %cst_137 = arith.constant dense<0.000000e+00> : vector<18x64xf32>
    %272 = tpu.matmul %270, %271, %cst_137 {dimension_numbers = #tpu.dot_dimension_numbers<[1], [0], [0], [1], [0, 0, 1, 1], [], []>} : vector<18x18xbf16>, vector<18x64xbf16>, vector<18x64xf32> -> vector<18x64xf32>
    %273 = arith.addf %272, %269 : vector<18x64xf32>
    %274 = vector.broadcast %268 : vector<1x64xf32> to vector<18x64xf32>
    %275 = arith.addf %273, %274 : vector<18x64xf32>
    %cst_138 = arith.constant 5.000000e-01 : f32
    %276 = vector.broadcast %cst_138 : f32 to vector<18x64xf32>
    %277 = arith.mulf %275, %276 : vector<18x64xf32>
    %cst_139 = arith.constant 0.000000e+00 : f32
    %278 = vector.broadcast %cst_139 : f32 to vector<18x64xf32>
    %279 = arith.maximumf %277, %278 : vector<18x64xf32>
    %c0_140 = arith.constant 0 : index
    %c0_141 = arith.constant 0 : index
    %280 = vector.load %arg18[%c0_140, %c0_141] : memref<86x64xf32, #tpu.memory_space<vmem>>, vector<18x64xf32>
    tpu.vector_store %arg18[%c0_140, %c0_141], %279 {strides = array<i32>} : memref<86x64xf32, #tpu.memory_space<vmem>>, vector<18x64xf32>,
    %281 = vector.extract_strided_slice %266 {offsets = [18, 0], sizes = [18, 64], strides = [1, 1]} : vector<36x64xf32> to vector<18x64xf32>
    %282 = arith.truncf %263 : vector<18x18xf32> to vector<18x18xbf16>
    %283 = arith.truncf %281 : vector<18x64xf32> to vector<18x64xbf16>
    %cst_142 = arith.constant dense<0.000000e+00> : vector<18x64xf32>
    %284 = tpu.matmul %282, %283, %cst_142 {dimension_numbers = #tpu.dot_dimension_numbers<[1], [0], [0], [1], [0, 0, 1, 1], [], []>} : vector<18x18xbf16>, vector<18x64xbf16>, vector<18x64xf32> -> vector<18x64xf32>
    %285 = arith.addf %284, %281 : vector<18x64xf32>
    %286 = vector.broadcast %268 : vector<1x64xf32> to vector<18x64xf32>
    %287 = arith.addf %285, %286 : vector<18x64xf32>
    %cst_143 = arith.constant 5.000000e-01 : f32
    %288 = vector.broadcast %cst_143 : f32 to vector<18x64xf32>
    %289 = arith.mulf %287, %288 : vector<18x64xf32>
    %cst_144 = arith.constant 0.000000e+00 : f32
    %290 = vector.broadcast %cst_144 : f32 to vector<18x64xf32>
    %291 = arith.maximumf %289, %290 : vector<18x64xf32>
    %c18_145 = arith.constant 18 : index
    %c0_146 = arith.constant 0 : index
    %292 = vector.load %arg18[%c18_145, %c0_146] : memref<86x64xf32, #tpu.memory_space<vmem>>, vector<18x64xf32>
    tpu.vector_store %arg18[%c18_145, %c0_146], %291 {strides = array<i32>} : memref<86x64xf32, #tpu.memory_space<vmem>>, vector<18x64xf32>,
    %c0_147 = arith.constant 0 : index
    %c0_148 = arith.constant 0 : index
    %293 = vector.load %arg18[%c0_147, %c0_148] : memref<86x64xf32, #tpu.memory_space<vmem>>, vector<36x64xf32>
    %294 = arith.truncf %293 : vector<36x64xf32> to vector<36x64xbf16>
    %295 = arith.truncf %215 : vector<64x64xf32> to vector<64x64xbf16>
    %cst_149 = arith.constant dense<0.000000e+00> : vector<36x64xf32>
    %296 = tpu.matmul %294, %295, %cst_149 {dimension_numbers = #tpu.dot_dimension_numbers<[1], [0], [0], [1], [0, 0, 1, 1], [], []>} : vector<36x64xbf16>, vector<64x64xbf16>, vector<36x64xf32> -> vector<36x64xf32>
    %cst_150 = arith.constant 2.000000e+00 : f32
    %297 = vector.broadcast %cst_150 : f32 to vector<1x64xf32>
    %298 = arith.mulf %297, %217 : vector<1x64xf32>
    %299 = vector.extract_strided_slice %296 {offsets = [0, 0], sizes = [18, 64], strides = [1, 1]} : vector<36x64xf32> to vector<18x64xf32>
    %300 = arith.truncf %242 : vector<18x18xf32> to vector<18x18xbf16>
    %301 = arith.truncf %299 : vector<18x64xf32> to vector<18x64xbf16>
    %cst_151 = arith.constant dense<0.000000e+00> : vector<18x64xf32>
    %302 = tpu.matmul %300, %301, %cst_151 {dimension_numbers = #tpu.dot_dimension_numbers<[1], [0], [0], [1], [0, 0, 1, 1], [], []>} : vector<18x18xbf16>, vector<18x64xbf16>, vector<18x64xf32> -> vector<18x64xf32>
    %303 = arith.addf %302, %299 : vector<18x64xf32>
    %304 = vector.broadcast %298 : vector<1x64xf32> to vector<18x64xf32>
    %305 = arith.addf %303, %304 : vector<18x64xf32>
    %cst_152 = arith.constant 5.000000e-01 : f32
    %306 = vector.broadcast %cst_152 : f32 to vector<18x64xf32>
    %307 = arith.mulf %305, %306 : vector<18x64xf32>
    %cst_153 = arith.constant 0.000000e+00 : f32
    %308 = vector.broadcast %cst_153 : f32 to vector<18x64xf32>
    %309 = arith.maximumf %307, %308 : vector<18x64xf32>
    %c0_154 = arith.constant 0 : index
    %c0_155 = arith.constant 0 : index
    %310 = vector.load %arg18[%c0_154, %c0_155] : memref<86x64xf32, #tpu.memory_space<vmem>>, vector<18x64xf32>
    tpu.vector_store %arg18[%c0_154, %c0_155], %309 {strides = array<i32>} : memref<86x64xf32, #tpu.memory_space<vmem>>, vector<18x64xf32>,
    %311 = vector.extract_strided_slice %296 {offsets = [18, 0], sizes = [18, 64], strides = [1, 1]} : vector<36x64xf32> to vector<18x64xf32>
    %312 = arith.truncf %263 : vector<18x18xf32> to vector<18x18xbf16>
    %313 = arith.truncf %311 : vector<18x64xf32> to vector<18x64xbf16>
    %cst_156 = arith.constant dense<0.000000e+00> : vector<18x64xf32>
    %314 = tpu.matmul %312, %313, %cst_156 {dimension_numbers = #tpu.dot_dimension_numbers<[1], [0], [0], [1], [0, 0, 1, 1], [], []>} : vector<18x18xbf16>, vector<18x64xbf16>, vector<18x64xf32> -> vector<18x64xf32>
    %315 = arith.addf %314, %311 : vector<18x64xf32>
    %316 = vector.broadcast %298 : vector<1x64xf32> to vector<18x64xf32>
    %317 = arith.addf %315, %316 : vector<18x64xf32>
    %cst_157 = arith.constant 5.000000e-01 : f32
    %318 = vector.broadcast %cst_157 : f32 to vector<18x64xf32>
    %319 = arith.mulf %317, %318 : vector<18x64xf32>
    %cst_158 = arith.constant 0.000000e+00 : f32
    %320 = vector.broadcast %cst_158 : f32 to vector<18x64xf32>
    %321 = arith.maximumf %319, %320 : vector<18x64xf32>
    %c18_159 = arith.constant 18 : index
    %c0_160 = arith.constant 0 : index
    %322 = vector.load %arg18[%c18_159, %c0_160] : memref<86x64xf32, #tpu.memory_space<vmem>>, vector<18x64xf32>
    tpu.vector_store %arg18[%c18_159, %c0_160], %321 {strides = array<i32>} : memref<86x64xf32, #tpu.memory_space<vmem>>, vector<18x64xf32>,
    %c0_161 = arith.constant 0 : index
    %c0_162 = arith.constant 0 : index
    %323 = vector.load %arg18[%c0_161, %c0_162] : memref<86x64xf32, #tpu.memory_space<vmem>>, vector<36x64xf32>
    %324 = vector.extract_strided_slice %323 {offsets = [0, 0], sizes = [18, 64], strides = [1, 1]} : vector<36x64xf32> to vector<18x64xf32>
    %c0_163 = arith.constant 0 : index
    %c86_164 = arith.constant 86 : index
    %c0_165 = arith.constant 0 : index
    %325 = vector.load %arg15[%c0_163, %c86_164, %c0_165] : memref<2x128x128xf32, #tpu.memory_space<vmem>>, vector<1x18x64xf32>
    %326 = vector.shape_cast %325 : vector<1x18x64xf32> to vector<18x64xf32>
    %327 = vector.shape_cast %324 : vector<18x64xf32> to vector<1x18x64xf32>
    tpu.vector_store %arg15[%c0_163, %c86_164, %c0_165], %327 {strides = array<i32>} : memref<2x128x128xf32, #tpu.memory_space<vmem>>, vector<1x18x64xf32>,
    %328 = vector.extract_strided_slice %323 {offsets = [18, 0], sizes = [18, 64], strides = [1, 1]} : vector<36x64xf32> to vector<18x64xf32>
    %c1_166 = arith.constant 1 : index
    %c86_167 = arith.constant 86 : index
    %c0_168 = arith.constant 0 : index
    %329 = vector.load %arg15[%c1_166, %c86_167, %c0_168] : memref<2x128x128xf32, #tpu.memory_space<vmem>>, vector<1x18x64xf32>
    %330 = vector.shape_cast %329 : vector<1x18x64xf32> to vector<18x64xf32>
    %331 = vector.shape_cast %328 : vector<18x64xf32> to vector<1x18x64xf32>
    tpu.vector_store %arg15[%c1_166, %c86_167, %c0_168], %331 {strides = array<i32>} : memref<2x128x128xf32, #tpu.memory_space<vmem>>, vector<1x18x64xf32>,
    %c0_169 = arith.constant 0 : index
    %c0_170 = arith.constant 0 : index
    %332 = vector.load %arg13[%c0_169, %c0_170] : memref<86x64xf32, #tpu.memory_space<vmem>>, vector<86x64xf32>
    %c0_171 = arith.constant 0 : index
    %c0_172 = arith.constant 0 : index
    %333 = vector.load %arg14[%c0_171, %c0_172] : memref<86x1xf32, #tpu.memory_space<vmem>>, vector<86x1xf32>
    %334 = vector.extract_strided_slice %323 {offsets = [0, 0], sizes = [18, 64], strides = [1, 1]} : vector<36x64xf32> to vector<18x64xf32>
    "tpu.trace_start"() <{level = 10 : i32, message = "md,nd->mn"}> : () -> ()
    %cst_173 = arith.constant dense<0.000000e+00> : vector<86x18xf32>
    %335 = tpu.matmul %332, %334, %cst_173 {dimension_numbers = #tpu.dot_dimension_numbers<[1], [1], [0], [0], [0, 0, 1, 0], [], []>} : vector<86x64xf32>, vector<18x64xf32>, vector<86x18xf32> -> vector<86x18xf32>
    "tpu.trace_stop"() : () -> ()
    %336 = vector.broadcast %333 : vector<86x1xf32> to vector<86x18xf32>
    %337 = arith.addf %335, %336 : vector<86x18xf32>
    %338 = vector.extract_strided_slice %337 {offsets = [0, 0], sizes = [43, 18], strides = [1, 1]} : vector<86x18xf32> to vector<43x18xf32>
    %339 = vector.extract_strided_slice %337 {offsets = [43, 0], sizes = [43, 18], strides = [1, 1]} : vector<86x18xf32> to vector<43x18xf32>
    %cst_174 = arith.constant dense<0xFF800000> : vector<43xf32>
    %340 = vector.multi_reduction <maximumf>, %338, %cst_174 [1] : vector<43x18xf32> to vector<43xf32>
    %341 = vector.shape_cast %340 : vector<43xf32> to vector<43x1xf32>
    %342 = vector.broadcast %341 : vector<43x1xf32> to vector<43x18xf32>
    %343 = arith.subf %338, %342 : vector<43x18xf32>
    %344 = math.exp %343 : vector<43x18xf32>
    %cst_175 = arith.constant dense<0.000000e+00> : vector<43xf32>
    %345 = vector.multi_reduction <add>, %344, %cst_175 [1] : vector<43x18xf32> to vector<43xf32>
    %346 = vector.shape_cast %345 : vector<43xf32> to vector<43x1xf32>
    %347 = vector.broadcast %346 : vector<43x1xf32> to vector<43x18xf32>
    %348 = arith.divf %344, %347 : vector<43x18xf32>
    %349 = arith.truncf %348 : vector<43x18xf32> to vector<43x18xbf16>
    %350 = arith.truncf %334 : vector<18x64xf32> to vector<18x64xbf16>
    %cst_176 = arith.constant dense<0.000000e+00> : vector<43x64xf32>
    %351 = tpu.matmul %349, %350, %cst_176 {dimension_numbers = #tpu.dot_dimension_numbers<[1], [0], [0], [1], [0, 0, 1, 1], [], []>} : vector<43x18xbf16>, vector<18x64xbf16>, vector<43x64xf32> -> vector<43x64xf32>
    %cst_177 = arith.constant 1.000000e+03 : f32
    %352 = vector.broadcast %cst_177 : f32 to vector<43x18xf32>
    %353 = arith.mulf %352, %339 : vector<43x18xf32>
    %354 = arith.negf %353 : vector<43x18xf32>
    %355 = math.exp %354 : vector<43x18xf32>
    %cst_178 = arith.constant 1.000000e+00 : f32
    %356 = vector.broadcast %cst_178 : f32 to vector<43x18xf32>
    %357 = arith.addf %356, %355 : vector<43x18xf32>
    %358 = arith.divf %356, %357 : vector<43x18xf32>
    "tpu.trace_start"() <{level = 10 : i32, message = "nk,mk->nm"}> : () -> ()
    %cst_179 = arith.constant dense<0.000000e+00> : vector<18x43xf32>
    %359 = tpu.matmul %157, %358, %cst_179 {dimension_numbers = #tpu.dot_dimension_numbers<[1], [1], [0], [0], [0, 0, 1, 0], [], []>} : vector<18x18xf32>, vector<43x18xf32>, vector<18x43xf32> -> vector<18x43xf32>
    "tpu.trace_stop"() : () -> ()
    %cst_180 = arith.constant dense<0.000000e+00> : vector<43x43xf32>
    %360 = tpu.matmul %358, %359, %cst_180 {dimension_numbers = #tpu.dot_dimension_numbers<[1], [0], [0], [1], [0, 0, 1, 1], [], []>} : vector<43x18xf32>, vector<18x43xf32>, vector<43x43xf32> -> vector<43x43xf32>
    %cst_181 = arith.constant 1.000000e-01 : f32
    %361 = vector.broadcast %cst_181 : f32 to vector<43x43xf32>
    %362 = arith.cmpf ogt, %360, %361 : vector<43x43xf32>
    %cst_182 = arith.constant 1.000000e+00 : f32
    %363 = vector.broadcast %cst_182 : f32 to vector<43x43xf32>
    %cst_183 = arith.constant -9.000000e+15 : f32
    %364 = vector.broadcast %cst_183 : f32 to vector<43x43xf32>
    %365 = arith.select %362, %363, %364 : vector<43x43xi1>, vector<43x43xf32>
    %c0_184 = arith.constant 0 : index
    %c0_185 = arith.constant 0 : index
    %366 = vector.load %arg17[%c0_184, %c0_185] : memref<86x64xf32, #tpu.memory_space<vmem>>, vector<43x64xf32>
    tpu.vector_store %arg17[%c0_184, %c0_185], %351 {strides = array<i32>} : memref<86x64xf32, #tpu.memory_space<vmem>>, vector<43x64xf32>,
    %c0_186 = arith.constant 0 : index
    %c43_187 = arith.constant 43 : index
    %c0_188 = arith.constant 0 : index
    %367 = vector.load %arg15[%c0_186, %c43_187, %c0_188] : memref<2x128x128xf32, #tpu.memory_space<vmem>>, vector<1x43x18xf32>
    %368 = vector.shape_cast %367 : vector<1x43x18xf32> to vector<43x18xf32>
    %369 = vector.shape_cast %348 : vector<43x18xf32> to vector<1x43x18xf32>
    tpu.vector_store %arg15[%c0_186, %c43_187, %c0_188], %369 {strides = array<i32>} : memref<2x128x128xf32, #tpu.memory_space<vmem>>, vector<1x43x18xf32>,
    %c0_189 = arith.constant 0 : index
    %c43_190 = arith.constant 43 : index
    %c18_191 = arith.constant 18 : index
    %370 = vector.load %arg15[%c0_189, %c43_190, %c18_191] : memref<2x128x128xf32, #tpu.memory_space<vmem>>, vector<1x43x18xf32>
    %371 = vector.shape_cast %370 : vector<1x43x18xf32> to vector<43x18xf32>
    %372 = vector.shape_cast %358 : vector<43x18xf32> to vector<1x43x18xf32>
    tpu.vector_store %arg15[%c0_189, %c43_190, %c18_191], %372 {strides = array<i32>} : memref<2x128x128xf32, #tpu.memory_space<vmem>>, vector<1x43x18xf32>,
    %c0_192 = arith.constant 0 : index
    %c0_193 = arith.constant 0 : index
    %c64_194 = arith.constant 64 : index
    %373 = vector.load %arg15[%c0_192, %c0_193, %c64_194] : memref<2x128x128xf32, #tpu.memory_space<vmem>>, vector<1x43x43xf32>
    %374 = vector.shape_cast %373 : vector<1x43x43xf32> to vector<43x43xf32>
    %375 = vector.shape_cast %365 : vector<43x43xf32> to vector<1x43x43xf32>
    tpu.vector_store %arg15[%c0_192, %c0_193, %c64_194], %375 {strides = array<i32>} : memref<2x128x128xf32, #tpu.memory_space<vmem>>, vector<1x43x43xf32>,
    %376 = vector.extract_strided_slice %323 {offsets = [18, 0], sizes = [18, 64], strides = [1, 1]} : vector<36x64xf32> to vector<18x64xf32>
    "tpu.trace_start"() <{level = 10 : i32, message = "md,nd->mn"}> : () -> ()
    %cst_195 = arith.constant dense<0.000000e+00> : vector<86x18xf32>
    %377 = tpu.matmul %332, %376, %cst_195 {dimension_numbers = #tpu.dot_dimension_numbers<[1], [1], [0], [0], [0, 0, 1, 0], [], []>} : vector<86x64xf32>, vector<18x64xf32>, vector<86x18xf32> -> vector<86x18xf32>
    "tpu.trace_stop"() : () -> ()
    %378 = vector.broadcast %333 : vector<86x1xf32> to vector<86x18xf32>
    %379 = arith.addf %377, %378 : vector<86x18xf32>
    %380 = vector.extract_strided_slice %379 {offsets = [0, 0], sizes = [43, 18], strides = [1, 1]} : vector<86x18xf32> to vector<43x18xf32>
    %381 = vector.extract_strided_slice %379 {offsets = [43, 0], sizes = [43, 18], strides = [1, 1]} : vector<86x18xf32> to vector<43x18xf32>
    %cst_196 = arith.constant dense<0xFF800000> : vector<43xf32>
    %382 = vector.multi_reduction <maximumf>, %380, %cst_196 [1] : vector<43x18xf32> to vector<43xf32>
    %383 = vector.shape_cast %382 : vector<43xf32> to vector<43x1xf32>
    %384 = vector.broadcast %383 : vector<43x1xf32> to vector<43x18xf32>
    %385 = arith.subf %380, %384 : vector<43x18xf32>
    %386 = math.exp %385 : vector<43x18xf32>
    %cst_197 = arith.constant dense<0.000000e+00> : vector<43xf32>
    %387 = vector.multi_reduction <add>, %386, %cst_197 [1] : vector<43x18xf32> to vector<43xf32>
    %388 = vector.shape_cast %387 : vector<43xf32> to vector<43x1xf32>
    %389 = vector.broadcast %388 : vector<43x1xf32> to vector<43x18xf32>
    %390 = arith.divf %386, %389 : vector<43x18xf32>
    %391 = arith.truncf %390 : vector<43x18xf32> to vector<43x18xbf16>
    %392 = arith.truncf %376 : vector<18x64xf32> to vector<18x64xbf16>
    %cst_198 = arith.constant dense<0.000000e+00> : vector<43x64xf32>
    %393 = tpu.matmul %391, %392, %cst_198 {dimension_numbers = #tpu.dot_dimension_numbers<[1], [0], [0], [1], [0, 0, 1, 1], [], []>} : vector<43x18xbf16>, vector<18x64xbf16>, vector<43x64xf32> -> vector<43x64xf32>
    %cst_199 = arith.constant 1.000000e+03 : f32
    %394 = vector.broadcast %cst_199 : f32 to vector<43x18xf32>
    %395 = arith.mulf %394, %381 : vector<43x18xf32>
    %396 = arith.negf %395 : vector<43x18xf32>
    %397 = math.exp %396 : vector<43x18xf32>
    %cst_200 = arith.constant 1.000000e+00 : f32
    %398 = vector.broadcast %cst_200 : f32 to vector<43x18xf32>
    %399 = arith.addf %398, %397 : vector<43x18xf32>
    %400 = arith.divf %398, %399 : vector<43x18xf32>
    "tpu.trace_start"() <{level = 10 : i32, message = "nk,mk->nm"}> : () -> ()
    %cst_201 = arith.constant dense<0.000000e+00> : vector<18x43xf32>
    %401 = tpu.matmul %199, %400, %cst_201 {dimension_numbers = #tpu.dot_dimension_numbers<[1], [1], [0], [0], [0, 0, 1, 0], [], []>} : vector<18x18xf32>, vector<43x18xf32>, vector<18x43xf32> -> vector<18x43xf32>
    "tpu.trace_stop"() : () -> ()
    %cst_202 = arith.constant dense<0.000000e+00> : vector<43x43xf32>
    %402 = tpu.matmul %400, %401, %cst_202 {dimension_numbers = #tpu.dot_dimension_numbers<[1], [0], [0], [1], [0, 0, 1, 1], [], []>} : vector<43x18xf32>, vector<18x43xf32>, vector<43x43xf32> -> vector<43x43xf32>
    %cst_203 = arith.constant 1.000000e-01 : f32
    %403 = vector.broadcast %cst_203 : f32 to vector<43x43xf32>
    %404 = arith.cmpf ogt, %402, %403 : vector<43x43xf32>
    %cst_204 = arith.constant 1.000000e+00 : f32
    %405 = vector.broadcast %cst_204 : f32 to vector<43x43xf32>
    %cst_205 = arith.constant -9.000000e+15 : f32
    %406 = vector.broadcast %cst_205 : f32 to vector<43x43xf32>
    %407 = arith.select %404, %405, %406 : vector<43x43xi1>, vector<43x43xf32>
    %c43_206 = arith.constant 43 : index
    %c0_207 = arith.constant 0 : index
    %408 = vector.load %arg17[%c43_206, %c0_207] : memref<86x64xf32, #tpu.memory_space<vmem>>, vector<43x64xf32>
    tpu.vector_store %arg17[%c43_206, %c0_207], %393 {strides = array<i32>} : memref<86x64xf32, #tpu.memory_space<vmem>>, vector<43x64xf32>,
    %c1_208 = arith.constant 1 : index
    %c43_209 = arith.constant 43 : index
    %c0_210 = arith.constant 0 : index
    %409 = vector.load %arg15[%c1_208, %c43_209, %c0_210] : memref<2x128x128xf32, #tpu.memory_space<vmem>>, vector<1x43x18xf32>
    %410 = vector.shape_cast %409 : vector<1x43x18xf32> to vector<43x18xf32>
    %411 = vector.shape_cast %390 : vector<43x18xf32> to vector<1x43x18xf32>
    tpu.vector_store %arg15[%c1_208, %c43_209, %c0_210], %411 {strides = array<i32>} : memref<2x128x128xf32, #tpu.memory_space<vmem>>, vector<1x43x18xf32>,
    %c1_211 = arith.constant 1 : index
    %c43_212 = arith.constant 43 : index
    %c18_213 = arith.constant 18 : index
    %412 = vector.load %arg15[%c1_211, %c43_212, %c18_213] : memref<2x128x128xf32, #tpu.memory_space<vmem>>, vector<1x43x18xf32>
    %413 = vector.shape_cast %412 : vector<1x43x18xf32> to vector<43x18xf32>
    %414 = vector.shape_cast %400 : vector<43x18xf32> to vector<1x43x18xf32>
    tpu.vector_store %arg15[%c1_211, %c43_212, %c18_213], %414 {strides = array<i32>} : memref<2x128x128xf32, #tpu.memory_space<vmem>>, vector<1x43x18xf32>,
    %c1_214 = arith.constant 1 : index
    %c0_215 = arith.constant 0 : index
    %c64_216 = arith.constant 64 : index
    %415 = vector.load %arg15[%c1_214, %c0_215, %c64_216] : memref<2x128x128xf32, #tpu.memory_space<vmem>>, vector<1x43x43xf32>
    %416 = vector.shape_cast %415 : vector<1x43x43xf32> to vector<43x43xf32>
    %417 = vector.shape_cast %407 : vector<43x43xf32> to vector<1x43x43xf32>
    tpu.vector_store %arg15[%c1_214, %c0_215, %c64_216], %417 {strides = array<i32>} : memref<2x128x128xf32, #tpu.memory_space<vmem>>, vector<1x43x43xf32>,
    %c3 = arith.constant 3 : index
    %c0_217 = arith.constant 0 : index
    %c0_218 = arith.constant 0 : index
    %418 = vector.load %arg7[%c3, %c0_217, %c0_218] : memref<5x64x64xf32, #tpu.memory_space<vmem>>, vector<1x64x64xf32>
    %419 = vector.shape_cast %418 : vector<1x64x64xf32> to vector<64x64xf32>
    %c3_219 = arith.constant 3 : index
    %c0_220 = arith.constant 0 : index
    %c0_221 = arith.constant 0 : index
    %420 = vector.load %arg8[%c3_219, %c0_220, %c0_221] : memref<5x1x64xf32, #tpu.memory_space<vmem>>, vector<1x1x64xf32>
    %421 = vector.shape_cast %420 : vector<1x1x64xf32> to vector<1x64xf32>
    %c4 = arith.constant 4 : index
    %c0_222 = arith.constant 0 : index
    %c0_223 = arith.constant 0 : index
    %422 = vector.load %arg7[%c4, %c0_222, %c0_223] : memref<5x64x64xf32, #tpu.memory_space<vmem>>, vector<1x64x64xf32>
    %423 = vector.shape_cast %422 : vector<1x64x64xf32> to vector<64x64xf32>
    %c4_224 = arith.constant 4 : index
    %c0_225 = arith.constant 0 : index
    %c0_226 = arith.constant 0 : index
    %424 = vector.load %arg8[%c4_224, %c0_225, %c0_226] : memref<5x1x64xf32, #tpu.memory_space<vmem>>, vector<1x1x64xf32>
    %425 = vector.shape_cast %424 : vector<1x1x64xf32> to vector<1x64xf32>
    %c0_227 = arith.constant 0 : index
    %c0_228 = arith.constant 0 : index
    %426 = vector.load %arg17[%c0_227, %c0_228] : memref<86x64xf32, #tpu.memory_space<vmem>>, vector<86x64xf32>
    %427 = arith.truncf %426 : vector<86x64xf32> to vector<86x64xbf16>
    %428 = arith.truncf %0 : vector<64x1xf32> to vector<64x1xbf16>
    %cst_229 = arith.constant dense<0.000000e+00> : vector<86x1xf32>
    %429 = tpu.matmul %427, %428, %cst_229 {dimension_numbers = #tpu.dot_dimension_numbers<[1], [0], [0], [1], [0, 0, 1, 1], [], []>} : vector<86x64xbf16>, vector<64x1xbf16>, vector<86x1xf32> -> vector<86x1xf32>
    %430 = vector.extract_strided_slice %426 {offsets = [0, 0], sizes = [43, 64], strides = [1, 1]} : vector<86x64xf32> to vector<43x64xf32>
    %431 = arith.truncf %1 : vector<1x64xf32> to vector<1x64xbf16>
    %432 = arith.truncf %430 : vector<43x64xf32> to vector<43x64xbf16>
    "tpu.trace_start"() <{level = 10 : i32, message = "kd,nd->kn"}> : () -> ()
    %cst_230 = arith.constant dense<0.000000e+00> : vector<1x43xf32>
    %433 = tpu.matmul %431, %432, %cst_230 {dimension_numbers = #tpu.dot_dimension_numbers<[1], [1], [0], [0], [0, 0, 1, 0], [], []>} : vector<1x64xbf16>, vector<43x64xbf16>, vector<1x43xf32> -> vector<1x43xf32>
    "tpu.trace_stop"() : () -> ()
    %434 = vector.extract_strided_slice %429 {offsets = [0, 0], sizes = [43, 1], strides = [1, 1]} : vector<86x1xf32> to vector<43x1xf32>
    %435 = vector.broadcast %434 : vector<43x1xf32> to vector<43x43xf32>
    %436 = vector.broadcast %433 : vector<1x43xf32> to vector<43x43xf32>
    %437 = arith.addf %435, %436 : vector<43x43xf32>
    %cst_231 = arith.constant 0.000000e+00 : f32
    %438 = vector.broadcast %cst_231 : f32 to vector<43x43xf32>
    %439 = arith.cmpf ogt, %365, %438 : vector<43x43xf32>
    %cst_232 = arith.constant -9.000000e+15 : f32
    %440 = vector.broadcast %cst_232 : f32 to vector<43x43xf32>
    %441 = arith.select %439, %437, %440 : vector<43x43xi1>, vector<43x43xf32>
    %cst_233 = arith.constant dense<0xFF800000> : vector<43xf32>
    %442 = vector.multi_reduction <maximumf>, %441, %cst_233 [1] : vector<43x43xf32> to vector<43xf32>
    %443 = vector.shape_cast %442 : vector<43xf32> to vector<43x1xf32>
    %444 = vector.broadcast %443 : vector<43x1xf32> to vector<43x43xf32>
    %445 = arith.subf %441, %444 : vector<43x43xf32>
    %446 = math.exp %445 : vector<43x43xf32>
    %cst_234 = arith.constant dense<0.000000e+00> : vector<43xf32>
    %447 = vector.multi_reduction <add>, %446, %cst_234 [1] : vector<43x43xf32> to vector<43xf32>
    %448 = vector.shape_cast %447 : vector<43xf32> to vector<43x1xf32>
    %449 = vector.broadcast %448 : vector<43x1xf32> to vector<43x43xf32>
    %450 = arith.divf %446, %449 : vector<43x43xf32>
    %451 = vector.extract_strided_slice %426 {offsets = [43, 0], sizes = [43, 64], strides = [1, 1]} : vector<86x64xf32> to vector<43x64xf32>
    %452 = arith.truncf %1 : vector<1x64xf32> to vector<1x64xbf16>
    %453 = arith.truncf %451 : vector<43x64xf32> to vector<43x64xbf16>
    "tpu.trace_start"() <{level = 10 : i32, message = "kd,nd->kn"}> : () -> ()
    %cst_235 = arith.constant dense<0.000000e+00> : vector<1x43xf32>
    %454 = tpu.matmul %452, %453, %cst_235 {dimension_numbers = #tpu.dot_dimension_numbers<[1], [1], [0], [0], [0, 0, 1, 0], [], []>} : vector<1x64xbf16>, vector<43x64xbf16>, vector<1x43xf32> -> vector<1x43xf32>
    "tpu.trace_stop"() : () -> ()
    %455 = vector.extract_strided_slice %429 {offsets = [43, 0], sizes = [43, 1], strides = [1, 1]} : vector<86x1xf32> to vector<43x1xf32>
    %456 = vector.broadcast %455 : vector<43x1xf32> to vector<43x43xf32>
    %457 = vector.broadcast %454 : vector<1x43xf32> to vector<43x43xf32>
    %458 = arith.addf %456, %457 : vector<43x43xf32>
    %cst_236 = arith.constant 0.000000e+00 : f32
    %459 = vector.broadcast %cst_236 : f32 to vector<43x43xf32>
    %460 = arith.cmpf ogt, %407, %459 : vector<43x43xf32>
    %cst_237 = arith.constant -9.000000e+15 : f32
    %461 = vector.broadcast %cst_237 : f32 to vector<43x43xf32>
    %462 = arith.select %460, %458, %461 : vector<43x43xi1>, vector<43x43xf32>
    %cst_238 = arith.constant dense<0xFF800000> : vector<43xf32>
    %463 = vector.multi_reduction <maximumf>, %462, %cst_238 [1] : vector<43x43xf32> to vector<43xf32>
    %464 = vector.shape_cast %463 : vector<43xf32> to vector<43x1xf32>
    %465 = vector.broadcast %464 : vector<43x1xf32> to vector<43x43xf32>
    %466 = arith.subf %462, %465 : vector<43x43xf32>
    %467 = math.exp %466 : vector<43x43xf32>
    %cst_239 = arith.constant dense<0.000000e+00> : vector<43xf32>
    %468 = vector.multi_reduction <add>, %467, %cst_239 [1] : vector<43x43xf32> to vector<43xf32>
    %469 = vector.shape_cast %468 : vector<43xf32> to vector<43x1xf32>
    %470 = vector.broadcast %469 : vector<43x1xf32> to vector<43x43xf32>
    %471 = arith.divf %467, %470 : vector<43x43xf32>
    %472 = arith.truncf %426 : vector<86x64xf32> to vector<86x64xbf16>
    %473 = arith.truncf %419 : vector<64x64xf32> to vector<64x64xbf16>
    %cst_240 = arith.constant dense<0.000000e+00> : vector<86x64xf32>
    %474 = tpu.matmul %472, %473, %cst_240 {dimension_numbers = #tpu.dot_dimension_numbers<[1], [0], [0], [1], [0, 0, 1, 1], [], []>} : vector<86x64xbf16>, vector<64x64xbf16>, vector<86x64xf32> -> vector<86x64xf32>
    %cst_241 = arith.constant 2.000000e+00 : f32
    %475 = vector.broadcast %cst_241 : f32 to vector<1x64xf32>
    %476 = arith.mulf %475, %421 : vector<1x64xf32>
    %477 = vector.extract_strided_slice %474 {offsets = [0, 0], sizes = [43, 64], strides = [1, 1]} : vector<86x64xf32> to vector<43x64xf32>
    %478 = arith.truncf %450 : vector<43x43xf32> to vector<43x43xbf16>
    %479 = arith.truncf %477 : vector<43x64xf32> to vector<43x64xbf16>
    %cst_242 = arith.constant dense<0.000000e+00> : vector<43x64xf32>
    %480 = tpu.matmul %478, %479, %cst_242 {dimension_numbers = #tpu.dot_dimension_numbers<[1], [0], [0], [1], [0, 0, 1, 1], [], []>} : vector<43x43xbf16>, vector<43x64xbf16>, vector<43x64xf32> -> vector<43x64xf32>
    %481 = arith.addf %480, %477 : vector<43x64xf32>
    %482 = vector.broadcast %476 : vector<1x64xf32> to vector<43x64xf32>
    %483 = arith.addf %481, %482 : vector<43x64xf32>
    %cst_243 = arith.constant 5.000000e-01 : f32
    %484 = vector.broadcast %cst_243 : f32 to vector<43x64xf32>
    %485 = arith.mulf %483, %484 : vector<43x64xf32>
    %cst_244 = arith.constant 0.000000e+00 : f32
    %486 = vector.broadcast %cst_244 : f32 to vector<43x64xf32>
    %487 = arith.maximumf %485, %486 : vector<43x64xf32>
    %c0_245 = arith.constant 0 : index
    %c0_246 = arith.constant 0 : index
    %488 = vector.load %arg18[%c0_245, %c0_246] : memref<86x64xf32, #tpu.memory_space<vmem>>, vector<43x64xf32>
    tpu.vector_store %arg18[%c0_245, %c0_246], %487 {strides = array<i32>} : memref<86x64xf32, #tpu.memory_space<vmem>>, vector<43x64xf32>,
    %489 = vector.extract_strided_slice %474 {offsets = [43, 0], sizes = [43, 64], strides = [1, 1]} : vector<86x64xf32> to vector<43x64xf32>
    %490 = arith.truncf %471 : vector<43x43xf32> to vector<43x43xbf16>
    %491 = arith.truncf %489 : vector<43x64xf32> to vector<43x64xbf16>
    %cst_247 = arith.constant dense<0.000000e+00> : vector<43x64xf32>
    %492 = tpu.matmul %490, %491, %cst_247 {dimension_numbers = #tpu.dot_dimension_numbers<[1], [0], [0], [1], [0, 0, 1, 1], [], []>} : vector<43x43xbf16>, vector<43x64xbf16>, vector<43x64xf32> -> vector<43x64xf32>
    %493 = arith.addf %492, %489 : vector<43x64xf32>
    %494 = vector.broadcast %476 : vector<1x64xf32> to vector<43x64xf32>
    %495 = arith.addf %493, %494 : vector<43x64xf32>
    %cst_248 = arith.constant 5.000000e-01 : f32
    %496 = vector.broadcast %cst_248 : f32 to vector<43x64xf32>
    %497 = arith.mulf %495, %496 : vector<43x64xf32>
    %cst_249 = arith.constant 0.000000e+00 : f32
    %498 = vector.broadcast %cst_249 : f32 to vector<43x64xf32>
    %499 = arith.maximumf %497, %498 : vector<43x64xf32>
    %c43_250 = arith.constant 43 : index
    %c0_251 = arith.constant 0 : index
    %500 = vector.load %arg18[%c43_250, %c0_251] : memref<86x64xf32, #tpu.memory_space<vmem>>, vector<43x64xf32>
    tpu.vector_store %arg18[%c43_250, %c0_251], %499 {strides = array<i32>} : memref<86x64xf32, #tpu.memory_space<vmem>>, vector<43x64xf32>,
    %c0_252 = arith.constant 0 : index
    %c0_253 = arith.constant 0 : index
    %501 = vector.load %arg18[%c0_252, %c0_253] : memref<86x64xf32, #tpu.memory_space<vmem>>, vector<86x64xf32>
    %502 = arith.truncf %501 : vector<86x64xf32> to vector<86x64xbf16>
    %503 = arith.truncf %423 : vector<64x64xf32> to vector<64x64xbf16>
    %cst_254 = arith.constant dense<0.000000e+00> : vector<86x64xf32>
    %504 = tpu.matmul %502, %503, %cst_254 {dimension_numbers = #tpu.dot_dimension_numbers<[1], [0], [0], [1], [0, 0, 1, 1], [], []>} : vector<86x64xbf16>, vector<64x64xbf16>, vector<86x64xf32> -> vector<86x64xf32>
    %cst_255 = arith.constant 2.000000e+00 : f32
    %505 = vector.broadcast %cst_255 : f32 to vector<1x64xf32>
    %506 = arith.mulf %505, %425 : vector<1x64xf32>
    %507 = vector.extract_strided_slice %504 {offsets = [0, 0], sizes = [43, 64], strides = [1, 1]} : vector<86x64xf32> to vector<43x64xf32>
    %508 = arith.truncf %450 : vector<43x43xf32> to vector<43x43xbf16>
    %509 = arith.truncf %507 : vector<43x64xf32> to vector<43x64xbf16>
    %cst_256 = arith.constant dense<0.000000e+00> : vector<43x64xf32>
    %510 = tpu.matmul %508, %509, %cst_256 {dimension_numbers = #tpu.dot_dimension_numbers<[1], [0], [0], [1], [0, 0, 1, 1], [], []>} : vector<43x43xbf16>, vector<43x64xbf16>, vector<43x64xf32> -> vector<43x64xf32>
    %511 = arith.addf %510, %507 : vector<43x64xf32>
    %512 = vector.broadcast %506 : vector<1x64xf32> to vector<43x64xf32>
    %513 = arith.addf %511, %512 : vector<43x64xf32>
    %cst_257 = arith.constant 5.000000e-01 : f32
    %514 = vector.broadcast %cst_257 : f32 to vector<43x64xf32>
    %515 = arith.mulf %513, %514 : vector<43x64xf32>
    %cst_258 = arith.constant 0.000000e+00 : f32
    %516 = vector.broadcast %cst_258 : f32 to vector<43x64xf32>
    %517 = arith.maximumf %515, %516 : vector<43x64xf32>
    %c0_259 = arith.constant 0 : index
    %c0_260 = arith.constant 0 : index
    %518 = vector.load %arg18[%c0_259, %c0_260] : memref<86x64xf32, #tpu.memory_space<vmem>>, vector<43x64xf32>
    tpu.vector_store %arg18[%c0_259, %c0_260], %517 {strides = array<i32>} : memref<86x64xf32, #tpu.memory_space<vmem>>, vector<43x64xf32>,
    %519 = vector.extract_strided_slice %504 {offsets = [43, 0], sizes = [43, 64], strides = [1, 1]} : vector<86x64xf32> to vector<43x64xf32>
    %520 = arith.truncf %471 : vector<43x43xf32> to vector<43x43xbf16>
    %521 = arith.truncf %519 : vector<43x64xf32> to vector<43x64xbf16>
    %cst_261 = arith.constant dense<0.000000e+00> : vector<43x64xf32>
    %522 = tpu.matmul %520, %521, %cst_261 {dimension_numbers = #tpu.dot_dimension_numbers<[1], [0], [0], [1], [0, 0, 1, 1], [], []>} : vector<43x43xbf16>, vector<43x64xbf16>, vector<43x64xf32> -> vector<43x64xf32>
    %523 = arith.addf %522, %519 : vector<43x64xf32>
    %524 = vector.broadcast %506 : vector<1x64xf32> to vector<43x64xf32>
    %525 = arith.addf %523, %524 : vector<43x64xf32>
    %cst_262 = arith.constant 5.000000e-01 : f32
    %526 = vector.broadcast %cst_262 : f32 to vector<43x64xf32>
    %527 = arith.mulf %525, %526 : vector<43x64xf32>
    %cst_263 = arith.constant 0.000000e+00 : f32
    %528 = vector.broadcast %cst_263 : f32 to vector<43x64xf32>
    %529 = arith.maximumf %527, %528 : vector<43x64xf32>
    %c43_264 = arith.constant 43 : index
    %c0_265 = arith.constant 0 : index
    %530 = vector.load %arg18[%c43_264, %c0_265] : memref<86x64xf32, #tpu.memory_space<vmem>>, vector<43x64xf32>
    tpu.vector_store %arg18[%c43_264, %c0_265], %529 {strides = array<i32>} : memref<86x64xf32, #tpu.memory_space<vmem>>, vector<43x64xf32>,
    %c0_266 = arith.constant 0 : index
    %c0_267 = arith.constant 0 : index
    %531 = vector.load %arg18[%c0_266, %c0_267] : memref<86x64xf32, #tpu.memory_space<vmem>>, vector<86x64xf32>
    %c0_268 = arith.constant 0 : index
    %c0_269 = arith.constant 0 : index
    %532 = vector.load %arg16[%c0_268, %c0_269] : memref<86x64xf32, #tpu.memory_space<vmem>>, vector<86x64xf32>
    %533 = arith.addf %531, %532 : vector<86x64xf32>
    %534 = arith.truncf %533 : vector<86x64xf32> to vector<86x64xbf16>
    %c0_270 = arith.constant 0 : index
    %c0_271 = arith.constant 0 : index
    %535 = vector.load %arg9[%c0_270, %c0_271] : memref<64x64xf32, #tpu.memory_space<vmem>>, vector<64x64xf32>
    %536 = arith.truncf %535 : vector<64x64xf32> to vector<64x64xbf16>
    %cst_272 = arith.constant dense<0.000000e+00> : vector<86x64xf32>
    %537 = tpu.matmul %534, %536, %cst_272 {dimension_numbers = #tpu.dot_dimension_numbers<[1], [0], [0], [1], [0, 0, 1, 1], [], []>} : vector<86x64xbf16>, vector<64x64xbf16>, vector<86x64xf32> -> vector<86x64xf32>
    %c0_273 = arith.constant 0 : index
    %c0_274 = arith.constant 0 : index
    %538 = vector.load %arg10[%c0_273, %c0_274] : memref<1x64xf32, #tpu.memory_space<vmem>>, vector<1x64xf32>
    %539 = vector.broadcast %538 : vector<1x64xf32> to vector<86x64xf32>
    %540 = arith.addf %537, %539 : vector<86x64xf32>
    %541 = math.tanh %540 : vector<86x64xf32>
    %542 = vector.extract_strided_slice %541 {offsets = [0, 0], sizes = [43, 64], strides = [1, 1]} : vector<86x64xf32> to vector<43x64xf32>
    %c0_275 = arith.constant 0 : index
    %c0_276 = arith.constant 0 : index
    %c0_277 = arith.constant 0 : index
    %543 = vector.load %arg15[%c0_275, %c0_276, %c0_277] : memref<2x128x128xf32, #tpu.memory_space<vmem>>, vector<1x43x64xf32>
    %544 = vector.shape_cast %543 : vector<1x43x64xf32> to vector<43x64xf32>
    %545 = vector.shape_cast %542 : vector<43x64xf32> to vector<1x43x64xf32>
    tpu.vector_store %arg15[%c0_275, %c0_276, %c0_277], %545 {strides = array<i32>} : memref<2x128x128xf32, #tpu.memory_space<vmem>>, vector<1x43x64xf32>,
    %546 = vector.extract_strided_slice %541 {offsets = [43, 0], sizes = [43, 64], strides = [1, 1]} : vector<86x64xf32> to vector<43x64xf32>
    %c1_278 = arith.constant 1 : index
    %c0_279 = arith.constant 0 : index
    %c0_280 = arith.constant 0 : index
    %547 = vector.load %arg15[%c1_278, %c0_279, %c0_280] : memref<2x128x128xf32, #tpu.memory_space<vmem>>, vector<1x43x64xf32>
    %548 = vector.shape_cast %547 : vector<1x43x64xf32> to vector<43x64xf32>
    %549 = vector.shape_cast %546 : vector<43x64xf32> to vector<1x43x64xf32>
    tpu.vector_store %arg15[%c1_278, %c0_279, %c0_280], %549 {strides = array<i32>} : memref<2x128x128xf32, #tpu.memory_space<vmem>>, vector<1x43x64xf32>,
    return
  }
  func.func @transform_0(%arg0: i32) -> (i32, i32, i32) {
    %c0_i32 = arith.constant 0 : i32
    %c0_i32_0 = arith.constant 0 : i32
    %c0_i32_1 = arith.constant 0 : i32
    return %arg0, %c0_i32, %c0_i32_0 : i32, i32, i32
  }
  func.func @transform_1(%arg0: i32) -> (i32, i32, i32) {
    %c0_i32 = arith.constant 0 : i32
    %c0_i32_0 = arith.constant 0 : i32
    %c0_i32_1 = arith.constant 0 : i32
    return %arg0, %c0_i32, %c0_i32_0 : i32, i32, i32
  }
  func.func @transform_2(%arg0: i32) -> (i32, i32) {
    %c0_i32 = arith.constant 0 : i32
    %c0_i32_0 = arith.constant 0 : i32
    %c0_i32_1 = arith.constant 0 : i32
    return %c0_i32, %c0_i32_0 : i32, i32
  }
  func.func @transform_3(%arg0: i32) -> (i32, i32) {
    %c0_i32 = arith.constant 0 : i32
    %c0_i32_0 = arith.constant 0 : i32
    %c0_i32_1 = arith.constant 0 : i32
    return %c0_i32, %c0_i32_0 : i32, i32
  }
  func.func @transform_4(%arg0: i32) -> (i32, i32) {
    %c0_i32 = arith.constant 0 : i32
    %c0_i32_0 = arith.constant 0 : i32
    %c0_i32_1 = arith.constant 0 : i32
    return %c0_i32, %c0_i32_0 : i32, i32
  }
  func.func @transform_5(%arg0: i32) -> (i32, i32) {
    %c0_i32 = arith.constant 0 : i32
    %c0_i32_0 = arith.constant 0 : i32
    %c0_i32_1 = arith.constant 0 : i32
    return %c0_i32, %c0_i32_0 : i32, i32
  }
  func.func @transform_6(%arg0: i32) -> (i32, i32, i32) {
    %c0_i32 = arith.constant 0 : i32
    %c0_i32_0 = arith.constant 0 : i32
    %c0_i32_1 = arith.constant 0 : i32
    %c0_i32_2 = arith.constant 0 : i32
    return %c0_i32, %c0_i32_0, %c0_i32_1 : i32, i32, i32
  }
  func.func @transform_7(%arg0: i32) -> (i32, i32, i32) {
    %c0_i32 = arith.constant 0 : i32
    %c0_i32_0 = arith.constant 0 : i32
    %c0_i32_1 = arith.constant 0 : i32
    %c0_i32_2 = arith.constant 0 : i32
    return %c0_i32, %c0_i32_0, %c0_i32_1 : i32, i32, i32
  }
  func.func @transform_8(%arg0: i32) -> (i32, i32) {
    %c0_i32 = arith.constant 0 : i32
    %c0_i32_0 = arith.constant 0 : i32
    %c0_i32_1 = arith.constant 0 : i32
    return %c0_i32, %c0_i32_0 : i32, i32
  }
  func.func @transform_9(%arg0: i32) -> (i32, i32) {
    %c0_i32 = arith.constant 0 : i32
    %c0_i32_0 = arith.constant 0 : i32
    %c0_i32_1 = arith.constant 0 : i32
    return %c0_i32, %c0_i32_0 : i32, i32
  }
  func.func @transform_10(%arg0: i32) -> (i32, i32) {
    %c0_i32 = arith.constant 0 : i32
    %c0_i32_0 = arith.constant 0 : i32
    %c0_i32_1 = arith.constant 0 : i32
    return %c0_i32, %c0_i32_0 : i32, i32
  }
  func.func @transform_11(%arg0: i32) -> (i32, i32) {
    %c0_i32 = arith.constant 0 : i32
    %c0_i32_0 = arith.constant 0 : i32
    %c0_i32_1 = arith.constant 0 : i32
    return %c0_i32, %c0_i32_0 : i32, i32
  }
  func.func @transform_12(%arg0: i32) -> (i32, i32) {
    %c0_i32 = arith.constant 0 : i32
    %c0_i32_0 = arith.constant 0 : i32
    %c0_i32_1 = arith.constant 0 : i32
    return %c0_i32, %c0_i32_0 : i32, i32
  }
  func.func @transform_13(%arg0: i32) -> (i32, i32) {
    %c0_i32 = arith.constant 0 : i32
    %c0_i32_0 = arith.constant 0 : i32
    %c0_i32_1 = arith.constant 0 : i32
    return %c0_i32, %c0_i32_0 : i32, i32
  }
  func.func @transform_14(%arg0: i32) -> (i32, i32, i32) {
    %c0_i32 = arith.constant 0 : i32
    %c0_i32_0 = arith.constant 0 : i32
    %c0_i32_1 = arith.constant 0 : i32
    return %arg0, %c0_i32, %c0_i32_0 : i32, i32, i32
  }
}

</mosaic_0001>

<bundles_post_ra>
// kernel: tpu_custom_call.1
= control target key start
LH: loop header
LB: loop body
LE: loop exit
PB: predicated region body
PF: predicated region fallthrough
CT: control target
= control target key end

     0   :  { %vm77_vm0 = vcmask 523264   ;;  %v10467_v5 = vmov 0.0   ;;  %vm83_vm1 = vcmask 518144   ;;  %vm7684_vm2 = vmmov 0   ;;  %s10445_s0 = inlined_call_operand.vmem [shape: f32[2,43,64], index: 0, kind: input, shape index: {}]   ;;  %s10446_s1 = inlined_call_operand.vmem [shape: f32[2,43,43], index: 1, kind: input, shape index: {}]   ;;  %s10447_s2 = inlined_call_operand.vmem [shape: f32[64,1], index: 2, kind: input, shape index: {}]   ;;  %s10448_s3 = inlined_call_operand.vmem [shape: f32[1,64], index: 3, kind: input, shape index: {}]   ;;  %s10449_s4 = inlined_call_operand.vmem [shape: f32[64,64], index: 4, kind: input, shape index: {}]   ;;  %s10450_s5 = inlined_call_operand.vmem [shape: f32[1,64], index: 5, kind: input, shape index: {}]   ;;  %s10451_s6 = inlined_call_operand.vmem [shape: f32[5,64,64], index: 6, kind: input, shape index: {}]   ;;  %s10452_s7 = inlined_call_operand.vmem [shape: f32[5,1,64], index: 7, kind: input, shape index: {}]   ;;  %s10453_s8 = inlined_call_operand.vmem [shape: f32[64,64], index: 8, kind: input, shape index: {}]   ;;  %s10454_s9 = inlined_call_operand.vmem [shape: f32[1,64], index: 9, kind: input, shape index: {}]   ;;  %s10455_s10 = inlined_call_operand.vmem [shape: f32[36,64], index: 10, kind: input, shape index: {}]   ;;  %s10456_s11 = inlined_call_operand.vmem [shape: f32[36,1], index: 11, kind: input, shape index: {}]   ;;  %s10457_s12 = inlined_call_operand.vmem [shape: f32[86,64], index: 12, kind: input, shape index: {}]   ;;  %s10458_s13 = inlined_call_operand.vmem [shape: f32[86,1], index: 13, kind: input, shape index: {}]   ;;  %s10459_s14 = inlined_call_operand.hbm [shape: f32[2,128,128], index: 14, kind: output, shape index: {}]  }
   0x1   :  { %v49_v0 = vld [vmem:[%s10447_s2] sm:$0xff]  ;;  %v50_v1 = vld [vmem:[%s10447_s2 + $0x8] sm:$0xff]  ;;  %v51_v2 = vld [vmem:[%s10447_s2 + $0x10] sm:$0xff]  ;;  %6500 = vmatprep.subr.bf16.mxu1 %v10467_v5  ;;  %6506 = vmatprep.mubr.msk.bf16.mxu1 %vm7684_vm2, %v10467_v5 }
   0x2   :  { %v7780_v3 = vpack.c.bf16 %v50_v1, %v49_v0  ;;  %v52_v4 = vld [vmem:[%s10447_s2 + $0x18] sm:$0xff]  ;;  %v53_v7 = vld [vmem:[%s10447_s2 + $0x20] sm:$0xff]  ;;  %v54_v8 = vld [vmem:[%s10447_s2 + $0x28] sm:$0xff] }
   0x3   :  { %v7786_v6 = vpack.c.bf16 %v52_v4, %v51_v2  ;;  %v71_v9 = vld [vmem:[%s10445_s0] sm:$0xff]  ;;  %v72_v10 = vld [vmem:[%s10445_s0 + $0x8] sm:$0xff]  ;;  %v73_v11 = vld [vmem:[%s10445_s0 + $0x10] sm:$0xff]  ;;  %v7827_v17 = vpack.c.bf16 %v54_v8, %v53_v7 }
   0x4   :  { %6480 = vmatprep.subr.bf16.mxu0 %v7780_v3  ;;  %78 = vst.msk [vmem:[#allocation3] sm:$0xff] %vm77_vm0, %v71_v9  ;;  %v74_v12 = vld [vmem:[%s10445_s0 + $0x18] sm:$0xff]  ;;  %v55_v13 = vld [vmem:[%s10447_s2 + $0x30] sm:$0xff]  ;;  %79 = vst.msk [vmem:[#allocation3 + $0x8] sm:$0xff] %vm77_vm0, %v72_v10 }
   0x5   :  { %6481 = vmatpush3.bf16.msra.mxu0 %v7780_v3  ;;  %80 = vst.msk [vmem:[#allocation3 + $0x10] sm:$0xff] %vm77_vm0, %v73_v11  ;;  %81 = vst.msk [vmem:[#allocation3 + $0x18] sm:$0xff] %vm77_vm0, %v74_v12  ;;  %v75_v14 = vld [vmem:[%s10445_s0 + $0x20] sm:$0xff]  ;;  %v76_v15 = vld [vmem:[%s10445_s0 + $0x28] sm:$0x7] }
   0x6   :  { %v5893_v16 = vld [vmem:[%s10445_s0 + $0x30] sm:$0xff]  ;;  %6482 = vmatprep.subr.bf16.mxu0 %v7786_v6  ;;  %82 = vst.msk [vmem:[#allocation3 + $0x20] sm:$0xff] %vm77_vm0, %v75_v14  ;;  %v5894_v18 = vld [vmem:[%s10445_s0 + $0x38] sm:$0xff]  ;;  %v5895_v19 = vld [vmem:[%s10445_s0 + $0x40] sm:$0xff] }
   0x7   :  { %84 = vst.msk [vmem:[#allocation3 + $0x28] sm:$0x7] %vm83_vm1, %v76_v15  ;;  %v5896_v20 = vld [vmem:[%s10445_s0 + $0x48] sm:$0xff]  ;;  %v56_v21 = vld [vmem:[%s10447_s2 + $0x38] sm:$0xff]  ;;  %v5897_v22 = vld [vmem:[%s10445_s0 + $0x50] sm:$0xff] }
   0x8   :  { %92 = vst.msk [vmem:[#allocation3 + $0x2b] sm:$0xff] %vm77_vm0, %v5893_v16  ;;  %93 = vst.msk [vmem:[#allocation3 + $0x33] sm:$0xff] %vm77_vm0, %v5894_v18  ;;  %v5898_v23 = vld [vmem:[%s10445_s0 + $0x58] sm:$0x7] }
   0x9   :  { %94 = vst.msk [vmem:[#allocation3 + $0x3b] sm:$0xff] %vm77_vm0, %v5895_v19  ;;  %95 = vst.msk [vmem:[#allocation3 + $0x43] sm:$0xff] %vm77_vm0, %v5896_v20 }
   0xa   :  { %96 = vst.msk [vmem:[#allocation3 + $0x4b] sm:$0xff] %vm77_vm0, %v5897_v22 }
   0xb   :  { %97 = vst.msk [vmem:[#allocation3 + $0x53] sm:$0x7] %vm83_vm1, %v5898_v23 }
   0xc   :  { %19 = vsyncpa [#allocation6], 0  ;;  %6483 = vmatpush3.bf16.msra.mxu0 %v7786_v6  ;;  %v7857_v24 = vpack.c.bf16 %v56_v21, %v55_v13  ;;  %v116_v25 = vld [vmem:[#allocation3] sm:$0xff]  ;;  %v117_v26 = vld [vmem:[#allocation3 + $0x8] sm:$0xff]  ;;  %vm10462_vm3 = vsmask.f32 6400 }
   0xd   :  { %6484 = vmatprep.subr.bf16.mxu0 %v7827_v17  ;;  %v118_v27 = vld [vmem:[#allocation3 + $0x10] sm:$0xff]  ;;  %v7860_v28 = vpack.c.bf16 %v117_v26, %v116_v25  ;;  %v119_v29 = vld [vmem:[#allocation3 + $0x18] sm:$0xff]  ;;  %v120_v30 = vld [vmem:[#allocation3 + $0x20] sm:$0xff]  ;;  %v7685_v9 = vmov 0   ;;  %vm10461_vm5 = vcmask 351232   ;;  %vm525_vm7 = vcmask 1044480  }
   0xe   :  { %v7867_v40 = vpack.c.bf16 %v119_v29, %v118_v27  ;;  %v57_v4 = vld [vmem:[%s10448_s3] sm:$0x1]  ;;  %7359 = vset.pattern.permute.xlu0 %v7685_v9  ;;  %7360 = vset.pattern.permute.xlu1 %v7685_v9  ;;  %vm10460_vm13 = vcmask 346112   ;;  %s7692_s20 = smov 18  }
   0xf   :  { %v121_v31 = vld [vmem:[#allocation3 + $0x28] sm:$0xff]  ;;  %v122_v32 = vld [vmem:[#allocation3 + $0x30] sm:$0xff]  ;;  %6488 = vmatprep.mubr.msk.bf16.mxu0 %vm77_vm0, %v7860_v28  ;;  %v138_v37 = vsel %vm77_vm0, %v7860_v28, 0  ;;  %v7902_v7 = vpack.c.bf16 %v57_v4, %v57_v4  ;;  %v60_v4 = vld [vmem:[%s10446_s1 + $0x10] sm:$0xff] }
  0x10   :  { %6485 = vmatpush3.bf16.msra.mxu0 %v7827_v17  ;;  %v123_v33 = vld [vmem:[#allocation3 + $0x38] sm:$0xff]  ;;  %v124_v34 = vld [vmem:[#allocation3 + $0x40] sm:$0xff]  ;;  %v399_v38 = vpack.c.bf16 %v122_v32, %v121_v31  ;;  %v7869_v41 = vpack.c.bf16 %v121_v31, %v120_v30  ;;  %6501 = vmatpush3.bf16.xpose.msra.mxu1 %v138_v37  ;;  %v141_v57 = vsel %vm77_vm0, %v7867_v40, 0  ;;  %vm321_vm9 = vcmp.gt.f32.partialorder %v60_v4, 0.0 }
  0x11   :  { %6486 = vmatprep.subr.bf16.mxu0 %v7857_v24  ;;  %v125_v35 = vld [vmem:[#allocation3 + $0x48] sm:$0xff]  ;;  %v400_v39 = vpack.c.bf16 %v124_v34, %v123_v33  ;;  %6502 = vmatprep.subr.bf16.mxu1 %v10467_v5  ;;  %v7881_v59 = vpack.c.bf16 %v123_v33, %v122_v32  ;;  %v99_v33 = vld [vmem:[%s10449_s4 + $0x8] sm:$0xff] }
  0x12   :  { %v126_v36 = vld [vmem:[#allocation3 + $0x50] sm:$0x3f]  ;;  %v404_v43 = vshrl.u32 %v399_v38, 16  ;;  %v407_v44 = vshll.u32 %v399_v38, 16  ;;  %v7884_v62 = vpack.c.bf16 %v125_v35, %v124_v34  ;;  %v144_v0 = vsel %vm77_vm0, %v7869_v41, 0  ;;  %v98_v32 = vld [vmem:[%s10449_s4] sm:$0xff] }
  0x13   :  { %v401_v42 = vpack.c.bf16 %v126_v36, %v125_v35  ;;  %v412_v45 = vshrl.u32 %v400_v39, 16  ;;  %v415_v46 = vshll.u32 %v400_v39, 16  ;;  %v7896_v2 = vpack.c.bf16 %v126_v36, %v126_v36  ;;  %v100_v34 = vld [vmem:[%s10449_s4 + $0x10] sm:$0xff]  ;;  %v101_v36 = vld [vmem:[%s10449_s4 + $0x18] sm:$0xff]  ;;  %v102_v38 = vld [vmem:[%s10449_s4 + $0x20] sm:$0xff] }
  0x14   :  { %6487 = vmatpush3.bf16.msra.mxu0 %v7857_v24  ;;  %v406_v49 = vrot.slane %v404_v43, 1  ;;  %v409_v50 = vrot.slane %v407_v44, 2  ;;  %v615_v35 = vpack.c.bf16 %v99_v33, %v98_v32  ;;  %v616_v37 = vpack.c.bf16 %v101_v36, %v100_v34  ;;  %v103_v39 = vld [vmem:[%s10449_s4 + $0x28] sm:$0xff]  ;;  %v104_v43 = vld [vmem:[%s10449_s4 + $0x30] sm:$0xff]  ;;  %v105_v44 = vld [vmem:[%s10449_s4 + $0x38] sm:$0xff]  ;;  %s7691_s4 = smov 64  }
  0x15   :  { %6510 = vmatprep.subr.bf16.mxu0 %v10467_v5  ;;  %v421_v47 = vshrl.u32 %v401_v42, 16  ;;  %v424_v48 = vshll.u32 %v401_v42, 16  ;;  %v414_v51 = vrot.slane %v412_v45, 1  ;;  %v417_v52 = vrot.slane %v415_v46, 2  ;;  %v62_v32 = vld [vmem:[%s10446_s1 + $0x20] sm:$0xff]  ;;  %v5890_v33 = vld [vmem:[%s10446_s1 + $0x48] sm:$0xff] }
  0x16   :  { %v410_v55 = vor.u32 %v409_v50, %v406_v49  ;;  %v617_v42 = vpack.c.bf16 %v103_v39, %v102_v38  ;;  %v618_v45 = vpack.c.bf16 %v105_v44, %v104_v43  ;;  %v309_v46 = vlaneseq  ;;  %v5889_v39 = vld [vmem:[%s10446_s1 + $0x40] sm:$0xff] }
  0x17   :  { %6489 = vmatmul.mubr.msk.bf16.vlgmr.msra.gmra.mrb[0].mxu0 %vm77_vm0, %v7867_v40  ;;  %v423_v53 = vrot.slane %v421_v47, 1  ;;  %v426_v54 = vrot.slane %v424_v48, 2  ;;  %v418_v56 = vor.u32 %v417_v52, %v414_v51  ;;  %v59_v51 = vld [vmem:[%s10446_s1 + $0x8] sm:$0xff]  ;;  %vm323_vm14 = vcmp.gt.f32.partialorder %v62_v32, 0.0 }
  0x18   :  { %6492 = vmatprep.mubr.msk.bf16.mxu0 %vm77_vm0, %v7869_v41  ;;  %6503 = vmatpush3.bf16.xpose.msra.mxu1 %v141_v57  ;;  %v310_v47 = vshrl.u32 %v309_v46, 7  ;;  %vm320_vm6 = vcmp.gt.f32.partialorder %v59_v51, 0.0  ;;  %vm516_vm15 = vcmp.gt.f32.partialorder %v5890_v33, 0.0 }
  0x19   :  { %v419_v58 = vsel %vm10462_vm3, %v410_v55, %v418_v56  ;;  %v427_v61 = vor.u32 %v426_v54, %v423_v53  ;;  %6504 = vmatprep.subr.bf16.mxu1 %v10467_v5 }
  0x1a   :  { %v430_v60 = vsel %vm77_vm0, %v419_v58, 0  ;;  %v7955_v48 = vsub.s32 0, %v310_v47  ;;  %v5892_v47 = vld [vmem:[%s10446_s1 + $0x58] sm:$0x7] }
  0x1b   :  { %v428_v63 = vsel %vm10462_vm3, %v418_v56, %v427_v61  ;;  %v436_v8 = vsel %vm77_vm0, %v427_v61, 0 }
  0x1c   :  { %v433_v1 = vsel %vm77_vm0, %v428_v63, 0  ;;  %v61_v63 = vld [vmem:[%s10446_s1 + $0x18] sm:$0xff] }
  0x1d   :  { %6511 = vmatpush3.bf16.xpose.msra.mxu0 %v430_v60  ;;  %vm322_vm8 = vcmp.gt.f32.partialorder %v61_v63, 0.0 }
  0x1e   :  { %6512 = vmatprep.subr.bf16.mxu0 %v10467_v5 }
  0x1f   :  { %6493 = vmatmul.mubr.msk.bf16.gmra.mrb[4].mxu0 %vm77_vm0, %v7881_v59 }
  0x20   :  { %6496 = vmatprep.mubr.msk.bf16.mxu0 %vm77_vm0, %v7884_v62  ;;  %6505 = vmatpush3.bf16.xpose.msra.mxu1 %v144_v0 }
  0x21   :  { %6520 = vmatprep.subr.bf16.mxu1 %v615_v35 }
  0x25   :  { %6513 = vmatpush3.bf16.xpose.msra.mxu0 %v433_v1 }
  0x26   :  { %6514 = vmatprep.subr.bf16.mxu0 %v10467_v5 }
  0x27   :  { %6497 = vmatmul.mubr.msk.bf16.gmra.mrb[8].mxu0 %vm77_vm0, %v7896_v2  ;;  %6507 = vmatmul.mubr.msk.bf16.vlgmr.msra.gmra.mrb[0].mxu1 %vm77_vm0, %v7902_v7 }
  0x28   :  { %6516 = vmatprep.mubr.msk.bf16.mxu0 %vm7684_vm2, %v10467_v5  ;;  %6528 = vmatprep.mubr.msk.bf16.mxu1 %vm77_vm0, %v7860_v28 }
  0x29   :  { %6521 = vmatpush3.bf16.msra.mxu1 %v615_v35 }
  0x2a   :  { %6522 = vmatprep.subr.bf16.mxu1 %v616_v37 }
  0x2d   :  { %6515 = vmatpush3.bf16.xpose.msra.mxu0 %v436_v8  ;;  %6523 = vmatpush3.bf16.msra.mxu1 %v616_v37  ;;  %v5888_v8 = vld [vmem:[%s10446_s1 + $0x38] sm:$0xff] }
  0x2e   :  { %6540 = vmatprep.subr.bf16.mxu0 %v10467_v5  ;;  %6524 = vmatprep.subr.bf16.mxu1 %v617_v42  ;;  %vm514_vm10 = vcmp.gt.f32.partialorder %v5888_v8, 0.0 }
  0x31   :  { %6525 = vmatpush3.bf16.msra.mxu1 %v617_v42 }
  0x32   :  { %6526 = vmatprep.subr.bf16.mxu1 %v618_v45 }
  0x34   :  { %6517 = vmatmul.mubr.msk.bf16.vlgmr.msra.gmra.mrb[12].mxu0 %vm77_vm0, %v7902_v7 }
  0x35   :  { %6546 = vmatprep.mubr.msk.bf16.mxu0 %vm7684_vm2, %v10467_v5  ;;  %6527 = vmatpush3.bf16.msra.mxu1 %v618_v45 }
  0x36   :  { %6558 = vmatprep.subr.bf16.mxu1 %v10467_v5 }
  0x38   :  { %6529 = vmatmul.mubr.msk.bf16.vlgmr.msra.gmra.mrb[4].mxu1 %vm77_vm0, %v7867_v40 }
  0x39   :  { %6532 = vmatprep.mubr.msk.bf16.mxu1 %vm77_vm0, %v7869_v41  ;;  %v58_v41 = vld [vmem:[%s10446_s1] sm:$0xff] }
  0x3a   :  { %vm319_vm4 = vcmp.gt.f32.partialorder %v58_v41, 0.0 }
  0x40   :  { %6533 = vmatmul.mubr.msk.bf16.gmra.mrb[8].mxu1 %vm77_vm0, %v7881_v59 }
  0x41   :  { %6536 = vmatprep.mubr.msk.bf16.mxu1 %vm77_vm0, %v7884_v62 }
  0x48   :  { %6537 = vmatmul.mubr.msk.bf16.gmra.mrb[12].mxu1 %vm77_vm0, %v7896_v2 }
  0x49   :  { %6564 = vmatprep.mubr.msk.bf16.mxu1 %vm7684_vm2, %v10467_v5 }
  0xea   :  { %v6490_v10 = vpop.f32.mrb[0].mxu0 }
  0xeb   :  { %v189_v11 = vpop.f32.mrb[1].mxu0 }
  0xec   :  { %281 = vperm.xlu0 %7359, %v189_v11   ;;  %v6491_v12 = vpop.f32.mrb[2].mxu0 }
  0xed   :  { %v192_v13 = vpop.f32.mrb[3].mxu0 }
  0xf0   :  { %286 = vperm.xlu0 %7359, %v192_v13   ;;  %v5887_v13 = vld [vmem:[%s10446_s1 + $0x30] sm:$0xff] }
  0xf1   :  { %vm513_vm11 = vcmp.gt.f32.partialorder %v5887_v13, 0.0 }
  0xf2   :  { %v6494_v14 = vpop.f32.mrb[4].mxu0 }
  0xf3   :  { %480 = vperm.xlu1 %7360, %v6494_v14   ;;  %v205_v15 = vpop.f32.mrb[5].mxu0 }
  0xf4   :  { %v6495_v16 = vpop.f32.mrb[6].mxu0 }
  0xf5   :  { %485 = vperm.xlu0 %7359, %v6495_v16   ;;  %v208_v18 = vpop.f32.mrb[7].mxu0 }
  0xf7   :  { %306 = vperm.xlu1 %7360, %v208_v18  }
  0xf9   :  { %296 = vperm.xlu0 %7359, %v6491_v12  }
  0xfa   :  { %v6498_v19 = vpop.f32.mrb[8].mxu0  ;;  %v273_v23 = vpop.f32.mrb[0].mxu1 }
  0xfb   :  { %291 = vperm.xlu1 %7360, %v6490_v10   ;;  %v221_v20 = vpop.f32.mrb[9].mxu0  ;;  %v6508_v25 = vpop.f32.mrb[1].mxu1  ;;  %v7958_v40 = vrot.slane %v273_v23, %v7955_v48 }
  0xfc   :  { %v6499_v21 = vpop.f32.mrb[10].mxu0  ;;  %v276_v26 = vpop.f32.mrb[2].mxu1 }
  0xfd   :  { %v224_v22 = vpop.f32.mrb[11].mxu0  ;;  %v6509_v27 = vpop.f32.mrb[3].mxu1 }
  0xfe   :  { %495 = vperm.xlu0 %7359, %v224_v22  }
  0xff   :  { %490 = vperm.xlu1 %7360, %v221_v20  }
 0x102   :  { %500 = vperm.xlu0 %7359, %v6498_v19   ;;  %v63_v19 = vld [vmem:[%s10446_s1 + $0x28] sm:$0x7] }
 0x103   :  { %301 = vperm.xlu1 %7360, %v205_v15   ;;  %vm324_vm12 = vcmp.gt.f32.partialorder %v63_v19, 0.0 }
 0x107   :  { %v472_v28 = vpop.f32.mrb[12].mxu0 }
 0x108   :  { %v6518_v29 = vpop.f32.mrb[13].mxu0  ;;  %v506_v56 = vrot.slane %v472_v28, %v7955_v48 }
 0x109   :  { %v475_v30 = vpop.f32.mrb[14].mxu0 }
 0x10a   :  { %v6519_v31 = vpop.f32.mrb[15].mxu0 }
 0x16b   :  { %v282_v49 = vpop.permute.xlu0 %281 }
 0x16c   :  { %v313_v50 = vadd.f32 %v7958_v40, %v282_v49 }
 0x16e   :  { %v7967_v52 = vsel %vm319_vm4, %v313_v50, -9e+15  ;;  %vm515_vm4 = vcmp.gt.f32.partialorder %v5889_v39, 0.0 }
 0x16f   :  { %v287_v53 = vpop.permute.xlu0 %286  ;;  %v332_v54 = vsel %vm10461_vm5, %v7967_v52, -inf }
 0x170   :  { %v314_v55 = vadd.f32 %v7958_v40, %v287_v53  ;;  %333 = vmax.xlane.f32.xlu1 %v332_v54 }
 0x172   :  { %v481_v57 = vpop.permute.xlu1 %480  ;;  %v7973_v58 = vsel %vm320_vm6, %v314_v55, -9e+15  ;;  %vm518_vm6 = vcmp.gt.f32.partialorder %v5892_v47, 0.0 }
 0x173   :  { %v335_v59 = vsel %vm10461_vm5, %v7973_v58, -inf  ;;  %v508_v60 = vadd.f32 %v506_v56, %v481_v57 }
 0x174   :  { %v486_v61 = vpop.permute.xlu0 %485  ;;  %336 = vmax.xlane.f32.xlu0 %v335_v59 }
 0x175   :  { %v509_v62 = vadd.f32 %v506_v56, %v486_v61  ;;  %v527_v9 = vrot.slane %v508_v60, 3 }
 0x176   :  { %v307_v0 = vpop.permute.xlu1 %306 }
 0x177   :  { %v529_v1 = vrot.slane %v509_v62, 3  ;;  %v507_v2 = vadd.f32 %v506_v56, %v307_v0  ;;  %v318_v26 = vadd.f32 %v7958_v40, %v307_v0  ;;  %v8056_v0 = vpop.f32.mrb[4].mxu1 }
 0x178   :  { %v297_v10 = vpop.permute.xlu0 %296 }
 0x179   :  { %v526_v11 = vrot.slane %v507_v2, 3  ;;  %v316_v12 = vadd.f32 %v7958_v40, %v297_v10  ;;  %v530_v15 = vsel %vm525_vm7, %v527_v9, %v529_v1  ;;  %v8017_v38 = vsel %vm324_vm12, %v318_v26, -9e+15  ;;  %vm8601_vm12 = vmpackc.low %vm10461_vm5, %vm10461_vm5 }
 0x17a   :  { %v292_v14 = vpop.permute.xlu1 %291  ;;  %v8002_v25 = vsel %vm514_vm10, %v530_v15, -9e+15  ;;  %v348_v49 = vsel %vm10460_vm13, %v8017_v38, -inf  ;;  %vm8421_vm10 = vmpackc.low %vm77_vm0, %vm77_vm0 }
 0x17b   :  { %v315_v16 = vadd.f32 %v7958_v40, %v292_v14  ;;  %v7992_v18 = vsel %vm322_vm8, %v316_v12, -9e+15  ;;  %v528_v21 = vsel %vm525_vm7, %v526_v11, %v527_v9  ;;  %v552_v35 = vsel %vm10461_vm5, %v8002_v25, -inf }
 0x17c   :  { %v341_v20 = vsel %vm10461_vm5, %v7992_v18, -inf  ;;  %v8007_v31 = vsel %vm513_vm11, %v528_v21, -9e+15  ;;  %vm1484_vm11 = vcmask 345088  }
 0x17d   :  { %342 = vmax.xlane.f32.xlu1 %v341_v20  ;;  %v496_v22 = vpop.permute.xlu0 %495  ;;  %v8000_v23 = vsel %vm321_vm9, %v315_v16, -9e+15  ;;  %v549_v44 = vsel %vm10461_vm5, %v8007_v31, -inf  ;;  %vm715_vm9 = vcmask 1045504  }
 0x17e   :  { %v511_v27 = vadd.f32 %v506_v56, %v496_v22  ;;  %v491_v28 = vpop.permute.xlu1 %490  ;;  %v338_v29 = vsel %vm10461_vm5, %v8000_v23, -inf }
 0x17f   :  { %v510_v30 = vadd.f32 %v506_v56, %v491_v28  ;;  %339 = vmax.xlane.f32.xlu0 %v338_v29 }
 0x180   :  { %v533_v34 = vrot.slane %v511_v27, 3 }
 0x181   :  { %v531_v36 = vrot.slane %v510_v30, 3  ;;  %v501_v37 = vpop.permute.xlu0 %500  ;;  %553 = vmax.xlane.f32.xlu1 %v552_v35 }
 0x182   :  { %v512_v42 = vadd.f32 %v506_v56, %v501_v37  ;;  %v302_v43 = vpop.permute.xlu1 %301 }
 0x183   :  { %v317_v45 = vadd.f32 %v7958_v40, %v302_v43  ;;  %550 = vmax.xlane.f32.xlu0 %v549_v44  ;;  %v534_v46 = vsel %vm525_vm7, %v531_v36, %v533_v34  ;;  %v532_v50 = vsel %vm525_vm7, %v529_v1, %v531_v36  ;;  %v5891_v40 = vld [vmem:[%s10446_s1 + $0x50] sm:$0xff]  ;;  %v8058_v1 = vpop.f32.mrb[5].mxu1 }
 0x184   :  { %v535_v41 = vrot.slane %v512_v42, 3  ;;  %v8034_v53 = vsel %vm516_vm15, %v534_v46, -9e+15  ;;  %v8041_v55 = vsel %vm515_vm4, %v532_v50, -9e+15  ;;  %vm517_vm8 = vcmp.gt.f32.partialorder %v5891_v40, 0.0 }
 0x185   :  { %349 = vmax.xlane.f32.xlu1 %v348_v49  ;;  %v8032_v51 = vsel %vm323_vm14, %v317_v45, -9e+15  ;;  %v558_v56 = vsel %vm10461_vm5, %v8034_v53, -inf  ;;  %v555_v60 = vsel %vm10461_vm5, %v8041_v55, -inf  ;;  %v8060_v2 = vpop.f32.mrb[6].mxu1  ;;  %vm1722_vm14 = vcmask 1042432  }
 0x186   :  { %v344_v54 = vsel %vm10461_vm5, %v8032_v51, -inf  ;;  %v536_v57 = vsel %vm525_vm7, %v533_v34, %v535_v41  ;;  %v8046_v59 = vsel %vm518_vm6, %v535_v41, -9e+15  ;;  %v704_v4 = vpack.c.bf16 %v8060_v2, %v8056_v0  ;;  %v8064_v8 = vpop.f32.mrb[7].mxu1 }
 0x187   :  { %345 = vmax.xlane.f32.xlu0 %v344_v54  ;;  %v8050_v61 = vsel %vm517_vm8, %v536_v57, -9e+15  ;;  %v564_v62 = vsel %vm10460_vm13, %v8046_v59, -inf  ;;  %v703_v9 = vpack.c.bf16 %v8064_v8, %v8058_v1  ;;  %v8069_v11 = vpop.f32.mrb[8].mxu1  ;;  %vm7688_vm15 = vmmov 1  }
 0x188   :  { %v561_v63 = vsel %vm10461_vm5, %v8050_v61, -inf  ;;  %v8072_v13 = vpop.f32.mrb[9].mxu1  ;;  %vm8745_vm4 = vmpackc.low %vm1722_vm14, %vm7688_vm15  ;;  %vm1814_vm6 = vcmask 517120   ;;  %vm2567_vm8 = vcmask 1046528   ;;  %vm2530_vm14 = vcmask 146432  }
 0x189   :  { %559 = vmax.xlane.f32.xlu1 %v558_v56  ;;  %6541 = vmatpush3.bf16.msra.mxu0 %v703_v9  ;;  %v8074_v14 = vpop.f32.mrb[10].mxu1 }
 0x18a   :  { %6542 = vmatprep.subr.bf16.mxu0 %v10467_v5  ;;  %v8076_v16 = vpop.f32.mrb[11].mxu1 }
 0x18b   :  { %556 = vmax.xlane.f32.xlu0 %v555_v60  ;;  %v705_v20 = vpack.c.bf16 %v8076_v16, %v8072_v13  ;;  %v8083_v21 = vpack.c.bf16 %v8069_v11, %v8076_v16  ;;  %v8086_v26 = vpop.f32.mrb[12].mxu1 }
 0x18d   :  { %565 = vmax.xlane.f32.xlu1 %v564_v62  ;;  %6543 = vmatpush3.bf16.msra.mxu0 %v704_v4  ;;  %v815_v60 = vshrl.u32 %v8083_v21, 16 }
 0x18e   :  { %6544 = vmatprep.subr.bf16.mxu0 %v10467_v5 }
 0x18f   :  { %562 = vmax.xlane.f32.xlu0 %v561_v63 }
 0x1fd   :  { %v334_v10 = vpop.xlane.xlu1 %333 }
 0x1fe   :  { %v351_v12 = vsub.f32 %v7967_v52, %v334_v10  ;;  %v8116_v10 = vpop.f32.mrb[13].mxu1 }
 0x200   :  { %v357_v15 = vmul.f32 1.442695, %v351_v12 }
 0x201   :  { %v337_v19 = vpop.xlane.xlu0 %336 }
 0x202   :  { %7361 = vpow2.f32 %v357_v15  ;;  %v352_v52 = vsub.f32 %v7973_v58, %v337_v19 }
 0x204   :  { %v359_v22 = vmul.f32 1.442695, %v352_v52 }
 0x206   :  { %7363 = vpow2.f32 %v359_v22  ;;  %v817_v22 = vrot.slane %v815_v60, 1 }
 0x20a   :  { %v343_v27 = vpop.xlane.xlu1 %342 }
 0x20b   :  { %v354_v28 = vsub.f32 %v7992_v18, %v343_v27 }
 0x20c   :  { %v8089_v29 = vpop.eup %7361  ;;  %v340_v30 = vpop.xlane.xlu0 %339 }
 0x20d   :  { %v363_v32 = vmul.f32 1.442695, %v354_v28  ;;  %v353_v33 = vsub.f32 %v8000_v23, %v340_v30  ;;  %v369_v34 = vsel %vm10461_vm5, %v8089_v29, 0.0 }
 0x20e   :  { %v554_v35 = vpop.xlane.xlu1 %553  ;;  %370 = vadd.xlane.f32.xlu0 %v369_v34  ;;  %v851_v34 = vrot.slane %v8074_v14, 3 }
 0x20f   :  { %7365 = vpow2.f32 %v363_v32  ;;  %v361_v58 = vmul.f32 1.442695, %v353_v33  ;;  %v568_v36 = vsub.f32 %v8002_v25, %v554_v35 }
 0x210   :  { %v8095_v37 = vpop.eup %7363  ;;  %v551_v39 = vpop.xlane.xlu0 %550 }
 0x211   :  { %7367 = vpow2.f32 %v361_v58  ;;  %v575_v18 = vmul.f32 1.442695, %v568_v36  ;;  %v567_v42 = vsub.f32 %v8007_v31, %v551_v39  ;;  %v372_v43 = vsel %vm10461_vm5, %v8095_v37, 0.0 }
 0x212   :  { %373 = vadd.xlane.f32.xlu1 %v372_v43  ;;  %v350_v23 = vpop.xlane.xlu1 %349 }
 0x213   :  { %7369 = vpow2.f32 %v575_v18  ;;  %v573_v44 = vmul.f32 1.442695, %v567_v42  ;;  %v356_v45 = vsub.f32 %v8017_v38, %v350_v23  ;;  %v853_v18 = vrot.slane %v8116_v10, 3 }
 0x214   :  { %v346_v46 = vpop.xlane.xlu0 %345  ;;  %v7686_v23 = vmov 65535  }
 0x215   :  { %7371 = vpow2.f32 %v573_v44  ;;  %v367_v47 = vmul.f32 1.442695, %v356_v45  ;;  %v355_v25 = vsub.f32 %v8032_v51, %v346_v46  ;;  %v818_v51 = vshll.u32 %v8083_v21, 16 }
 0x216   :  { %v560_v41 = vpop.xlane.xlu1 %559  ;;  %v812_v21 = vpack.c.bf16 %v8116_v10, %v8074_v14  ;;  %v716_v44 = vsel %vm525_vm7, 4294967295, %v7686_v23 }
 0x217   :  { %7373 = vpow2.f32 %v367_v47  ;;  %v365_v49 = vmul.f32 1.442695, %v355_v25  ;;  %v570_v50 = vsub.f32 %v8034_v53, %v560_v41  ;;  %v820_v27 = vrot.slane %v818_v51, 2 }
 0x218   :  { %v557_v31 = vpop.xlane.xlu0 %556  ;;  %v823_v32 = vshrl.u32 %v812_v21, 16  ;;  %v826_v33 = vshll.u32 %v812_v21, 16  ;;  %v8141_v46 = vsel %vm715_vm9, %v716_v44, 0 }
 0x219   :  { %v8103_v40 = vpop.eup %7365  ;;  %7375 = vpow2.f32 %v365_v49  ;;  %v579_v54 = vmul.f32 1.442695, %v570_v50  ;;  %v569_v56 = vsub.f32 %v8041_v55, %v557_v31  ;;  %v849_v55 = vrot.slane %v8069_v11, 3  ;;  %10488 = vst [vmem:[#allocation8_spill] sm:$0xff] %v8141_v46 }
 0x21a   :  { %v566_v57 = vpop.xlane.xlu1 %565  ;;  %v378_v38 = vsel %vm10461_vm5, %v8103_v40, 0.0  ;;  %v848_v11 = vrot.slane %v8076_v16, 3  ;;  %v825_v36 = vrot.slane %v823_v32, 1  ;;  %v828_v39 = vrot.slane %v826_v33, 2  ;;  %v1327_v32 = vld [vmem:[%s10456_s11 + $0x10] sm:$0xff]  ;;  %v1326_v33 = vld [vmem:[%s10456_s11 + $0x8] sm:$0xff] }
 0x21b   :  { %v8110_v62 = vpop.eup %7367  ;;  %7377 = vpow2.f32 %v579_v54  ;;  %v577_v63 = vmul.f32 1.442695, %v569_v56  ;;  %v572_v53 = vsub.f32 %v8046_v59, %v566_v57  ;;  %379 = vadd.xlane.f32.xlu1 %v378_v38  ;;  %v6539_v59 = vpop.f32.mrb[14].mxu1  ;;  %v821_v47 = vor.u32 %v820_v27, %v817_v22 }
 0x21c   :  { %v563_v4 = vpop.xlane.xlu0 %562  ;;  %v375_v9 = vsel %vm10461_vm5, %v8110_v62, 0.0  ;;  %v688_v35 = vpop.f32.mrb[15].mxu1  ;;  %v829_v14 = vor.u32 %v828_v39, %v825_v36  ;;  %v8144_v25 = vsel %vm525_vm7, %v848_v11, %v849_v55  ;;  %v719_v31 = vand.u32 %v8141_v46, %v705_v20  ;;  %v1328_v11 = vld [vmem:[%s10456_s11 + $0x18] sm:$0xff] }
 0x21d   :  { %v8118_v12 = vpop.eup %7369  ;;  %7379 = vpow2.f32 %v577_v63  ;;  %v583_v15 = vmul.f32 1.442695, %v572_v53  ;;  %v571_v19 = vsub.f32 %v8050_v61, %v563_v4  ;;  %376 = vadd.xlane.f32.xlu0 %v375_v9  ;;  %v813_v43 = vpack.c.bf16 %v8086_v26, %v688_v35 }
 0x21e   :  { %v588_v52 = vsel %vm10461_vm5, %v8118_v12, 0.0  ;;  %v830_v56 = vsel %vm10462_vm3, %v821_v47, %v829_v14  ;;  %v8156_v57 = vsel %vm525_vm7, %v849_v55, %v851_v34  ;;  %v8159_v38 = vsel %vm525_vm7, %v851_v34, %v853_v18  ;;  %6545 = vmatpush3.bf16.msra.mxu0 %v719_v31 }
 0x21f   :  { %v8126_v28 = vpop.eup %7371  ;;  %7381 = vpow2.f32 %v583_v15  ;;  %v581_v30 = vmul.f32 1.442695, %v571_v19  ;;  %589 = vadd.xlane.f32.xlu1 %v588_v52  ;;  %v832_v49 = vshrl.u32 %v813_v43, 16  ;;  %v835_v50 = vshll.u32 %v813_v43, 16  ;;  %6559 = vmatpush3.bf16.msra.mxu1 %v830_v56 }
 0x220   :  { %v585_v61 = vsel %vm10461_vm5, %v8126_v28, 0.0  ;;  %v857_v20 = vrot.slane %v8086_v26, 3  ;;  %6560 = vmatprep.subr.bf16.mxu1 %v10467_v5  ;;  %v855_v10 = vrot.slane %v688_v35, 3 }
 0x221   :  { %v8131_v58 = vpop.eup %7373  ;;  %7383 = vpow2.f32 %v581_v30  ;;  %586 = vadd.xlane.f32.xlu0 %v585_v61  ;;  %v834_v51 = vrot.slane %v832_v49, 1  ;;  %v837_v63 = vrot.slane %v835_v50, 2  ;;  %v1329_v30 = vld [vmem:[%s10456_s11 + $0x20] sm:$0xf] }
 0x222   :  { %v384_v42 = vsel %vm10460_vm13, %v8131_v58, 0.0  ;;  %v8177_v59 = vsel %vm525_vm7, %v853_v18, %v855_v10  ;;  %v8182_v52 = vsel %vm525_vm7, %v855_v10, %v857_v20  ;;  %v1325_v61 = vld [vmem:[%s10456_s11] sm:$0xff] }
 0x223   :  { %v8138_v45 = vpop.eup %7375  ;;  %385 = vadd.xlane.f32.xlu1 %v384_v42  ;;  %v838_v9 = vor.u32 %v837_v63, %v834_v51 }
 0x224   :  { %v381_v41 = vsel %vm10461_vm5, %v8138_v45, 0.0 }
 0x225   :  { %v8152_v54 = vpop.eup %7377  ;;  %382 = vadd.xlane.f32.xlu0 %v381_v41  ;;  %v839_v19 = vsel %vm10462_vm3, %v829_v14, %v838_v9  ;;  %v875_v27 = vand.u32 %v838_v9, %v8141_v46 }
 0x226   :  { %v594_v60 = vsel %vm10461_vm5, %v8152_v54, 0.0  ;;  %6561 = vmatpush3.bf16.msra.mxu1 %v839_v19 }
 0x227   :  { %v8163_v53 = vpop.eup %7379  ;;  %595 = vadd.xlane.f32.xlu1 %v594_v60  ;;  %6562 = vmatprep.subr.bf16.mxu1 %v10467_v5 }
 0x228   :  { %v591_v4 = vsel %vm10461_vm5, %v8163_v53, 0.0 }
 0x229   :  { %v8169_v55 = vpop.eup %7381  ;;  %592 = vadd.xlane.f32.xlu0 %v591_v4 }
 0x22a   :  { %v600_v15 = vsel %vm10460_vm13, %v8169_v55, 0.0  ;;  %6563 = vmatpush3.bf16.msra.mxu1 %v875_v27 }
 0x22b   :  { %v8174_v21 = vpop.eup %7383  ;;  %601 = vadd.xlane.f32.xlu1 %v600_v15  ;;  %6596 = vmatprep.subr.bf16.mxu1 %v10467_v5 }
 0x22c   :  { %v597_v22 = vsel %vm10461_vm5, %v8174_v21, 0.0 }
 0x22d   :  { %598 = vadd.xlane.f32.xlu0 %v597_v22 }
 0x23c   :  { %1347 = vperm.xlu1 %7360, %v1328_v11  }
 0x240   :  { %1352 = vperm.xlu1 %7360, %v1329_v30  }
 0x243   :  { %1342 = vperm.xlu0 %7359, %v1327_v32  }
 0x244   :  { %1337 = vperm.xlu1 %7360, %v1326_v33  }
 0x247   :  { %1332 = vperm.xlu0 %7359, %v1325_v61  }
 0x29b   :  { %v371_v34 = vpop.xlane.xlu0 %370 }
 0x29c   :  { %7385 = vrcp.f32 %v371_v34 }
 0x29f   :  { %v374_v35 = vpop.xlane.xlu1 %373 }
 0x2a0   :  { %7387 = vrcp.f32 %v374_v35 }
 0x2a6   :  { %v7386_v36 = vpop.eup %7385 }
 0x2a7   :  { %v388_v43 = vmul.f32 %v7386_v36, %v8089_v29 }
 0x2a8   :  { %v380_v39 = vpop.xlane.xlu1 %379 }
 0x2a9   :  { %7389 = vrcp.f32 %v380_v39 }
 0x2aa   :  { %v7388_v18 = vpop.eup %7387  ;;  %v377_v42 = vpop.xlane.xlu0 %376 }
 0x2ab   :  { %v390_v23 = vmul.f32 %v7388_v18, %v8095_v37  ;;  %7391 = vrcp.f32 %v377_v42  ;;  %v111_v42 = vld [vmem:[%s10451_s6 + $0x20] sm:$0xff] }
 0x2ac   :  { %v590_v44 = vpop.xlane.xlu1 %589 }
 0x2ad   :  { %7393 = vrcp.f32 %v590_v44  ;;  %v8206_v14 = vpack.c.bf16 %v390_v23, %v388_v43  ;;  %v112_v43 = vld [vmem:[%s10451_s6 + $0x28] sm:$0xff]  ;;  %v113_v44 = vld [vmem:[%s10451_s6 + $0x30] sm:$0xff] }
 0x2ae   :  { %v587_v47 = vpop.xlane.xlu0 %586  ;;  %v977_v23 = vpack.c.bf16 %v112_v43, %v111_v42 }
 0x2af   :  { %7395 = vrcp.f32 %v587_v47  ;;  %6547 = vmatmul.mubr.msk.bf16.vlgmr.msra.gmra.mrb[16].mxu0 %vm10461_vm5, %v8206_v14  ;;  %v114_v47 = vld [vmem:[%s10451_s6 + $0x38] sm:$0xff] }
 0x2b0   :  { %v386_v41 = vpop.xlane.xlu1 %385  ;;  %6550 = vmatprep.mubr.msk.bf16.mxu0 %vm7684_vm2, %v10467_v5 }
 0x2b1   :  { %7397 = vrcp.f32 %v386_v41  ;;  %v978_v41 = vpack.c.bf16 %v114_v47, %v113_v44 }
 0x2b2   :  { %v383_v49 = vpop.xlane.xlu0 %382 }
 0x2b3   :  { %v7390_v50 = vpop.eup %7389  ;;  %7399 = vrcp.f32 %v383_v49  ;;  %v106_v49 = vld [vmem:[%s10450_s5] sm:$0x1] }
 0x2b4   :  { %v596_v29 = vpop.xlane.xlu1 %595  ;;  %v394_v60 = vmul.f32 %v7390_v50, %v8103_v40  ;;  %v699_v50 = vmul.f32 2.0, %v106_v49 }
 0x2b5   :  { %v7392_v37 = vpop.eup %7391  ;;  %7401 = vrcp.f32 %v596_v29 }
 0x2b6   :  { %v593_v31 = vpop.xlane.xlu0 %592  ;;  %v392_v56 = vmul.f32 %v7392_v37, %v8110_v62  ;;  %v8279_v29 = vrot.slane %v699_v50, %v7955_v48 }
 0x2b7   :  { %v7394_v51 = vpop.eup %7393  ;;  %7403 = vrcp.f32 %v593_v31 }
 0x2b8   :  { %v8214_v63 = vpack.c.bf16 %v394_v60, %v392_v56  ;;  %v606_v9 = vmul.f32 %v7394_v51, %v8118_v12  ;;  %v602_v15 = vpop.xlane.xlu1 %601 }
 0x2b9   :  { %v7396_v4 = vpop.eup %7395 }
 0x2ba   :  { %v604_v10 = vmul.f32 %v7396_v4, %v8126_v28  ;;  %6551 = vmatmul.mubr.msk.bf16.gmra.mrb[20].mxu0 %vm10461_vm5, %v8214_v63  ;;  %v599_v19 = vpop.xlane.xlu0 %598 }
 0x2bb   :  { %v7398_v22 = vpop.eup %7397  ;;  %7405 = vrcp.f32 %v599_v19  ;;  %6554 = vmatprep.mubr.msk.bf16.mxu0 %vm7684_vm2, %v10467_v5 }
 0x2bc   :  { %v8222_v40 = vpack.c.bf16 %v606_v9, %v604_v10  ;;  %7407 = vrcp.f32 %v602_v15  ;;  %v398_v28 = vmul.f32 %v7398_v22, %v8131_v58 }
 0x2bd   :  { %v7400_v62 = vpop.eup %7399 }
 0x2be   :  { %6565 = vmatmul.mubr.msk.bf16.vlgmr.msra.gmra.mrb[16].mxu1 %vm10461_vm5, %v8222_v40  ;;  %v396_v12 = vmul.f32 %v7400_v62, %v8138_v45 }
 0x2bf   :  { %v7402_v27 = vpop.eup %7401  ;;  %6568 = vmatprep.mubr.msk.bf16.mxu1 %vm7684_vm2, %v10467_v5 }
 0x2c0   :  { %v8230_v11 = vpack.c.bf16 %v398_v28, %v396_v12  ;;  %v610_v33 = vmul.f32 %v7402_v27, %v8152_v54  ;;  %v107_v54 = vld [vmem:[%s10451_s6] sm:$0xff] }
 0x2c1   :  { %v7404_v30 = vpop.eup %7403 }
 0x2c2   :  { %6555 = vmatmul.mubr.msk.bf16.gmra.mrb[24].mxu0 %vm10461_vm5, %v8230_v11  ;;  %v608_v32 = vmul.f32 %v7404_v30, %v8163_v53  ;;  %v108_v53 = vld [vmem:[%s10451_s6 + $0x8] sm:$0xff] }
 0x2c3   :  { %v975_v39 = vpack.c.bf16 %v108_v53, %v107_v54 }
 0x2c4   :  { %v8236_v61 = vpack.c.bf16 %v610_v33, %v608_v32 }
 0x2c5   :  { %v7406_v34 = vpop.eup %7405  ;;  %6576 = vmatprep.subr.bf16.mxu0 %v975_v39 }
 0x2c6   :  { %6569 = vmatmul.mubr.msk.bf16.gmra.mrb[20].mxu1 %vm10461_vm5, %v8236_v61  ;;  %v7408_v58 = vpop.eup %7407  ;;  %v612_v45 = vmul.f32 %v7406_v34, %v8174_v21  ;;  %6577 = vmatpush3.bf16.msra.mxu0 %v975_v39  ;;  %v110_v21 = vld [vmem:[%s10451_s6 + $0x18] sm:$0xff] }
 0x2c7   :  { %6572 = vmatprep.mubr.msk.bf16.mxu1 %vm7684_vm2, %v10467_v5  ;;  %v614_v35 = vmul.f32 %v7408_v58, %v8169_v55  ;;  %v109_v55 = vld [vmem:[%s10451_s6 + $0x10] sm:$0xff] }
 0x2c8   :  { %v976_v18 = vpack.c.bf16 %v110_v21, %v109_v55 }
 0x2c9   :  { %v8244_v36 = vpack.c.bf16 %v614_v35, %v612_v45 }
 0x2ca   :  { %6578 = vmatprep.subr.bf16.mxu0 %v976_v18 }
 0x2cb   :  { %6579 = vmatpush3.bf16.msra.mxu0 %v976_v18 }
 0x2cc   :  { %6580 = vmatprep.subr.bf16.mxu0 %v977_v23 }
 0x2ce   :  { %6573 = vmatmul.mubr.msk.bf16.gmra.mrb[24].mxu1 %vm10461_vm5, %v8244_v36 }
 0x2cf   :  { %6602 = vmatprep.mubr.msk.bf16.mxu1 %vm7684_vm2, %v10467_v5  ;;  %6581 = vmatpush3.bf16.msra.mxu0 %v977_v23 }
 0x2d0   :  { %6582 = vmatprep.subr.bf16.mxu0 %v978_v41 }
 0x2d3   :  { %6583 = vmatpush3.bf16.msra.mxu0 %v978_v41 }
 0x2d4   :  { %6614 = vmatprep.subr.bf16.mxu0 %v10467_v5 }
 0x382   :  { %v755_v37 = vpop.f32.mrb[16].mxu0 }
 0x383   :  { %v756_v31 = vadd.f32 %v755_v37, %v8058_v1  ;;  %v6548_v56 = vpop.f32.mrb[17].mxu0 }
 0x384   :  { %v758_v60 = vpop.f32.mrb[18].mxu0 }
 0x385   :  { %v784_v51 = vadd.f32 %v8279_v29, %v756_v31  ;;  %v759_v4 = vadd.f32 %v758_v60, %v8064_v8  ;;  %v6549_v9 = vpop.f32.mrb[19].mxu0 }
 0x387   :  { %v790_v10 = vmul.f32 0.5, %v784_v51  ;;  %v785_v15 = vadd.f32 %v8279_v29, %v759_v4 }
 0x389   :  { %v796_v19 = vmax.f32 %v790_v10, 0.0  ;;  %v791_v22 = vmul.f32 0.5, %v785_v15 }
 0x38b   :  { %802 = vst.msk [vmem:[#allocation2] sm:$0xff] %vm77_vm0, %v796_v19  ;;  %v797_v62 = vmax.f32 %v791_v22, 0.0 }
 0x38d   :  { %803 = vst.msk [vmem:[#allocation2 + $0x8] sm:$0xff] %vm77_vm0, %v797_v62  ;;  %v763_v12 = vpop.f32.mrb[20].mxu0 }
 0x38e   :  { %v764_v1 = vadd.f32 %v8056_v0, %v763_v12  ;;  %v6552_v28 = vpop.f32.mrb[21].mxu0 }
 0x38f   :  { %v766_v27 = vpop.f32.mrb[22].mxu0 }
 0x390   :  { %v786_v30 = vadd.f32 %v8279_v29, %v764_v1  ;;  %v767_v8 = vadd.f32 %v8060_v2, %v766_v27  ;;  %v6553_v32 = vpop.f32.mrb[23].mxu0 }
 0x391   :  { %v911_v33 = vpop.f32.mrb[16].mxu1 }
 0x392   :  { %v792_v34 = vmul.f32 0.5, %v786_v30  ;;  %v787_v58 = vadd.f32 %v8279_v29, %v767_v8  ;;  %v912_v45 = vadd.f32 %v911_v33, %v8144_v25  ;;  %v6566_v35 = vpop.f32.mrb[17].mxu1  ;;  %v958_v18 = vld [vmem:[#allocation2] sm:$0xff] }
 0x393   :  { %v914_v54 = vpop.f32.mrb[18].mxu1 }
 0x394   :  { %v798_v53 = vmax.f32 %v792_v34, 0.0  ;;  %v793_v39 = vmul.f32 0.5, %v787_v58  ;;  %v934_v55 = vadd.f32 %v912_v45, %v8279_v29  ;;  %v915_v0 = vadd.f32 %v914_v54, %v8156_v57  ;;  %v6567_v21 = vpop.f32.mrb[19].mxu1  ;;  %v959_v42 = vld [vmem:[#allocation2 + $0x8] sm:$0xff] }
 0x395   :  { %v771_v43 = vpop.f32.mrb[24].mxu0  ;;  %v969_v2 = vpack.c.bf16 %v959_v42, %v958_v18 }
 0x396   :  { %804 = vst.msk [vmem:[#allocation2 + $0x10] sm:$0xff] %vm77_vm0, %v798_v53  ;;  %v799_v23 = vmax.f32 %v793_v39, 0.0  ;;  %v940_v44 = vmul.f32 0.5, %v934_v55  ;;  %v935_v47 = vadd.f32 %v915_v0, %v8279_v29  ;;  %v772_v25 = vadd.f32 %v771_v43, %v8072_v13  ;;  %v6556_v41 = vpop.f32.mrb[25].mxu0 }
 0x397   :  { %v774_v49 = vpop.f32.mrb[26].mxu0  ;;  %6584 = vmatprep.mubr.msk.bf16.mxu0 %vm77_vm0, %v969_v2 }
 0x398   :  { %805 = vst.msk [vmem:[#allocation2 + $0x18] sm:$0xff] %vm77_vm0, %v799_v23  ;;  %v946_v57 = vmax.f32 %v940_v44, 0.0  ;;  %v941_v50 = vmul.f32 0.5, %v935_v47  ;;  %v788_v37 = vadd.f32 %v8279_v29, %v772_v25  ;;  %v775_v31 = vadd.f32 %v774_v49, %v8076_v16  ;;  %v6557_v56 = vpop.f32.mrb[27].mxu0 }
 0x399   :  { %v919_v60 = vpop.f32.mrb[20].mxu1 }
 0x39a   :  { %952 = vst.msk [vmem:[#allocation2 + $0x2b] sm:$0xff] %vm77_vm0, %v946_v57  ;;  %v947_v51 = vmax.f32 %v941_v50, 0.0  ;;  %v794_v4 = vmul.f32 0.5, %v788_v37  ;;  %v789_v13 = vadd.f32 %v8279_v29, %v775_v31  ;;  %v920_v9 = vadd.f32 %v919_v60, %v8159_v38  ;;  %v6570_v10 = vpop.f32.mrb[21].mxu1 }
 0x39b   :  { %v922_v15 = vpop.f32.mrb[22].mxu1 }
 0x39c   :  { %953 = vst.msk [vmem:[#allocation2 + $0x33] sm:$0xff] %vm77_vm0, %v947_v51  ;;  %v800_v19 = vmax.f32 %v794_v4, 0.0  ;;  %v795_v22 = vmul.f32 0.5, %v789_v13  ;;  %v936_v62 = vadd.f32 %v920_v9, %v8279_v29  ;;  %v923_v16 = vadd.f32 %v922_v15, %v8177_v59  ;;  %v6571_v12 = vpop.f32.mrb[23].mxu1 }
 0x39d   :  { %v960_v30 = vld [vmem:[#allocation2 + $0x10] sm:$0xff] }
 0x39e   :  { %806 = vst.msk [vmem:[#allocation2 + $0x20] sm:$0xff] %vm77_vm0, %v800_v19  ;;  %v801_v1 = vmax.f32 %v795_v22, 0.0  ;;  %v942_v28 = vmul.f32 0.5, %v936_v62  ;;  %v937_v27 = vadd.f32 %v923_v16, %v8279_v29 }
 0x39f   :  { %v961_v8 = vld [vmem:[#allocation2 + $0x18] sm:$0xff] }
 0x3a0   :  { %807 = vst.msk [vmem:[#allocation2 + $0x28] sm:$0x7] %vm83_vm1, %v801_v1  ;;  %v948_v38 = vmax.f32 %v942_v28, 0.0  ;;  %v943_v32 = vmul.f32 0.5, %v937_v27  ;;  %v970_v33 = vpack.c.bf16 %v961_v8, %v960_v30 }
 0x3a1   :  { %v927_v34 = vpop.f32.mrb[24].mxu1 }
 0x3a2   :  { %954 = vst.msk [vmem:[#allocation2 + $0x3b] sm:$0xff] %vm77_vm0, %v948_v38  ;;  %v949_v58 = vmax.f32 %v943_v32, 0.0  ;;  %v928_v59 = vadd.f32 %v927_v34, %v8182_v52  ;;  %v6574_v45 = vpop.f32.mrb[25].mxu1  ;;  %6585 = vmatmul.mubr.msk.bf16.vlgmr.msra.gmra.mrb[28].mxu0 %vm77_vm0, %v970_v33 }
 0x3a3   :  { %v930_v35 = vpop.f32.mrb[26].mxu1  ;;  %v964_v2 = vld [vmem:[#allocation2 + $0x30] sm:$0xff] }
 0x3a4   :  { %955 = vst.msk [vmem:[#allocation2 + $0x43] sm:$0xff] %vm77_vm0, %v949_v58  ;;  %v938_v54 = vadd.f32 %v928_v59, %v8279_v29  ;;  %v931_v53 = vadd.f32 %v930_v35, %v857_v20  ;;  %v6575_v39 = vpop.f32.mrb[27].mxu1 }
 0x3a5   :  { %v962_v21 = vld [vmem:[#allocation2 + $0x20] sm:$0xff] }
 0x3a6   :  { %v944_v55 = vmul.f32 0.5, %v938_v54  ;;  %v939_v0 = vadd.f32 %v931_v53, %v8279_v29 }
 0x3a7   :  { %v963_v18 = vld [vmem:[#allocation2 + $0x28] sm:$0xff] }
 0x3a8   :  { %v950_v42 = vmax.f32 %v944_v55, 0.0  ;;  %v945_v43 = vmul.f32 0.5, %v939_v0  ;;  %v971_v52 = vpack.c.bf16 %v963_v18, %v962_v21 }
 0x3a9   :  { %v965_v23 = vld [vmem:[#allocation2 + $0x38] sm:$0xff] }
 0x3aa   :  { %956 = vst.msk [vmem:[#allocation2 + $0x4b] sm:$0xff] %vm77_vm0, %v950_v42  ;;  %v951_v44 = vmax.f32 %v945_v43, 0.0  ;;  %6588 = vmatprep.mubr.msk.bf16.mxu0 %vm77_vm0, %v971_v52  ;;  %v972_v47 = vpack.c.bf16 %v965_v23, %v964_v2 }
 0x3ab   :  { %v966_v26 = vld [vmem:[#allocation2 + $0x40] sm:$0xff] }
 0x3ac   :  { %957 = vst.msk [vmem:[#allocation2 + $0x53] sm:$0x7] %vm83_vm1, %v951_v44  ;;  %6589 = vmatmul.mubr.msk.bf16.gmra.mrb[32].mxu0 %vm77_vm0, %v972_v47 }
 0x3b1   :  { %v967_v20 = vld [vmem:[#allocation2 + $0x48] sm:$0xff] }
 0x3b2   :  { %v973_v29 = vpack.c.bf16 %v967_v20, %v966_v26 }
 0x3b3   :  { %v968_v25 = vld [vmem:[#allocation2 + $0x50] sm:$0x3f] }
 0x3b4   :  { %6592 = vmatprep.mubr.msk.bf16.mxu0 %vm77_vm0, %v973_v29  ;;  %v974_v41 = vpack.c.bf16 %v968_v25, %v968_v25 }
 0x3b6   :  { %6593 = vmatmul.mubr.msk.bf16.gmra.mrb[36].mxu0 %vm77_vm0, %v974_v41 }
 0x3b7   :  { %6620 = vmatprep.mubr.msk.bf16.mxu0 %vm7684_vm2, %v10467_v5 }
 0x475   :  { %v8326_v49 = vpop.f32.mrb[28].mxu0 }
 0x476   :  { %v8328_v57 = vpop.f32.mrb[29].mxu0 }
 0x477   :  { %v8330_v50 = vpop.f32.mrb[30].mxu0 }
 0x478   :  { %v1079_v37 = vpack.c.bf16 %v8330_v50, %v8326_v49  ;;  %v8334_v31 = vpop.f32.mrb[31].mxu0 }
 0x479   :  { %v1078_v56 = vpack.c.bf16 %v8334_v31, %v8328_v57 }
 0x47b   :  { %6597 = vmatpush3.bf16.msra.mxu1 %v1078_v56 }
 0x47c   :  { %6598 = vmatprep.subr.bf16.mxu1 %v10467_v5 }
 0x47f   :  { %v6590_v60 = vpop.f32.mrb[32].mxu0  ;;  %6599 = vmatpush3.bf16.msra.mxu1 %v1079_v37 }
 0x480   :  { %v8339_v51 = vpop.f32.mrb[33].mxu0  ;;  %6600 = vmatprep.subr.bf16.mxu1 %v10467_v5  ;;  %v1209_v13 = vrot.slane %v6590_v60, 3 }
 0x481   :  { %v6591_v4 = vpop.f32.mrb[34].mxu0 }
 0x482   :  { %v1211_v9 = vrot.slane %v6591_v4, 3  ;;  %v8342_v10 = vpop.f32.mrb[35].mxu0 }
 0x483   :  { %v1080_v15 = vpack.c.bf16 %v8342_v10, %v8339_v51  ;;  %v1171_v19 = vpack.c.bf16 %v6590_v60, %v8342_v10  ;;  %v1208_v22 = vrot.slane %v8342_v10, 3 }
 0x484   :  { %v8349_v62 = vsel %vm525_vm7, %v1209_v13, %v1211_v9 }
 0x485   :  { %v1082_v16 = vand.u32 %v1080_v15, %v8141_v46  ;;  %v8353_v12 = vsel %vm525_vm7, %v1208_v22, %v1209_v13  ;;  %v1175_v1 = vshrl.u32 %v1171_v19, 16  ;;  %v1178_v28 = vshll.u32 %v1171_v19, 16 }
 0x487   :  { %6601 = vmatpush3.bf16.msra.mxu1 %v1082_v16  ;;  %v1177_v33 = vrot.slane %v1175_v1, 1  ;;  %v1180_v34 = vrot.slane %v1178_v28, 2 }
 0x489   :  { %v8355_v27 = vpop.f32.mrb[36].mxu0  ;;  %v1181_v23 = vor.u32 %v1180_v34, %v1177_v33 }
 0x48a   :  { %v1063_v30 = vpop.f32.mrb[37].mxu0  ;;  %6603 = vmatmul.mubr.msk.bf16.vlgmr.msra.gmra.mrb[28].mxu1 %vm10461_vm5, %v8206_v14  ;;  %v1217_v53 = vrot.slane %v8355_v27, 3 }
 0x48b   :  { %v1172_v8 = vpack.c.bf16 %v1063_v30, %v6591_v4  ;;  %v1213_v38 = vrot.slane %v1063_v30, 3  ;;  %v6595_v32 = vpop.f32.mrb[38].mxu0  ;;  %6606 = vmatprep.mubr.msk.bf16.mxu1 %vm7684_vm2, %v10467_v5 }
 0x48c   :  { %v1066_v58 = vpop.f32.mrb[39].mxu0 }
 0x48d   :  { %v1183_v59 = vshrl.u32 %v1172_v8, 16  ;;  %v1186_v45 = vshll.u32 %v1172_v8, 16  ;;  %v1173_v35 = vpack.c.bf16 %v8355_v27, %v1066_v58  ;;  %v1215_v54 = vrot.slane %v1066_v58, 3  ;;  %v8483_v27 = vld [vmem:[%s10455_s10] sm:$0xff] }
 0x48e   :  { %v8364_v39 = vsel %vm525_vm7, %v1211_v9, %v1213_v38 }
 0x48f   :  { %v1185_v14 = vrot.slane %v1183_v59, 1  ;;  %v1188_v55 = vrot.slane %v1186_v45, 2  ;;  %v1192_v0 = vshrl.u32 %v1173_v35, 16  ;;  %v1195_v21 = vshll.u32 %v1173_v35, 16 }
 0x490   :  { %v8367_v18 = vsel %vm525_vm7, %v1213_v38, %v1215_v54  ;;  %v8372_v42 = vsel %vm525_vm7, %v1215_v54, %v1217_v53 }
 0x491   :  { %v1189_v43 = vor.u32 %v1188_v55, %v1185_v14  ;;  %v1194_v52 = vrot.slane %v1192_v0, 1  ;;  %v1197_v2 = vrot.slane %v1195_v21, 2 }
 0x492   :  { %6607 = vmatmul.mubr.msk.bf16.gmra.mrb[32].mxu1 %vm10461_vm5, %v8214_v63  ;;  %v10465_v63 = vmov 0.0|0.0  }
 0x493   :  { %v1198_v44 = vor.u32 %v1197_v2, %v1194_v52  ;;  %v1190_v47 = vsel %vm10462_vm3, %v1181_v23, %v1189_v43  ;;  %6610 = vmatprep.mubr.msk.bf16.mxu1 %vm7684_vm2, %v10467_v5  ;;  %7336 = vmatprep.subr.bf16.mxu1 %v10465_v63 }
 0x494   :  { %6615 = vmatpush3.bf16.msra.mxu0 %v1190_v47 }
 0x495   :  { %6616 = vmatprep.subr.bf16.mxu0 %v10467_v5  ;;  %v1199_v26 = vsel %vm10462_vm3, %v1189_v43, %v1198_v44  ;;  %v1226_v20 = vand.u32 %v1198_v44, %v8141_v46 }
 0x498   :  { %6617 = vmatpush3.bf16.msra.mxu0 %v1199_v26 }
 0x499   :  { %6618 = vmatprep.subr.bf16.mxu0 %v10467_v5 }
 0x49a   :  { %6611 = vmatmul.mubr.msk.bf16.gmra.mrb[36].mxu1 %vm10461_vm5, %v8230_v11 }
 0x49b   :  { %6650 = vmatprep.mubr.msk.f32.mxu1 %vm7684_vm2, %v10467_v5 }
 0x49c   :  { %6619 = vmatpush3.bf16.msra.mxu0 %v1226_v20 }
 0x49d   :  { %7240 = vmatprep.subr.bf16.mxu0 %v10465_v63 }
 0x49f   :  { %6621 = vmatmul.mubr.msk.bf16.vlgmr.msra.gmra.mrb[40].mxu0 %vm10461_vm5, %v8222_v40  ;;  %v115_v40 = vld [vmem:[%s10452_s7] sm:$0x1] }
 0x4a0   :  { %6624 = vmatprep.mubr.msk.bf16.mxu0 %vm7684_vm2, %v10467_v5  ;;  %v1077_v11 = vmul.f32 2.0, %v115_v40 }
 0x4a7   :  { %6625 = vmatmul.mubr.msk.bf16.gmra.mrb[44].mxu0 %vm10461_vm5, %v8236_v61  ;;  %v8405_v61 = vrot.slane %v1077_v11, %v7955_v48 }
 0x4a8   :  { %6628 = vmatprep.mubr.msk.bf16.mxu0 %vm7684_vm2, %v10467_v5 }
 0x4af   :  { %6629 = vmatmul.mubr.msk.bf16.gmra.mrb[48].mxu0 %vm10461_vm5, %v8244_v36 }
 0x4b0   :  { %6644 = vmatprep.mubr.msk.f32.mxu0 %vm7684_vm2, %v10467_v5 }
 0x55d   :  { %v1118_v29 = vpop.f32.mrb[28].mxu1 }
 0x55e   :  { %v1119_v25 = vadd.f32 %v1118_v29, %v8328_v57  ;;  %v6604_v36 = vpop.f32.mrb[29].mxu1 }
 0x55f   :  { %v1121_v41 = vpop.f32.mrb[30].mxu1 }
 0x560   :  { %v1147_v37 = vadd.f32 %v8405_v61, %v1119_v25  ;;  %v1122_v56 = vadd.f32 %v1121_v41, %v8334_v31  ;;  %v6605_v60 = vpop.f32.mrb[31].mxu1 }
 0x562   :  { %v1153_v4 = vmul.f32 0.5, %v1147_v37  ;;  %v1148_v13 = vadd.f32 %v8405_v61, %v1122_v56 }
 0x564   :  { %v1159_v9 = vmax.f32 %v1153_v4, 0.0  ;;  %v1154_v15 = vmul.f32 0.5, %v1148_v13 }
 0x565   :  { %v1126_v19 = vpop.f32.mrb[32].mxu1 }
 0x566   :  { %1165 = vst.msk [vmem:[#allocation2] sm:$0xff] %vm77_vm0, %v1159_v9  ;;  %v1160_v22 = vmax.f32 %v1154_v15, 0.0  ;;  %v1127_v16 = vadd.f32 %v8326_v49, %v1126_v19  ;;  %v6608_v1 = vpop.f32.mrb[33].mxu1 }
 0x567   :  { %v1129_v57 = vpop.f32.mrb[34].mxu1 }
 0x568   :  { %1166 = vst.msk [vmem:[#allocation2 + $0x8] sm:$0xff] %vm77_vm0, %v1160_v22  ;;  %v1149_v28 = vadd.f32 %v8405_v61, %v1127_v16  ;;  %v1130_v31 = vadd.f32 %v8330_v50, %v1129_v57  ;;  %v6609_v30 = vpop.f32.mrb[35].mxu1  ;;  %v3163_v50 = vld [vmem:[%s10457_s12 + $0x20] sm:$0xff] }
 0x56a   :  { %v1155_v8 = vmul.f32 0.5, %v1149_v28  ;;  %v1150_v38 = vadd.f32 %v8405_v61, %v1130_v31 }
 0x56c   :  { %v1161_v32 = vmax.f32 %v1155_v8, 0.0  ;;  %v1156_v33 = vmul.f32 0.5, %v1150_v38 }
 0x56d   :  { %v1134_v34 = vpop.f32.mrb[36].mxu1  ;;  %v1309_v35 = vld [vmem:[#allocation2] sm:$0xff] }
 0x56e   :  { %1167 = vst.msk [vmem:[#allocation2 + $0x10] sm:$0xff] %vm77_vm0, %v1161_v32  ;;  %v1162_v58 = vmax.f32 %v1156_v33, 0.0  ;;  %v1135_v49 = vadd.f32 %v1134_v34, %v8339_v51  ;;  %v6612_v59 = vpop.f32.mrb[37].mxu1 }
 0x56f   :  { %v1137_v45 = vpop.f32.mrb[38].mxu1  ;;  %v1310_v54 = vld [vmem:[#allocation2 + $0x8] sm:$0xff] }
 0x570   :  { %1168 = vst.msk [vmem:[#allocation2 + $0x18] sm:$0xff] %vm77_vm0, %v1162_v58  ;;  %v1151_v14 = vadd.f32 %v8405_v61, %v1135_v49  ;;  %v1138_v55 = vadd.f32 %v1137_v45, %v8342_v10  ;;  %v6613_v0 = vpop.f32.mrb[39].mxu1  ;;  %v8428_v21 = vpack.c.bf16 %v1310_v54, %v1309_v35 }
 0x572   :  { %v1157_v51 = vmul.f32 0.5, %v1151_v14  ;;  %v1152_v43 = vadd.f32 %v8405_v61, %v1138_v55  ;;  %v1262_v52 = vpop.f32.mrb[40].mxu0  ;;  %7243 = vmatpush3.bf16.xpose.msk.msra.mxu0 %vm8421_vm10, %v8428_v21  ;;  %7339 = vmatpush3.bf16.xpose.msk.msra.mxu1 %vm8421_vm10, %v8428_v21 }
 0x573   :  { %v1263_v2 = vadd.f32 %v1262_v52, %v8353_v12  ;;  %v6622_v23 = vpop.f32.mrb[41].mxu0  ;;  %7244 = vmatprep.subr.bf16.mxu0 %v10465_v63  ;;  %7337 = vmatprep.subr.bf16.mxu1 %v10465_v63  ;;  %v8506_v52 = vld [vmem:[%s10455_s10 + $0x8] sm:$0xff] }
 0x574   :  { %v1163_v10 = vmax.f32 %v1157_v51, 0.0  ;;  %v1158_v44 = vmul.f32 0.5, %v1152_v43  ;;  %v1265_v47 = vpop.f32.mrb[42].mxu0 }
 0x575   :  { %v1285_v26 = vadd.f32 %v1263_v2, %v8405_v61  ;;  %v1266_v20 = vadd.f32 %v1265_v47, %v8349_v62  ;;  %v6623_v40 = vpop.f32.mrb[43].mxu0  ;;  %v1311_v12 = vld [vmem:[#allocation2 + $0x10] sm:$0xff]  ;;  %v8511_v2 = vld [vmem:[%s10455_s10 + $0x18] sm:$0xff] }
 0x576   :  { %1169 = vst.msk [vmem:[#allocation2 + $0x20] sm:$0xff] %vm77_vm0, %v1163_v10  ;;  %v1164_v11 = vmax.f32 %v1158_v44, 0.0 }
 0x577   :  { %v1291_v29 = vmul.f32 0.5, %v1285_v26  ;;  %v1286_v25 = vadd.f32 %v1266_v20, %v8405_v61  ;;  %v1312_v36 = vld [vmem:[#allocation2 + $0x18] sm:$0xff]  ;;  %v8529_v20 = vld [vmem:[%s10455_s10 + $0x20] sm:$0xf] }
 0x578   :  { %1170 = vst.msk [vmem:[#allocation2 + $0x28] sm:$0x7] %vm83_vm1, %v1164_v11  ;;  %v8445_v41 = vpack.c.bf16 %v1312_v36, %v1311_v12 }
 0x579   :  { %v1297_v37 = vmax.f32 %v1291_v29, 0.0  ;;  %v1292_v56 = vmul.f32 0.5, %v1286_v25 }
 0x57a   :  { %v1270_v60 = vpop.f32.mrb[44].mxu0  ;;  %7247 = vmatpush3.bf16.xpose.msk.msra.mxu0 %vm8421_vm10, %v8445_v41  ;;  %7340 = vmatpush3.bf16.xpose.msk.msra.mxu1 %vm8421_vm10, %v8445_v41 }
 0x57b   :  { %1303 = vst.msk [vmem:[#allocation2 + $0x2b] sm:$0xff] %vm77_vm0, %v1297_v37  ;;  %v1298_v62 = vmax.f32 %v1292_v56, 0.0  ;;  %v1271_v4 = vadd.f32 %v1270_v60, %v8364_v39  ;;  %v6626_v13 = vpop.f32.mrb[45].mxu0  ;;  %7248 = vmatprep.subr.bf16.mxu0 %v10465_v63  ;;  %7338 = vmatprep.subr.bf16.mxu1 %v10465_v63 }
 0x57c   :  { %v1273_v9 = vpop.f32.mrb[46].mxu0 }
 0x57d   :  { %1304 = vst.msk [vmem:[#allocation2 + $0x33] sm:$0xff] %vm77_vm0, %v1298_v62  ;;  %v1287_v15 = vadd.f32 %v1271_v4, %v8405_v61  ;;  %v1274_v19 = vadd.f32 %v1273_v9, %v8367_v18  ;;  %v6627_v22 = vpop.f32.mrb[47].mxu0  ;;  %v1313_v39 = vld [vmem:[#allocation2 + $0x20] sm:$0xff] }
 0x57e   :  { %v8555_v22 = vpop.permute.xlu0 %1342 }
 0x57f   :  { %v1293_v16 = vmul.f32 0.5, %v1287_v15  ;;  %v1288_v1 = vadd.f32 %v1274_v19, %v8405_v61  ;;  %v8553_v19 = vpop.permute.xlu1 %1347 }
 0x581   :  { %v1299_v57 = vmax.f32 %v1293_v16, 0.0  ;;  %v1294_v28 = vmul.f32 0.5, %v1288_v1 }
 0x582   :  { %v1278_v31 = vpop.f32.mrb[48].mxu0  ;;  %v8461_v30 = vld [vmem:[#allocation2 + $0x28] sm:$0xff]  ;;  %v8559_v1 = vpop.permute.xlu0 %1332 }
 0x583   :  { %1305 = vst.msk [vmem:[#allocation2 + $0x3b] sm:$0xff] %vm77_vm0, %v1299_v57  ;;  %v1300_v8 = vmax.f32 %v1294_v28, 0.0  ;;  %v1279_v38 = vadd.f32 %v1278_v31, %v8372_v42  ;;  %v6630_v32 = vpop.f32.mrb[49].mxu0  ;;  %v7249_v33 = vpack.c.bf16 %v8461_v30, %v1313_v39  ;;  %v8557_v16 = vpop.permute.xlu1 %1352 }
 0x584   :  { %v1281_v34 = vpop.f32.mrb[50].mxu0  ;;  %v8466_v18 = vld [vmem:[#allocation2 + $0x30] sm:$0xff] }
 0x585   :  { %1306 = vst.msk [vmem:[#allocation2 + $0x43] sm:$0xff] %vm77_vm0, %v1300_v8  ;;  %v1289_v58 = vadd.f32 %v1279_v38, %v8405_v61  ;;  %v1282_v49 = vadd.f32 %v1281_v34, %v1217_v53  ;;  %v6631_v59 = vpop.f32.mrb[51].mxu0  ;;  %7251 = vmatpush3.bf16.xpose.msk.msra.mxu0 %vm8421_vm10, %v7249_v33  ;;  %7341 = vmatpush3.bf16.xpose.msk.msra.mxu1 %vm8421_vm10, %v7249_v33  ;;  %v8488_v53 = vld [vmem:[%s10455_s10 + $0x10] sm:$0xff] }
 0x586   :  { %6659 = vmatprep.subr.bf16.mxu0 %v8428_v21  ;;  %v2004_v42 = vpack.c.bf16 %v8466_v18, %v8461_v30  ;;  %v1524_v26 = vand.u32 %v7249_v33, %v8141_v46 }
 0x587   :  { %v1295_v45 = vmul.f32 0.5, %v1289_v58  ;;  %v1290_v35 = vadd.f32 %v1282_v49, %v8405_v61  ;;  %v8567_v32 = vpop.permute.xlu1 %1337 }
 0x588   :  { %v2008_v0 = vshrl.u32 %v2004_v42, 16  ;;  %v2011_v51 = vshll.u32 %v2004_v42, 16 }
 0x589   :  { %v1301_v54 = vmax.f32 %v1295_v45, 0.0  ;;  %v1296_v14 = vmul.f32 0.5, %v1290_v35 }
 0x58a   :  { %v8495_v61 = vld [vmem:[#allocation2 + $0x38] sm:$0xff]  ;;  %v2013_v10 = vrot.slane %v2011_v51, 2 }
 0x58b   :  { %1307 = vst.msk [vmem:[#allocation2 + $0x4b] sm:$0xff] %vm77_vm0, %v1301_v54  ;;  %v1302_v55 = vmax.f32 %v1296_v14, 0.0 }
 0x58c   :  { %6645 = vmatmul.mubr.msk.f32.vlgmr.msra.gmra.mrb[52].mxu0 %vm77_vm0, %v8483_v27  ;;  %6651 = vmatmul.mubr.msk.f32.vlgmr.msra.gmra.mrb[40].mxu1 %vm77_vm0, %v8488_v53  ;;  %v8497_v43 = vld [vmem:[#allocation2 + $0x40] sm:$0xff] }
 0x58d   :  { %1308 = vst.msk [vmem:[#allocation2 + $0x53] sm:$0x7] %vm83_vm1, %v1302_v55  ;;  %6660 = vmatpush3.bf16.msra.mxu0 %v8428_v21  ;;  %6647 = vmatprep.mubr.msk.f32.mxu0 %vm7684_vm2, %v10467_v5  ;;  %v2005_v23 = vpack.c.bf16 %v8497_v43, %v8495_v61  ;;  %v2010_v21 = vrot.slane %v2008_v0, 1 }
 0x58e   :  { %6661 = vmatprep.subr.bf16.mxu0 %v8445_v41  ;;  %6653 = vmatprep.mubr.msk.f32.mxu1 %vm7684_vm2, %v10467_v5 }
 0x58f   :  { %v2016_v44 = vshrl.u32 %v2005_v23, 16  ;;  %v2019_v47 = vshll.u32 %v2005_v23, 16  ;;  %v2014_v29 = vor.u32 %v2013_v10, %v2010_v21 }
 0x590   :  { %6648 = vmatmul.mubr.msk.f32.gmra.mrb[54].mxu0 %vm77_vm0, %v8506_v52  ;;  %6654 = vmatmul.mubr.msk.f32.gmra.mrb[42].mxu1 %vm77_vm0, %v8511_v2 }
 0x591   :  { %6662 = vmatpush3.bf16.msra.mxu0 %v8445_v41  ;;  %6656 = vmatprep.mubr.msk.f32.mxu1 %vm7684_vm2, %v10467_v5  ;;  %v2018_v40 = vrot.slane %v2016_v44, 1  ;;  %v2021_v11 = vrot.slane %v2019_v47, 2  ;;  %v7647_v41 = vld [vmem:[%s10446_s1] sm:$0xff] }
 0x592   :  { %6663 = vmatprep.subr.bf16.mxu0 %v1524_v26  ;;  %v8533_v12 = vld [vmem:[#allocation2 + $0x48] sm:$0xff] }
 0x593   :  { %v2022_v25 = vor.u32 %v2021_v11, %v2018_v40 }
 0x594   :  { %6657 = vmatmul.mubr.msk.f32.gmra.mrb[44].mxu1 %vm77_vm0, %v8529_v20  ;;  %v8535_v36 = vld [vmem:[#allocation2 + $0x50] sm:$0x3f] }
 0x595   :  { %6664 = vmatpush3.bf16.msra.mxu0 %v1524_v26  ;;  %6675 = vmatprep.mubr.msk.f32.mxu1 %vm10461_vm5, %v7647_v41  ;;  %v8542_v37 = vsel %vm10462_vm3, %v2014_v29, %v2022_v25  ;;  %v2006_v56 = vpack.c.bf16 %v8535_v36, %v8533_v12 }
 0x596   :  { %7258 = vmatprep.subr.bf16.mxu0 %v10465_v63 }
 0x597   :  { %v2025_v60 = vshrl.u32 %v2006_v56, 16  ;;  %v2028_v62 = vshll.u32 %v2006_v56, 16 }
 0x599   :  { %v2027_v4 = vrot.slane %v2025_v60, 1  ;;  %v2030_v13 = vrot.slane %v2028_v62, 2 }
 0x59b   :  { %v8547_v9 = vor.u32 %v2030_v13, %v2027_v4 }
 0x59d   :  { %v8551_v15 = vsel %vm10462_vm3, %v2022_v25, %v8547_v9 }
 0x65f   :  { %v1454_v57 = vpop.f32.mrb[52].mxu0  ;;  %v1464_v28 = vpop.f32.mrb[40].mxu1 }
 0x660   :  { %v8562_v31 = vadd.f32 %v1454_v57, %v8559_v1  ;;  %v8565_v39 = vadd.f32 %v1464_v28, %v8555_v22  ;;  %v6652_v8 = vpop.f32.mrb[41].mxu1  ;;  %v6646_v38 = vpop.f32.mrb[53].mxu0 }
 0x661   :  { %v7655_v38 = vld [vmem:[%s10446_s1 + $0x40] sm:$0xff] }
 0x662   :  { %v5944_v33 = vmul.f32 -1000.0, %v8565_v39  ;;  %v1478_v34 = vsel %vm10461_vm5, %v8562_v31, -inf  ;;  %v1485_v55 = vsel %vm1484_vm11, %v8565_v39, -inf }
 0x663   :  { %v1469_v58 = vpop.f32.mrb[42].mxu1  ;;  %1479 = vmax.xlane.f32.xlu0 %v1478_v34  ;;  %v1459_v49 = vpop.f32.mrb[54].mxu0  ;;  %v1859_v34 = vrot.slane %v8495_v61, 3  ;;  %v1861_v61 = vrot.slane %v8497_v43, 3  ;;  %v7652_v43 = vld [vmem:[%s10446_s1 + $0x28] sm:$0x7] }
 0x664   :  { %v1580_v59 = vmul.f32 1.442695, %v5944_v33  ;;  %v1470_v42 = vadd.f32 %v1469_v58, %v8553_v19  ;;  %v8574_v45 = vadd.f32 %v1459_v49, %v8567_v32  ;;  %v6655_v35 = vpop.f32.mrb[43].mxu1  ;;  %v6649_v54 = vpop.f32.mrb[55].mxu0  ;;  %v1857_v58 = vrot.slane %v8466_v18, 3 }
 0x665   :  { %v1856_v49 = vrot.slane %v8461_v30, 3  ;;  %v7648_v54 = vld [vmem:[%s10446_s1 + $0x8] sm:$0xff]  ;;  %v1863_v18 = vrot.slane %v8533_v12, 3  ;;  %v7649_v30 = vld [vmem:[%s10446_s1 + $0x10] sm:$0xff]  ;;  %v7651_v12 = vld [vmem:[%s10446_s1 + $0x20] sm:$0xff] }
 0x666   :  { %v5945_v14 = vmul.f32 -1000.0, %v1470_v42  ;;  %v1481_v0 = vsel %vm10461_vm5, %v8574_v45, -inf  ;;  %7409 = vpow2.f32 %v1580_v59  ;;  %v1860_v59 = vsel %vm525_vm7, %v1857_v58, %v1859_v34 }
 0x667   :  { %v1474_v51 = vpop.f32.mrb[44].mxu1  ;;  %1486 = vmax.xlane.f32.xlu0 %v1485_v55  ;;  %1482 = vmax.xlane.f32.xlu1 %v1481_v0  ;;  %v1858_v42 = vsel %vm525_vm7, %v1856_v49, %v1857_v58  ;;  %v7650_v55 = vld [vmem:[%s10446_s1 + $0x18] sm:$0xff]  ;;  %v1862_v0 = vsel %vm525_vm7, %v1859_v34, %v1861_v61 }
 0x668   :  { %v1582_v23 = vmul.f32 1.442695, %v5945_v14  ;;  %v1475_v21 = vadd.f32 %v1474_v51, %v8557_v16  ;;  %v6658_v10 = vpop.f32.mrb[45].mxu1  ;;  %v7269_v35 = vpack.c.bf16 %v1860_v59, %v1858_v42  ;;  %v1864_v14 = vsel %vm525_vm7, %v1861_v61, %v1863_v18 }
 0x669   :  { %v7273_v51 = vpack.c.bf16 %v1864_v14, %v1862_v0 }
 0x66a   :  { %7411 = vpow2.f32 %v1582_v23  ;;  %v5946_v44 = vmul.f32 -1000.0, %v1475_v21  ;;  %v1865_v23 = vrot.slane %v8535_v36, 3 }
 0x66c   :  { %v1584_v47 = vmul.f32 1.442695, %v5946_v44  ;;  %v1866_v21 = vsel %vm525_vm7, %v1863_v18, %v1865_v23 }
 0x66d   :  { %v7277_v10 = vpack.c.bf16 %v1865_v23, %v1866_v21 }
 0x66e   :  { %7413 = vpow2.f32 %v1584_v47 }
 0x670   :  { %v7410_v26 = vpop.eup %7409 }
 0x671   :  { %v1586_v11 = vadd.f32 1.0, %v7410_v26 }
 0x674   :  { %v7412_v40 = vpop.eup %7411 }
 0x675   :  { %v1587_v29 = vadd.f32 1.0, %v7412_v40 }
 0x677   :  { %7415 = vrcp.f32 %v1587_v29 }
 0x678   :  { %v7414_v25 = vpop.eup %7413  ;;  %7417 = vrcp.f32 %v1586_v11 }
 0x679   :  { %v1588_v41 = vadd.f32 1.0, %v7414_v25 }
 0x67b   :  { %7419 = vrcp.f32 %v1588_v41 }
 0x681   :  { %v8581_v56 = vpop.eup %7415 }
 0x682   :  { %v8583_v60 = vpop.eup %7417  ;;  %v1599_v62 = vrot.slane %v8581_v56, 2 }
 0x683   :  { %v1598_v57 = vrot.slane %v8583_v60, 2 }
 0x685   :  { %v8586_v4 = vpop.eup %7419  ;;  %v8593_v28 = vsel %vm715_vm9, %v1598_v57, %v1599_v62 }
 0x686   :  { %v8589_v13 = vrot.slane %v8586_v4, 2 }
 0x688   :  { %v8597_v8 = vsel %vm715_vm9, %v1599_v62, %v8589_v13 }
 0x689   :  { %v7252_v33 = vpack.c.bf16 %v8597_v8, %v8593_v28 }
 0x68b   :  { %7254 = vmatprep.subr.msk.bf16.mxu1 %vm8601_vm12, %v7252_v33 }
 0x68c   :  { %7257 = vmatpush3.bf16.xpose.msk.msra.mxu1 %vm8601_vm12, %v7252_v33 }
 0x68d   :  { %6673 = vmatprep.subr.msk.mxu1 %vm10461_vm5, %v8589_v13 }
 0x694   :  { %6674 = vmatpush3.xpose.msk.msra.mxu1 %vm10461_vm5, %v8589_v13 }
 0x695   :  { %7268 = vmatprep.subr.bf16.mxu1 %v10465_v63 }
 0x697   :  { %6676 = vmatmul.mubr.msk.f32.vlgmr.msra.gmra.mrb[46].mxu1 %vm10461_vm5, %v7648_v54 }
 0x698   :  { %7271 = vmatpush3.bf16.xpose.msk.msra.mxu1 %vm8421_vm10, %v7269_v35  ;;  %6678 = vmatprep.mubr.msk.f32.mxu1 %vm10461_vm5, %v7649_v30 }
 0x699   :  { %7272 = vmatprep.subr.bf16.mxu1 %v10465_v63 }
 0x69b   :  { %6679 = vmatmul.mubr.msk.f32.gmra.mrb[48].mxu1 %vm10461_vm5, %v7650_v55 }
 0x69c   :  { %6681 = vmatprep.mubr.msk.f32.mxu1 %vm10461_vm5, %v7651_v12 }
 0x69f   :  { %6682 = vmatmul.mubr.msk.f32.gmra.mrb[50].mxu1 %vm10461_vm5, %v7652_v43 }
 0x6a0   :  { %7275 = vmatpush3.bf16.xpose.msk.msra.mxu1 %vm8421_vm10, %v7273_v51  ;;  %6717 = vmatprep.mubr.msk.f32.mxu1 %vm7684_vm2, %v10467_v5 }
 0x6a1   :  { %7276 = vmatprep.subr.bf16.mxu1 %v10465_v63 }
 0x6a8   :  { %7279 = vmatpush3.bf16.xpose.msk.msra.mxu1 %vm8421_vm10, %v7277_v10 }
 0x6a9   :  { %6778 = vmatprep.subr.bf16.mxu1 %v10467_v5 }
 0x6af   :  { %6718 = vmatmul.mubr.msk.f32.vlgmr.msra.gmra.mrb[52].mxu1 %vm77_vm0, %v8483_v27 }
 0x6b0   :  { %6720 = vmatprep.mubr.msk.f32.mxu1 %vm7684_vm2, %v10467_v5  ;;  %6779 = vmatpush3.bf16.msra.mxu1 %v7780_v3 }
 0x6b1   :  { %6780 = vmatprep.subr.bf16.mxu1 %v10467_v5 }
 0x6b3   :  { %6721 = vmatmul.mubr.msk.f32.gmra.mrb[54].mxu1 %vm77_vm0, %v8506_v52 }
 0x6b4   :  { %6723 = vmatprep.mubr.msk.f32.mxu1 %vm7684_vm2, %v10467_v5  ;;  %6781 = vmatpush3.bf16.msra.mxu1 %v7786_v6 }
 0x6b5   :  { %6782 = vmatprep.subr.bf16.mxu1 %v10467_v5 }
 0x6b7   :  { %6724 = vmatmul.mubr.msk.f32.gmra.mrb[56].mxu1 %vm77_vm0, %v8488_v53 }
 0x6b8   :  { %6726 = vmatprep.mubr.msk.f32.mxu1 %vm7684_vm2, %v10467_v5  ;;  %6783 = vmatpush3.bf16.msra.mxu1 %v7827_v17 }
 0x6b9   :  { %6784 = vmatprep.subr.bf16.mxu1 %v10467_v5 }
 0x6bb   :  { %6727 = vmatmul.mubr.msk.f32.gmra.mrb[58].mxu1 %vm77_vm0, %v8511_v2 }
 0x6bc   :  { %6729 = vmatprep.mubr.msk.f32.mxu1 %vm7684_vm2, %v10467_v5  ;;  %6785 = vmatpush3.bf16.msra.mxu1 %v7857_v24 }
 0x6bd   :  { %6806 = vmatprep.subr.bf16.mxu1 %v10467_v5 }
 0x6bf   :  { %6730 = vmatmul.mubr.msk.f32.gmra.mrb[60].mxu1 %vm77_vm0, %v8529_v20 }
 0x6c0   :  { %6786 = vmatprep.mubr.msk.bf16.mxu1 %vm7684_vm2, %v10467_v5 }
 0x6f0   :  { %v1480_v47 = vpop.xlane.xlu0 %1479 }
 0x6f1   :  { %v1488_v11 = vsub.f32 %v8562_v31, %v1480_v47 }
 0x6f3   :  { %v1491_v62 = vmul.f32 1.442695, %v1488_v11 }
 0x6f4   :  { %v1487_v29 = vpop.xlane.xlu0 %1486  ;;  %v1483_v25 = vpop.xlane.xlu1 %1482 }
 0x6f5   :  { %v1490_v41 = vsub.f32 %v8565_v39, %v1487_v29  ;;  %v1489_v57 = vsub.f32 %v8574_v45, %v1483_v25  ;;  %7421 = vpow2.f32 %v1491_v62 }
 0x6f7   :  { %v1495_v33 = vmul.f32 1.442695, %v1490_v41  ;;  %v1493_v34 = vmul.f32 1.442695, %v1489_v57 }
 0x6f9   :  { %7423 = vpow2.f32 %v1495_v33 }
 0x6fa   :  { %7425 = vpow2.f32 %v1493_v34 }
 0x6ff   :  { %v7422_v18 = vpop.eup %7421 }
 0x700   :  { %v1497_v55 = vsel %vm10461_vm5, %v7422_v18, 0.0 }
 0x703   :  { %v7424_v14 = vpop.eup %7423 }
 0x704   :  { %v7426_v12 = vpop.eup %7425 }
 0x705   :  { %v1500_v23 = vsel %vm10461_vm5, %v7426_v12, 0.0 }
 0x76a   :  { %v8686_v27 = vpop.f32.mrb[46].mxu1 }
 0x76b   :  { %v8688_v53 = vpop.f32.mrb[47].mxu1 }
 0x76c   :  { %v7259_v52 = vpack.c.bf16 %v8686_v27, %v8688_v53 }
 0x76e   :  { %v8692_v2 = vpop.f32.mrb[48].mxu1 }
 0x76f   :  { %v8694_v36 = vpop.f32.mrb[49].mxu1 }
 0x770   :  { %v7262_v44 = vpack.c.bf16 %v8692_v2, %v8694_v36 }
 0x772   :  { %v8698_v26 = vpop.f32.mrb[50].mxu1 }
 0x773   :  { %v8700_v20 = vpop.f32.mrb[51].mxu1 }
 0x774   :  { %v7265_v40 = vpack.c.bf16 %v8698_v26, %v8700_v20 }
 0x782   :  { %v1945_v58 = vpop.f32.mrb[52].mxu1 }
 0x783   :  { %v1946_v49 = vadd.f32 %v1945_v58, %v8559_v1  ;;  %v6719_v59 = vpop.f32.mrb[53].mxu1 }
 0x785   :  { %v1969_v42 = vsel %vm10461_vm5, %v1946_v49, -inf }
 0x786   :  { %v1950_v35 = vpop.f32.mrb[54].mxu1  ;;  %1970 = vmax.xlane.f32.xlu0 %v1969_v42 }
 0x787   :  { %v1951_v31 = vadd.f32 %v1950_v35, %v8567_v32  ;;  %v6722_v54 = vpop.f32.mrb[55].mxu1  ;;  %v1503_v32 = vsel %vm1484_vm11, %v7424_v14, 0.0 }
 0x789   :  { %v1972_v39 = vsel %vm10461_vm5, %v1951_v31, -inf }
 0x78a   :  { %v1955_v45 = vpop.f32.mrb[56].mxu1  ;;  %1973 = vmax.xlane.f32.xlu1 %v1972_v39 }
 0x78b   :  { %v1956_v30 = vadd.f32 %v1955_v45, %v8555_v22  ;;  %v6725_v61 = vpop.f32.mrb[57].mxu1 }
 0x78d   :  { %v1975_v1 = vsel %vm1484_vm11, %v1956_v30, -inf  ;;  %v5973_v35 = vmul.f32 -1000.0, %v1956_v30 }
 0x78e   :  { %v1960_v0 = vpop.f32.mrb[58].mxu1  ;;  %1976 = vmax.xlane.f32.xlu0 %v1975_v1  ;;  %1498 = vadd.xlane.f32.xlu1 %v1497_v55 }
 0x78f   :  { %v6728_v51 = vpop.f32.mrb[59].mxu1  ;;  %v1961_v22 = vadd.f32 %v1960_v0, %v8553_v19  ;;  %v2098_v39 = vmul.f32 1.442695, %v5973_v35  ;;  %v7656_v35 = vld [vmem:[%s10446_s1 + $0x48] sm:$0xff] }
 0x791   :  { %v5974_v29 = vmul.f32 -1000.0, %v1961_v22 }
 0x792   :  { %v1965_v43 = vpop.f32.mrb[60].mxu1  ;;  %1504 = vadd.xlane.f32.xlu1 %v1503_v32  ;;  %1501 = vadd.xlane.f32.xlu0 %v1500_v23 }
 0x793   :  { %v6731_v21 = vpop.f32.mrb[61].mxu1  ;;  %v1966_v10 = vadd.f32 %v1965_v43, %v8557_v16  ;;  %v2100_v33 = vmul.f32 1.442695, %v5974_v29 }
 0x795   :  { %v5975_v41 = vmul.f32 -1000.0, %v1966_v10 }
 0x797   :  { %v2102_v58 = vmul.f32 1.442695, %v5975_v41 }
 0x813   :  { %v1971_v47 = vpop.xlane.xlu0 %1970 }
 0x814   :  { %v1978_v11 = vsub.f32 %v1946_v49, %v1971_v47 }
 0x816   :  { %v1981_v25 = vmul.f32 1.442695, %v1978_v11 }
 0x817   :  { %v1974_v62 = vpop.xlane.xlu1 %1973 }
 0x818   :  { %7427 = vpow2.f32 %v1981_v25  ;;  %v1979_v57 = vsub.f32 %v1951_v31, %v1974_v62 }
 0x81a   :  { %v1983_v34 = vmul.f32 1.442695, %v1979_v57 }
 0x81b   :  { %v1977_v59 = vpop.xlane.xlu0 %1976  ;;  %v1499_v42 = vpop.xlane.xlu1 %1498 }
 0x81c   :  { %7429 = vpow2.f32 %v1983_v34  ;;  %v1980_v54 = vsub.f32 %v1956_v30, %v1977_v59  ;;  %v7653_v59 = vld [vmem:[%s10446_s1 + $0x30] sm:$0xff] }
 0x81d   :  { %7431 = vrcp.f32 %v1499_v42  ;;  %v7654_v42 = vld [vmem:[%s10446_s1 + $0x38] sm:$0xff] }
 0x81e   :  { %7433 = vpow2.f32 %v2100_v33  ;;  %v1985_v19 = vmul.f32 1.442695, %v1980_v54  ;;  %v7657_v54 = vld [vmem:[%s10446_s1 + $0x50] sm:$0xff] }
 0x81f   :  { %7435 = vpow2.f32 %v2102_v58  ;;  %v1502_v16 = vpop.xlane.xlu0 %1501  ;;  %v1505_v49 = vpop.xlane.xlu1 %1504 }
 0x820   :  { %7437 = vpow2.f32 %v1985_v19  ;;  %v7658_v19 = vld [vmem:[%s10446_s1 + $0x58] sm:$0x7] }
 0x821   :  { %7439 = vrcp.f32 %v1502_v16 }
 0x822   :  { %v8718_v45 = vpop.eup %7427  ;;  %7441 = vrcp.f32 %v1505_v49 }
 0x823   :  { %v1987_v31 = vsel %vm10461_vm5, %v8718_v45, 0.0  ;;  %7443 = vpow2.f32 %v2098_v39 }
 0x824   :  { %1988 = vadd.xlane.f32.xlu0 %v1987_v31 }
 0x826   :  { %v8722_v61 = vpop.eup %7429 }
 0x827   :  { %v7432_v30 = vpop.eup %7431  ;;  %v1990_v1 = vsel %vm10461_vm5, %v8722_v61, 0.0 }
 0x828   :  { %v7434_v55 = vpop.eup %7433  ;;  %1991 = vadd.xlane.f32.xlu1 %v1990_v1  ;;  %v1507_v0 = vmul.f32 %v7432_v30, %v7422_v18 }
 0x829   :  { %v7436_v51 = vpop.eup %7435  ;;  %v2105_v25 = vadd.f32 1.0, %v7434_v55 }
 0x82a   :  { %v8726_v32 = vpop.eup %7437  ;;  %1816 = vst.msk [vmem:[#allocation5 + $0x68] sm:$0xff] %vm10461_vm5, %v1507_v0  ;;  %v2106_v10 = vadd.f32 1.0, %v7436_v51 }
 0x82b   :  { %v7440_v23 = vpop.eup %7439  ;;  %v1993_v43 = vsel %vm1484_vm11, %v8726_v32, 0.0 }
 0x82c   :  { %v7442_v21 = vpop.eup %7441  ;;  %1994 = vadd.xlane.f32.xlu0 %v1993_v43  ;;  %v1509_v22 = vmul.f32 %v7440_v23, %v7426_v12  ;;  %7445 = vrcp.f32 %v2106_v10 }
 0x82d   :  { %v1511_v47 = vmul.f32 %v7442_v21, %v7424_v14  ;;  %v7444_v11 = vpop.eup %7443  ;;  %7447 = vrcp.f32 %v2105_v25 }
 0x82e   :  { %v1512_v29 = vpack.c.bf16 %v1509_v22, %v1507_v0  ;;  %1817 = vst.msk [vmem:[#allocation5 + $0x70] sm:$0xff] %vm10461_vm5, %v1509_v22  ;;  %v2104_v41 = vadd.f32 1.0, %v7444_v11 }
 0x82f   :  { %v1513_v18 = vpack.c.bf16 %v1511_v47, %v1511_v47  ;;  %1818 = vst.msk [vmem:[#allocation5 + $0x78] sm:$0x3] %vm1484_vm11, %v1511_v47 }
 0x830   :  { %6665 = vmatprep.mubr.msk.bf16.mxu0 %vm10461_vm5, %v1512_v29  ;;  %7449 = vrcp.f32 %v2104_v41 }
 0x831   :  { %6666 = vmatmul.mubr.msk.bf16.vlgmr.msra.gmra.mrb[56].mxu0 %vm10461_vm5, %v1513_v18 }
 0x832   :  { %7260 = vmatpush3.bf16.msra.mxu0 %v7259_v52  ;;  %6696 = vmatprep.mubr.msk.f32.mxu0 %vm7684_vm2, %v10467_v5 }
 0x833   :  { %7261 = vmatprep.subr.bf16.mxu0 %v10465_v63 }
 0x836   :  { %7263 = vmatpush3.bf16.msra.mxu0 %v7262_v44  ;;  %v8754_v27 = vpop.eup %7445 }
 0x837   :  { %7264 = vmatprep.subr.bf16.mxu0 %v10465_v63  ;;  %v8757_v53 = vpop.eup %7447  ;;  %v8762_v52 = vrot.slane %v8754_v27, 2 }
 0x838   :  { %v2117_v36 = vrot.slane %v8757_v53, 2 }
 0x83a   :  { %7267 = vmatpush3.bf16.msk.msra.mxu0 %vm8745_vm4, %v7265_v40  ;;  %v8767_v2 = vpop.eup %7449  ;;  %v8781_v44 = vsel %vm715_vm9, %v2117_v36, %v8762_v52 }
 0x83b   :  { %6732 = vmatprep.subr.bf16.mxu0 %v8542_v37 }
 0x83d   :  { %6697 = vmatmul.mubr.msk.f32.vlgmr.msra.gmra.mrb[60].mxu0 %vm10461_vm5, %v8593_v28  ;;  %v2042_v28 = vand.u32 %v8547_v9, %v8141_v46 }
 0x83e   :  { %6733 = vmatpush3.bf16.msra.mxu0 %v8542_v37  ;;  %6699 = vmatprep.mubr.msk.f32.mxu0 %vm7684_vm2, %v10467_v5  ;;  %v2116_v37 = vrot.slane %v8767_v2, 2 }
 0x83f   :  { %6734 = vmatprep.subr.bf16.mxu0 %v8551_v15 }
 0x840   :  { %v8784_v26 = vsel %vm715_vm9, %v2116_v37, %v2117_v36 }
 0x841   :  { %6700 = vmatmul.mubr.msk.f32.gmra.mrb[62].mxu0 %vm10461_vm5, %v8597_v8  ;;  %v7280_v9 = vpack.c.bf16 %v8781_v44, %v8784_v26 }
 0x842   :  { %6735 = vmatpush3.bf16.msra.mxu0 %v8551_v15  ;;  %6702 = vmatprep.mubr.msk.f32.mxu0 %vm7684_vm2, %v10467_v5 }
 0x843   :  { %6736 = vmatprep.subr.bf16.mxu0 %v2042_v28 }
 0x845   :  { %6703 = vmatmul.mubr.msk.f32.gmra.mrb[64].mxu0 %vm10461_vm5, %v8589_v13 }
 0x846   :  { %6737 = vmatpush3.bf16.msra.mxu0 %v2042_v28 }
 0x847   :  { %7282 = vmatprep.subr.msk.bf16.mxu0 %vm8601_vm12, %v7280_v9 }
 0x8b1   :  { %v1989_v15 = vpop.xlane.xlu0 %1988 }
 0x8b2   :  { %7451 = vrcp.f32 %v1989_v15 }
 0x8b5   :  { %v1992_v8 = vpop.xlane.xlu1 %1991 }
 0x8b6   :  { %7453 = vrcp.f32 %v1992_v8 }
 0x8b9   :  { %v1995_v20 = vpop.xlane.xlu0 %1994 }
 0x8ba   :  { %7455 = vrcp.f32 %v1995_v20 }
 0x8bc   :  { %v7452_v40 = vpop.eup %7451 }
 0x8bd   :  { %v1997_v12 = vmul.f32 %v7452_v40, %v8718_v45 }
 0x8bf   :  { %2333 = vst.msk [vmem:[#allocation5 + $0xe8] sm:$0xff] %vm10461_vm5, %v1997_v12 }
 0x8c0   :  { %v7454_v62 = vpop.eup %7453 }
 0x8c1   :  { %v1999_v13 = vmul.f32 %v7454_v62, %v8722_v61 }
 0x8c3   :  { %v2002_v57 = vpack.c.bf16 %v1999_v13, %v1997_v12  ;;  %2334 = vst.msk [vmem:[#allocation5 + $0xf0] sm:$0xff] %vm10461_vm5, %v1999_v13 }
 0x8c4   :  { %v7456_v33 = vpop.eup %7455 }
 0x8c5   :  { %v2001_v34 = vmul.f32 %v7456_v33, %v8726_v32  ;;  %6738 = vmatprep.mubr.msk.bf16.mxu0 %vm10461_vm5, %v2002_v57 }
 0x8c7   :  { %v2003_v58 = vpack.c.bf16 %v2001_v34, %v2001_v34  ;;  %2335 = vst.msk [vmem:[#allocation5 + $0xf8] sm:$0x3] %vm1484_vm11, %v2001_v34 }
 0x8c9   :  { %6739 = vmatmul.mubr.msk.bf16.vlgmr.msra.gmra.mrb[68].mxu0 %vm10461_vm5, %v2003_v58  ;;  %v5990_v58 = vld [vmem:[%s10451_s6 + $0x48] sm:$0xff] }
 0x8ca   :  { %7285 = vmatpush3.bf16.xpose.msk.msra.mxu0 %vm8601_vm12, %v7280_v9  ;;  %6748 = vmatprep.mubr.msk.f32.mxu0 %vm10461_vm5, %v7653_v59 }
 0x8cb   :  { %6746 = vmatprep.subr.msk.mxu0 %vm10461_vm5, %v8762_v52 }
 0x8d2   :  { %6747 = vmatpush3.xpose.msk.msra.mxu0 %vm10461_vm5, %v8762_v52 }
 0x8d3   :  { %7286 = vmatprep.subr.bf16.mxu0 %v10465_v63 }
 0x8d5   :  { %6749 = vmatmul.mubr.msk.f32.vlgmr.msra.gmra.mrb[66].mxu0 %vm10461_vm5, %v7654_v42  ;;  %v5992_v42 = vld [vmem:[%s10451_s6 + $0x58] sm:$0xff] }
 0x8d6   :  { %6751 = vmatprep.mubr.msk.f32.mxu0 %vm10461_vm5, %v7655_v38 }
 0x8d9   :  { %6752 = vmatmul.mubr.msk.f32.gmra.mrb[72].mxu0 %vm10461_vm5, %v7656_v35  ;;  %v5993_v35 = vld [vmem:[%s10451_s6 + $0x60] sm:$0xff] }
 0x8da   :  { %6754 = vmatprep.mubr.msk.f32.mxu0 %vm10461_vm5, %v7657_v54  ;;  %v5994_v54 = vld [vmem:[%s10451_s6 + $0x68] sm:$0xff] }
 0x8dd   :  { %6755 = vmatmul.mubr.msk.f32.gmra.mrb[74].mxu0 %vm10461_vm5, %v7658_v19  ;;  %v2686_v19 = vpack.c.bf16 %v5994_v54, %v5993_v35 }
 0x8de   :  { %6769 = vmatprep.mubr.msk.f32.mxu0 %vm7684_vm2, %v10467_v5 }
 0x904   :  { %v6667_v16 = vpop.f32.mrb[56].mxu0 }
 0x905   :  { %1815 = vst.msk [vmem:[#allocation3 + $0x10] sm:$0x3] %vm1814_vm6, %v6667_v16  ;;  %v1560_v49 = vpop.f32.mrb[57].mxu0  ;;  %v5995_v16 = vld [vmem:[%s10451_s6 + $0x70] sm:$0xff] }
 0x906   :  { %1812 = vst.msk [vmem:[#allocation3] sm:$0xff] %vm77_vm0, %v1560_v49  ;;  %v6668_v39 = vpop.f32.mrb[58].mxu0  ;;  %v5996_v49 = vld [vmem:[%s10451_s6 + $0x78] sm:$0xff] }
 0x907   :  { %v1563_v45 = vpop.f32.mrb[59].mxu0  ;;  %v2687_v39 = vpack.c.bf16 %v5996_v49, %v5995_v16 }
 0x908   :  { %1813 = vst.msk [vmem:[#allocation3 + $0x8] sm:$0xff] %vm77_vm0, %v1563_v45 }
 0x90d   :  { %v2385_v31 = vld [vmem:[#allocation3] sm:$0xff] }
 0x90f   :  { %v2386_v61 = vld [vmem:[#allocation3 + $0x8] sm:$0xff] }
 0x910   :  { %v8836_v30 = vpop.f32.mrb[60].mxu0  ;;  %v8838_v1 = vpack.c.bf16 %v2386_v61, %v2385_v31 }
 0x911   :  { %v6698_v55 = vpop.f32.mrb[61].mxu0  ;;  %vm1806_vm11 = vcmp.gt.f32.partialorder %v8836_v30, 0.1 }
 0x912   :  { %6787 = vmatmul.mubr.msk.bf16.vlgmr.msra.gmra.mrb[64].mxu1 %vm77_vm0, %v8838_v1  ;;  %v2394_v34 = vsel %vm77_vm0, %v8838_v1, 0 }
 0x913   :  { %6790 = vmatprep.mubr.msk.bf16.mxu1 %vm7684_vm2, %v10467_v5 }
 0x914   :  { %v8844_v0 = vpop.f32.mrb[62].mxu0 }
 0x915   :  { %v6701_v51 = vpop.f32.mrb[63].mxu0  ;;  %vm1807_vm12 = vcmp.gt.f32.partialorder %v8844_v0, 0.1 }
 0x918   :  { %v8846_v32 = vpop.f32.mrb[64].mxu0 }
 0x919   :  { %v6704_v23 = vpop.f32.mrb[65].mxu0 }
 0x99c   :  { %v6740_v43 = vpop.f32.mrb[68].mxu0 }
 0x99d   :  { %2331 = vst.msk [vmem:[#allocation3 + $0x22] sm:$0x3] %vm1814_vm6, %v6740_v43  ;;  %v2078_v21 = vpop.f32.mrb[69].mxu0 }
 0x99e   :  { %2329 = vst.msk [vmem:[#allocation3 + $0x12] sm:$0xff] %vm77_vm0, %v2078_v21  ;;  %v6741_v22 = vpop.f32.mrb[70].mxu0 }
 0x99f   :  { %v2081_v10 = vpop.f32.mrb[71].mxu0 }
 0x9a0   :  { %2330 = vst.msk [vmem:[#allocation3 + $0x1a] sm:$0xff] %vm77_vm0, %v2081_v10 }
 0x9a5   :  { %v2387_v47 = vld [vmem:[#allocation3 + $0x10] sm:$0xff] }
 0x9a6   :  { %v2458_v14 = vpack.c.bf16 %v2387_v47, %v2387_v47 }
 0x9a7   :  { %v2388_v11 = vld [vmem:[#allocation3 + $0x18] sm:$0xff]  ;;  %v2389_v29 = vld [vmem:[#allocation3 + $0x20] sm:$0xf] }
 0x9a8   :  { %v6750_v25 = vpop.f32.mrb[66].mxu0  ;;  %v8851_v18 = vpack.c.bf16 %v2388_v11, %v2387_v47  ;;  %v8853_v41 = vpack.c.bf16 %v2389_v29, %v2389_v29 }
 0x9a9   :  { %v2211_v36 = vpop.f32.mrb[67].mxu0 }
 0x9aa   :  { %v7287_v28 = vpack.c.bf16 %v6750_v25, %v2211_v36  ;;  %6791 = vmatmul.mubr.msk.bf16.gmra.mrb[68].mxu1 %vm77_vm0, %v8851_v18  ;;  %v2568_v37 = vrot.slane %v8851_v18, 1  ;;  %v2569_v9 = vrot.slane %v8853_v41, 1 }
 0x9ab   :  { %6794 = vmatprep.mubr.msk.bf16.mxu1 %vm7684_vm2, %v10467_v5 }
 0x9ac   :  { %v6753_v15 = vpop.f32.mrb[72].mxu0  ;;  %7288 = vmatpush3.bf16.msra.mxu0 %v7287_v28  ;;  %v2570_v8 = vsel %vm2567_vm8, %v2568_v37, %v2569_v9  ;;  %v2575_v33 = vsel %vm77_vm0, %v2569_v9, 0 }
 0x9ad   :  { %v2221_v20 = vpop.f32.mrb[73].mxu0  ;;  %7289 = vmatprep.subr.bf16.mxu0 %v10465_v63  ;;  %v2572_v40 = vsel %vm77_vm0, %v2570_v8, 0 }
 0x9ae   :  { %v7290_v12 = vpack.c.bf16 %v6753_v15, %v2221_v20  ;;  %6807 = vmatpush3.bf16.xpose.msra.mxu1 %v2572_v40  ;;  %v10463_v20 = vmov -9e+15  }
 0x9af   :  { %6808 = vmatprep.subr.bf16.mxu1 %v10467_v5  ;;  %v8946_v40 = vsel %vm1806_vm11, 1.0, %v10463_v20  ;;  %vm2755_vm11 = vcmask 1040384  }
 0x9b0   :  { %v6756_v62 = vpop.f32.mrb[74].mxu0  ;;  %7291 = vmatpush3.bf16.msra.mxu0 %v7290_v12  ;;  %v8949_v12 = vsel %vm1807_vm12, 1.0, %v10463_v20  ;;  %vm1808_vm12 = vcmp.gt.f32.partialorder %v8846_v32, 0.1 }
 0x9b1   :  { %v2231_v13 = vpop.f32.mrb[75].mxu0  ;;  %7292 = vmatprep.subr.bf16.mxu0 %v10465_v63  ;;  %vm2525_vm15 = vcmp.gt.f32.partialorder %v8949_v12, 0.0 }
 0x9b2   :  { %v7293_v57 = vpack.c.bf16 %v6756_v62, %v2231_v13  ;;  %6795 = vmatmul.mubr.msk.bf16.gmra.mrb[72].mxu1 %vm77_vm0, %v8853_v41 }
 0x9b3   :  { %6810 = vmatprep.mubr.msk.bf16.mxu1 %vm7684_vm2, %v10467_v5 }
 0x9b4   :  { %7295 = vmatpush3.bf16.msk.msra.mxu0 %vm8745_vm4, %v7293_v57  ;;  %vm2524_vm4 = vcmp.gt.f32.partialorder %v8946_v40, 0.0 }
 0x9b5   :  { %6798 = vmatprep.subr.bf16.mxu0 %v10467_v5 }
 0x9b6   :  { %6809 = vmatpush3.bf16.xpose.msra.mxu1 %v2575_v33 }
 0x9b7   :  { %6770 = vmatmul.mubr.msk.f32.vlgmr.msra.gmra.mrb[76].mxu0 %vm10461_vm5, %v8784_v26  ;;  %v5989_v26 = vld [vmem:[%s10451_s6 + $0x40] sm:$0xff] }
 0x9b8   :  { %6772 = vmatprep.mubr.msk.f32.mxu0 %vm7684_vm2, %v10467_v5  ;;  %v2684_v59 = vpack.c.bf16 %v5990_v58, %v5989_v26 }
 0x9bb   :  { %6773 = vmatmul.mubr.msk.f32.gmra.mrb[78].mxu0 %vm10461_vm5, %v8781_v44  ;;  %v2460_v44 = vsel %vm77_vm0, %v2458_v14, 0 }
 0x9bc   :  { %6775 = vmatprep.mubr.msk.f32.mxu0 %vm7684_vm2, %v10467_v5 }
 0x9bd   :  { %6799 = vmatpush3.bf16.xpose.msra.mxu0 %v2394_v34  ;;  %6811 = vmatmul.mubr.msk.bf16.vlgmr.msra.gmra.mrb[76].mxu1 %vm77_vm0, %v7902_v7 }
 0x9be   :  { %6800 = vmatprep.subr.bf16.mxu0 %v10467_v5 }
 0x9bf   :  { %6776 = vmatmul.mubr.msk.f32.gmra.mrb[80].mxu0 %vm10461_vm5, %v8762_v52  ;;  %v5991_v52 = vld [vmem:[%s10451_s6 + $0x50] sm:$0xff] }
 0x9c0   :  { %6802 = vmatprep.mubr.msk.bf16.mxu0 %vm7684_vm2, %v10467_v5  ;;  %v2685_v38 = vpack.c.bf16 %v5992_v42, %v5991_v52 }
 0x9c5   :  { %6801 = vmatpush3.bf16.xpose.msra.mxu0 %v2460_v44 }
 0x9c6   :  { %6814 = vmatprep.subr.bf16.mxu0 %v10467_v5 }
 0x9cc   :  { %6803 = vmatmul.mubr.msk.bf16.vlgmr.msra.gmra.mrb[84].mxu0 %vm77_vm0, %v7902_v7 }
 0x9cd   :  { %6815 = vmatpush3.bf16.msra.mxu0 %v2684_v59  ;;  %6822 = vmatprep.mubr.msk.bf16.mxu0 %vm7684_vm2, %v10467_v5 }
 0x9ce   :  { %6816 = vmatprep.subr.bf16.mxu0 %v10467_v5 }
 0x9d1   :  { %6817 = vmatpush3.bf16.msra.mxu0 %v2685_v38 }
 0x9d2   :  { %6818 = vmatprep.subr.bf16.mxu0 %v10467_v5 }
 0x9d5   :  { %6819 = vmatpush3.bf16.msra.mxu0 %v2686_v19 }
 0x9d6   :  { %6820 = vmatprep.subr.bf16.mxu0 %v10467_v5 }
 0x9d9   :  { %6821 = vmatpush3.bf16.msra.mxu0 %v2687_v39 }
 0x9da   :  { %6850 = vmatprep.subr.bf16.mxu0 %v10467_v5 }
 0x9dc   :  { %6823 = vmatmul.mubr.msk.bf16.vlgmr.msra.gmra.mrb[88].mxu0 %vm77_vm0, %v8838_v1 }
 0x9dd   :  { %6826 = vmatprep.mubr.msk.bf16.mxu0 %vm7684_vm2, %v10467_v5 }
 0x9e4   :  { %6827 = vmatmul.mubr.msk.bf16.gmra.mrb[92].mxu0 %vm77_vm0, %v8851_v18 }
 0x9e5   :  { %v2436_v45 = vpop.f32.mrb[64].mxu1  ;;  %6830 = vmatprep.mubr.msk.bf16.mxu0 %vm7684_vm2, %v10467_v5 }
 0x9e6   :  { %2504 = vperm.xlu1 %7360, %v2436_v45   ;;  %v6788_v31 = vpop.f32.mrb[65].mxu1 }
 0x9e7   :  { %v2439_v61 = vpop.f32.mrb[66].mxu1 }
 0x9e8   :  { %2509 = vperm.xlu0 %7359, %v2439_v61   ;;  %v6789_v55 = vpop.f32.mrb[67].mxu1 }
 0x9ec   :  { %6831 = vmatmul.mubr.msk.bf16.gmra.mrb[96].mxu0 %vm77_vm0, %v8853_v41 }
 0x9ed   :  { %6858 = vmatprep.mubr.msk.bf16.mxu0 %vm7684_vm2, %v10467_v5 }
 0xa65   :  { %v2505_v62 = vpop.permute.xlu1 %2504 }
 0xa67   :  { %v2510_v33 = vpop.permute.xlu0 %2509 }
 0xa7d   :  { %v2444_v1 = vpop.f32.mrb[68].mxu1 }
 0xa7e   :  { %2514 = vperm.xlu1 %7360, %v2444_v1   ;;  %v6792_v51 = vpop.f32.mrb[69].mxu1 }
 0xa7f   :  { %v2447_v23 = vpop.f32.mrb[70].mxu1 }
 0xa80   :  { %v6793_v43 = vpop.f32.mrb[71].mxu1 }
 0xa82   :  { %2619 = vperm.xlu1 %7360, %v2447_v23  }
 0xa85   :  { %v2452_v21 = vpop.f32.mrb[72].mxu1 }
 0xa86   :  { %2624 = vperm.xlu0 %7359, %v2452_v21   ;;  %v6796_v22 = vpop.f32.mrb[73].mxu1 }
 0xa87   :  { %v2455_v10 = vpop.f32.mrb[74].mxu1 }
 0xa88   :  { %v6797_v47 = vpop.f32.mrb[75].mxu1 }
 0xa8a   :  { %v8937_v11 = vpop.f32.mrb[76].mxu0 }
 0xa8b   :  { %v6771_v29 = vpop.f32.mrb[77].mxu0  ;;  %vm2323_vm13 = vcmp.gt.f32.partialorder %v8937_v11, 0.1 }
 0xa8c   :  { %v9005_v32 = vsel %vm2323_vm13, 1.0, %v10463_v20 }
 0xa8e   :  { %v8939_v25 = vpop.f32.mrb[78].mxu0 }
 0xa8f   :  { %v6774_v18 = vpop.f32.mrb[79].mxu0  ;;  %vm2324_vm5 = vcmp.gt.f32.partialorder %v8939_v25, 0.1 }
 0xa90   :  { %v2611_v41 = vpop.f32.mrb[76].mxu1 }
 0xa91   :  { %v6812_v36 = vpop.f32.mrb[77].mxu1 }
 0xa92   :  { %v8941_v28 = vpop.f32.mrb[80].mxu0  ;;  %v2614_v37 = vpop.f32.mrb[78].mxu1 }
 0xa93   :  { %v6777_v9 = vpop.f32.mrb[81].mxu0  ;;  %v6813_v15 = vpop.f32.mrb[79].mxu1 }
 0xa94   :  { %v8998_v9 = vsel %vm1808_vm12, 1.0, %v10463_v20  ;;  %v2630_v15 = vrot.slane %v2611_v41, %v7955_v48  ;;  %vm2325_vm12 = vcmp.gt.f32.partialorder %v8941_v28, 0.1 }
 0xa9f   :  { %v2496_v8 = vpop.f32.mrb[84].mxu0 }
 0xaa0   :  { %v2520_v13 = vrot.slane %v2496_v8, %v7955_v48  ;;  %v6804_v57 = vpop.f32.mrb[85].mxu0 }
 0xaa1   :  { %v2499_v34 = vpop.f32.mrb[86].mxu0 }
 0xaa2   :  { %v2522_v14 = vadd.f32 %v2520_v13, %v2510_v33  ;;  %v2521_v44 = vadd.f32 %v2520_v13, %v2505_v62  ;;  %v6805_v30 = vpop.f32.mrb[87].mxu0 }
 0xaa4   :  { %v8954_v0 = vsel %vm2525_vm15, %v2522_v14, -9e+15  ;;  %v8956_v26 = vsel %vm2524_vm4, %v2521_v44, -9e+15  ;;  %vm2537_vm15 = vcmask 140288   ;;  %vm2526_vm4 = vcmp.gt.f32.partialorder %v8998_v9, 0.0 }
 0xaa5   :  { %v2534_v58 = vsel %vm2530_vm14, %v8954_v0, -inf  ;;  %v2531_v59 = vsel %vm2530_vm14, %v8956_v26, -inf }
 0xaa6   :  { %2535 = vmax.xlane.f32.xlu0 %v2534_v58  ;;  %2532 = vmax.xlane.f32.xlu1 %v2531_v59  ;;  %v9010_v58 = vsel %vm2325_vm12, 1.0, %v10463_v20 }
 0xaa7   :  { %vm2636_vm13 = vcmp.gt.f32.partialorder %v9010_v58, 0.0 }
 0xaaf   :  { %v8962_v52 = vpop.f32.mrb[88].mxu0 }
 0xab0   :  { %v6824_v42 = vpop.f32.mrb[89].mxu0 }
 0xab1   :  { %v8964_v38 = vpop.f32.mrb[90].mxu0  ;;  %v9015_v42 = vsel %vm2324_vm5, 1.0, %v10463_v20  ;;  %vm9480_vm5 = vmpackc.low %vm2530_vm14, %vm2530_vm14 }
 0xab2   :  { %v2747_v35 = vpack.c.bf16 %v8964_v38, %v8962_v52  ;;  %v6825_v54 = vpop.f32.mrb[91].mxu0  ;;  %vm2635_vm3 = vcmp.gt.f32.partialorder %v9015_v42, 0.0 }
 0xab4   :  { %6834 = vmatprep.subr.bf16.mxu1 %v2747_v35 }
 0xab5   :  { %6835 = vmatpush3.bf16.msra.mxu1 %v2747_v35 }
 0xab7   :  { %v8968_v19 = vpop.f32.mrb[92].mxu0 }
 0xab8   :  { %v2748_v16 = vpack.c.bf16 %v8968_v19, %v8968_v19  ;;  %v6828_v49 = vpop.f32.mrb[93].mxu0  ;;  %v2838_v45 = vrot.slane %v8968_v19, 2 }
 0xab9   :  { %v2733_v39 = vpop.f32.mrb[94].mxu0 }
 0xaba   :  { %v2827_v31 = vpack.c.bf16 %v2733_v39, %v8968_v19  ;;  %v2839_v61 = vrot.slane %v2733_v39, 2  ;;  %v6829_v55 = vpop.f32.mrb[95].mxu0  ;;  %7342 = vmatprep.subr.msk.bf16.mxu1 %vm2755_vm11, %v2748_v16  ;;  %v2757_v1 = vsel %vm2755_vm11, %v2748_v16, 0 }
 0xabb   :  { %6837 = vmatpush3.bf16.msra.mxu1 %v2757_v1 }
 0xabc   :  { %v8977_v51 = vsel %vm715_vm9, %v2838_v45, %v2839_v61  ;;  %v2831_v47 = vrot.slane %v2827_v31, 1 }
 0xabf   :  { %v8979_v23 = vpop.f32.mrb[96].mxu0 }
 0xac0   :  { %v2828_v43 = vpack.c.bf16 %v8979_v23, %v8979_v23  ;;  %v2841_v21 = vrot.slane %v8979_v23, 2  ;;  %v6832_v22 = vpop.f32.mrb[97].mxu0 }
 0xac1   :  { %v2741_v10 = vpop.f32.mrb[98].mxu0 }
 0xac2   :  { %v8984_v29 = vrot.slane %v2828_v43, 1  ;;  %v6833_v18 = vpop.f32.mrb[99].mxu0  ;;  %v8989_v36 = vsel %vm715_vm9, %v2839_v61, %v2841_v21 }
 0xac4   :  { %v8993_v37 = vsel %vm2567_vm8, %v2831_v47, %v8984_v29 }
 0xac5   :  { %6842 = vmatprep.subr.bf16.mxu1 %v8993_v37 }
 0xafd   :  { %v2515_v8 = vpop.permute.xlu1 %2514 }
 0xafe   :  { %v2523_v62 = vadd.f32 %v2520_v13, %v2515_v8  ;;  %v2631_v57 = vadd.f32 %v2630_v15, %v2515_v8 }
 0xb00   :  { %v2529_v33 = vsel %vm2526_vm4, %v2523_v62, -9e+15  ;;  %v2640_v41 = vrot.slane %v2631_v57, 2  ;;  %vm2634_vm4 = vcmp.gt.f32.partialorder %v9005_v32, 0.0 }
 0xb01   :  { %v2620_v34 = vpop.permute.xlu1 %2619  ;;  %v2538_v14 = vsel %vm2537_vm15, %v2529_v33, -inf }
 0xb02   :  { %v2632_v44 = vadd.f32 %v2630_v15, %v2620_v34  ;;  %2539 = vmax.xlane.f32.xlu0 %v2538_v14 }
 0xb04   :  { %v2641_v13 = vrot.slane %v2632_v44, 2 }
 0xb05   :  { %v2625_v30 = vpop.permute.xlu0 %2624 }
 0xb06   :  { %v2633_v11 = vadd.f32 %v2630_v15, %v2625_v30  ;;  %v2642_v59 = vsel %vm715_vm9, %v2640_v41, %v2641_v13 }
 0xb07   :  { %v2648_v35 = vsel %vm2634_vm4, %v2642_v59, -9e+15  ;;  %vm10511_vm4 = vcmask 351232  }
 0xb08   :  { %v2643_v54 = vrot.slane %v2633_v11, 2  ;;  %v2651_v28 = vsel %vm2530_vm14, %v2648_v35, -inf }
 0xb09   :  { %2652 = vmax.xlane.f32.xlu1 %v2651_v28 }
 0xb0a   :  { %v2644_v25 = vsel %vm715_vm9, %v2641_v13, %v2643_v54  ;;  %v2650_v16 = vsel %vm2636_vm13, %v2643_v54, -9e+15  ;;  %vm10512_vm13 = vmmov %vm10511_vm4 }
 0xb0b   :  { %v2649_v49 = vsel %vm2635_vm3, %v2644_v25, -9e+15  ;;  %v2657_v39 = vsel %vm2537_vm15, %v2650_v16, -inf  ;;  %vm3413_vm3 = vcmask 141312  }
 0xb0c   :  { %v2654_v45 = vsel %vm2530_vm14, %v2649_v49, -inf }
 0xb0d   :  { %2655 = vmax.xlane.f32.xlu0 %v2654_v45  ;;  %2658 = vmax.xlane.f32.xlu1 %v2657_v39  ;;  %v3172_v45 = vld [vmem:[%s10458_s13 + $0x10] sm:$0xff] }
 0xb33   :  { %v2536_v31 = vpop.xlane.xlu0 %2535  ;;  %v2533_v61 = vpop.xlane.xlu1 %2532 }
 0xb34   :  { %v2542_v55 = vsub.f32 %v8954_v0, %v2536_v31  ;;  %v2541_v1 = vsub.f32 %v8956_v26, %v2533_v61  ;;  %v3170_v31 = vld [vmem:[%s10458_s13] sm:$0xff] }
 0xb35   :  { %v3174_v61 = vld [vmem:[%s10458_s13 + $0x20] sm:$0xff] }
 0xb36   :  { %v2546_v43 = vmul.f32 1.442695, %v2542_v55  ;;  %v2544_v22 = vmul.f32 1.442695, %v2541_v1  ;;  %v3173_v55 = vld [vmem:[%s10458_s13 + $0x18] sm:$0xff]  ;;  %v3175_v1 = vld [vmem:[%s10458_s13 + $0x28] sm:$0xff] }
 0xb38   :  { %7457 = vpow2.f32 %v2546_v43 }
 0xb39   :  { %7459 = vpow2.f32 %v2544_v22 }
 0xb42   :  { %v7458_v10 = vpop.eup %7457 }
 0xb43   :  { %v7460_v47 = vpop.eup %7459  ;;  %v2553_v18 = vsel %vm2530_vm14, %v7458_v10, 0.0 }
 0xb44   :  { %2554 = vadd.xlane.f32.xlu1 %v2553_v18  ;;  %v2550_v15 = vsel %vm2530_vm14, %v7460_v47, 0.0 }
 0xb45   :  { %2551 = vadd.xlane.f32.xlu0 %v2550_v15 }
 0xb8f   :  { %v2540_v8 = vpop.xlane.xlu0 %2539 }
 0xb90   :  { %v2543_v62 = vsub.f32 %v2529_v33, %v2540_v8 }
 0xb92   :  { %v2548_v57 = vmul.f32 1.442695, %v2543_v62 }
 0xb94   :  { %7461 = vpow2.f32 %v2548_v57 }
 0xb96   :  { %v2653_v34 = vpop.xlane.xlu1 %2652 }
 0xb97   :  { %v2660_v0 = vsub.f32 %v2648_v35, %v2653_v34 }
 0xb99   :  { %v2663_v14 = vmul.f32 1.442695, %v2660_v0 }
 0xb9a   :  { %v2656_v26 = vpop.xlane.xlu0 %2655  ;;  %v2659_v44 = vpop.xlane.xlu1 %2658 }
 0xb9b   :  { %7463 = vpow2.f32 %v2663_v14  ;;  %v2661_v41 = vsub.f32 %v2649_v49, %v2656_v26  ;;  %v2662_v13 = vsub.f32 %v2650_v16, %v2659_v44  ;;  %v3171_v16 = vld [vmem:[%s10458_s13 + $0x8] sm:$0xff] }
 0xb9d   :  { %v2665_v30 = vmul.f32 1.442695, %v2661_v41  ;;  %v2667_v11 = vmul.f32 1.442695, %v2662_v13 }
 0xb9e   :  { %v7462_v59 = vpop.eup %7461 }
 0xb9f   :  { %7465 = vpow2.f32 %v2665_v30  ;;  %v2556_v54 = vsel %vm2537_vm15, %v7462_v59, 0.0 }
 0xba0   :  { %7467 = vpow2.f32 %v2667_v11  ;;  %2557 = vadd.xlane.f32.xlu0 %v2556_v54 }
 0xba5   :  { %v7464_v28 = vpop.eup %7463 }
 0xba6   :  { %v2669_v33 = vsel %vm2530_vm14, %v7464_v28, 0.0 }
 0xba7   :  { %2670 = vadd.xlane.f32.xlu1 %v2669_v33 }
 0xba9   :  { %v7466_v25 = vpop.eup %7465 }
 0xbaa   :  { %v7468_v35 = vpop.eup %7467  ;;  %v2672_v39 = vsel %vm2530_vm14, %v7466_v25, 0.0 }
 0xbab   :  { %2673 = vadd.xlane.f32.xlu0 %v2672_v39  ;;  %v2675_v49 = vsel %vm2537_vm15, %v7468_v35, 0.0 }
 0xbac   :  { %2676 = vadd.xlane.f32.xlu1 %v2675_v49 }
 0xbbd   :  { %3188 = vperm.xlu1 %7360, %v3171_v16  }
 0xbc1   :  { %3193 = vperm.xlu1 %7360, %v3172_v45   ;;  %3183 = vperm.xlu0 %7359, %v3170_v31   ;;  %v6002_v45 = vld [vmem:[%s10451_s6 + $0xa0] sm:$0xff]  ;;  %v6003_v31 = vld [vmem:[%s10451_s6 + $0xa8] sm:$0xff] }
 0xbc5   :  { %3203 = vperm.xlu1 %7360, %v3174_v61   ;;  %3198 = vperm.xlu0 %7359, %v3173_v55   ;;  %v2925_v61 = vpack.c.bf16 %v6003_v31, %v6002_v45  ;;  %v6004_v55 = vld [vmem:[%s10451_s6 + $0xb0] sm:$0xff] }
 0xbc9   :  { %3208 = vperm.xlu0 %7359, %v3175_v1   ;;  %v6005_v1 = vld [vmem:[%s10451_s6 + $0xb8] sm:$0xff] }
 0xbd1   :  { %v2555_v43 = vpop.xlane.xlu1 %2554 }
 0xbd2   :  { %7469 = vrcp.f32 %v2555_v43  ;;  %v2552_v22 = vpop.xlane.xlu0 %2551  ;;  %v2926_v43 = vpack.c.bf16 %v6005_v1, %v6004_v55 }
 0xbd3   :  { %7471 = vrcp.f32 %v2552_v22  ;;  %v5997_v22 = vld [vmem:[%s10452_s7 + $0x1] sm:$0x1] }
 0xbdc   :  { %v7470_v18 = vpop.eup %7469 }
 0xbdd   :  { %v7472_v15 = vpop.eup %7471  ;;  %v2562_v8 = vmul.f32 %v7470_v18, %v7458_v10  ;;  %v2744_v18 = vmul.f32 2.0, %v5997_v22 }
 0xbde   :  { %v2560_v62 = vmul.f32 %v7472_v15, %v7460_v47  ;;  %v2853_v47 = vsel %vm2755_vm11, %v8984_v29, 0 }
 0xbdf   :  { %v2811_v15 = vrot.slane %v2744_v18, %v7955_v48 }
 0xbe0   :  { %v2745_v57 = vpack.c.bf16 %v2562_v8, %v2560_v62 }
 0xbe2   :  { %6838 = vmatprep.mubr.msk.bf16.mxu1 %vm2530_vm14, %v2745_v57 }
 0xc2d   :  { %v2558_v34 = vpop.xlane.xlu0 %2557 }
 0xc2e   :  { %7473 = vrcp.f32 %v2558_v34 }
 0xc34   :  { %v2671_v0 = vpop.xlane.xlu1 %2670 }
 0xc35   :  { %7475 = vrcp.f32 %v2671_v0 }
 0xc38   :  { %v7474_v14 = vpop.eup %7473  ;;  %v2674_v26 = vpop.xlane.xlu0 %2673 }
 0xc39   :  { %v2564_v44 = vmul.f32 %v7474_v14, %v7462_v59  ;;  %7477 = vrcp.f32 %v2674_v26  ;;  %v2677_v41 = vpop.xlane.xlu1 %2676 }
 0xc3a   :  { %7479 = vrcp.f32 %v2677_v41 }
 0xc3b   :  { %v9050_v13 = vpack.c.bf16 %v2564_v44, %v2564_v44 }
 0xc3d   :  { %6839 = vmatmul.mubr.msk.bf16.vlgmr.msra.gmra.mrb[80].mxu1 %vm2530_vm14, %v9050_v13 }
 0xc3e   :  { %6843 = vmatpush3.bf16.msra.mxu1 %v8993_v37  ;;  %v5999_v37 = vld [vmem:[%s10451_s6 + $0x88] sm:$0xff] }
 0xc3f   :  { %7343 = vmatprep.subr.msk.bf16.mxu1 %vm2755_vm11, %v8984_v29  ;;  %v7476_v10 = vpop.eup %7475  ;;  %v5998_v29 = vld [vmem:[%s10451_s6 + $0x80] sm:$0xff] }
 0xc40   :  { %v2679_v59 = vmul.f32 %v7476_v10, %v7464_v28  ;;  %v2923_v28 = vpack.c.bf16 %v5999_v37, %v5998_v29 }
 0xc42   :  { %6845 = vmatpush3.bf16.msra.mxu1 %v2853_v47  ;;  %6851 = vmatpush3.bf16.msra.mxu0 %v2923_v28 }
 0xc43   :  { %v7478_v30 = vpop.eup %7477  ;;  %6852 = vmatprep.subr.bf16.mxu0 %v10467_v5 }
 0xc44   :  { %v7480_v11 = vpop.eup %7479  ;;  %v2681_v54 = vmul.f32 %v7478_v30, %v7466_v25  ;;  %v6000_v25 = vld [vmem:[%s10451_s6 + $0x90] sm:$0xff] }
 0xc45   :  { %v2683_v33 = vmul.f32 %v7480_v11, %v7468_v35  ;;  %v6001_v35 = vld [vmem:[%s10451_s6 + $0x98] sm:$0xff] }
 0xc46   :  { %v9059_v39 = vpack.c.bf16 %v2681_v54, %v2679_v59  ;;  %v2924_v16 = vpack.c.bf16 %v6001_v35, %v6000_v25 }
 0xc47   :  { %v9061_v49 = vpack.c.bf16 %v2683_v33, %v2683_v33 }
 0xc48   :  { %6846 = vmatprep.mubr.msk.bf16.mxu1 %vm2530_vm14, %v9059_v39  ;;  %6853 = vmatpush3.bf16.msra.mxu0 %v2924_v16 }
 0xc49   :  { %6847 = vmatmul.mubr.msk.bf16.vlgmr.msra.gmra.mrb[84].mxu1 %vm2530_vm14, %v9061_v49  ;;  %6854 = vmatprep.subr.bf16.mxu0 %v10467_v5 }
 0xc4a   :  { %6874 = vmatprep.mubr.msk.bf16.mxu1 %vm2530_vm14, %v2745_v57 }
 0xc4c   :  { %6855 = vmatpush3.bf16.msra.mxu0 %v2925_v61 }
 0xc4d   :  { %6856 = vmatprep.subr.bf16.mxu0 %v10467_v5 }
 0xc50   :  { %6857 = vmatpush3.bf16.msra.mxu0 %v2926_v43 }
 0xc51   :  { %6925 = vmatprep.subr.bf16.mxu0 %v10467_v5 }
 0xd10   :  { %v6840_v8 = vpop.f32.mrb[80].mxu1 }
 0xd11   :  { %v2802_v62 = vadd.f32 %v6840_v8, %v8968_v19  ;;  %v2793_v57 = vpop.f32.mrb[81].mxu1 }
 0xd12   :  { %v2794_v34 = vadd.f32 %v2793_v57, %v8962_v52  ;;  %v6841_v0 = vpop.f32.mrb[82].mxu1 }
 0xd13   :  { %v2815_v14 = vadd.f32 %v2811_v15, %v2802_v62  ;;  %v2796_v26 = vpop.f32.mrb[83].mxu1 }
 0xd14   :  { %v2813_v44 = vadd.f32 %v2811_v15, %v2794_v34  ;;  %v2797_v41 = vadd.f32 %v2796_v26, %v8964_v38 }
 0xd15   :  { %v2818_v10 = vmul.f32 0.5, %v2815_v14 }
 0xd16   :  { %v2816_v47 = vmul.f32 0.5, %v2813_v44  ;;  %v2814_v30 = vadd.f32 %v2811_v15, %v2797_v41 }
 0xd17   :  { %v2821_v11 = vmax.f32 %v2818_v10, 0.0 }
 0xd18   :  { %v2819_v59 = vmax.f32 %v2816_v47, 0.0  ;;  %v2817_v54 = vmul.f32 0.5, %v2814_v30 }
 0xd19   :  { %2824 = vst.msk [vmem:[#allocation4 + $0x10] sm:$0x3] %vm1814_vm6, %v2821_v11 }
 0xd1a   :  { %2822 = vst.msk [vmem:[#allocation4] sm:$0xff] %vm77_vm0, %v2819_v59  ;;  %v2820_v19 = vmax.f32 %v2817_v54, 0.0 }
 0xd1c   :  { %2823 = vst.msk [vmem:[#allocation4 + $0x8] sm:$0xff] %vm77_vm0, %v2820_v19  ;;  %v6848_v52 = vpop.f32.mrb[84].mxu1 }
 0xd1d   :  { %v2898_v33 = vadd.f32 %v6848_v52, %v2841_v21  ;;  %v2889_v29 = vpop.f32.mrb[85].mxu1 }
 0xd1e   :  { %v2890_v38 = vadd.f32 %v2889_v29, %v8977_v51  ;;  %v6849_v37 = vpop.f32.mrb[86].mxu1 }
 0xd1f   :  { %v2905_v28 = vadd.f32 %v2898_v33, %v2811_v15  ;;  %v2892_v25 = vpop.f32.mrb[87].mxu1 }
 0xd20   :  { %v2903_v35 = vadd.f32 %v2890_v38, %v2811_v15  ;;  %v2893_v16 = vadd.f32 %v2892_v25, %v8989_v36 }
 0xd21   :  { %v2908_v45 = vmul.f32 0.5, %v2905_v28  ;;  %v2915_v1 = vld [vmem:[#allocation4] sm:$0xff] }
 0xd22   :  { %v2906_v31 = vmul.f32 0.5, %v2903_v35  ;;  %v2904_v61 = vadd.f32 %v2893_v16, %v2811_v15 }
 0xd23   :  { %v2911_v55 = vmax.f32 %v2908_v45, 0.0  ;;  %v2916_v43 = vld [vmem:[#allocation4 + $0x8] sm:$0xff] }
 0xd24   :  { %v2909_v22 = vmax.f32 %v2906_v31, 0.0  ;;  %v2907_v18 = vmul.f32 0.5, %v2904_v61  ;;  %v2920_v8 = vpack.c.bf16 %v2916_v43, %v2915_v1 }
 0xd25   :  { %2914 = vst.msk [vmem:[#allocation4 + $0x22] sm:$0x3] %vm1814_vm6, %v2911_v55 }
 0xd26   :  { %2912 = vst.msk [vmem:[#allocation4 + $0x12] sm:$0xff] %vm77_vm0, %v2909_v22  ;;  %v2910_v51 = vmax.f32 %v2907_v18, 0.0  ;;  %6859 = vmatmul.mubr.msk.bf16.vlgmr.msra.gmra.mrb[100].mxu0 %vm77_vm0, %v2920_v8 }
 0xd27   :  { %6862 = vmatprep.mubr.msk.bf16.mxu0 %vm7684_vm2, %v10467_v5 }
 0xd28   :  { %2913 = vst.msk [vmem:[#allocation4 + $0x1a] sm:$0xff] %vm77_vm0, %v2910_v51 }
 0xd2d   :  { %v2917_v23 = vld [vmem:[#allocation4 + $0x10] sm:$0xff] }
 0xd2f   :  { %v2918_v21 = vld [vmem:[#allocation4 + $0x18] sm:$0xff]  ;;  %v2919_v15 = vld [vmem:[#allocation4 + $0x20] sm:$0xf] }
 0xd30   :  { %v2921_v36 = vpack.c.bf16 %v2918_v21, %v2917_v23  ;;  %v2922_v62 = vpack.c.bf16 %v2919_v15, %v2919_v15 }
 0xd32   :  { %6863 = vmatmul.mubr.msk.bf16.gmra.mrb[104].mxu0 %vm77_vm0, %v2921_v36 }
 0xd33   :  { %6866 = vmatprep.mubr.msk.bf16.mxu0 %vm7684_vm2, %v10467_v5 }
 0xd3a   :  { %6867 = vmatmul.mubr.msk.bf16.gmra.mrb[108].mxu0 %vm77_vm0, %v2922_v62 }
 0xd3b   :  { %6929 = vmatprep.mubr.msk.bf16.mxu0 %vm7684_vm2, %v10467_v5 }
 0xdf9   :  { %v2970_v57 = vpop.f32.mrb[100].mxu0 }
 0xdfa   :  { %v6860_v34 = vpop.f32.mrb[101].mxu0 }
 0xdfb   :  { %v2973_v0 = vpop.f32.mrb[102].mxu0 }
 0xdfc   :  { %v2993_v14 = vpack.c.bf16 %v2973_v0, %v2970_v57  ;;  %v6861_v26 = vpop.f32.mrb[103].mxu0 }
 0xdfe   :  { %6870 = vmatprep.subr.bf16.mxu1 %v2993_v14 }
 0xdff   :  { %6871 = vmatpush3.bf16.msra.mxu1 %v2993_v14 }
 0xe05   :  { %v2978_v44 = vpop.f32.mrb[104].mxu0 }
 0xe06   :  { %v2994_v41 = vpack.c.bf16 %v2978_v44, %v2978_v44  ;;  %v6864_v10 = vpop.f32.mrb[105].mxu0  ;;  %v3075_v30 = vrot.slane %v2978_v44, 2 }
 0xe07   :  { %v2981_v47 = vpop.f32.mrb[106].mxu0 }
 0xe08   :  { %v3064_v11 = vpack.c.bf16 %v2981_v47, %v2978_v44  ;;  %v3076_v59 = vrot.slane %v2981_v47, 2  ;;  %v6865_v54 = vpop.f32.mrb[107].mxu0  ;;  %7344 = vmatprep.subr.msk.bf16.mxu1 %vm2755_vm11, %v2994_v41  ;;  %v2996_v19 = vsel %vm2755_vm11, %v2994_v41, 0 }
 0xe09   :  { %6873 = vmatpush3.bf16.msra.mxu1 %v2996_v19 }
 0xe0a   :  { %v3077_v52 = vsel %vm715_vm9, %v3075_v30, %v3076_v59  ;;  %v3068_v25 = vrot.slane %v3064_v11, 1 }
 0xe0c   :  { %6875 = vmatmul.mubr.msk.bf16.vlgmr.msra.gmra.mrb[88].mxu1 %vm2530_vm14, %v9050_v13 }
 0xe0d   :  { %v2986_v33 = vpop.f32.mrb[108].mxu0  ;;  %6882 = vmatprep.mubr.msk.bf16.mxu1 %vm2530_vm14, %v9059_v39  ;;  %v6006_v39 = vld [vmem:[%s10452_s7 + $0x2] sm:$0x1] }
 0xe0e   :  { %v3065_v29 = vpack.c.bf16 %v2986_v33, %v2986_v33  ;;  %v3078_v38 = vrot.slane %v2986_v33, 2  ;;  %v6868_v37 = vpop.f32.mrb[109].mxu0  ;;  %v2992_v61 = vmul.f32 2.0, %v6006_v39 }
 0xe0f   :  { %v2989_v28 = vpop.f32.mrb[110].mxu0 }
 0xe10   :  { %v3069_v35 = vrot.slane %v3065_v29, 1  ;;  %v6869_v16 = vpop.f32.mrb[111].mxu0  ;;  %v3079_v45 = vsel %vm715_vm9, %v3076_v59, %v3078_v38  ;;  %v3050_v55 = vrot.slane %v2992_v61, %v7955_v48 }
 0xe12   :  { %v3070_v31 = vsel %vm2567_vm8, %v3068_v25, %v3069_v35  ;;  %v3084_v13 = vsel %vm2755_vm11, %v3069_v35, 0 }
 0xe13   :  { %6878 = vmatprep.subr.bf16.mxu1 %v3070_v31 }
 0xe14   :  { %6879 = vmatpush3.bf16.msra.mxu1 %v3070_v31  ;;  %v3159_v31 = vld [vmem:[%s10457_s12] sm:$0xff] }
 0xe15   :  { %7345 = vmatprep.subr.msk.bf16.mxu1 %vm2755_vm11, %v3069_v35 }
 0xe18   :  { %6881 = vmatpush3.bf16.msra.mxu1 %v3084_v13 }
 0xe19   :  { %7296 = vmatprep.subr.bf16.mxu1 %v10465_v63 }
 0xe1b   :  { %6883 = vmatmul.mubr.msk.bf16.vlgmr.msra.gmra.mrb[92].mxu1 %vm2530_vm14, %v9061_v49 }
 0xe1c   :  { %6892 = vmatprep.mubr.msk.f32.mxu1 %vm7684_vm2, %v10467_v5 }
 0xedf   :  { %v6876_v1 = vpop.f32.mrb[88].mxu1 }
 0xee0   :  { %v3041_v43 = vadd.f32 %v6876_v1, %v2978_v44  ;;  %v3032_v22 = vpop.f32.mrb[89].mxu1 }
 0xee1   :  { %v3033_v18 = vadd.f32 %v3032_v22, %v2970_v57  ;;  %v6877_v8 = vpop.f32.mrb[90].mxu1 }
 0xee2   :  { %v3054_v51 = vadd.f32 %v3050_v55, %v3041_v43  ;;  %v3035_v23 = vpop.f32.mrb[91].mxu1 }
 0xee3   :  { %v3052_v21 = vadd.f32 %v3050_v55, %v3033_v18  ;;  %v3036_v36 = vadd.f32 %v3035_v23, %v2973_v0  ;;  %v3160_v18 = vld [vmem:[%s10457_s12 + $0x8] sm:$0xff] }
 0xee4   :  { %v3057_v49 = vmul.f32 0.5, %v3054_v51 }
 0xee5   :  { %v3055_v15 = vmul.f32 0.5, %v3052_v21  ;;  %v3053_v62 = vadd.f32 %v3050_v55, %v3036_v36  ;;  %v3161_v21 = vld [vmem:[%s10457_s12 + $0x10] sm:$0xff]  ;;  %v3162_v36 = vld [vmem:[%s10457_s12 + $0x18] sm:$0xff] }
 0xee6   :  { %v3060_v34 = vmax.f32 %v3057_v49, 0.0  ;;  %v3164_v49 = vld [vmem:[%s10457_s12 + $0x28] sm:$0xff] }
 0xee7   :  { %v3058_v14 = vmax.f32 %v3055_v15, 0.0  ;;  %v3056_v26 = vmul.f32 0.5, %v3053_v62  ;;  %v3165_v15 = vld [vmem:[%s10457_s12 + $0x30] sm:$0xff]  ;;  %v3166_v62 = vld [vmem:[%s10457_s12 + $0x38] sm:$0xff] }
 0xee8   :  { %3063 = vst.msk [vmem:[#allocation4 + $0x10] sm:$0x3] %vm1814_vm6, %v3060_v34  ;;  %v3167_v34 = vld [vmem:[%s10457_s12 + $0x40] sm:$0xff] }
 0xee9   :  { %3061 = vst.msk [vmem:[#allocation4] sm:$0xff] %vm77_vm0, %v3058_v14  ;;  %v3059_v41 = vmax.f32 %v3056_v26, 0.0  ;;  %v3168_v14 = vld [vmem:[%s10457_s12 + $0x48] sm:$0xff]  ;;  %v3169_v26 = vld [vmem:[%s10457_s12 + $0x50] sm:$0x3f]  ;;  %s7690_s12 = smov 43  }
 0xeeb   :  { %3062 = vst.msk [vmem:[#allocation4 + $0x8] sm:$0xff] %vm77_vm0, %v3059_v41  ;;  %v9277_v41 = vpop.permute.xlu0 %3183 }
 0xeee   :  { %v6884_v44 = vpop.f32.mrb[92].mxu1 }
 0xeef   :  { %v3129_v57 = vadd.f32 %v6884_v44, %v3078_v38  ;;  %v3120_v10 = vpop.f32.mrb[93].mxu1 }
 0xef0   :  { %v3121_v47 = vadd.f32 %v3120_v10, %v3077_v52  ;;  %v6885_v30 = vpop.f32.mrb[94].mxu1  ;;  %v9145_v19 = vld [vmem:[#allocation4] sm:$0xff] }
 0xef1   :  { %v3136_v11 = vadd.f32 %v3129_v57, %v3050_v55  ;;  %v3123_v0 = vpop.f32.mrb[95].mxu1  ;;  %10495 = vst [vmem:[#allocation9_spill] sm:$0xff] %v9145_v19 }
 0xef2   :  { %v3134_v59 = vadd.f32 %v3121_v47, %v3050_v55  ;;  %v3124_v54 = vadd.f32 %v3123_v0, %v3079_v45  ;;  %v9147_v33 = vld [vmem:[#allocation4 + $0x8] sm:$0xff]  ;;  %v9282_v47 = vpop.permute.xlu1 %3188 }
 0xef3   :  { %10496 = vst [vmem:[#allocation10_spill] sm:$0xff] %v9147_v33  ;;  %v3139_v29 = vmul.f32 0.5, %v3136_v11  ;;  %v7297_v37 = vpack.c.bf16 %v9147_v33, %v9145_v19 }
 0xef4   :  { %v3137_v28 = vmul.f32 0.5, %v3134_v59  ;;  %v3135_v25 = vadd.f32 %v3124_v54, %v3050_v55 }
 0xef5   :  { %v3142_v35 = vmax.f32 %v3139_v29, 0.0  ;;  %7299 = vmatpush3.bf16.xpose.msk.msra.mxu1 %vm8421_vm10, %v7297_v37  ;;  %6926 = vmatpush3.bf16.msra.mxu0 %v7297_v37 }
 0xef6   :  { %v3140_v52 = vmax.f32 %v3137_v28, 0.0  ;;  %v3138_v38 = vmul.f32 0.5, %v3135_v25  ;;  %6890 = vmatprep.subr.mxu1 %v10467_v5  ;;  %6927 = vmatprep.subr.bf16.mxu0 %v10467_v5  ;;  %v9291_v29 = vpop.permute.xlu1 %3193 }
 0xef7   :  { %3145 = vst.msk [vmem:[#allocation4 + $0x22] sm:$0x3] %vm1814_vm6, %v3142_v35 }
 0xef8   :  { %3143 = vst.msk [vmem:[#allocation4 + $0x12] sm:$0xff] %vm77_vm0, %v3140_v52  ;;  %v3141_v16 = vmax.f32 %v3138_v38, 0.0  ;;  %v9298_v52 = vpop.permute.xlu0 %3198 }
 0xefa   :  { %3144 = vst.msk [vmem:[#allocation4 + $0x1a] sm:$0xff] %vm77_vm0, %v3141_v16 }
 0xeff   :  { %v9158_v45 = vld [vmem:[#allocation4 + $0x10] sm:$0xff] }
 0xf00   :  { %10497 = vst [vmem:[#allocation11_spill] sm:$0xff] %v9158_v45  ;;  %6891 = vmatpush3.xpose.msk.msra.mxu1 %vm77_vm0, %v9158_v45  ;;  %v3469_v13 = vpack.c.bf16 %v9158_v45, %v9158_v45  ;;  %v3880_v1 = vrot.slane %v9158_v45, 2 }
 0xf01   :  { %7316 = vmatprep.subr.bf16.mxu1 %v10465_v63  ;;  %v9168_v39 = vld [vmem:[#allocation4 + $0x18] sm:$0xff]  ;;  %v9170_v61 = vld [vmem:[#allocation4 + $0x20] sm:$0xf] }
 0xf02   :  { %10498 = vst [vmem:[#allocation12_spill] sm:$0xff] %v9168_v39  ;;  %10499 = vst [vmem:[#allocation13_spill] sm:$0xff] %v9170_v61  ;;  %v3480_v55 = vsel %vm2755_vm11, %v3469_v13, 0  ;;  %v3881_v43 = vrot.slane %v9168_v39, 2  ;;  %v3883_v22 = vrot.slane %v9170_v61, 2 }
 0xf03   :  { %6893 = vmatmul.mubr.msk.f32.vlgmr.msra.gmra.mrb[62].mxu1 %vm77_vm0, %v3159_v31  ;;  %6928 = vmatpush3.bf16.msra.mxu0 %v3480_v55  ;;  %v9305_v55 = vpop.permute.xlu1 %3203 }
 0xf04   :  { %6895 = vmatprep.mubr.msk.f32.mxu1 %vm7684_vm2, %v10467_v5  ;;  %v3882_v8 = vsel %vm715_vm9, %v3880_v1, %v3881_v43  ;;  %v3884_v51 = vsel %vm715_vm9, %v3881_v43, %v3883_v22  ;;  %7300 = vmatprep.subr.bf16.mxu0 %v10465_v63  ;;  %vm3696_vm9 = vcmask 1041408  }
 0xf05   :  { %v7317_v23 = vpack.c.bf16 %v3884_v51, %v3882_v8  ;;  %v3209_v8 = vpop.permute.xlu0 %3208 }
 0xf07   :  { %6896 = vmatmul.mubr.msk.f32.gmra.mrb[96].mxu1 %vm77_vm0, %v3160_v18 }
 0xf08   :  { %7319 = vmatpush3.bf16.xpose.msk.msra.mxu1 %vm8421_vm10, %v7317_v23  ;;  %6898 = vmatprep.mubr.msk.f32.mxu1 %vm7684_vm2, %v10467_v5  ;;  %vm10508_vm10 = vsmask.f32 6400 }
 0xf09   :  { %6981 = vmatprep.subr.mxu1 %v10467_v5 }
 0xf0b   :  { %6899 = vmatmul.mubr.msk.f32.gmra.mrb[98].mxu1 %vm77_vm0, %v3161_v21 }
 0xf0c   :  { %6901 = vmatprep.mubr.msk.f32.mxu1 %vm7684_vm2, %v10467_v5 }
 0xf0f   :  { %6902 = vmatmul.mubr.msk.f32.gmra.mrb[100].mxu1 %vm77_vm0, %v3162_v36 }
 0xf10   :  { %6982 = vmatpush3.xpose.msk.msra.mxu1 %vm77_vm0, %v3883_v22  ;;  %6904 = vmatprep.mubr.msk.f32.mxu1 %vm7684_vm2, %v10467_v5 }
 0xf13   :  { %6905 = vmatmul.mubr.msk.f32.gmra.mrb[102].mxu1 %vm77_vm0, %v3163_v50 }
 0xf14   :  { %6907 = vmatprep.mubr.msk.f32.mxu1 %vm7684_vm2, %v10467_v5 }
 0xf17   :  { %6908 = vmatmul.mubr.msk.f32.gmra.mrb[104].mxu1 %vm77_vm0, %v3164_v49 }
 0xf18   :  { %6910 = vmatprep.mubr.msk.f32.mxu1 %vm7684_vm2, %v10467_v5 }
 0xf1b   :  { %6911 = vmatmul.mubr.msk.f32.gmra.mrb[106].mxu1 %vm77_vm0, %v3165_v15 }
 0xf1c   :  { %6913 = vmatprep.mubr.msk.f32.mxu1 %vm7684_vm2, %v10467_v5 }
 0xf1f   :  { %6914 = vmatmul.mubr.msk.f32.gmra.mrb[108].mxu1 %vm77_vm0, %v3166_v62 }
 0xf20   :  { %6916 = vmatprep.mubr.msk.f32.mxu1 %vm7684_vm2, %v10467_v5 }
 0xf23   :  { %6917 = vmatmul.mubr.msk.f32.gmra.mrb[110].mxu1 %vm77_vm0, %v3167_v34 }
 0xf24   :  { %6919 = vmatprep.mubr.msk.f32.mxu1 %vm7684_vm2, %v10467_v5 }
 0xf27   :  { %6920 = vmatmul.mubr.msk.f32.gmra.mrb[112].mxu1 %vm77_vm0, %v3168_v14 }
 0xf28   :  { %6922 = vmatprep.mubr.msk.f32.mxu1 %vm7684_vm2, %v10467_v5 }
 0xf2b   :  { %6923 = vmatmul.mubr.msk.f32.gmra.mrb[114].mxu1 %vm77_vm0, %v3169_v26 }
 0xf2c   :  { %6983 = vmatprep.mubr.msk.f32.mxu1 %vm7684_vm2, %v10467_v5 }
 0xf2f   :  { %6984 = vmatmul.mubr.msk.f32.vlgmr.msra.gmra.mrb[116].mxu1 %vm77_vm0, %v3159_v31 }
 0xf30   :  { %6986 = vmatprep.mubr.msk.f32.mxu1 %vm7684_vm2, %v10467_v5 }
 0xf33   :  { %6987 = vmatmul.mubr.msk.f32.gmra.mrb[118].mxu1 %vm77_vm0, %v3160_v18 }
 0xf34   :  { %6989 = vmatprep.mubr.msk.f32.mxu1 %vm7684_vm2, %v10467_v5 }
 0xf37   :  { %6990 = vmatmul.mubr.msk.f32.gmra.mrb[120].mxu1 %vm77_vm0, %v3161_v21 }
 0xf38   :  { %6992 = vmatprep.mubr.msk.f32.mxu1 %vm7684_vm2, %v10467_v5 }
 0xf3b   :  { %6993 = vmatmul.mubr.msk.f32.gmra.mrb[122].mxu1 %vm77_vm0, %v3162_v36 }
 0xf3c   :  { %6995 = vmatprep.mubr.msk.f32.mxu1 %vm7684_vm2, %v10467_v5 }
 0xf3f   :  { %6996 = vmatmul.mubr.msk.f32.gmra.mrb[124].mxu1 %vm77_vm0, %v3163_v50 }
 0xf40   :  { %6998 = vmatprep.mubr.msk.f32.mxu1 %vm7684_vm2, %v10467_v5 }
 0xf43   :  { %6999 = vmatmul.mubr.msk.f32.gmra.mrb[126].mxu1 %vm77_vm0, %v3164_v49 }
 0xf44   :  { %7001 = vmatprep.mubr.msk.f32.mxu1 %vm7684_vm2, %v10467_v5 }
 0xf47   :  { %7002 = vmatmul.mubr.msk.f32.gmra.mrb[128].mxu1 %vm77_vm0, %v3165_v15 }
 0xf48   :  { %7004 = vmatprep.mubr.msk.f32.mxu1 %vm7684_vm2, %v10467_v5 }
 0xf4b   :  { %7005 = vmatmul.mubr.msk.f32.gmra.mrb[130].mxu1 %vm77_vm0, %v3166_v62 }
 0xf4c   :  { %7007 = vmatprep.mubr.msk.f32.mxu1 %vm7684_vm2, %v10467_v5 }
 0xf4f   :  { %7008 = vmatmul.mubr.msk.f32.gmra.mrb[132].mxu1 %vm77_vm0, %v3167_v34 }
 0xf50   :  { %7010 = vmatprep.mubr.msk.f32.mxu1 %vm7684_vm2, %v10467_v5 }
 0xf53   :  { %7011 = vmatmul.mubr.msk.f32.gmra.mrb[134].mxu1 %vm77_vm0, %v3168_v14 }
 0xf54   :  { %7013 = vmatprep.mubr.msk.f32.mxu1 %vm7684_vm2, %v10467_v5 }
 0xf57   :  { %7014 = vmatmul.mubr.msk.f32.gmra.mrb[136].mxu1 %vm77_vm0, %v3169_v26 }
 0xfd6   :  { %v3344_v44 = vpop.f32.mrb[62].mxu1 }
 0xfd7   :  { %v9280_v57 = vadd.f32 %v3344_v44, %v9277_v41  ;;  %v6894_v10 = vpop.f32.mrb[63].mxu1 }
 0xfd8   :  { %v3177_v10 = vld [vmem:[%s10458_s13 + $0x38] sm:$0xff] }
 0xfd9   :  { %v3398_v30 = vsel %vm2530_vm14, %v9280_v57, -inf }
 0xfda   :  { %3399 = vmax.xlane.f32.xlu1 %v3398_v30  ;;  %v3349_v11 = vpop.f32.mrb[96].mxu1  ;;  %v3176_v30 = vld [vmem:[%s10458_s13 + $0x30] sm:$0xff] }
 0xfdb   :  { %v9287_v0 = vadd.f32 %v3349_v11, %v9282_v47  ;;  %v6897_v59 = vpop.f32.mrb[97].mxu1 }
 0xfdd   :  { %v3401_v54 = vsel %vm2530_vm14, %v9287_v0, -inf }
 0xfde   :  { %3402 = vmax.xlane.f32.xlu0 %v3401_v54  ;;  %v3354_v37 = vpop.f32.mrb[98].mxu1  ;;  %v3178_v54 = vld [vmem:[%s10458_s13 + $0x40] sm:$0xff] }
 0xfdf   :  { %v9294_v28 = vadd.f32 %v3354_v37, %v9291_v29  ;;  %v6900_v25 = vpop.f32.mrb[99].mxu1  ;;  %v3179_v37 = vld [vmem:[%s10458_s13 + $0x48] sm:$0xff] }
 0xfe1   :  { %v3404_v35 = vsel %vm2530_vm14, %v9294_v28, -inf }
 0xfe2   :  { %3405 = vmax.xlane.f32.xlu0 %v3404_v35  ;;  %v3359_v38 = vpop.f32.mrb[100].mxu1 }
 0xfe3   :  { %v9301_v16 = vadd.f32 %v3359_v38, %v9298_v52  ;;  %v6903_v31 = vpop.f32.mrb[101].mxu1 }
 0xfe5   :  { %v3407_v13 = vsel %vm2530_vm14, %v9301_v16, -inf }
 0xfe6   :  { %3408 = vmax.xlane.f32.xlu1 %v3407_v13  ;;  %v3364_v1 = vpop.f32.mrb[102].mxu1 }
 0xfe7   :  { %v9308_v43 = vadd.f32 %v3364_v1, %v9305_v55  ;;  %v6906_v22 = vpop.f32.mrb[103].mxu1 }
 0xfe9   :  { %v3410_v18 = vsel %vm2530_vm14, %v9308_v43, -inf }
 0xfea   :  { %3411 = vmax.xlane.f32.xlu0 %v3410_v18  ;;  %v3369_v51 = vpop.f32.mrb[104].mxu1 }
 0xfeb   :  { %v9312_v23 = vadd.f32 %v3369_v51, %v3209_v8  ;;  %v6909_v21 = vpop.f32.mrb[105].mxu1 }
 0xfed   :  { %v3414_v36 = vsel %vm3413_vm3, %v9312_v23, -inf }
 0xfee   :  { %3415 = vmax.xlane.f32.xlu1 %v3414_v36  ;;  %v9316_v50 = vpop.f32.mrb[106].mxu1 }
 0xfef   :  { %v6912_v49 = vpop.f32.mrb[107].mxu1 }
 0xff2   :  { %v9318_v15 = vpop.f32.mrb[108].mxu1 }
 0xff3   :  { %v6915_v62 = vpop.f32.mrb[109].mxu1 }
 0xff6   :  { %v9320_v34 = vpop.f32.mrb[110].mxu1 }
 0xff7   :  { %v6918_v14 = vpop.f32.mrb[111].mxu1 }
 0xffa   :  { %v9322_v26 = vpop.f32.mrb[112].mxu1 }
 0xffb   :  { %v6921_v44 = vpop.f32.mrb[113].mxu1 }
 0xffe   :  { %v9330_v11 = vpop.f32.mrb[114].mxu1 }
 0xfff   :  { %3218 = vperm.xlu1 %7360, %v3177_v10   ;;  %v6924_v59 = vpop.f32.mrb[115].mxu1 }
0x1000   :  { %3213 = vperm.xlu0 %7359, %v3176_v30  }
0x1002   :  { %v9338_v25 = vpop.f32.mrb[116].mxu1 }
0x1003   :  { %3223 = vperm.xlu1 %7360, %v3178_v54   ;;  %v6985_v35 = vpop.f32.mrb[117].mxu1 }
0x1004   :  { %3228 = vperm.xlu0 %7359, %v3179_v37  }
0x1006   :  { %v9340_v38 = vpop.f32.mrb[118].mxu1 }
0x1007   :  { %v6988_v31 = vpop.f32.mrb[119].mxu1 }
0x100a   :  { %v9342_v13 = vpop.f32.mrb[120].mxu1 }
0x100b   :  { %v6991_v1 = vpop.f32.mrb[121].mxu1 }
0x100e   :  { %v9344_v22 = vpop.f32.mrb[122].mxu1 }
0x100f   :  { %v6994_v18 = vpop.f32.mrb[123].mxu1 }
0x1012   :  { %v9346_v51 = vpop.f32.mrb[124].mxu1 }
0x1013   :  { %v6997_v21 = vpop.f32.mrb[125].mxu1 }
0x1016   :  { %v3982_v36 = vpop.f32.mrb[126].mxu1 }
0x1017   :  { %v7000_v49 = vpop.f32.mrb[127].mxu1  ;;  %v9358_v5 = vadd.f32 %v3982_v36, %v3209_v8 }
0x101a   :  { %v3987_v62 = vpop.f32.mrb[128].mxu1 }
0x101b   :  { %v7003_v14 = vpop.f32.mrb[129].mxu1 }
0x101e   :  { %v9348_v44 = vpop.f32.mrb[130].mxu1 }
0x101f   :  { %v7006_v10 = vpop.f32.mrb[131].mxu1 }
0x1022   :  { %v9350_v30 = vpop.f32.mrb[132].mxu1 }
0x1023   :  { %v7009_v59 = vpop.f32.mrb[133].mxu1 }
0x1026   :  { %v9352_v54 = vpop.f32.mrb[134].mxu1 }
0x1027   :  { %v7012_v37 = vpop.f32.mrb[135].mxu1 }
0x1067   :  { %v3400_v35 = vpop.xlane.xlu1 %3399 }
0x1068   :  { %v3417_v31 = vsub.f32 %v9280_v57, %v3400_v35 }
0x106a   :  { %v3423_v1 = vmul.f32 1.442695, %v3417_v31 }
0x106b   :  { %v3403_v18 = vpop.xlane.xlu0 %3402 }
0x106c   :  { %7481 = vpow2.f32 %v3423_v1  ;;  %v3418_v21 = vsub.f32 %v9287_v0, %v3403_v18 }
0x106e   :  { %v3425_v49 = vmul.f32 1.442695, %v3418_v21 }
0x106f   :  { %v3406_v20 = vpop.xlane.xlu0 %3405 }
0x1070   :  { %7483 = vpow2.f32 %v3425_v49  ;;  %v3419_v14 = vsub.f32 %v9294_v28, %v3406_v20  ;;  %v6082_v20 = vmul.f32 -1000.0, %v9358_v5 }
0x1072   :  { %v3427_v10 = vmul.f32 1.442695, %v3419_v14  ;;  %v4169_v8 = vmul.f32 1.442695, %v6082_v20 }
0x1073   :  { %v3409_v63 = vpop.xlane.xlu1 %3408 }
0x1074   :  { %7485 = vpow2.f32 %v3427_v10  ;;  %v3420_v59 = vsub.f32 %v9301_v16, %v3409_v63 }
0x1076   :  { %v9360_v37 = vpop.eup %7481  ;;  %v3429_v57 = vmul.f32 1.442695, %v3420_v59 }
0x1077   :  { %v3412_v35 = vpop.xlane.xlu0 %3411  ;;  %v3435_v31 = vsel %vm2530_vm14, %v9360_v37, 0.0 }
0x1078   :  { %7487 = vpow2.f32 %v3429_v57  ;;  %v3421_v0 = vsub.f32 %v9308_v43, %v3412_v35  ;;  %3436 = vadd.xlane.f32.xlu1 %v3435_v31 }
0x107a   :  { %v9366_v28 = vpop.eup %7483  ;;  %v3431_v1 = vmul.f32 1.442695, %v3421_v0 }
0x107b   :  { %v3416_v18 = vpop.xlane.xlu1 %3415  ;;  %v3438_v63 = vsel %vm2530_vm14, %v9366_v28, 0.0 }
0x107c   :  { %7489 = vpow2.f32 %v3431_v1  ;;  %v3422_v16 = vsub.f32 %v9312_v23, %v3416_v18  ;;  %3439 = vadd.xlane.f32.xlu0 %v3438_v63  ;;  %v9390_v18 = vadd.f32 %v9338_v25, %v9277_v41  ;;  %v9403_v41 = vadd.f32 %v9344_v22, %v9298_v52 }
0x107e   :  { %v9371_v36 = vpop.eup %7485  ;;  %v3433_v21 = vmul.f32 1.442695, %v3422_v16  ;;  %v3180_v16 = vld [vmem:[%s10458_s13 + $0x50] sm:$0x3f] }
0x107f   :  { %v3214_v49 = vpop.permute.xlu0 %3213  ;;  %v3441_v43 = vsel %vm2530_vm14, %v9371_v36, 0.0 }
0x1080   :  { %7491 = vpow2.f32 %v3433_v21  ;;  %v3375_v14 = vadd.f32 %v9316_v50, %v3214_v49  ;;  %v3988_v10 = vadd.f32 %v3987_v62, %v3214_v49  ;;  %3442 = vadd.xlane.f32.xlu1 %v3441_v43  ;;  %v4011_v21 = vsel %vm2530_vm14, %v9390_v18, -inf }
0x1081   :  { %7493 = vpow2.f32 %v4169_v8  ;;  %v9397_v8 = vadd.f32 %v9340_v38, %v9282_v47  ;;  %v9411_v38 = vadd.f32 %v9346_v51, %v9305_v55  ;;  %v4026_v55 = vsel %vm3413_vm3, %v9358_v5, -inf }
0x1082   :  { %v9376_v59 = vpop.eup %7487  ;;  %v6083_v57 = vmul.f32 -1000.0, %v3988_v10  ;;  %v9407_v10 = vpop.f32.mrb[136].mxu1 }
0x1083   :  { %v3444_v35 = vsel %vm2530_vm14, %v9376_v59, 0.0  ;;  %v4014_v25 = vsel %vm2530_vm14, %v9397_v8, -inf  ;;  %v7015_v47 = vpop.f32.mrb[137].mxu1  ;;  %v4023_v52 = vsel %vm2530_vm14, %v9411_v38, -inf }
0x1084   :  { %v4171_v31 = vmul.f32 1.442695, %v6083_v57  ;;  %3445 = vadd.xlane.f32.xlu1 %v3444_v35  ;;  %v4020_v57 = vsel %vm2530_vm14, %v9403_v41, -inf }
0x1086   :  { %v9380_v0 = vpop.eup %7489  ;;  %7495 = vpow2.f32 %v4171_v31 }
0x1087   :  { %v3447_v20 = vsel %vm2530_vm14, %v9380_v0, 0.0 }
0x1088   :  { %3448 = vadd.xlane.f32.xlu1 %v3447_v20 }
0x108a   :  { %v9384_v1 = vpop.eup %7491 }
0x108b   :  { %v7494_v50 = vpop.eup %7493  ;;  %v3450_v62 = vsel %vm3413_vm3, %v9384_v1, 0.0 }
0x108c   :  { %3451 = vadd.xlane.f32.xlu1 %v3450_v62  ;;  %v4181_v63 = vadd.f32 1.0, %v7494_v50  ;;  %v9434_v50 = vadd.f32 %v9342_v13, %v9291_v29 }
0x108e   :  { %7497 = vrcp.f32 %v4181_v63  ;;  %v4017_v62 = vsel %vm2530_vm14, %v9434_v50, -inf  ;;  %v9438_v63 = vpop.permute.xlu1 %3218 }
0x1090   :  { %v7496_v49 = vpop.eup %7495  ;;  %4012 = vmax.xlane.f32.xlu1 %v4011_v21  ;;  %v6044_v21 = vmul.f32 -1000.0, %v3375_v14 }
0x1091   :  { %v4182_v43 = vadd.f32 1.0, %v7496_v49 }
0x1092   :  { %3233 = vperm.xlu0 %7359, %v3180_v16   ;;  %v3380_v16 = vadd.f32 %v9318_v15, %v9438_v63  ;;  %v9445_v47 = vpop.permute.xlu1 %3223 }
0x1093   :  { %7499 = vrcp.f32 %v4182_v43  ;;  %v9442_v43 = vpop.permute.xlu0 %3228 }
0x1094   :  { %4015 = vmax.xlane.f32.xlu1 %v4014_v25  ;;  %v6045_v49 = vmul.f32 -1000.0, %v3380_v16  ;;  %v6043_v25 = vmul.f32 -1000.0, %v9312_v23  ;;  %v3390_v29 = vadd.f32 %v9322_v26, %v9442_v43 }
0x1096   :  { %v3555_v13 = vmul.f32 1.442695, %v6045_v49 }
0x1098   :  { %4021 = vmax.xlane.f32.xlu1 %v4020_v57  ;;  %v9415_v35 = vpop.eup %7497  ;;  %v3553_v57 = vmul.f32 1.442695, %v6044_v21 }
0x1099   :  { %10500 = vst [vmem:[#allocation14_spill] sm:$0xff] %v9415_v35  ;;  %v4205_v31 = vrot.slane %v9415_v35, 3 }
0x109a   :  { %7501 = vpow2.f32 %v3553_v57 }
0x109b   :  { %7503 = vpow2.f32 %v3555_v13 }
0x109c   :  { %4024 = vmax.xlane.f32.xlu1 %v4023_v52  ;;  %v3385_v52 = vadd.f32 %v9320_v34, %v9445_v47 }
0x109d   :  { %v9419_v22 = vpop.eup %7499 }
0x109e   :  { %v10469_v20 = vrot.slane %v9419_v22, 3  ;;  %v6046_v15 = vmul.f32 -1000.0, %v3385_v52 }
0x10a0   :  { %4027 = vmax.xlane.f32.xlu1 %v4026_v55  ;;  %v9428_v51 = vsel %vm525_vm7, %v4205_v31, %v10469_v20  ;;  %v3551_v31 = vmul.f32 1.442695, %v6043_v25  ;;  %v6047_v55 = vmul.f32 -1000.0, %v3390_v29 }
0x10a1   :  { %7059 = vmatprep.mubr.msk.f32.mxu1 %vm2530_vm14, %v9428_v51 }
0x10a2   :  { %7505 = vpow2.f32 %v3551_v31  ;;  %v3559_v14 = vmul.f32 1.442695, %v6047_v55 }
0x10a4   :  { %7507 = vpow2.f32 %v3559_v14  ;;  %v7502_v23 = vpop.eup %7501 }
0x10a5   :  { %v7504_v16 = vpop.eup %7503  ;;  %v3564_v20 = vadd.f32 1.0, %v7502_v23 }
0x10a6   :  { %v3565_v33 = vadd.f32 1.0, %v7504_v16 }
0x10ac   :  { %v7506_v21 = vpop.eup %7505 }
0x10ad   :  { %v3563_v26 = vadd.f32 1.0, %v7506_v21 }
0x10ae   :  { %v7508_v49 = vpop.eup %7507 }
0x10af   :  { %v3567_v57 = vadd.f32 1.0, %v7508_v49 }
0x10b1   :  { %4018 = vmax.xlane.f32.xlu0 %v4017_v62  ;;  %v3557_v62 = vmul.f32 1.442695, %v6046_v15 }
0x10b3   :  { %7509 = vpow2.f32 %v3557_v62 }
0x10b4   :  { %7511 = vrcp.f32 %v3564_v20 }
0x10b5   :  { %7513 = vrcp.f32 %v3565_v33 }
0x10b6   :  { %7515 = vrcp.f32 %v3563_v26 }
0x10bd   :  { %v7510_v34 = vpop.eup %7509 }
0x10be   :  { %v3566_v29 = vadd.f32 1.0, %v7510_v34  ;;  %v9451_v52 = vpop.eup %7511 }
0x10bf   :  { %v9453_v55 = vpop.eup %7513  ;;  %v3588_v23 = vrot.slane %v9451_v52, 3 }
0x10c0   :  { %v9455_v15 = vpop.eup %7515  ;;  %v3590_v16 = vrot.slane %v9453_v55, 3 }
0x10c1   :  { %v3587_v49 = vrot.slane %v9455_v15, 3 }
0x1105   :  { %v3437_v25 = vpop.xlane.xlu1 %3436 }
0x1106   :  { %7517 = vrcp.f32 %v3437_v25 }
0x1109   :  { %v3440_v13 = vpop.xlane.xlu0 %3439 }
0x110a   :  { %7519 = vrcp.f32 %v3440_v13  ;;  %v9473_v13 = vsel %vm525_vm7, %v3588_v23, %v3590_v16 }
0x110b   :  { %7521 = vrcp.f32 %v3567_v57 }
0x110c   :  { %7523 = vrcp.f32 %v3566_v29  ;;  %v9470_v29 = vsel %vm525_vm7, %v3587_v49, %v3588_v23 }
0x110d   :  { %v3443_v31 = vpop.xlane.xlu1 %3442 }
0x110e   :  { %7525 = vrcp.f32 %v3443_v31 }
0x1110   :  { %v7518_v20 = vpop.eup %7517 }
0x1111   :  { %v3454_v33 = vmul.f32 %v7518_v20, %v9360_v37  ;;  %v3234_v14 = vpop.permute.xlu0 %3233  ;;  %v3446_v62 = vpop.xlane.xlu1 %3445 }
0x1112   :  { %v3395_v21 = vadd.f32 %v9330_v11, %v3234_v14  ;;  %7527 = vrcp.f32 %v3446_v62  ;;  %v9462_v26 = vadd.f32 %v9407_v10, %v3234_v14  ;;  %v7301_v62 = vpack.c.bf16 %v9473_v13, %v9470_v29 }
0x1113   :  { %3813 = vst.msk [vmem:[#allocation5 + $0x2b] sm:$0xff] %vm2530_vm14, %v3454_v33 }
0x1114   :  { %v7520_v34 = vpop.eup %7519  ;;  %v6048_v25 = vmul.f32 -1000.0, %v3395_v21 }
0x1115   :  { %v9466_v57 = vpop.eup %7521  ;;  %v3456_v37 = vmul.f32 %v7520_v34, %v9366_v28  ;;  %v3449_v31 = vpop.xlane.xlu1 %3448  ;;  %v10503_v34 = vmov 0.0  }
0x1116   :  { %v9475_v11 = vpop.eup %7523  ;;  %v3561_v10 = vmul.f32 1.442695, %v6048_v25  ;;  %7529 = vrcp.f32 %v3449_v31  ;;  %v3594_v21 = vrot.slane %v9466_v57, 3  ;;  %v10504_v25 = vmov 0.0|0.0  }
0x1117   :  { %v3465_v20 = vpack.c.bf16 %v3456_v37, %v3454_v33  ;;  %3814 = vst.msk [vmem:[#allocation5 + $0x33] sm:$0xff] %vm2530_vm14, %v3456_v37  ;;  %v3592_v33 = vrot.slane %v9475_v11, 3 }
0x1118   :  { %v7526_v28 = vpop.eup %7525  ;;  %7531 = vpow2.f32 %v3561_v10 }
0x1119   :  { %6930 = vmatmul.mubr.msk.bf16.vlgmr.msra.gmra.mrb[112].mxu0 %vm2530_vm14, %v3465_v20  ;;  %v3458_v23 = vmul.f32 %v7526_v28, %v9371_v36  ;;  %v3452_v49 = vpop.xlane.xlu1 %3451  ;;  %v9498_v36 = vsel %vm525_vm7, %v3590_v16, %v3592_v33  ;;  %v9501_v31 = vsel %vm525_vm7, %v3592_v33, %v3594_v21 }
0x111a   :  { %7303 = vmatpush3.bf16.xpose.msk.msra.mxu0 %vm9480_vm5, %v7301_v62  ;;  %6933 = vmatprep.mubr.msk.bf16.mxu0 %vm7684_vm2, %v10503_v34  ;;  %7533 = vrcp.f32 %v3452_v49  ;;  %v7305_v49 = vpack.c.bf16 %v9501_v31, %v9498_v36 }
0x111b   :  { %7304 = vmatprep.subr.bf16.mxu0 %v10504_v25  ;;  %3815 = vst.msk [vmem:[#allocation5 + $0x3b] sm:$0xff] %vm2530_vm14, %v3458_v23 }
0x111c   :  { %v7528_v37 = vpop.eup %7527 }
0x111d   :  { %v3460_v10 = vmul.f32 %v7528_v37, %v9376_v59  ;;  %v4013_v20 = vpop.xlane.xlu1 %4012 }
0x111e   :  { %v4029_v28 = vsub.f32 %v9390_v18, %v4013_v20 }
0x111f   :  { %v3466_v62 = vpack.c.bf16 %v3460_v10, %v3458_v23  ;;  %3816 = vst.msk [vmem:[#allocation5 + $0x43] sm:$0xff] %vm2530_vm14, %v3460_v10 }
0x1120   :  { %v7530_v19 = vpop.eup %7529  ;;  %v4035_v35 = vmul.f32 1.442695, %v4029_v28 }
0x1121   :  { %6934 = vmatmul.mubr.msk.bf16.gmra.mrb[116].mxu0 %vm2530_vm14, %v3466_v62  ;;  %v4016_v16 = vpop.xlane.xlu1 %4015  ;;  %v3462_v18 = vmul.f32 %v7530_v19, %v9380_v0 }
0x1122   :  { %v7532_v59 = vpop.eup %7531  ;;  %7307 = vmatpush3.bf16.xpose.msk.msra.mxu0 %vm9480_vm5, %v7305_v49  ;;  %6937 = vmatprep.mubr.msk.bf16.mxu0 %vm7684_vm2, %v10503_v34  ;;  %7535 = vpow2.f32 %v4035_v35  ;;  %v4030_v33 = vsub.f32 %v9397_v8, %v4016_v16 }
0x1123   :  { %v3568_v23 = vadd.f32 1.0, %v7532_v59  ;;  %7308 = vmatprep.subr.bf16.mxu0 %v10504_v25  ;;  %3817 = vst.msk [vmem:[#allocation5 + $0x4b] sm:$0xff] %vm2530_vm14, %v3462_v18 }
0x1124   :  { %v7534_v37 = vpop.eup %7533  ;;  %v4037_v10 = vmul.f32 1.442695, %v4030_v33 }
0x1125   :  { %7537 = vrcp.f32 %v3568_v23  ;;  %v4022_v20 = vpop.xlane.xlu1 %4021  ;;  %v3464_v28 = vmul.f32 %v7534_v37, %v9384_v1 }
0x1126   :  { %7539 = vpow2.f32 %v4037_v10  ;;  %v4032_v10 = vsub.f32 %v9403_v41, %v4022_v20 }
0x1127   :  { %v3467_v62 = vpack.c.bf16 %v3464_v28, %v3462_v18  ;;  %3818 = vst.msk [vmem:[#allocation5 + $0x53] sm:$0x7] %vm3413_vm3, %v3464_v28 }
0x1129   :  { %6938 = vmatmul.mubr.msk.bf16.gmra.mrb[120].mxu0 %vm2530_vm14, %v3467_v62  ;;  %v4025_v19 = vpop.xlane.xlu1 %4024 }
0x112a   :  { %v4033_v0 = vsub.f32 %v9411_v38, %v4025_v19  ;;  %6953 = vmatprep.mubr.msk.f32.mxu0 %vm7684_vm2, %v10503_v34  ;;  %v4041_v19 = vmul.f32 1.442695, %v4032_v10 }
0x112c   :  { %v7536_v8 = vpop.eup %7535  ;;  %v4043_v35 = vmul.f32 1.442695, %v4033_v0 }
0x112d   :  { %v4047_v49 = vsel %vm2530_vm14, %v7536_v8, 0.0 }
0x112e   :  { %7541 = vpow2.f32 %v4043_v35  ;;  %4048 = vadd.xlane.f32.xlu1 %v4047_v49 }
0x112f   :  { %v9523_v59 = vpop.eup %7537 }
0x1130   :  { %v9526_v1 = vrot.slane %v9523_v59, 3  ;;  %v7540_v16 = vpop.eup %7539 }
0x1131   :  { %v4050_v18 = vsel %vm2530_vm14, %v7540_v16, 0.0 }
0x1132   :  { %v9531_v38 = vsel %vm525_vm7, %v3594_v21, %v9526_v1  ;;  %4051 = vadd.xlane.f32.xlu1 %v4050_v18  ;;  %v4028_v21 = vpop.xlane.xlu1 %4027 }
0x1133   :  { %v7309_v23 = vpack.c.bf16 %v9526_v1, %v9531_v38  ;;  %v4034_v0 = vsub.f32 %v9358_v5, %v4028_v21 }
0x1135   :  { %7311 = vmatpush3.bf16.xpose.msk.msra.mxu0 %vm9480_vm5, %v7309_v23  ;;  %v4045_v41 = vmul.f32 1.442695, %v4034_v0 }
0x1138   :  { %v7542_v33 = vpop.eup %7541 }
0x1139   :  { %v4059_v37 = vsel %vm2530_vm14, %v7542_v33, 0.0 }
0x113a   :  { %4060 = vadd.xlane.f32.xlu0 %v4059_v37 }
0x113c   :  { %6954 = vmatmul.mubr.msk.f32.vlgmr.msra.gmra.mrb[82].mxu0 %vm2530_vm14, %v8946_v40 }
0x113d   :  { %6956 = vmatprep.mubr.msk.f32.mxu0 %vm7684_vm2, %v10503_v34 }
0x113e   :  { %v4019_v28 = vpop.xlane.xlu0 %4018 }
0x113f   :  { %v4031_v62 = vsub.f32 %v9434_v50, %v4019_v28 }
0x1140   :  { %6957 = vmatmul.mubr.msk.f32.gmra.mrb[124].mxu0 %vm2530_vm14, %v8949_v12 }
0x1141   :  { %v4039_v35 = vmul.f32 1.442695, %v4031_v62  ;;  %6959 = vmatprep.mubr.msk.f32.mxu0 %vm7684_vm2, %v10503_v34 }
0x1143   :  { %7543 = vpow2.f32 %v4039_v35 }
0x1144   :  { %6960 = vmatmul.mubr.msk.f32.gmra.mrb[126].mxu0 %vm2530_vm14, %v8998_v9  ;;  %7545 = vpow2.f32 %v4041_v19 }
0x1145   :  { %6968 = vmatprep.mubr.msk.f32.mxu0 %vm2530_vm14, %v9470_v29  ;;  %7547 = vpow2.f32 %v4045_v41 }
0x114d   :  { %v7544_v50 = vpop.eup %7543 }
0x114e   :  { %v4053_v20 = vsel %vm2530_vm14, %v7544_v50, 0.0  ;;  %v7546_v49 = vpop.eup %7545 }
0x114f   :  { %4054 = vadd.xlane.f32.xlu1 %v4053_v20  ;;  %v4056_v5 = vsel %vm2530_vm14, %v7546_v49, 0.0  ;;  %v7548_v18 = vpop.eup %7547 }
0x1150   :  { %v4062_v23 = vsel %vm3413_vm3, %v7548_v18, 0.0 }
0x1153   :  { %4057 = vadd.xlane.f32.xlu1 %v4056_v5 }
0x1157   :  { %4063 = vadd.xlane.f32.xlu1 %v4062_v23 }
0x11bb   :  { %v4049_v37 = vpop.xlane.xlu1 %4048 }
0x11bc   :  { %7549 = vrcp.f32 %v4049_v37 }
0x11bf   :  { %v4052_v10 = vpop.xlane.xlu1 %4051 }
0x11c0   :  { %7551 = vrcp.f32 %v4052_v10 }
0x11c6   :  { %v7550_v21 = vpop.eup %7549 }
0x11c7   :  { %v9556_v28 = vmul.f32 %v7550_v21, %v7536_v8  ;;  %v4061_v29 = vpop.xlane.xlu0 %4060 }
0x11c8   :  { %7553 = vrcp.f32 %v4061_v29 }
0x11c9   :  { %4430 = vst.msk [vmem:[#allocation5 + $0xab] sm:$0xff] %vm2530_vm14, %v9556_v28 }
0x11ca   :  { %v7552_v62 = vpop.eup %7551 }
0x11cb   :  { %v9560_v19 = vmul.f32 %v7552_v62, %v7540_v16 }
0x11cd   :  { %v4077_v0 = vpack.c.bf16 %v9560_v19, %v9556_v28  ;;  %4431 = vst.msk [vmem:[#allocation5 + $0xb3] sm:$0xff] %vm2530_vm14, %v9560_v19 }
0x11d2   :  { %v7554_v35 = vpop.eup %7553 }
0x11d3   :  { %v9566_v41 = vmul.f32 %v7554_v35, %v7542_v33 }
0x11d5   :  { %4434 = vst.msk [vmem:[#allocation5 + $0xcb] sm:$0xff] %vm2530_vm14, %v9566_v41 }
0x11dc   :  { %v4055_v8 = vpop.xlane.xlu1 %4054 }
0x11dd   :  { %7555 = vrcp.f32 %v4055_v8 }
0x11e0   :  { %v4058_v20 = vpop.xlane.xlu1 %4057 }
0x11e1   :  { %7557 = vrcp.f32 %v4058_v20 }
0x11e4   :  { %v4064_v5 = vpop.xlane.xlu1 %4063 }
0x11e5   :  { %7559 = vrcp.f32 %v4064_v5 }
0x11e7   :  { %v7556_v16 = vpop.eup %7555 }
0x11e8   :  { %v9570_v23 = vmul.f32 %v7556_v16, %v7544_v50 }
0x11ea   :  { %4432 = vst.msk [vmem:[#allocation5 + $0xbb] sm:$0xff] %vm2530_vm14, %v9570_v23 }
0x11eb   :  { %v7558_v37 = vpop.eup %7557 }
0x11ec   :  { %v3516_v10 = vpop.f32.mrb[112].mxu0  ;;  %v9574_v21 = vmul.f32 %v7558_v37, %v7546_v49  ;;  %v3993_v37 = vadd.f32 %v9348_v44, %v9438_v63 }
0x11ed   :  { %3807 = vst.msk [vmem:[#allocation3] sm:$0xff] %vm77_vm0, %v3516_v10  ;;  %v6931_v33 = vpop.f32.mrb[113].mxu0 }
0x11ee   :  { %v3519_v29 = vpop.f32.mrb[114].mxu0  ;;  %v4078_v62 = vpack.c.bf16 %v9574_v21, %v9570_v23  ;;  %4433 = vst.msk [vmem:[#allocation5 + $0xc3] sm:$0xff] %vm2530_vm14, %v9574_v21  ;;  %v6084_v33 = vmul.f32 -1000.0, %v3993_v37 }
0x11ef   :  { %v7560_v35 = vpop.eup %7559  ;;  %3808 = vst.msk [vmem:[#allocation3 + $0x8] sm:$0xff] %vm77_vm0, %v3519_v29  ;;  %v6932_v50 = vpop.f32.mrb[115].mxu0  ;;  %v3998_v29 = vadd.f32 %v9350_v30, %v9445_v47  ;;  %v6087_v30 = vmul.f32 -1000.0, %v9462_v26 }
0x11f0   :  { %v9582_v8 = vmul.f32 %v7560_v35, %v7548_v18  ;;  %v4173_v50 = vmul.f32 1.442695, %v6084_v33 }
0x11f1   :  { %v6085_v44 = vmul.f32 -1000.0, %v3998_v29  ;;  %v4080_v29 = vpack.c.bf16 %v9168_v39, %v9158_v45 }
0x11f2   :  { %4435 = vst.msk [vmem:[#allocation5 + $0xd3] sm:$0x7] %vm3413_vm3, %v9582_v8  ;;  %7561 = vpow2.f32 %v4173_v50  ;;  %v4081_v50 = vpack.c.bf16 %v9170_v61, %v9170_v61  ;;  %v10507_v23 = vpack.c.bf16 %v9582_v8, %v9566_v41 }
0x11f4   :  { %v3524_v20 = vpop.f32.mrb[116].mxu0  ;;  %v4512_v14 = vld [vmem:[#allocation3] sm:$0xff] }
0x11f5   :  { %3809 = vst.msk [vmem:[#allocation3 + $0x10] sm:$0xff] %vm77_vm0, %v3524_v20  ;;  %v6935_v5 = vpop.f32.mrb[117].mxu0  ;;  %v4003_v20 = vadd.f32 %v9352_v54, %v9442_v43 }
0x11f6   :  { %v3527_v16 = vpop.f32.mrb[118].mxu0 }
0x11f7   :  { %3810 = vst.msk [vmem:[#allocation3 + $0x18] sm:$0xff] %vm77_vm0, %v3527_v16  ;;  %v6936_v10 = vpop.f32.mrb[119].mxu0  ;;  %v6086_v63 = vmul.f32 -1000.0, %v4003_v20  ;;  %v4175_v16 = vmul.f32 1.442695, %v6085_v44 }
0x11f8   :  { %v4179_v10 = vmul.f32 1.442695, %v6087_v30  ;;  %v4085_v30 = vrot.slane %v4081_v50, 1 }
0x11f9   :  { %v4177_v37 = vmul.f32 1.442695, %v6086_v63  ;;  %7563 = vpow2.f32 %v4175_v16 }
0x11fb   :  { %7565 = vpow2.f32 %v4177_v37  ;;  %v4084_v37 = vrot.slane %v4080_v29, 1 }
0x11fc   :  { %v3532_v18 = vpop.f32.mrb[120].mxu0  ;;  %v7562_v47 = vpop.eup %7561  ;;  %7567 = vpow2.f32 %v4179_v10 }
0x11fd   :  { %3811 = vst.msk [vmem:[#allocation3 + $0x20] sm:$0xff] %vm77_vm0, %v3532_v18  ;;  %v6939_v35 = vpop.f32.mrb[121].mxu0  ;;  %v4183_v33 = vadd.f32 1.0, %v7562_v47  ;;  %v4086_v47 = vsel %vm2567_vm8, %v4084_v37, %v4085_v30  ;;  %vm10509_vm8 = vmmov %vm10508_vm10 }
0x11fe   :  { %v3535_v5 = vpop.f32.mrb[122].mxu0  ;;  %vm10524_vm3 = vmmov %vm10509_vm8 }
0x11ff   :  { %3812 = vst.msk [vmem:[#allocation3 + $0x28] sm:$0x7] %vm83_vm1, %v3535_v5  ;;  %v6940_v49 = vpop.f32.mrb[123].mxu0  ;;  %7569 = vrcp.f32 %v4183_v33 }
0x1203   :  { %v7564_v43 = vpop.eup %7563 }
0x1204   :  { %v4184_v26 = vadd.f32 1.0, %v7564_v43 }
0x1205   :  { %v7566_v20 = vpop.eup %7565 }
0x1206   :  { %v4185_v63 = vadd.f32 1.0, %v7566_v20  ;;  %7571 = vrcp.f32 %v4184_v26  ;;  %v7568_v10 = vpop.eup %7567 }
0x1207   :  { %v4186_v33 = vadd.f32 1.0, %v7568_v10 }
0x1208   :  { %7573 = vrcp.f32 %v4185_v63 }
0x1209   :  { %7575 = vrcp.f32 %v4186_v33 }
0x120f   :  { %v3682_v18 = vpop.f32.mrb[82].mxu0 }
0x1210   :  { %v6955_v35 = vpop.f32.mrb[83].mxu0 }
0x1211   :  { %v4098_v35 = vsel %vm2755_vm11, %v4085_v30, 0 }
0x1213   :  { %v3687_v54 = vpop.f32.mrb[124].mxu0 }
0x1214   :  { %v7312_v5 = vpack.c.bf16 %v3687_v54, %v3682_v18  ;;  %v6958_v49 = vpop.f32.mrb[125].mxu0  ;;  %v9611_v18 = vpop.eup %7569  ;;  %v10505_v54 = vrot.slane %v9419_v22, 3 }
0x1216   :  { %7313 = vmatprep.subr.bf16.mxu0 %v7312_v5 }
0x1217   :  { %v3692_v44 = vpop.f32.mrb[126].mxu0  ;;  %7315 = vmatpush3.bf16.msra.mxu0 %v7312_v5 }
0x1218   :  { %v6961_v16 = vpop.f32.mrb[127].mxu0  ;;  %6966 = vmatprep.subr.msk.mxu0 %vm3696_vm9, %v3692_v44 }
0x121b   :  { %6967 = vmatpush3.msk.msra.mxu0 %vm3696_vm9, %v3692_v44 }
0x121c   :  { %6969 = vmatmul.mubr.msk.f32.vlgmr.msra.gmra.mrb[128].mxu0 %vm2530_vm14, %v9473_v13  ;;  %7016 = vmatprep.subr.bf16.mxu0 %v10503_v34  ;;  %v4208_v13 = vrot.slane %v9611_v18, 3 }
0x121d   :  { %6971 = vmatprep.mubr.msk.f32.mxu0 %vm2530_vm14, %v9498_v36  ;;  %7017 = vmatpush3.bf16.msra.mxu0 %v4086_v47  ;;  %v9623_v36 = vpop.eup %7571  ;;  %v4516_v47 = vld [vmem:[#allocation3 + $0x20] sm:$0xff] }
0x121e   :  { %7018 = vmatprep.subr.bf16.mxu0 %v10503_v34  ;;  %v9632_v43 = vpop.eup %7573  ;;  %v4210_v5 = vrot.slane %v9623_v36, 3 }
0x121f   :  { %v9653_v28 = vpop.eup %7575 }
0x1220   :  { %6972 = vmatmul.mubr.msk.f32.gmra.mrb[130].mxu0 %vm2530_vm14, %v9501_v31  ;;  %v9628_v31 = vsel %vm525_vm7, %v10505_v54, %v4208_v13  ;;  %v9648_v49 = vsel %vm525_vm7, %v4208_v13, %v4210_v5  ;;  %10506 = vst [vmem:[#allocation15_spill] sm:$0xff] %v9653_v28 }
0x1221   :  { %6974 = vmatprep.mubr.msk.f32.mxu0 %vm2530_vm14, %v9531_v38  ;;  %7019 = vmatpush3.bf16.msra.mxu0 %v4098_v35  ;;  %v7321_v38 = vpack.c.bf16 %v9628_v31, %v9428_v51 }
0x1222   :  { %7320 = vmatprep.subr.bf16.mxu0 %v10504_v25 }
0x1224   :  { %6975 = vmatmul.mubr.msk.f32.gmra.mrb[132].mxu0 %vm2530_vm14, %v9526_v1  ;;  %v4212_v1 = vrot.slane %v9632_v43, 3 }
0x1225   :  { %7020 = vmatprep.mubr.msk.bf16.mxu0 %vm7684_vm2, %v10503_v34 }
0x1226   :  { %v9651_v51 = vsel %vm525_vm7, %v4210_v5, %v4212_v1 }
0x1227   :  { %v7325_v19 = vpack.c.bf16 %v9651_v51, %v9648_v49 }
0x1228   :  { %7021 = vmatmul.mubr.msk.bf16.vlgmr.msra.gmra.mrb[136].mxu0 %vm2530_vm14, %v4077_v0  ;;  %v9662_v0 = vrot.slane %v9653_v28, 3 }
0x1229   :  { %7024 = vmatprep.mubr.msk.bf16.mxu0 %vm7684_vm2, %v10503_v34 }
0x122a   :  { %7323 = vmatpush3.bf16.xpose.msk.msra.mxu0 %vm9480_vm5, %v7321_v38  ;;  %v9671_v29 = vsel %vm525_vm7, %v4212_v1, %v9662_v0 }
0x122b   :  { %7324 = vmatprep.subr.bf16.mxu0 %v10504_v25  ;;  %v7329_v21 = vpack.c.bf16 %v9662_v0, %v9671_v29 }
0x1230   :  { %7025 = vmatmul.mubr.msk.bf16.gmra.mrb[140].mxu0 %vm2530_vm14, %v4078_v62 }
0x1231   :  { %7028 = vmatprep.mubr.msk.bf16.mxu0 %vm7684_vm2, %v10503_v34 }
0x1232   :  { %7327 = vmatpush3.bf16.xpose.msk.msra.mxu0 %vm9480_vm5, %v7325_v19 }
0x1233   :  { %7328 = vmatprep.subr.bf16.mxu0 %v10504_v25  ;;  %v4513_v25 = vld [vmem:[#allocation3 + $0x8] sm:$0xff] }
0x1234   :  { %v9696_v41 = vpack.c.bf16 %v4513_v25, %v4512_v14 }
0x1238   :  { %7029 = vmatmul.mubr.msk.bf16.gmra.mrb[144].mxu0 %vm2530_vm14, %v10507_v23 }
0x1239   :  { %7044 = vmatprep.mubr.msk.f32.mxu0 %vm7684_vm2, %v10503_v34 }
0x123a   :  { %7331 = vmatpush3.bf16.xpose.msk.msra.mxu0 %vm9480_vm5, %v7329_v21  ;;  %vm10525_vm5 = vmmov %vm10524_vm3 }
0x123b   :  { %7068 = vmatprep.subr.bf16.mxu0 %v7780_v3 }
0x1241   :  { %7045 = vmatmul.mubr.msk.f32.vlgmr.msra.gmra.mrb[134].mxu0 %vm2530_vm14, %v9005_v32 }
0x1242   :  { %7069 = vmatpush3.bf16.msra.mxu0 %v7780_v3  ;;  %7047 = vmatprep.mubr.msk.f32.mxu0 %vm7684_vm2, %v10503_v34  ;;  %v4515_v3 = vld [vmem:[#allocation3 + $0x18] sm:$0xff] }
0x1243   :  { %7070 = vmatprep.subr.bf16.mxu0 %v7786_v6 }
0x1245   :  { %7048 = vmatmul.mubr.msk.f32.gmra.mrb[148].mxu0 %vm2530_vm14, %v9015_v42 }
0x1246   :  { %7071 = vmatpush3.bf16.msra.mxu0 %v7786_v6  ;;  %7050 = vmatprep.mubr.msk.f32.mxu0 %vm7684_vm2, %v10503_v34  ;;  %v4514_v6 = vld [vmem:[#allocation3 + $0x10] sm:$0xff] }
0x1247   :  { %7072 = vmatprep.subr.bf16.mxu0 %v7827_v17  ;;  %v9705_v62 = vpack.c.bf16 %v4515_v3, %v4514_v6 }
0x1249   :  { %7051 = vmatmul.mubr.msk.f32.gmra.mrb[150].mxu0 %vm2530_vm14, %v9010_v58 }
0x124a   :  { %7073 = vmatpush3.bf16.msra.mxu0 %v7827_v17  ;;  %7076 = vmatprep.mubr.msk.bf16.mxu0 %vm77_vm0, %v9696_v41 }
0x124b   :  { %7074 = vmatprep.subr.bf16.mxu0 %v7857_v24 }
0x124e   :  { %7075 = vmatpush3.bf16.msra.mxu0 %v7857_v24 }
0x124f   :  { %7098 = vmatprep.subr.bf16.mxu0 %v10503_v34 }
0x1251   :  { %7077 = vmatmul.mubr.msk.bf16.vlgmr.msra.gmra.mrb[152].mxu0 %vm77_vm0, %v9705_v62 }
0x12ef   :  { %v9710_v8 = vpop.f32.mrb[128].mxu0 }
0x12f0   :  { %v9712_v50 = vpop.f32.mrb[129].mxu0 }
0x12f1   :  { %vm3795_vm11 = vcmp.gt.f32.partialorder %v9712_v50, 0.1 }
0x12f3   :  { %v9714_v17 = vpop.f32.mrb[130].mxu0 }
0x12f4   :  { %v9716_v20 = vpop.f32.mrb[131].mxu0 }
0x12f7   :  { %v9718_v26 = vpop.f32.mrb[132].mxu0 }
0x12f8   :  { %v9720_v44 = vpop.f32.mrb[133].mxu0 }
0x12fb   :  { %v4134_v24 = vpop.f32.mrb[136].mxu0 }
0x12fc   :  { %4424 = vst.msk [vmem:[#allocation3 + $0x2b] sm:$0xff] %vm77_vm0, %v4134_v24  ;;  %v7022_v63 = vpop.f32.mrb[137].mxu0 }
0x12fd   :  { %v4137_v16 = vpop.f32.mrb[138].mxu0 }
0x12fe   :  { %4425 = vst.msk [vmem:[#allocation3 + $0x33] sm:$0xff] %vm77_vm0, %v4137_v16  ;;  %v7023_v37 = vpop.f32.mrb[139].mxu0 }
0x1303   :  { %v4142_v30 = vpop.f32.mrb[140].mxu0  ;;  %v4517_v10 = vld [vmem:[#allocation3 + $0x28] sm:$0xff] }
0x1304   :  { %4426 = vst.msk [vmem:[#allocation3 + $0x3b] sm:$0xff] %vm77_vm0, %v4142_v30  ;;  %v7026_v33 = vpop.f32.mrb[141].mxu0  ;;  %v9725_v35 = vpack.c.bf16 %v4517_v10, %v4516_v47 }
0x1305   :  { %v4145_v13 = vpop.f32.mrb[142].mxu0  ;;  %v4518_v54 = vld [vmem:[#allocation3 + $0x30] sm:$0xff] }
0x1306   :  { %4427 = vst.msk [vmem:[#allocation3 + $0x43] sm:$0xff] %vm77_vm0, %v4145_v13  ;;  %v7027_v38 = vpop.f32.mrb[143].mxu0  ;;  %7080 = vmatprep.mubr.msk.bf16.mxu0 %vm77_vm0, %v9725_v35  ;;  %v4785_v1 = vpack.c.bf16 %v4518_v54, %v4517_v10 }
0x1308   :  { %v4789_v25 = vshrl.u32 %v4785_v1, 16  ;;  %v4792_v14 = vshll.u32 %v4785_v1, 16 }
0x130a   :  { %v4791_v16 = vrot.slane %v4789_v25, 1  ;;  %v4794_v37 = vrot.slane %v4792_v14, 2 }
0x130b   :  { %v4150_v5 = vpop.f32.mrb[144].mxu0  ;;  %v4519_v19 = vld [vmem:[#allocation3 + $0x38] sm:$0xff] }
0x130c   :  { %4428 = vst.msk [vmem:[#allocation3 + $0x4b] sm:$0xff] %vm77_vm0, %v4150_v5  ;;  %v7030_v23 = vpop.f32.mrb[145].mxu0  ;;  %v9731_v21 = vpack.c.bf16 %v4519_v19, %v4518_v54  ;;  %v4795_v1 = vor.u32 %v4794_v37, %v4791_v16 }
0x130d   :  { %v4153_v3 = vpop.f32.mrb[146].mxu0  ;;  %v4520_v6 = vld [vmem:[#allocation3 + $0x40] sm:$0xff] }
0x130e   :  { %4429 = vst.msk [vmem:[#allocation3 + $0x53] sm:$0x7] %vm83_vm1, %v4153_v3  ;;  %v7031_v24 = vpop.f32.mrb[147].mxu0  ;;  %7081 = vmatmul.mubr.msk.bf16.gmra.mrb[156].mxu0 %vm77_vm0, %v9731_v21  ;;  %v4786_v63 = vpack.c.bf16 %v4520_v6, %v4519_v19 }
0x1310   :  { %v4797_v30 = vshrl.u32 %v4786_v63, 16  ;;  %v4800_v47 = vshll.u32 %v4786_v63, 16 }
0x1312   :  { %v4799_v10 = vrot.slane %v4797_v30, 1  ;;  %v4802_v33 = vrot.slane %v4800_v47, 2 }
0x1313   :  { %v4521_v13 = vld [vmem:[#allocation3 + $0x48] sm:$0xff] }
0x1314   :  { %v4300_v54 = vpop.f32.mrb[134].mxu0  ;;  %v9736_v38 = vpack.c.bf16 %v4521_v13, %v4520_v6  ;;  %v4803_v5 = vor.u32 %v4802_v33, %v4799_v10 }
0x1315   :  { %v7046_v23 = vpop.f32.mrb[135].mxu0  ;;  %v4522_v61 = vld [vmem:[#allocation3 + $0x50] sm:$0x3f] }
0x1316   :  { %7084 = vmatprep.mubr.msk.bf16.mxu0 %vm77_vm0, %v9736_v38  ;;  %v9740_v3 = vpack.c.bf16 %v4522_v61, %v4522_v61  ;;  %v4787_v19 = vpack.c.bf16 %v4522_v61, %v4521_v13  ;;  %v4804_v25 = vsel %vm10508_vm10, %v4795_v1, %v4803_v5  ;;  %vm3797_vm10 = vcmp.gt.f32.partialorder %v9716_v20, 0.1 }
0x1317   :  { %v4815_v14 = vsel %vm77_vm0, %v4804_v25, 0 }
0x1318   :  { %v4305_v24 = vpop.f32.mrb[148].mxu0  ;;  %7085 = vmatmul.mubr.msk.bf16.gmra.mrb[160].mxu0 %vm77_vm0, %v9740_v3  ;;  %v4806_v6 = vshrl.u32 %v4787_v19, 16  ;;  %v4809_v63 = vshll.u32 %v4787_v19, 16 }
0x1319   :  { %v7332_v16 = vpack.c.bf16 %v4305_v24, %v4300_v54  ;;  %7099 = vmatpush3.bf16.xpose.msra.mxu0 %v4815_v14  ;;  %v7049_v37 = vpop.f32.mrb[149].mxu0  ;;  %7104 = vmatprep.mubr.msk.bf16.mxu0 %vm7684_vm2, %v10503_v34  ;;  %v4536_v14 = vsel %vm77_vm0, %v9725_v35, 0  ;;  %v6106_v24 = vld [vmem:[%s10451_s6 + $0xd0] sm:$0xff] }
0x131a   :  { %7100 = vmatprep.subr.bf16.mxu0 %v10503_v34  ;;  %v4808_v30 = vrot.slane %v4806_v6, 1  ;;  %v4811_v61 = vrot.slane %v4809_v63, 2  ;;  %v6107_v6 = vld [vmem:[%s10451_s6 + $0xd8] sm:$0xff]  ;;  %v6109_v37 = vld [vmem:[%s10451_s6 + $0xe8] sm:$0xff] }
0x131b   :  { %7333 = vmatprep.subr.bf16.mxu1 %v7332_v16  ;;  %v5000_v63 = vpack.c.bf16 %v6107_v6, %v6106_v24 }
0x131c   :  { %v4310_v47 = vpop.f32.mrb[150].mxu0  ;;  %7335 = vmatpush3.bf16.msra.mxu1 %v7332_v16  ;;  %v4812_v10 = vor.u32 %v4811_v61, %v4808_v30  ;;  %v6108_v16 = vld [vmem:[%s10451_s6 + $0xe0] sm:$0xff]  ;;  %v6110_v61 = vld [vmem:[%s10451_s6 + $0xf0] sm:$0xff] }
0x131d   :  { %v7052_v33 = vpop.f32.mrb[151].mxu0  ;;  %7057 = vmatprep.subr.msk.mxu1 %vm3696_vm9, %v4310_v47  ;;  %v5001_v30 = vpack.c.bf16 %v6109_v37, %v6108_v16 }
0x131e   :  { %v4813_v13 = vsel %vm10509_vm8, %v4803_v5, %v4812_v10  ;;  %vm3798_vm8 = vcmp.gt.f32.partialorder %v9714_v17, 0.1 }
0x131f   :  { %v4818_v54 = vsel %vm77_vm0, %v4813_v13, 0 }
0x1320   :  { %7058 = vmatpush3.msk.msra.mxu1 %vm3696_vm9, %v4310_v47  ;;  %v6111_v47 = vld [vmem:[%s10451_s6 + $0xf8] sm:$0xff] }
0x1321   :  { %7101 = vmatpush3.bf16.xpose.msra.mxu0 %v4818_v54  ;;  %7060 = vmatmul.mubr.msk.f32.vlgmr.msra.gmra.mrb[138].mxu1 %vm2530_vm14, %v9628_v31  ;;  %v4530_v31 = vsel %vm77_vm0, %v9696_v41, 0 }
0x1322   :  { %7062 = vmatprep.mubr.msk.f32.mxu1 %vm2530_vm14, %v9648_v49  ;;  %7088 = vmatprep.subr.bf16.mxu1 %v10503_v34  ;;  %v4821_v49 = vsel %vm77_vm0, %v4812_v10, 0  ;;  %v5002_v10 = vpack.c.bf16 %v6111_v47, %v6110_v61 }
0x1323   :  { %7102 = vmatprep.subr.bf16.mxu0 %v10503_v34 }
0x1324   :  { %v7078_v1 = vpop.f32.mrb[152].mxu0 }
0x1325   :  { %7063 = vmatmul.mubr.msk.f32.gmra.mrb[140].mxu1 %vm2530_vm14, %v9651_v51  ;;  %v4581_v5 = vpop.f32.mrb[153].mxu0  ;;  %v4533_v51 = vsel %vm77_vm0, %v9705_v62, 0 }
0x1326   :  { %7065 = vmatprep.mubr.msk.f32.mxu1 %vm2530_vm14, %v9671_v29  ;;  %4669 = vperm.xlu0 %7359, %v4581_v5   ;;  %v7079_v23 = vpop.f32.mrb[154].mxu0  ;;  %v6104_v29 = vld [vmem:[%s10451_s6 + $0xc0] sm:$0xff] }
0x1327   :  { %v4584_v19 = vpop.f32.mrb[155].mxu0  ;;  %7089 = vmatpush3.bf16.xpose.msra.mxu1 %v4530_v31 }
0x1328   :  { %4674 = vperm.xlu1 %7360, %v4584_v19   ;;  %7090 = vmatprep.subr.bf16.mxu1 %v10503_v34 }
0x1329   :  { %7103 = vmatpush3.bf16.xpose.msra.mxu0 %v4821_v49  ;;  %7066 = vmatmul.mubr.msk.f32.gmra.mrb[142].mxu1 %vm2530_vm14, %v9662_v0  ;;  %v6105_v0 = vld [vmem:[%s10451_s6 + $0xc8] sm:$0xff]  ;;  %vm3796_vm14 = vcmp.gt.f32.partialorder %v9710_v8, 0.1 }
0x132a   :  { %7094 = vmatprep.mubr.msk.bf16.mxu1 %vm7684_vm2, %v10503_v34  ;;  %7128 = vmatprep.subr.bf16.mxu0 %v10503_v34  ;;  %v4999_v25 = vpack.c.bf16 %v6105_v0, %v6104_v29 }
0x132f   :  { %7091 = vmatpush3.bf16.xpose.msra.mxu1 %v4533_v51 }
0x1330   :  { %7092 = vmatprep.subr.bf16.mxu1 %v10503_v34  ;;  %7105 = vmatmul.mubr.msk.bf16.vlgmr.msra.gmra.mrb[164].mxu0 %vm77_vm0, %v7902_v7 }
0x1331   :  { %7134 = vmatprep.mubr.msk.bf16.mxu0 %vm7684_vm2, %v10503_v34 }
0x1337   :  { %7093 = vmatpush3.bf16.xpose.msra.mxu1 %v4536_v14 }
0x1338   :  { %7108 = vmatprep.subr.bf16.mxu1 %v4999_v25 }
0x133e   :  { %7095 = vmatmul.mubr.msk.bf16.vlgmr.msra.gmra.mrb[144].mxu1 %vm77_vm0, %v7902_v7 }
0x133f   :  { %7109 = vmatpush3.bf16.msra.mxu1 %v4999_v25  ;;  %7116 = vmatprep.mubr.msk.bf16.mxu1 %vm77_vm0, %v9696_v41  ;;  %v10510_v25 = vmov -9e+15  }
0x1340   :  { %7110 = vmatprep.subr.bf16.mxu1 %v5000_v63  ;;  %v9839_v14 = vsel %vm3796_vm14, 1.0, %v10510_v25  ;;  %v9842_v24 = vsel %vm3795_vm11, 1.0, %v10510_v25  ;;  %vm3799_vm14 = vcmp.gt.f32.partialorder %v9720_v44, 0.1 }
0x1341   :  { %vm4708_vm15 = vcmp.gt.f32.partialorder %v9839_v14, 0.0  ;;  %vm4707_vm12 = vcmp.gt.f32.partialorder %v9842_v24, 0.0 }
0x1343   :  { %7111 = vmatpush3.bf16.msra.mxu1 %v5000_v63 }
0x1344   :  { %7112 = vmatprep.subr.bf16.mxu1 %v5001_v30 }
0x1347   :  { %7113 = vmatpush3.bf16.msra.mxu1 %v5001_v30 }
0x1348   :  { %7114 = vmatprep.subr.bf16.mxu1 %v5002_v10 }
0x134b   :  { %7115 = vmatpush3.bf16.msra.mxu1 %v5002_v10 }
0x134c   :  { %7146 = vmatprep.subr.bf16.mxu1 %v10503_v34 }
0x134e   :  { %7117 = vmatmul.mubr.msk.bf16.vlgmr.msra.gmra.mrb[148].mxu1 %vm77_vm0, %v9705_v62 }
0x134f   :  { %7120 = vmatprep.mubr.msk.bf16.mxu1 %vm77_vm0, %v9725_v35 }
0x1356   :  { %7121 = vmatmul.mubr.msk.bf16.gmra.mrb[152].mxu1 %vm77_vm0, %v9731_v21 }
0x1357   :  { %7124 = vmatprep.mubr.msk.bf16.mxu1 %vm77_vm0, %v9736_v38 }
0x135e   :  { %7125 = vmatmul.mubr.msk.bf16.gmra.mrb[156].mxu1 %vm77_vm0, %v9740_v3 }
0x135f   :  { %7152 = vmatprep.mubr.msk.bf16.mxu1 %vm7684_vm2, %v10503_v34 }
0x13a5   :  { %v4670_v6 = vpop.permute.xlu0 %4669 }
0x13a7   :  { %v4675_v37 = vpop.permute.xlu1 %4674 }
0x13e1   :  { %v7082_v7 = vpop.f32.mrb[156].mxu0 }
0x13e2   :  { %4865 = vperm.xlu1 %7360, %v7082_v7   ;;  %v4597_v41 = vpop.f32.mrb[157].mxu0 }
0x13e3   :  { %v7083_v33 = vpop.f32.mrb[158].mxu0 }
0x13e4   :  { %4870 = vperm.xlu0 %7359, %v7083_v33   ;;  %v4600_v62 = vpop.f32.mrb[159].mxu0 }
0x13e6   :  { %4694 = vperm.xlu1 %7360, %v4600_v62  }
0x13e8   :  { %4684 = vperm.xlu0 %7359, %v7079_v23  }
0x13ea   :  { %4679 = vperm.xlu1 %7360, %v7078_v1  }
0x13eb   :  { %v7086_v35 = vpop.f32.mrb[160].mxu0 }
0x13ec   :  { %v4613_v21 = vpop.f32.mrb[161].mxu0 }
0x13ed   :  { %v7087_v13 = vpop.f32.mrb[162].mxu0 }
0x13ee   :  { %4875 = vperm.xlu1 %7360, %v4613_v21   ;;  %v4616_v38 = vpop.f32.mrb[163].mxu0 }
0x13ef   :  { %4880 = vperm.xlu0 %7359, %v4616_v38  }
0x13f2   :  { %4689 = vperm.xlu1 %7360, %v4597_v41  }
0x13f3   :  { %4885 = vperm.xlu0 %7359, %v7086_v35  }
0x13f4   :  { %v9822_v3 = vpop.f32.mrb[138].mxu1 }
0x13f5   :  { %v9824_v54 = vpop.f32.mrb[139].mxu1 }
0x13f6   :  { %vm4412_vm9 = vcmp.gt.f32.partialorder %v9824_v54, 0.1 }
0x13f8   :  { %v9826_v5 = vpop.f32.mrb[140].mxu1 }
0x13f9   :  { %v9828_v31 = vpop.f32.mrb[141].mxu1 }
0x13fc   :  { %v9830_v19 = vpop.f32.mrb[142].mxu1 }
0x13fd   :  { %v9832_v23 = vpop.f32.mrb[143].mxu1 }
0x1403   :  { %v9834_v1 = vpop.f32.mrb[164].mxu0 }
0x1404   :  { %v7106_v49 = vpop.f32.mrb[165].mxu0 }
0x1405   :  { %v4860_v51 = vpop.f32.mrb[166].mxu0 }
0x1406   :  { %v7107_v29 = vpop.f32.mrb[167].mxu0 }
0x1411   :  { %v4661_v0 = vpop.f32.mrb[144].mxu1 }
0x1412   :  { %v9845_v63 = vrot.slane %v4661_v0, %v7955_v48  ;;  %v7096_v16 = vpop.f32.mrb[145].mxu1 }
0x1413   :  { %v4664_v30 = vpop.f32.mrb[146].mxu1 }
0x1414   :  { %v4701_v61 = vadd.f32 %v9845_v63, %v4670_v6  ;;  %v4702_v8 = vadd.f32 %v9845_v63, %v4675_v37  ;;  %v7097_v47 = vpop.f32.mrb[147].mxu1 }
0x1416   :  { %v9851_v50 = vsel %vm4707_vm12, %v4701_v61, -9e+15  ;;  %v9853_v10 = vsel %vm4708_vm15, %v4702_v8, -9e+15  ;;  %vm4413_vm12 = vcmp.gt.f32.partialorder %v9822_v3, 0.1 }
0x1417   :  { %v4719_v7 = vsel %vm10511_vm4, %v9851_v50, -inf  ;;  %v4722_v41 = vsel %vm10512_vm13, %v9853_v10, -inf  ;;  %v9943_v3 = vsel %vm3799_vm14, 1.0, %v10510_v25  ;;  %vm4415_vm14 = vcmp.gt.f32.partialorder %v9826_v5, 0.1 }
0x1418   :  { %4720 = vmax.xlane.f32.xlu1 %v4719_v7  ;;  %4723 = vmax.xlane.f32.xlu0 %v4722_v41 }
0x1421   :  { %v9859_v33 = vpop.f32.mrb[148].mxu1 }
0x1422   :  { %10513 = vst [vmem:[#allocation16_spill] sm:$0xff] %v9859_v33  ;;  %v9861_v62 = vpop.f32.mrb[149].mxu1 }
0x1423   :  { %10514 = vst [vmem:[#allocation17_spill] sm:$0xff] %v9861_v62  ;;  %v9863_v35 = vpop.f32.mrb[150].mxu1 }
0x1424   :  { %10515 = vst [vmem:[#allocation18_spill] sm:$0xff] %v9863_v35  ;;  %v5088_v21 = vpack.c.bf16 %v9863_v35, %v9859_v33  ;;  %v9867_v13 = vpop.f32.mrb[151].mxu1 }
0x1425   :  { %10516 = vst [vmem:[#allocation19_spill] sm:$0xff] %v9867_v13  ;;  %v5087_v38 = vpack.c.bf16 %v9867_v13, %v9861_v62 }
0x1427   :  { %7129 = vmatpush3.bf16.msra.mxu0 %v5087_v38 }
0x1428   :  { %7130 = vmatprep.subr.bf16.mxu0 %v10503_v34 }
0x1429   :  { %v7122_v49 = vpop.f32.mrb[152].mxu1 }
0x142a   :  { %v9872_v51 = vpop.f32.mrb[153].mxu1  ;;  %v5230_v0 = vrot.slane %v7122_v49, 3 }
0x142b   :  { %10517 = vst [vmem:[#allocation20_spill] sm:$0xff] %v9872_v51  ;;  %v7123_v29 = vpop.f32.mrb[154].mxu1  ;;  %7131 = vmatpush3.bf16.msra.mxu0 %v5088_v21 }
0x142c   :  { %v5232_v6 = vrot.slane %v7123_v29, 3  ;;  %v9874_v16 = vpop.f32.mrb[155].mxu1  ;;  %7132 = vmatprep.subr.bf16.mxu0 %v10503_v34 }
0x142d   :  { %10518 = vst [vmem:[#allocation21_spill] sm:$0xff] %v9874_v16  ;;  %v5089_v37 = vpack.c.bf16 %v9874_v16, %v9872_v51  ;;  %v5192_v30 = vpack.c.bf16 %v7122_v49, %v9874_v16  ;;  %v5229_v61 = vrot.slane %v9874_v16, 3 }
0x142e   :  { %v9882_v8 = vsel %vm525_vm7, %v5230_v0, %v5232_v6 }
0x142f   :  { %10519 = vst [vmem:[#allocation22_spill] sm:$0xff] %v9882_v8  ;;  %v5100_v47 = vand.u32 %v5089_v37, %v8141_v46  ;;  %v9886_v7 = vsel %vm525_vm7, %v5229_v61, %v5230_v0  ;;  %v5196_v41 = vshrl.u32 %v5192_v30, 16  ;;  %v5199_v21 = vshll.u32 %v5192_v30, 16 }
0x1430   :  { %10520 = vst [vmem:[#allocation23_spill] sm:$0xff] %v9886_v7 }
0x1431   :  { %v9888_v38 = vpop.f32.mrb[156].mxu1  ;;  %7133 = vmatpush3.bf16.msra.mxu0 %v5100_v47  ;;  %v5198_v49 = vrot.slane %v5196_v41, 1  ;;  %v5201_v62 = vrot.slane %v5199_v21, 2 }
0x1432   :  { %10521 = vst [vmem:[#allocation24_spill] sm:$0xff] %v9888_v38  ;;  %v5069_v35 = vpop.f32.mrb[157].mxu1  ;;  %v10484_v0 = vrot.slane %v9888_v38, 3 }
0x1433   :  { %v5193_v33 = vpack.c.bf16 %v5069_v35, %v7123_v29  ;;  %v5234_v51 = vrot.slane %v5069_v35, 3  ;;  %v7127_v13 = vpop.f32.mrb[158].mxu1  ;;  %v5202_v41 = vor.u32 %v5201_v62, %v5198_v49 }
0x1434   :  { %v5072_v16 = vpop.f32.mrb[159].mxu1 }
0x1435   :  { %v5204_v39 = vshrl.u32 %v5193_v33, 16  ;;  %v5207_v45 = vshll.u32 %v5193_v33, 16  ;;  %v5194_v8 = vpack.c.bf16 %v9888_v38, %v5072_v16  ;;  %v5236_v37 = vrot.slane %v5072_v16, 3 }
0x1436   :  { %v9893_v61 = vsel %vm525_vm7, %v5232_v6, %v5234_v51 }
0x1437   :  { %v5206_v30 = vrot.slane %v5204_v39, 1  ;;  %v5209_v7 = vrot.slane %v5207_v45, 2  ;;  %v5213_v47 = vshrl.u32 %v5194_v8, 16  ;;  %v5216_v28 = vshll.u32 %v5194_v8, 16 }
0x1438   :  { %v9896_v35 = vsel %vm525_vm7, %v5234_v51, %v5236_v37  ;;  %v9901_v13 = vsel %vm525_vm7, %v5236_v37, %v10484_v0  ;;  %v9915_v37 = vsel %vm4412_vm9, 1.0, %v10510_v25  ;;  %vm4414_vm9 = vcmp.gt.f32.partialorder %v9828_v31, 0.1 }
0x1439   :  { %10522 = vst [vmem:[#allocation25_spill] sm:$0xff] %v9896_v35  ;;  %10523 = vst [vmem:[#allocation26_spill] sm:$0xff] %v9901_v13  ;;  %v5210_v33 = vor.u32 %v5209_v7, %v5206_v30  ;;  %v5215_v29 = vrot.slane %v5213_v47, 1  ;;  %v5218_v16 = vrot.slane %v5216_v28, 2  ;;  %v4891_v28 = vrot.slane %v9834_v1, %v7955_v48 }
0x143a   :  { %vm4898_vm11 = vcmp.gt.f32.partialorder %v9915_v37, 0.0 }
0x143b   :  { %v5219_v21 = vor.u32 %v5218_v16, %v5215_v29  ;;  %v5211_v6 = vsel %vm10524_vm3, %v5202_v41, %v5210_v33  ;;  %v9921_v16 = vsel %vm3798_vm8, 1.0, %v10510_v25  ;;  %vm3800_vm3 = vcmp.gt.f32.partialorder %v9718_v26, 0.1 }
0x143c   :  { %7147 = vmatpush3.bf16.msra.mxu1 %v5211_v6  ;;  %vm4710_vm13 = vcmp.gt.f32.partialorder %v9921_v16, 0.0 }
0x143d   :  { %7148 = vmatprep.subr.bf16.mxu1 %v10503_v34  ;;  %v5220_v45 = vsel %vm10525_vm5, %v5210_v33, %v5219_v21  ;;  %v5256_v39 = vand.u32 %v5219_v21, %v8141_v46  ;;  %v9918_v33 = vsel %vm3797_vm10, 1.0, %v10510_v25  ;;  %vm10526_vm5 = vmmov %vm10511_vm4  ;;  %vm4711_vm10 = vcmp.gt.f32.partialorder %v9943_v3, 0.0 }
0x143e   :  { %vm4709_vm15 = vcmp.gt.f32.partialorder %v9918_v33, 0.0 }
0x1440   :  { %7149 = vmatpush3.bf16.msra.mxu1 %v5220_v45 }
0x1441   :  { %7150 = vmatprep.subr.bf16.mxu1 %v10503_v34 }
0x1444   :  { %7151 = vmatpush3.bf16.msra.mxu1 %v5256_v39 }
0x1445   :  { %7184 = vmatprep.subr.bf16.mxu1 %v10503_v34 }
0x1461   :  { %v4866_v62 = vpop.permute.xlu1 %4865 }
0x1462   :  { %v4893_v8 = vadd.f32 %v4891_v28, %v4866_v62 }
0x1463   :  { %v4871_v51 = vpop.permute.xlu0 %4870 }
0x1464   :  { %v4894_v30 = vadd.f32 %v4891_v28, %v4871_v51  ;;  %v4911_v1 = vrot.slane %v4893_v8, 3  ;;  %v9946_v8 = vsel %vm4413_vm12, 1.0, %v10510_v25 }
0x1465   :  { %v4695_v7 = vpop.permute.xlu1 %4694  ;;  %vm4899_vm8 = vcmp.gt.f32.partialorder %v9946_v8, 0.0 }
0x1466   :  { %v4892_v49 = vadd.f32 %v4891_v28, %v4695_v7  ;;  %v4913_v21 = vrot.slane %v4894_v30, 3  ;;  %v4706_v31 = vadd.f32 %v9845_v63, %v4695_v7 }
0x1467   :  { %v4685_v47 = vpop.permute.xlu0 %4684 }
0x1468   :  { %v4910_v29 = vrot.slane %v4892_v49, 3  ;;  %v4704_v17 = vadd.f32 %v9845_v63, %v4685_v47 }
0x1469   :  { %v4680_v20 = vpop.permute.xlu1 %4679 }
0x146a   :  { %v4703_v54 = vadd.f32 %v9845_v63, %v4680_v20  ;;  %v4912_v41 = vsel %vm525_vm7, %v4910_v29, %v4911_v1  ;;  %v9948_v49 = vsel %vm4710_vm13, %v4704_v17, -9e+15  ;;  %v4914_v29 = vsel %vm525_vm7, %v4911_v1, %v4913_v21  ;;  %vm10528_vm13 = vmmov %vm10526_vm5 }
0x146b   :  { %v9930_v6 = vsel %vm4898_vm11, %v4912_v41, -9e+15  ;;  %v9953_v20 = vsel %vm3800_vm3, 1.0, %v10510_v25  ;;  %vm10527_vm11 = vmmov %vm10511_vm4  ;;  %v9961_v41 = vsel %vm4414_vm9, 1.0, %v10510_v25 }
0x146c   :  { %v9932_v45 = vsel %vm4709_vm15, %v4703_v54, -9e+15  ;;  %v4933_v39 = vsel %vm10511_vm4, %v9930_v6, -inf  ;;  %v4728_v17 = vsel %vm10527_vm11, %v9948_v49, -inf  ;;  %vm4416_vm15 = vcmp.gt.f32.partialorder %v9832_v23, 0.1  ;;  %vm10529_vm3 = vmmov %vm10526_vm5 }
0x146d   :  { %v4876_v62 = vpop.permute.xlu1 %4875  ;;  %4934 = vmax.xlane.f32.xlu1 %v4933_v39  ;;  %v4725_v51 = vsel %vm10526_vm5, %v9932_v45, -inf  ;;  %vm4712_vm12 = vcmp.gt.f32.partialorder %v9953_v20, 0.0  ;;  %vm4900_vm4 = vcmp.gt.f32.partialorder %v9961_v41, 0.0  ;;  %v9979_v23 = vsel %vm4415_vm14, 1.0, %v10510_v25  ;;  %vm10531_vm14 = vmmov %vm10529_vm3 }
0x146e   :  { %v4895_v30 = vadd.f32 %v4891_v28, %v4876_v62  ;;  %4726 = vmax.xlane.f32.xlu0 %v4725_v51  ;;  %v4881_v47 = vpop.permute.xlu0 %4880  ;;  %v9965_v62 = vsel %vm4899_vm8, %v4914_v29, -9e+15  ;;  %vm4417_vm5 = vcmp.gt.f32.partialorder %v9830_v19, 0.1  ;;  %vm4901_vm9 = vcmp.gt.f32.partialorder %v9979_v23, 0.0 }
0x146f   :  { %v4896_v26 = vadd.f32 %v4891_v28, %v4881_v47  ;;  %vm10530_vm8 = vcmask 346112  }
0x1470   :  { %v4915_v54 = vrot.slane %v4895_v30, 3 }
0x1471   :  { %v4690_v44 = vpop.permute.xlu1 %4689  ;;  %v4917_v51 = vrot.slane %v4896_v26, 3 }
0x1472   :  { %v4705_v1 = vadd.f32 %v9845_v63, %v4690_v44  ;;  %4729 = vmax.xlane.f32.xlu0 %v4728_v17  ;;  %v4886_v39 = vpop.permute.xlu0 %4885  ;;  %v4916_v47 = vsel %vm525_vm7, %v4913_v21, %v4915_v54  ;;  %v4936_v63 = vsel %vm10528_vm13, %v9965_v62, -inf  ;;  %v4718_v21 = vsel %vm4712_vm12, %v4706_v31, -9e+15  ;;  %vm10533_vm12 = vmmov %vm10529_vm3 }
0x1473   :  { %v4897_v30 = vadd.f32 %v4891_v28, %v4886_v39  ;;  %v9982_v28 = vsel %vm4416_vm15, 1.0, %v10510_v25  ;;  %v4929_v26 = vsel %vm4900_vm4, %v4916_v47, -9e+15  ;;  %v4918_v44 = vsel %vm525_vm7, %v4915_v54, %v4917_v51  ;;  %vm10532_vm15 = vmmov %vm10529_vm3 }
0x1474   :  { %v4717_v0 = vsel %vm4711_vm10, %v4705_v1, -9e+15  ;;  %vm4902_vm10 = vcmp.gt.f32.partialorder %v9982_v28, 0.0  ;;  %v4734_v5 = vsel %vm10530_vm8, %v4718_v21, -inf  ;;  %v4939_v1 = vsel %vm10531_vm14, %v4929_v26, -inf  ;;  %vm10534_vm4 = vmmov %vm10530_vm8 }
0x1475   :  { %v4919_v7 = vrot.slane %v4897_v30, 3  ;;  %v4731_v29 = vsel %vm10529_vm3, %v4717_v0, -inf  ;;  %v9992_v39 = vsel %vm4417_vm5, 1.0, %v10510_v25  ;;  %v4930_v31 = vsel %vm4901_vm9, %v4918_v44, -9e+15  ;;  %vm10535_vm13 = vmmov %vm10529_vm3 }
0x1476   :  { %4937 = vmax.xlane.f32.xlu0 %v4936_v63  ;;  %4732 = vmax.xlane.f32.xlu1 %v4731_v29  ;;  %vm4903_vm11 = vcmp.gt.f32.partialorder %v9992_v39, 0.0  ;;  %v4942_v19 = vsel %vm10532_vm15, %v4930_v31, -inf  ;;  %vm10536_vm5 = vmmov %vm10529_vm3 }
0x1477   :  { %v4920_v17 = vsel %vm525_vm7, %v4917_v51, %v4919_v7  ;;  %v9997_v51 = vsel %vm4903_vm11, %v4919_v7, -9e+15  ;;  %vm10537_vm9 = vmmov %vm10529_vm3 }
0x1478   :  { %v4931_v30 = vsel %vm4902_vm10, %v4920_v17, -9e+15  ;;  %v4948_v47 = vsel %vm10534_vm4, %v9997_v51, -inf  ;;  %vm10538_vm10 = vmmov %vm10529_vm3 }
0x1479   :  { %v4945_v54 = vsel %vm10533_vm12, %v4931_v30, -inf  ;;  %vm10539_vm8 = vmmov %vm10529_vm3 }
0x147a   :  { %4735 = vmax.xlane.f32.xlu0 %v4734_v5  ;;  %4940 = vmax.xlane.f32.xlu1 %v4939_v1  ;;  %vm10540_vm14 = vmmov %vm10529_vm3 }
0x147b   :  { %vm10541_vm11 = vmmov %vm10534_vm4 }
0x147c   :  { %vm10542_vm15 = vmmov %vm10529_vm3 }
0x147d   :  { %vm10543_vm12 = vmmov %vm10529_vm3 }
0x147e   :  { %4943 = vmax.xlane.f32.xlu0 %v4942_v19  ;;  %4946 = vmax.xlane.f32.xlu1 %v4945_v54  ;;  %vm10544_vm4 = vmmov %vm10529_vm3 }
0x1482   :  { %4949 = vmax.xlane.f32.xlu0 %v4948_v47 }
0x14a5   :  { %v4721_v25 = vpop.xlane.xlu1 %4720  ;;  %v4724_v63 = vpop.xlane.xlu0 %4723 }
0x14a6   :  { %v4737_v29 = vsub.f32 %v9851_v50, %v4721_v25  ;;  %v4738_v44 = vsub.f32 %v9853_v10, %v4724_v63 }
0x14a8   :  { %v4743_v17 = vmul.f32 1.442695, %v4737_v29  ;;  %v4745_v5 = vmul.f32 1.442695, %v4738_v44 }
0x14aa   :  { %7577 = vpow2.f32 %v4743_v17 }
0x14ab   :  { %7579 = vpow2.f32 %v4745_v5 }
0x14b4   :  { %v10003_v1 = vpop.eup %7577 }
0x14b5   :  { %v10005_v19 = vpop.eup %7579  ;;  %v4755_v7 = vsel %vm10535_vm13, %v10003_v1, 0.0  ;;  %vm10545_vm13 = vmmov %vm10541_vm11 }
0x14b6   :  { %v4758_v54 = vsel %vm10529_vm3, %v10005_v19, 0.0  ;;  %4756 = vadd.xlane.f32.xlu1 %v4755_v7 }
0x14b7   :  { %4759 = vadd.xlane.f32.xlu0 %v4758_v54 }
0x14fa   :  { %v4935_v47 = vpop.xlane.xlu1 %4934 }
0x14fb   :  { %v4951_v50 = vsub.f32 %v9930_v6, %v4935_v47  ;;  %v4727_v10 = vpop.xlane.xlu0 %4726 }
0x14fc   :  { %v4739_v25 = vsub.f32 %v9932_v45, %v4727_v10 }
0x14fd   :  { %v4957_v63 = vmul.f32 1.442695, %v4951_v50 }
0x14fe   :  { %v4747_v29 = vmul.f32 1.442695, %v4739_v25 }
0x14ff   :  { %v4730_v44 = vpop.xlane.xlu0 %4729 }
0x1500   :  { %7581 = vpow2.f32 %v4747_v29  ;;  %v4740_v17 = vsub.f32 %v9948_v49, %v4730_v44 }
0x1501   :  { %7583 = vpow2.f32 %v4957_v63 }
0x1502   :  { %v4749_v5 = vmul.f32 1.442695, %v4740_v17 }
0x1503   :  { %v4938_v46 = vpop.xlane.xlu0 %4937  ;;  %v4733_v38 = vpop.xlane.xlu1 %4732 }
0x1504   :  { %7585 = vpow2.f32 %v4749_v5  ;;  %v4952_v7 = vsub.f32 %v9965_v62, %v4938_v46  ;;  %v4741_v54 = vsub.f32 %v4717_v0, %v4733_v38 }
0x1506   :  { %v4959_v13 = vmul.f32 1.442695, %v4952_v7  ;;  %v4751_v35 = vmul.f32 1.442695, %v4741_v54 }
0x1507   :  { %v4736_v6 = vpop.xlane.xlu0 %4735  ;;  %v4941_v47 = vpop.xlane.xlu1 %4940 }
0x1508   :  { %7587 = vpow2.f32 %v4959_v13  ;;  %v4742_v45 = vsub.f32 %v4718_v21, %v4736_v6  ;;  %v4953_v50 = vsub.f32 %v4929_v26, %v4941_v47 }
0x1509   :  { %7589 = vpow2.f32 %v4751_v35 }
0x150a   :  { %v10015_v10 = vpop.eup %7581  ;;  %v4753_v25 = vmul.f32 1.442695, %v4742_v45  ;;  %v4961_v49 = vmul.f32 1.442695, %v4953_v50 }
0x150b   :  { %v4944_v63 = vpop.xlane.xlu0 %4943  ;;  %v4947_v29 = vpop.xlane.xlu1 %4946  ;;  %v4761_v44 = vsel %vm10536_vm5, %v10015_v10, 0.0  ;;  %vm1828_vm5 = vcmask 703834  }
0x150c   :  { %v10019_v17 = vpop.eup %7583  ;;  %7591 = vpow2.f32 %v4753_v25  ;;  %v4954_v46 = vsub.f32 %v4930_v31, %v4944_v63  ;;  %v4955_v38 = vsub.f32 %v4931_v30, %v4947_v29  ;;  %4762 = vadd.xlane.f32.xlu1 %v4761_v44 }
0x150d   :  { %7593 = vpow2.f32 %v4961_v49  ;;  %v4969_v26 = vsel %vm10538_vm10, %v10019_v17, 0.0  ;;  %vm1830_vm10 = vcmask 703832  }
0x150e   :  { %v10021_v0 = vpop.eup %7585  ;;  %v4963_v13 = vmul.f32 1.442695, %v4954_v46  ;;  %v4965_v35 = vmul.f32 1.442695, %v4955_v38 }
0x150f   :  { %v4950_v62 = vpop.xlane.xlu0 %4949  ;;  %v4764_v21 = vsel %vm10537_vm9, %v10021_v0, 0.0  ;;  %vm10548_vm9 = vmmov %vm10529_vm3 }
0x1510   :  { %7595 = vpow2.f32 %v4963_v13  ;;  %v4956_v5 = vsub.f32 %v9997_v51, %v4950_v62  ;;  %4765 = vadd.xlane.f32.xlu0 %v4764_v21  ;;  %4970 = vadd.xlane.f32.xlu1 %v4969_v26  ;;  %v10551_v21 = vld [vmem:[#allocation11_spill] sm:$0xff] }
0x1511   :  { %7597 = vpow2.f32 %v4965_v35 }
0x1512   :  { %v10028_v31 = vpop.eup %7587  ;;  %v4967_v30 = vmul.f32 1.442695, %v4956_v5 }
0x1513   :  { %v10030_v7 = vpop.eup %7589  ;;  %v4972_v54 = vsel %vm10539_vm8, %v10028_v31, 0.0  ;;  %vm1832_vm8 = vcmask 699736  }
0x1514   :  { %7599 = vpow2.f32 %v4967_v30  ;;  %4973 = vadd.xlane.f32.xlu0 %v4972_v54  ;;  %v4767_v6 = vsel %vm10540_vm14, %v10030_v7, 0.0  ;;  %vm10549_vm14 = vmmov %vm10529_vm3 }
0x1515   :  { %4768 = vadd.xlane.f32.xlu1 %v4767_v6 }
0x1516   :  { %v10036_v47 = vpop.eup %7591 }
0x1517   :  { %v10038_v51 = vpop.eup %7593  ;;  %v4770_v45 = vsel %vm10541_vm11, %v10036_v47, 0.0  ;;  %vm1849_vm11 = vcmask 665088  }
0x1518   :  { %4771 = vadd.xlane.f32.xlu0 %v4770_v45  ;;  %v4975_v50 = vsel %vm10542_vm15, %v10038_v51, 0.0  ;;  %vm1846_vm15 = vcmask 671232  }
0x1519   :  { %4976 = vadd.xlane.f32.xlu1 %v4975_v50 }
0x151a   :  { %v10044_v25 = vpop.eup %7595 }
0x151b   :  { %v10046_v49 = vpop.eup %7597  ;;  %v4978_v63 = vsel %vm10543_vm12, %v10044_v25, 0.0  ;;  %vm10550_vm12 = vmmov %vm10529_vm3 }
0x151c   :  { %4979 = vadd.xlane.f32.xlu0 %v4978_v63  ;;  %v4981_v29 = vsel %vm10544_vm4, %v10046_v49, 0.0  ;;  %vm10553_vm4 = vmmov %vm10529_vm3 }
0x151d   :  { %4982 = vadd.xlane.f32.xlu1 %v4981_v29 }
0x151e   :  { %v10052_v44 = vpop.eup %7599 }
0x151f   :  { %v4984_v46 = vsel %vm10545_vm13, %v10052_v44, 0.0  ;;  %vm10555_vm13 = vmmov %vm10529_vm3 }
0x1520   :  { %4985 = vadd.xlane.f32.xlu0 %v4984_v46  ;;  %v10556_v46 = vld [vmem:[#allocation12_spill] sm:$0xff] }
0x152e   :  { %1819 = vrot.lane.b32.xlu1 %v8583_v60, %s7690_s12 }
0x1532   :  { %1823 = vrot.lane.b32.xlu1 %v8586_v4, %s7690_s12 }
0x1536   :  { %1837 = vrot.lane.b32.xlu1 %v8946_v40, %s7691_s4  ;;  %1821 = vrot.lane.b32.xlu0 %v8581_v56, %s7690_s12 }
0x153a   :  { %1839 = vrot.lane.b32.xlu1 %v8949_v12, %s7691_s4  ;;  %1841 = vrot.lane.b32.xlu0 %v8998_v9, %s7691_s4  ;;  %v10546_v12 = vld [vmem:[#allocation14_spill] sm:$0xff]  ;;  %v10547_v9 = vld [vmem:[#allocation15_spill] sm:$0xff] }
0x153e   :  { %2336 = vrot.lane.b32.xlu1 %v8767_v2, %s7690_s12  ;;  %2338 = vrot.lane.b32.xlu0 %v8757_v53, %s7690_s12 }
0x1542   :  { %2340 = vrot.lane.b32.xlu1 %v8754_v27, %s7690_s12  ;;  %2351 = vrot.lane.b32.xlu0 %v9005_v32, %s7691_s4 }
0x1543   :  { %v4757_v60 = vpop.xlane.xlu1 %4756 }
0x1544   :  { %v4760_v4 = vpop.xlane.xlu0 %4759  ;;  %7601 = vrcp.f32 %v4757_v60  ;;  %v10557_v60 = vld [vmem:[#allocation13_spill] sm:$0xff] }
0x1545   :  { %7603 = vrcp.f32 %v4760_v4 }
0x1546   :  { %2353 = vrot.lane.b32.xlu1 %v9015_v42, %s7691_s4  ;;  %2355 = vrot.lane.b32.xlu0 %v9010_v58, %s7691_s4 }
0x154a   :  { %3819 = vrot.lane.b32.xlu1 %v9455_v15, %s7692_s20  ;;  %3821 = vrot.lane.b32.xlu0 %v9451_v52, %s7692_s20 }
0x154e   :  { %v7602_v56 = vpop.eup %7601  ;;  %3823 = vrot.lane.b32.xlu1 %v9453_v55, %s7692_s20  ;;  %3825 = vrot.lane.b32.xlu0 %v9475_v11, %s7692_s20 }
0x154f   :  { %v7604_v27 = vpop.eup %7603  ;;  %v4774_v53 = vmul.f32 %v7602_v56, %v10003_v1 }
0x1550   :  { %v4776_v2 = vmul.f32 %v7604_v27, %v10005_v19 }
0x1552   :  { %3827 = vrot.lane.b32.xlu1 %v9466_v57, %s7692_s20  ;;  %3829 = vrot.lane.b32.xlu0 %v9523_v59, %s7692_s20  ;;  %v10082_v40 = vpack.c.bf16 %v4776_v2, %v4774_v53 }
0x1554   :  { %7135 = vmatmul.mubr.msk.bf16.vlgmr.msra.gmra.mrb[168].mxu0 %vm10529_vm3, %v10082_v40  ;;  %vm3839_vm3 = vcmask 294032  }
0x1555   :  { %7138 = vmatprep.mubr.msk.bf16.mxu0 %vm7684_vm2, %v10503_v34 }
0x1556   :  { %3852 = vrot.lane.b32.xlu1 %v9842_v24, %s7691_s4  ;;  %3854 = vrot.lane.b32.xlu0 %v9839_v14, %s7691_s4 }
0x155a   :  { %3856 = vrot.lane.b32.xlu1 %v9918_v33, %s7691_s4  ;;  %3858 = vrot.lane.b32.xlu0 %v9921_v16, %s7691_s4 }
0x155e   :  { %3860 = vrot.lane.b32.xlu1 %v9943_v3, %s7691_s4  ;;  %3862 = vrot.lane.b32.xlu0 %v9953_v20, %s7691_s4 }
0x1562   :  { %4436 = vrot.lane.b32.xlu1 %v10546_v12, %s7692_s20  ;;  %4438 = vrot.lane.b32.xlu0 %v9419_v22, %s7692_s20 }
0x1566   :  { %4440 = vrot.lane.b32.xlu1 %v9611_v18, %s7692_s20  ;;  %4442 = vrot.lane.b32.xlu0 %v9623_v36, %s7692_s20 }
0x156a   :  { %4444 = vrot.lane.b32.xlu1 %v9632_v43, %s7692_s20  ;;  %4446 = vrot.lane.b32.xlu0 %v10547_v9, %s7692_s20 }
0x156e   :  { %4466 = vrot.lane.b32.xlu1 %v9915_v37, %s7691_s4  ;;  %4468 = vrot.lane.b32.xlu0 %v9946_v8, %s7691_s4 }
0x1572   :  { %4470 = vrot.lane.b32.xlu1 %v9961_v41, %s7691_s4  ;;  %4472 = vrot.lane.b32.xlu0 %v9979_v23, %s7691_s4 }
0x1576   :  { %4474 = vrot.lane.b32.xlu1 %v9982_v28, %s7691_s4  ;;  %4476 = vrot.lane.b32.xlu0 %v9992_v39, %s7691_s4 }
0x1599   :  { %v4763_v32 = vpop.xlane.xlu1 %4762 }
0x159a   :  { %7605 = vrcp.f32 %v4763_v32 }
0x159d   :  { %v4766_v58 = vpop.xlane.xlu0 %4765  ;;  %v4971_v42 = vpop.xlane.xlu1 %4970 }
0x159e   :  { %7607 = vrcp.f32 %v4766_v58 }
0x159f   :  { %7609 = vrcp.f32 %v4971_v42 }
0x15a1   :  { %v4974_v22 = vpop.xlane.xlu0 %4973 }
0x15a2   :  { %7611 = vrcp.f32 %v4974_v22  ;;  %v4769_v52 = vpop.xlane.xlu1 %4768 }
0x15a3   :  { %7613 = vrcp.f32 %v4769_v52 }
0x15a4   :  { %v7606_v15 = vpop.eup %7605 }
0x15a5   :  { %v4772_v55 = vpop.xlane.xlu0 %4771  ;;  %v4778_v18 = vmul.f32 %v7606_v15, %v10015_v10 }
0x15a6   :  { %7615 = vrcp.f32 %v4772_v55  ;;  %v4977_v57 = vpop.xlane.xlu1 %4976 }
0x15a7   :  { %7617 = vrcp.f32 %v4977_v57 }
0x15a8   :  { %v7608_v11 = vpop.eup %7607 }
0x15a9   :  { %v4980_v59 = vpop.xlane.xlu0 %4979  ;;  %v4780_v36 = vmul.f32 %v7608_v11, %v10021_v0  ;;  %v7610_v43 = vpop.eup %7609 }
0x15aa   :  { %7619 = vrcp.f32 %v4980_v59  ;;  %v4983_v14 = vpop.xlane.xlu1 %4982  ;;  %v4988_v33 = vmul.f32 %v7610_v43, %v10019_v17 }
0x15ab   :  { %v10120_v24 = vpack.c.bf16 %v4780_v36, %v4778_v18 }
0x15ac   :  { %v7612_v37 = vpop.eup %7611 }
0x15ad   :  { %v4990_v16 = vmul.f32 %v7612_v37, %v10028_v31  ;;  %v4986_v3 = vpop.xlane.xlu0 %4985  ;;  %7139 = vmatmul.mubr.msk.bf16.gmra.mrb[172].mxu0 %vm10548_vm9, %v10120_v24  ;;  %v7614_v8 = vpop.eup %7613  ;;  %v10552_v31 = vld [vmem:[#allocation9_spill] sm:$0xff]  ;;  %vm3157_vm9 = vcmask 519168  }
0x15ae   :  { %7621 = vrcp.f32 %v4986_v3  ;;  %v1820_v20 = vpop.permute.xlu1 %1819  ;;  %7142 = vmatprep.mubr.msk.bf16.mxu0 %vm7684_vm2, %v10503_v34  ;;  %v4782_v39 = vmul.f32 %v7614_v8, %v10030_v7  ;;  %v6114_v3 = vld [vmem:[%s10451_s6 + $0x108] sm:$0xff] }
0x15af   :  { %v10128_v41 = vpack.c.bf16 %v4990_v16, %v4988_v33  ;;  %1829 = vst.msk [vmem:[#allocation5 + $0x66] sm:$0xfc] %vm1828_vm5, %v1820_v20  ;;  %7623 = vrcp.f32 %v4983_v14  ;;  %v6113_v16 = vld [vmem:[%s10451_s6 + $0x100] sm:$0xff]  ;;  %v6115_v20 = vld [vmem:[%s10451_s6 + $0x110] sm:$0xff] }
0x15b0   :  { %v7616_v23 = vpop.eup %7615  ;;  %v5356_v8 = vpack.c.bf16 %v6114_v3, %v6113_v16 }
0x15b1   :  { %v1822_v28 = vpop.permute.xlu0 %1821  ;;  %7153 = vmatmul.mubr.msk.bf16.vlgmr.msra.gmra.mrb[160].mxu1 %vm10549_vm14, %v10128_v41  ;;  %v4784_v1 = vmul.f32 %v7616_v23, %v10036_v47  ;;  %v7618_v19 = vpop.eup %7617  ;;  %v10554_v47 = vld [vmem:[#allocation10_spill] sm:$0xff]  ;;  %vm3876_vm14 = vcmask 870912  }
0x15b2   :  { %1831 = vst.msk [vmem:[#allocation5 + $0x6e] sm:$0xff] %vm1830_vm10, %v1822_v28  ;;  %v1824_v10 = vpop.permute.xlu1 %1823  ;;  %7156 = vmatprep.mubr.msk.bf16.mxu1 %vm7684_vm2, %v10503_v34  ;;  %v4992_v13 = vmul.f32 %v7618_v19, %v10038_v51  ;;  %7164 = vmatprep.subr.bf16.mxu0 %v5356_v8  ;;  %v6116_v23 = vld [vmem:[%s10451_s6 + $0x118] sm:$0xff] }
0x15b3   :  { %1833 = vst.msk [vmem:[#allocation5 + $0x76] sm:$0xf] %vm1832_vm8, %v1824_v10  ;;  %v10139_v17 = vpack.c.bf16 %v4784_v1, %v4782_v39  ;;  %7165 = vmatpush3.bf16.msra.mxu0 %v5356_v8  ;;  %v5357_v28 = vpack.c.bf16 %v6116_v23, %v6115_v20  ;;  %v6117_v39 = vld [vmem:[%s10451_s6 + $0x120] sm:$0xff]  ;;  %v6118_v1 = vld [vmem:[%s10451_s6 + $0x128] sm:$0xff]  ;;  %v6119_v10 = vld [vmem:[%s10451_s6 + $0x130] sm:$0xff] }
0x15b4   :  { %v7620_v38 = vpop.eup %7619  ;;  %v5358_v19 = vpack.c.bf16 %v6118_v1, %v6117_v39  ;;  %v10564_v20 = vld [vmem:[#allocation20_spill] sm:$0xff] }
0x15b5   :  { %v1842_v0 = vpop.permute.xlu0 %1841  ;;  %7143 = vmatmul.mubr.msk.bf16.gmra.mrb[176].mxu0 %vm10550_vm12, %v10139_v17  ;;  %v4994_v35 = vmul.f32 %v7620_v38, %v10044_v25  ;;  %7166 = vmatprep.subr.bf16.mxu0 %v5357_v28  ;;  %v6120_v38 = vld [vmem:[%s10451_s6 + $0x138] sm:$0xff]  ;;  %vm10573_vm12 = vsmask.f32 6400 }
0x15b6   :  { %1850 = vst.msk [vmem:[#allocation5 + $0x66] sm:$0x3] %vm1849_vm11, %v1842_v0  ;;  %v1838_v62 = vpop.permute.xlu1 %1837  ;;  %v5359_v0 = vpack.c.bf16 %v6120_v38, %v6119_v10  ;;  %v10565_v38 = vld [vmem:[#allocation21_spill] sm:$0xff] }
0x15b7   :  { %3153 = vst.msk [vmem:[#allocation5 + $0x66] sm:$0x3] %vm1814_vm6, %v10551_v21  ;;  %v10149_v26 = vpack.c.bf16 %v4994_v35, %v4992_v13  ;;  %vm3154_vm6 = vcmask 523266   ;;  %7167 = vmatpush3.bf16.msra.mxu0 %v5357_v28  ;;  %v6112_v13 = vld [vmem:[%s10452_s7 + $0x3] sm:$0x1] }
0x15b8   :  { %1847 = vst.msk [vmem:[#allocation5 + $0x56] sm:$0xff] %vm1846_vm15, %v1838_v62  ;;  %v7622_v5 = vpop.eup %7621  ;;  %7168 = vmatprep.subr.bf16.mxu0 %v5358_v19  ;;  %v5083_v35 = vmul.f32 2.0, %v6112_v13 }
0x15b9   :  { %3151 = vst.msk [vmem:[#allocation5 + $0x56] sm:$0xff] %vm77_vm0, %v10552_v31  ;;  %v2339_v30 = vpop.permute.xlu0 %2338  ;;  %7157 = vmatmul.mubr.msk.bf16.gmra.mrb[164].mxu1 %vm10553_vm4, %v10149_v26  ;;  %v7624_v7 = vpop.eup %7623  ;;  %v4998_v6 = vmul.f32 %v7622_v5, %v10052_v44  ;;  %v10558_v5 = vld [vmem:[#allocation17_spill] sm:$0xff] }
0x15ba   :  { %2346 = vst.msk [vmem:[#allocation5 + $0xee] sm:$0xff] %vm1830_vm10, %v2339_v30  ;;  %v1840_v54 = vpop.permute.xlu1 %1839  ;;  %7160 = vmatprep.mubr.msk.bf16.mxu1 %vm7684_vm2, %v10503_v34  ;;  %v4996_v45 = vmul.f32 %v7624_v7, %v10046_v49  ;;  %vm3844_vm10 = vcmask 291984   ;;  %v10231_v62 = vrot.slane %v5083_v35, %v7955_v48 }
0x15bb   :  { %1848 = vst.msk [vmem:[#allocation5 + $0x5e] sm:$0xff] %vm1846_vm15, %v1840_v54  ;;  %7169 = vmatpush3.bf16.msra.mxu0 %v5358_v19 }
0x15bc   :  { %3152 = vst.msk [vmem:[#allocation5 + $0x5e] sm:$0xff] %vm77_vm0, %v10554_v47  ;;  %v10166_v25 = vpack.c.bf16 %v4998_v6, %v4996_v45  ;;  %7170 = vmatprep.subr.bf16.mxu0 %v5359_v0  ;;  %v10559_v6 = vld [vmem:[#allocation19_spill] sm:$0xff] }
0x15bd   :  { %v2352_v51 = vpop.permute.xlu0 %2351 }
0x15be   :  { %2360 = vst.msk [vmem:[#allocation5 + $0xd6] sm:$0xff] %vm1846_vm15, %v2352_v51  ;;  %v2337_v50 = vpop.permute.xlu1 %2336 }
0x15bf   :  { %3155 = vst.msk [vmem:[#allocation5 + $0xd4] sm:$0xfc] %vm3154_vm6, %v10551_v21  ;;  %7171 = vmatpush3.bf16.msra.mxu0 %v5359_v0 }
0x15c0   :  { %2345 = vst.msk [vmem:[#allocation5 + $0xe6] sm:$0xfc] %vm1828_vm5, %v2337_v50  ;;  %vm3837_vm5 = vcmask 294035   ;;  %7202 = vmatprep.subr.bf16.mxu0 %v10503_v34 }
0x15c1   :  { %v2356_v63 = vpop.permute.xlu0 %2355  ;;  %7161 = vmatmul.mubr.msk.bf16.gmra.mrb[168].mxu1 %vm10555_vm13, %v10166_v25 }
0x15c2   :  { %2362 = vst.msk [vmem:[#allocation5 + $0xe6] sm:$0x3] %vm1849_vm11, %v2356_v63  ;;  %v2341_v29 = vpop.permute.xlu1 %2340  ;;  %7190 = vmatprep.mubr.msk.bf16.mxu1 %vm7684_vm2, %v10503_v34  ;;  %vm10571_vm11 = vmmov %vm10553_vm4 }
0x15c3   :  { %2347 = vst.msk [vmem:[#allocation5 + $0xf6] sm:$0xf] %vm1832_vm8, %v2341_v29  ;;  %vm3870_vm8 = vcmask 876032  }
0x15c5   :  { %v3822_v49 = vpop.permute.xlu0 %3821 }
0x15c6   :  { %3840 = vst.msk [vmem:[#allocation5 + $0x30] sm:$0xff] %vm3839_vm3, %v3822_v49  ;;  %v2354_v44 = vpop.permute.xlu1 %2353 }
0x15c7   :  { %2361 = vst.msk [vmem:[#allocation5 + $0xde] sm:$0xff] %vm1846_vm15, %v2354_v44  ;;  %vm10572_vm15 = vmmov %vm10553_vm4 }
0x15c8   :  { %3156 = vst.msk [vmem:[#allocation5 + $0xdc] sm:$0xff] %vm77_vm0, %v10556_v46  ;;  %vm10574_vm4 = vmmov %vm10573_vm12 }
0x15c9   :  { %3158 = vst.msk [vmem:[#allocation5 + $0xe4] sm:$0xf] %vm3157_vm9, %v10557_v60  ;;  %v3826_v4 = vpop.permute.xlu0 %3825  ;;  %vm5869_vm9 = vcmask 521216  }
0x15ca   :  { %3842 = vst.msk [vmem:[#allocation5 + $0x40] sm:$0xff] %vm3839_vm3, %v3826_v4  ;;  %v3820_v56 = vpop.permute.xlu1 %3819 }
0x15cb   :  { %3838 = vst.msk [vmem:[#allocation5 + $0x28] sm:$0xf8] %vm3837_vm5, %v3820_v56  ;;  %v10560_v56 = vld [vmem:[#allocation16_spill] sm:$0xff] }
0x15cd   :  { %v3830_v27 = vpop.permute.xlu0 %3829 }
0x15ce   :  { %3845 = vst.msk [vmem:[#allocation5 + $0x50] sm:$0x3f] %vm3844_vm10, %v3830_v27  ;;  %v3824_v53 = vpop.permute.xlu1 %3823 }
0x15cf   :  { %3841 = vst.msk [vmem:[#allocation5 + $0x38] sm:$0xff] %vm3839_vm3, %v3824_v53 }
0x15d1   :  { %v3855_v2 = vpop.permute.xlu0 %3854 }
0x15d2   :  { %3872 = vst.msk [vmem:[#allocation5 + $0x8] sm:$0xff] %vm3870_vm8, %v3855_v2  ;;  %v3828_v12 = vpop.permute.xlu1 %3827 }
0x15d3   :  { %3843 = vst.msk [vmem:[#allocation5 + $0x48] sm:$0xff] %vm3839_vm3, %v3828_v12 }
0x15d5   :  { %v3859_v9 = vpop.permute.xlu0 %3858 }
0x15d6   :  { %3874 = vst.msk [vmem:[#allocation5 + $0x18] sm:$0xff] %vm3870_vm8, %v3859_v9  ;;  %v3853_v32 = vpop.permute.xlu1 %3852  ;;  %v10561_v9 = vld [vmem:[#allocation18_spill] sm:$0xff] }
0x15d7   :  { %3871 = vst.msk [vmem:[#allocation5] sm:$0xff] %vm3870_vm8, %v3853_v32 }
0x15d9   :  { %v3863_v58 = vpop.permute.xlu0 %3862 }
0x15da   :  { %3877 = vst.msk [vmem:[#allocation5 + $0x28] sm:$0x7] %vm3876_vm14, %v3863_v58  ;;  %v3857_v42 = vpop.permute.xlu1 %3856 }
0x15db   :  { %3873 = vst.msk [vmem:[#allocation5 + $0x10] sm:$0xff] %vm3870_vm8, %v3857_v42 }
0x15dd   :  { %v4439_v22 = vpop.permute.xlu0 %4438 }
0x15de   :  { %4455 = vst.msk [vmem:[#allocation5 + $0xb0] sm:$0xff] %vm3839_vm3, %v4439_v22  ;;  %v3861_v52 = vpop.permute.xlu1 %3860 }
0x15df   :  { %3875 = vst.msk [vmem:[#allocation5 + $0x20] sm:$0xff] %vm3870_vm8, %v3861_v52 }
0x15e1   :  { %v4443_v55 = vpop.permute.xlu0 %4442 }
0x15e2   :  { %4457 = vst.msk [vmem:[#allocation5 + $0xc0] sm:$0xff] %vm3839_vm3, %v4443_v55  ;;  %v4437_v15 = vpop.permute.xlu1 %4436  ;;  %v10562_v55 = vld [vmem:[#allocation23_spill] sm:$0xff] }
0x15e3   :  { %4454 = vst.msk [vmem:[#allocation5 + $0xa8] sm:$0xf8] %vm3837_vm5, %v4437_v15 }
0x15e5   :  { %v4447_v57 = vpop.permute.xlu0 %4446 }
0x15e6   :  { %4459 = vst.msk [vmem:[#allocation5 + $0xd0] sm:$0x3f] %vm3844_vm10, %v4447_v57  ;;  %v4441_v11 = vpop.permute.xlu1 %4440 }
0x15e7   :  { %4456 = vst.msk [vmem:[#allocation5 + $0xb8] sm:$0xff] %vm3839_vm3, %v4441_v11 }
0x15e9   :  { %v4469_v59 = vpop.permute.xlu0 %4468 }
0x15ea   :  { %4485 = vst.msk [vmem:[#allocation5 + $0x88] sm:$0xff] %vm3870_vm8, %v4469_v59  ;;  %v4445_v18 = vpop.permute.xlu1 %4444 }
0x15eb   :  { %4458 = vst.msk [vmem:[#allocation5 + $0xc8] sm:$0xff] %vm3839_vm3, %v4445_v18 }
0x15ed   :  { %v4473_v36 = vpop.permute.xlu0 %4472 }
0x15ee   :  { %4487 = vst.msk [vmem:[#allocation5 + $0x98] sm:$0xff] %vm3870_vm8, %v4473_v36  ;;  %v4467_v43 = vpop.permute.xlu1 %4466 }
0x15ef   :  { %4484 = vst.msk [vmem:[#allocation5 + $0x80] sm:$0xff] %vm3870_vm8, %v4467_v43  ;;  %v10563_v43 = vld [vmem:[#allocation22_spill] sm:$0xff] }
0x15f1   :  { %v4477_v14 = vpop.permute.xlu0 %4476 }
0x15f2   :  { %4489 = vst.msk [vmem:[#allocation5 + $0xa8] sm:$0x7] %vm3876_vm14, %v4477_v14  ;;  %v4471_v37 = vpop.permute.xlu1 %4470 }
0x15f3   :  { %4486 = vst.msk [vmem:[#allocation5 + $0x90] sm:$0xff] %vm3870_vm8, %v4471_v37 }
0x15f6   :  { %v4475_v33 = vpop.permute.xlu1 %4474 }
0x15f7   :  { %4488 = vst.msk [vmem:[#allocation5 + $0xa0] sm:$0xff] %vm3870_vm8, %v4475_v33 }
0x1627   :  { %v5136_v21 = vpop.f32.mrb[168].mxu0 }
0x1628   :  { %v5137_v31 = vadd.f32 %v5136_v21, %v10558_v5  ;;  %v7136_v30 = vpop.f32.mrb[169].mxu0 }
0x1629   :  { %v5139_v7 = vpop.f32.mrb[170].mxu0 }
0x162a   :  { %v5165_v54 = vadd.f32 %v10231_v62, %v5137_v31  ;;  %v5140_v47 = vadd.f32 %v5139_v7, %v10559_v6  ;;  %v7137_v51 = vpop.f32.mrb[171].mxu0 }
0x162c   :  { %v5171_v45 = vmul.f32 0.5, %v5165_v54  ;;  %v5166_v50 = vadd.f32 %v10231_v62, %v5140_v47 }
0x162e   :  { %v5177_v63 = vmax.f32 %v5171_v45, 0.0  ;;  %v5172_v29 = vmul.f32 0.5, %v5166_v50  ;;  %v10566_v45 = vld [vmem:[#allocation25_spill] sm:$0xff] }
0x1630   :  { %5183 = vst.msk [vmem:[#allocation4] sm:$0xff] %vm77_vm0, %v5177_v63  ;;  %v5178_v49 = vmax.f32 %v5172_v29, 0.0 }
0x1632   :  { %5184 = vst.msk [vmem:[#allocation4 + $0x8] sm:$0xff] %vm77_vm0, %v5178_v49 }
0x1637   :  { %v5339_v44 = vld [vmem:[#allocation4] sm:$0xff] }
0x1639   :  { %v5340_v46 = vld [vmem:[#allocation4 + $0x8] sm:$0xff] }
0x163a   :  { %v5350_v60 = vpack.c.bf16 %v5340_v46, %v5339_v44 }
0x163c   :  { %7172 = vmatprep.mubr.msk.bf16.mxu0 %vm77_vm0, %v5350_v60 }
0x1680   :  { %v5144_v4 = vpop.f32.mrb[172].mxu0 }
0x1681   :  { %v5145_v27 = vadd.f32 %v10560_v56, %v5144_v4  ;;  %v7140_v53 = vpop.f32.mrb[173].mxu0 }
0x1682   :  { %v5147_v2 = vpop.f32.mrb[174].mxu0 }
0x1683   :  { %v5167_v12 = vadd.f32 %v10231_v62, %v5145_v27  ;;  %v5148_v32 = vadd.f32 %v10561_v9, %v5147_v2  ;;  %v7141_v58 = vpop.f32.mrb[175].mxu0  ;;  %v10567_v2 = vld [vmem:[#allocation26_spill] sm:$0xff] }
0x1684   :  { %v5292_v42 = vpop.f32.mrb[160].mxu1 }
0x1685   :  { %v5173_v22 = vmul.f32 0.5, %v5167_v12  ;;  %v5168_v52 = vadd.f32 %v10231_v62, %v5148_v32  ;;  %v5293_v15 = vadd.f32 %v5292_v42, %v10562_v55  ;;  %v7154_v57 = vpop.f32.mrb[161].mxu1  ;;  %v10568_v42 = vld [vmem:[#allocation24_spill] sm:$0xff] }
0x1686   :  { %v5295_v11 = vpop.f32.mrb[162].mxu1 }
0x1687   :  { %v5179_v59 = vmax.f32 %v5173_v22, 0.0  ;;  %v5174_v18 = vmul.f32 0.5, %v5168_v52  ;;  %v5315_v36 = vadd.f32 %v5293_v15, %v10231_v62  ;;  %v5296_v14 = vadd.f32 %v5295_v11, %v10563_v43  ;;  %v7155_v37 = vpop.f32.mrb[163].mxu1 }
0x1688   :  { %v5152_v33 = vpop.f32.mrb[176].mxu0  ;;  %v10569_v22 = vrot.slane %v10568_v42, 3 }
0x1689   :  { %5185 = vst.msk [vmem:[#allocation4 + $0x10] sm:$0xff] %vm77_vm0, %v5179_v59  ;;  %v5180_v16 = vmax.f32 %v5174_v18, 0.0  ;;  %v5321_v3 = vmul.f32 0.5, %v5315_v36  ;;  %v5316_v8 = vadd.f32 %v5296_v14, %v10231_v62  ;;  %v5153_v23 = vadd.f32 %v5152_v33, %v10564_v20  ;;  %v7144_v28 = vpop.f32.mrb[177].mxu0 }
0x168a   :  { %v5155_v39 = vpop.f32.mrb[178].mxu0 }
0x168b   :  { %5186 = vst.msk [vmem:[#allocation4 + $0x18] sm:$0xff] %vm77_vm0, %v5180_v16  ;;  %v5327_v1 = vmax.f32 %v5321_v3, 0.0  ;;  %v5322_v19 = vmul.f32 0.5, %v5316_v8  ;;  %v5169_v10 = vadd.f32 %v10231_v62, %v5153_v23  ;;  %v5156_v0 = vadd.f32 %v5155_v39, %v10565_v38  ;;  %v7145_v13 = vpop.f32.mrb[179].mxu0 }
0x168c   :  { %v5300_v35 = vpop.f32.mrb[164].mxu1 }
0x168d   :  { %5333 = vst.msk [vmem:[#allocation4 + $0x2b] sm:$0xff] %vm77_vm0, %v5327_v1  ;;  %v5328_v21 = vmax.f32 %v5322_v19, 0.0  ;;  %v5175_v5 = vmul.f32 0.5, %v5169_v10  ;;  %v5170_v31 = vadd.f32 %v10231_v62, %v5156_v0  ;;  %v5301_v30 = vadd.f32 %v5300_v35, %v9893_v61  ;;  %v7158_v7 = vpop.f32.mrb[165].mxu1 }
0x168e   :  { %v5303_v54 = vpop.f32.mrb[166].mxu1 }
0x168f   :  { %5334 = vst.msk [vmem:[#allocation4 + $0x33] sm:$0xff] %vm77_vm0, %v5328_v21  ;;  %v5181_v6 = vmax.f32 %v5175_v5, 0.0  ;;  %v5176_v47 = vmul.f32 0.5, %v5170_v31  ;;  %v5317_v51 = vadd.f32 %v5301_v30, %v10231_v62  ;;  %v5304_v50 = vadd.f32 %v5303_v54, %v10566_v45  ;;  %v7159_v63 = vpop.f32.mrb[167].mxu1 }
0x1690   :  { %v5341_v46 = vld [vmem:[#allocation4 + $0x10] sm:$0xff] }
0x1691   :  { %5187 = vst.msk [vmem:[#allocation4 + $0x20] sm:$0xff] %vm77_vm0, %v5181_v6  ;;  %v5182_v29 = vmax.f32 %v5176_v47, 0.0  ;;  %v5323_v49 = vmul.f32 0.5, %v5317_v51  ;;  %v5318_v44 = vadd.f32 %v5304_v50, %v10231_v62  ;;  %v10570_v47 = vld [vmem:[#allocation8_spill] sm:$0xff] }
0x1692   :  { %v5342_v60 = vld [vmem:[#allocation4 + $0x18] sm:$0xff] }
0x1693   :  { %5188 = vst.msk [vmem:[#allocation4 + $0x28] sm:$0x7] %vm83_vm1, %v5182_v29  ;;  %v5329_v61 = vmax.f32 %v5323_v49, 0.0  ;;  %v5324_v4 = vmul.f32 0.5, %v5318_v44  ;;  %v5351_v56 = vpack.c.bf16 %v5342_v60, %v5341_v46 }
0x1694   :  { %v5308_v27 = vpop.f32.mrb[168].mxu1 }
0x1695   :  { %5335 = vst.msk [vmem:[#allocation4 + $0x3b] sm:$0xff] %vm77_vm0, %v5329_v61  ;;  %v5330_v53 = vmax.f32 %v5324_v4, 0.0  ;;  %v5309_v12 = vadd.f32 %v5308_v27, %v10567_v2  ;;  %v7162_v9 = vpop.f32.mrb[169].mxu1  ;;  %7173 = vmatmul.mubr.msk.bf16.vlgmr.msra.gmra.mrb[180].mxu0 %vm77_vm0, %v5351_v56 }
0x1696   :  { %v5311_v32 = vpop.f32.mrb[170].mxu1  ;;  %v5345_v14 = vld [vmem:[#allocation4 + $0x30] sm:$0xff] }
0x1697   :  { %5336 = vst.msk [vmem:[#allocation4 + $0x43] sm:$0xff] %vm77_vm0, %v5330_v53  ;;  %v5319_v58 = vadd.f32 %v5309_v12, %v10231_v62  ;;  %v5312_v52 = vadd.f32 %v5311_v32, %v10569_v22  ;;  %v7163_v55 = vpop.f32.mrb[171].mxu1 }
0x1698   :  { %v5343_v11 = vld [vmem:[#allocation4 + $0x20] sm:$0xff] }
0x1699   :  { %v5325_v15 = vmul.f32 0.5, %v5319_v58  ;;  %v5320_v57 = vadd.f32 %v5312_v52, %v10231_v62 }
0x169a   :  { %v5344_v59 = vld [vmem:[#allocation4 + $0x28] sm:$0xff] }
0x169b   :  { %v5331_v18 = vmax.f32 %v5325_v15, 0.0  ;;  %v5326_v36 = vmul.f32 0.5, %v5320_v57  ;;  %v5352_v43 = vpack.c.bf16 %v5344_v59, %v5343_v11 }
0x169c   :  { %v5346_v37 = vld [vmem:[#allocation4 + $0x38] sm:$0xff] }
0x169d   :  { %5337 = vst.msk [vmem:[#allocation4 + $0x4b] sm:$0xff] %vm77_vm0, %v5331_v18  ;;  %v5332_v33 = vmax.f32 %v5326_v36, 0.0  ;;  %7176 = vmatprep.mubr.msk.bf16.mxu0 %vm77_vm0, %v5352_v43  ;;  %v5353_v16 = vpack.c.bf16 %v5346_v37, %v5345_v14  ;;  %v5733_v37 = vld [vmem:[%s10453_s8 + $0x20] sm:$0xff] }
0x169e   :  { %v5347_v3 = vld [vmem:[#allocation4 + $0x40] sm:$0xff] }
0x169f   :  { %5338 = vst.msk [vmem:[#allocation4 + $0x53] sm:$0x7] %vm83_vm1, %v5332_v33  ;;  %7177 = vmatmul.mubr.msk.bf16.gmra.mrb[184].mxu0 %vm77_vm0, %v5353_v16  ;;  %v5734_v33 = vld [vmem:[%s10453_s8 + $0x28] sm:$0xff] }
0x16a0   :  { %v5739_v16 = vpack.c.bf16 %v5734_v33, %v5733_v37 }
0x16a4   :  { %v5348_v8 = vld [vmem:[#allocation4 + $0x48] sm:$0xff] }
0x16a5   :  { %v5354_v62 = vpack.c.bf16 %v5348_v8, %v5347_v3  ;;  %v5735_v3 = vld [vmem:[%s10453_s8 + $0x30] sm:$0xff]  ;;  %v5736_v8 = vld [vmem:[%s10453_s8 + $0x38] sm:$0xff] }
0x16a6   :  { %v5349_v20 = vld [vmem:[#allocation4 + $0x50] sm:$0x3f] }
0x16a7   :  { %7180 = vmatprep.mubr.msk.bf16.mxu0 %vm77_vm0, %v5354_v62  ;;  %v5355_v23 = vpack.c.bf16 %v5349_v20, %v5349_v20  ;;  %v5740_v62 = vpack.c.bf16 %v5736_v8, %v5735_v3  ;;  %v6121_v20 = vld [vmem:[%s10452_s7 + $0x4] sm:$0x1] }
0x16a9   :  { %7181 = vmatmul.mubr.msk.bf16.gmra.mrb[188].mxu0 %vm77_vm0, %v5355_v23  ;;  %v5458_v23 = vmul.f32 2.0, %v6121_v20  ;;  %v5704_v20 = vld [vmem:[#allocation2 + $0x18] sm:$0xff] }
0x16aa   :  { %7208 = vmatprep.mubr.msk.bf16.mxu0 %vm7684_vm2, %v10503_v34 }
0x1768   :  { %v10278_v28 = vpop.f32.mrb[180].mxu0 }
0x1769   :  { %v10280_v39 = vpop.f32.mrb[181].mxu0 }
0x176a   :  { %v10282_v1 = vpop.f32.mrb[182].mxu0 }
0x176b   :  { %v5460_v19 = vpack.c.bf16 %v10282_v1, %v10278_v28  ;;  %v10286_v10 = vpop.f32.mrb[183].mxu0 }
0x176c   :  { %v5459_v38 = vpack.c.bf16 %v10286_v10, %v10280_v39 }
0x176e   :  { %7185 = vmatpush3.bf16.msra.mxu1 %v5459_v38 }
0x176f   :  { %7186 = vmatprep.subr.bf16.mxu1 %v10503_v34 }
0x1772   :  { %v7178_v0 = vpop.f32.mrb[184].mxu0  ;;  %7187 = vmatpush3.bf16.msra.mxu1 %v5460_v19  ;;  %v10375_v19 = vrot.slane %v5458_v23, %v7955_v48 }
0x1773   :  { %v10291_v13 = vpop.f32.mrb[185].mxu0  ;;  %7188 = vmatprep.subr.bf16.mxu1 %v10503_v34  ;;  %v5590_v21 = vrot.slane %v7178_v0, 3 }
0x1774   :  { %v7179_v35 = vpop.f32.mrb[186].mxu0 }
0x1775   :  { %v5592_v5 = vrot.slane %v7179_v35, 3  ;;  %v10294_v31 = vpop.f32.mrb[187].mxu0 }
0x1776   :  { %v5461_v30 = vpack.c.bf16 %v10294_v31, %v10291_v13  ;;  %v5552_v7 = vpack.c.bf16 %v7178_v0, %v10294_v31  ;;  %v5589_v54 = vrot.slane %v10294_v31, 3 }
0x1777   :  { %v10301_v6 = vsel %vm525_vm7, %v5590_v21, %v5592_v5 }
0x1778   :  { %v5463_v51 = vand.u32 %v5461_v30, %v10570_v47  ;;  %v10305_v45 = vsel %vm525_vm7, %v5589_v54, %v5590_v21  ;;  %v5556_v50 = vshrl.u32 %v5552_v7, 16  ;;  %v5559_v63 = vshll.u32 %v5552_v7, 16 }
0x177a   :  { %7189 = vmatpush3.bf16.msra.mxu1 %v5463_v51  ;;  %v5558_v61 = vrot.slane %v5556_v50, 1  ;;  %v5561_v4 = vrot.slane %v5559_v63, 2 }
0x177c   :  { %v10307_v29 = vpop.f32.mrb[188].mxu0  ;;  %v5562_v59 = vor.u32 %v5561_v4, %v5558_v61 }
0x177d   :  { %v5444_v49 = vpop.f32.mrb[189].mxu0  ;;  %7191 = vmatmul.mubr.msk.bf16.vlgmr.msra.gmra.mrb[172].mxu1 %vm10571_vm11, %v10082_v40  ;;  %v5598_v9 = vrot.slane %v10307_v29, 3 }
0x177e   :  { %v5553_v44 = vpack.c.bf16 %v5444_v49, %v7179_v35  ;;  %v5594_v46 = vrot.slane %v5444_v49, 3  ;;  %v7183_v60 = vpop.f32.mrb[190].mxu0  ;;  %7194 = vmatprep.mubr.msk.bf16.mxu1 %vm7684_vm2, %v10503_v34 }
0x177f   :  { %v5447_v56 = vpop.f32.mrb[191].mxu0 }
0x1780   :  { %v5564_v27 = vshrl.u32 %v5553_v44, 16  ;;  %v5567_v53 = vshll.u32 %v5553_v44, 16  ;;  %v5554_v2 = vpack.c.bf16 %v10307_v29, %v5447_v56  ;;  %v5596_v12 = vrot.slane %v5447_v56, 3 }
0x1781   :  { %v10316_v32 = vsel %vm525_vm7, %v5592_v5, %v5594_v46 }
0x1782   :  { %v5566_v40 = vrot.slane %v5564_v27, 1  ;;  %v5569_v58 = vrot.slane %v5567_v53, 2  ;;  %v5573_v42 = vshrl.u32 %v5554_v2, 16  ;;  %v5576_v22 = vshll.u32 %v5554_v2, 16 }
0x1783   :  { %v10319_v52 = vsel %vm525_vm7, %v5594_v46, %v5596_v12  ;;  %v10324_v55 = vsel %vm525_vm7, %v5596_v12, %v5598_v9  ;;  %vm10575_vm7 = vmmov %vm10571_vm11 }
0x1784   :  { %v5570_v15 = vor.u32 %v5569_v58, %v5566_v40  ;;  %v5575_v57 = vrot.slane %v5573_v42, 1  ;;  %v5578_v11 = vrot.slane %v5576_v22, 2  ;;  %vm10576_vm6 = vmmov %vm10575_vm7  ;;  %v5701_v22 = vld [vmem:[#allocation2] sm:$0xff] }
0x1785   :  { %7195 = vmatmul.mubr.msk.bf16.gmra.mrb[176].mxu1 %vm10572_vm15, %v10120_v24  ;;  %vm10577_vm13 = vmmov %vm10576_vm6  ;;  %v5729_v24 = vld [vmem:[%s10453_s8] sm:$0xff] }
0x1786   :  { %v5579_v18 = vor.u32 %v5578_v11, %v5575_v57  ;;  %v5571_v36 = vsel %vm10573_vm12, %v5562_v59, %v5570_v15  ;;  %7198 = vmatprep.mubr.msk.bf16.mxu1 %vm7684_vm2, %v10503_v34  ;;  %vm10578_vm3 = vmmov %vm10576_vm6 }
0x1787   :  { %7203 = vmatpush3.bf16.msra.mxu0 %v5571_v36 }
0x1788   :  { %7204 = vmatprep.subr.bf16.mxu0 %v10503_v34  ;;  %v5580_v43 = vsel %vm10574_vm4, %v5570_v15, %v5579_v18  ;;  %v5607_v14 = vand.u32 %v5579_v18, %v10570_v47  ;;  %v5702_v15 = vld [vmem:[#allocation2 + $0x8] sm:$0xff] }
0x178b   :  { %7205 = vmatpush3.bf16.msra.mxu0 %v5580_v43 }
0x178c   :  { %7206 = vmatprep.subr.bf16.mxu0 %v10503_v34 }
0x178d   :  { %7199 = vmatmul.mubr.msk.bf16.gmra.mrb[180].mxu1 %vm10575_vm7, %v10139_v17 }
0x178f   :  { %7207 = vmatpush3.bf16.msra.mxu0 %v5607_v14 }
0x1792   :  { %7209 = vmatmul.mubr.msk.bf16.vlgmr.msra.gmra.mrb[192].mxu0 %vm10576_vm6, %v10128_v41  ;;  %v5730_v41 = vld [vmem:[%s10453_s8 + $0x8] sm:$0xff] }
0x1793   :  { %7212 = vmatprep.mubr.msk.bf16.mxu0 %vm7684_vm2, %v10503_v34  ;;  %v5737_v17 = vpack.c.bf16 %v5730_v41, %v5729_v24 }
0x1795   :  { %7220 = vmatprep.subr.bf16.mxu1 %v5737_v17 }
0x1796   :  { %7221 = vmatpush3.bf16.msra.mxu1 %v5737_v17 }
0x179a   :  { %7213 = vmatmul.mubr.msk.bf16.gmra.mrb[196].mxu0 %vm10577_vm13, %v10149_v26  ;;  %v5731_v26 = vld [vmem:[%s10453_s8 + $0x10] sm:$0xff] }
0x179b   :  { %7216 = vmatprep.mubr.msk.bf16.mxu0 %vm7684_vm2, %v10503_v34  ;;  %v5732_v34 = vld [vmem:[%s10453_s8 + $0x18] sm:$0xff]  ;;  %vm5863_vm2 = vcmask 523267  }
0x17a2   :  { %7217 = vmatmul.mubr.msk.bf16.gmra.mrb[200].mxu0 %vm10578_vm3, %v10166_v25  ;;  %v5738_v25 = vpack.c.bf16 %v5732_v34, %v5731_v26 }
0x17a4   :  { %7222 = vmatprep.subr.bf16.mxu1 %v5738_v25 }
0x17a5   :  { %7223 = vmatpush3.bf16.msra.mxu1 %v5738_v25 }
0x17a6   :  { %7224 = vmatprep.subr.bf16.mxu1 %v5739_v16 }
0x17a9   :  { %7225 = vmatpush3.bf16.msra.mxu1 %v5739_v16 }
0x17aa   :  { %7226 = vmatprep.subr.bf16.mxu1 %v5740_v62 }
0x17ad   :  { %7227 = vmatpush3.bf16.msra.mxu1 %v5740_v62 }
0x1850   :  { %v5499_v38 = vpop.f32.mrb[172].mxu1 }
0x1851   :  { %v5500_v0 = vadd.f32 %v5499_v38, %v10280_v39  ;;  %v7192_v35 = vpop.f32.mrb[173].mxu1 }
0x1852   :  { %v5502_v21 = vpop.f32.mrb[174].mxu1 }
0x1853   :  { %v5528_v5 = vadd.f32 %v10375_v19, %v5500_v0  ;;  %v5503_v30 = vadd.f32 %v5502_v21, %v10286_v10  ;;  %v7193_v7 = vpop.f32.mrb[175].mxu1 }
0x1855   :  { %v5534_v54 = vmul.f32 0.5, %v5528_v5  ;;  %v5529_v47 = vadd.f32 %v10375_v19, %v5503_v30 }
0x1857   :  { %v5540_v51 = vmax.f32 %v5534_v54, 0.0  ;;  %v5535_v50 = vmul.f32 0.5, %v5529_v47 }
0x1858   :  { %v5507_v63 = vpop.f32.mrb[176].mxu1 }
0x1859   :  { %5546 = vst.msk [vmem:[#allocation4] sm:$0xff] %vm77_vm0, %v5540_v51  ;;  %v5541_v48 = vmax.f32 %v5535_v50, 0.0  ;;  %v5508_v49 = vadd.f32 %v10278_v28, %v5507_v63  ;;  %v7196_v44 = vpop.f32.mrb[177].mxu1 }
0x185a   :  { %v5510_v39 = vpop.f32.mrb[178].mxu1 }
0x185b   :  { %5547 = vst.msk [vmem:[#allocation4 + $0x8] sm:$0xff] %vm77_vm0, %v5541_v48  ;;  %v5530_v46 = vadd.f32 %v10375_v19, %v5508_v49  ;;  %v5511_v10 = vadd.f32 %v10282_v1, %v5510_v39  ;;  %v7197_v60 = vpop.f32.mrb[179].mxu1 }
0x185c   :  { %v5706_v60 = vld [vmem:[#allocation2 + $0x28] sm:$0xff] }
0x185d   :  { %v5536_v61 = vmul.f32 0.5, %v5530_v46  ;;  %v5531_v4 = vadd.f32 %v10375_v19, %v5511_v10 }
0x185f   :  { %v5542_v56 = vmax.f32 %v5536_v61, 0.0  ;;  %v5537_v27 = vmul.f32 0.5, %v5531_v4 }
0x1860   :  { %v5515_v53 = vpop.f32.mrb[180].mxu1  ;;  %v5690_v2 = vld [vmem:[#allocation4] sm:$0xff] }
0x1861   :  { %5548 = vst.msk [vmem:[#allocation4 + $0x10] sm:$0xff] %vm77_vm0, %v5542_v56  ;;  %v5543_v12 = vmax.f32 %v5537_v27, 0.0  ;;  %v5516_v28 = vadd.f32 %v5515_v53, %v10291_v13  ;;  %v7200_v40 = vpop.f32.mrb[181].mxu1  ;;  %v5712_v59 = vadd.f32 %v5701_v22, %v5690_v2 }
0x1862   :  { %v5518_v58 = vpop.f32.mrb[182].mxu1  ;;  %v5691_v42 = vld [vmem:[#allocation4 + $0x8] sm:$0xff] }
0x1863   :  { %5549 = vst.msk [vmem:[#allocation4 + $0x18] sm:$0xff] %vm77_vm0, %v5543_v12  ;;  %v5532_v1 = vadd.f32 %v10375_v19, %v5516_v28  ;;  %v5519_v57 = vadd.f32 %v5518_v58, %v10294_v31  ;;  %v7201_v11 = vpop.f32.mrb[183].mxu1  ;;  %v5713_v18 = vadd.f32 %v5702_v15, %v5691_v42 }
0x1864   :  { %v5708_v11 = vld [vmem:[#allocation2 + $0x38] sm:$0xff] }
0x1865   :  { %v5538_v36 = vmul.f32 0.5, %v5532_v1  ;;  %v5533_v43 = vadd.f32 %v10375_v19, %v5519_v57  ;;  %v5643_v14 = vpop.f32.mrb[192].mxu0  ;;  %v5723_v24 = vpack.c.bf16 %v5713_v18, %v5712_v59  ;;  %v5707_v57 = vld [vmem:[#allocation2 + $0x30] sm:$0xff] }
0x1866   :  { %v5644_v13 = vadd.f32 %v5643_v14, %v10305_v45  ;;  %v7210_v41 = vpop.f32.mrb[193].mxu0  ;;  %v5703_v45 = vld [vmem:[#allocation2 + $0x10] sm:$0xff]  ;;  %v5710_v14 = vld [vmem:[#allocation2 + $0x48] sm:$0xff] }
0x1867   :  { %v5544_v17 = vmax.f32 %v5538_v36, 0.0  ;;  %v5539_v26 = vmul.f32 0.5, %v5533_v43  ;;  %v5646_v34 = vpop.f32.mrb[194].mxu0  ;;  %7228 = vmatprep.mubr.msk.bf16.mxu1 %vm77_vm0, %v5723_v24  ;;  %v5709_v43 = vld [vmem:[#allocation2 + $0x40] sm:$0xff] }
0x1868   :  { %v5666_v25 = vadd.f32 %v5644_v13, %v10375_v19  ;;  %v5647_v31 = vadd.f32 %v5646_v34, %v10301_v6  ;;  %v7211_v37 = vpop.f32.mrb[195].mxu0  ;;  %v5692_v33 = vld [vmem:[#allocation4 + $0x10] sm:$0xff] }
0x1869   :  { %5550 = vst.msk [vmem:[#allocation4 + $0x20] sm:$0xff] %vm77_vm0, %v5544_v17  ;;  %v5545_v16 = vmax.f32 %v5539_v26, 0.0  ;;  %v5714_v23 = vadd.f32 %v5703_v45, %v5692_v33  ;;  %v5711_v17 = vld [vmem:[#allocation2 + $0x50] sm:$0x3f] }
0x186a   :  { %v5672_v3 = vmul.f32 0.5, %v5666_v25  ;;  %v5667_v8 = vadd.f32 %v5647_v31, %v10375_v19  ;;  %v5693_v62 = vld [vmem:[#allocation4 + $0x18] sm:$0xff]  ;;  %v6154_v31 = vld [vmem:[%s10454_s9] ss:$0 sm:$0xff]  ;;  %s7693_s9 = smov [#allocation5]  }
0x186b   :  { %5551 = vst.msk [vmem:[#allocation4 + $0x28] sm:$0x7] %vm83_vm1, %v5545_v16  ;;  %v5715_v38 = vadd.f32 %v5704_v20, %v5693_v62  ;;  %s5876_s24 = sshll.u32 %s7693_s9, 4  ;;  %s5877_s24 = int_to_ptr.vmem [resolvable:$true] %s5876_s24 }
0x186c   :  { %v5678_v0 = vmax.f32 %v5672_v3, 0.0  ;;  %v5673_v35 = vmul.f32 0.5, %v5667_v8  ;;  %s7659_s25 = scalar_lea.vmem %s5877_s24, 4096  ;;  %p7664_p1 = scmp.lt.s32.totalorder %s5877_s24, %s5877_s24 }
0x186d   :  { %v5651_v21 = vpop.f32.mrb[196].mxu0  ;;  %v5724_v5 = vpack.c.bf16 %v5715_v38, %v5714_v23  ;;  %p7660_p0 = scmp.ne.s32.totalorder %s5877_s24, %s7659_s25  ;;  %p7665_p2 = scmp.lt.s32.totalorder %s7659_s25, %s7659_s25 }
0x186e   :  { %5684 = vst.msk [vmem:[#allocation4 + $0x2b] sm:$0xff] %vm77_vm0, %v5678_v0  ;;  %v5679_v6 = vmax.f32 %v5673_v35, 0.0  ;;  %v5652_v30 = vadd.f32 %v5651_v21, %v10316_v32  ;;  %v7214_v7 = vpop.f32.mrb[197].mxu0  ;;  %v5705_v32 = vld [vmem:[#allocation2 + $0x20] sm:$0xff] }
0x186f   :  { %v5654_v54 = vpop.f32.mrb[198].mxu0  ;;  %7229 = vmatmul.mubr.msk.bf16.vlgmr.msra.gmra.mrb[184].mxu1 %vm77_vm0, %v5724_v5  ;;  %p7666_p3 = por %p7665_p2, %p7664_p1 }
0x1870   :  { %5685 = vst.msk [vmem:[#allocation4 + $0x33] sm:$0xff] %vm77_vm0, %v5679_v6  ;;  %v5668_v47 = vadd.f32 %v5652_v30, %v10375_v19  ;;  %v5655_v51 = vadd.f32 %v5654_v54, %v10319_v52  ;;  %v7215_v50 = vpop.f32.mrb[199].mxu0  ;;  %v5694_v49 = vld [vmem:[#allocation4 + $0x20] sm:$0xff] }
0x1871   :  { %v5716_v27 = vadd.f32 %v5705_v32, %v5694_v49  ;;  %p7667_p4 = pnand %p7666_p3, %p7660_p0 }
0x1872   :  { %v5674_v63 = vmul.f32 0.5, %v5668_v47  ;;  %v5669_v48 = vadd.f32 %v5655_v51, %v10375_v19 }
0x1874   :  { %v5680_v44 = vmax.f32 %v5674_v63, 0.0  ;;  %v5675_v39 = vmul.f32 0.5, %v5669_v48 }
0x1875   :  { %v5659_v46 = vpop.f32.mrb[200].mxu0  ;;  %v5695_v10 = vld [vmem:[#allocation4 + $0x28] sm:$0xff] }
0x1876   :  { %5686 = vst.msk [vmem:[#allocation4 + $0x3b] sm:$0xff] %vm77_vm0, %v5680_v44  ;;  %v5681_v61 = vmax.f32 %v5675_v39, 0.0  ;;  %v5660_v4 = vadd.f32 %v5659_v46, %v10324_v55  ;;  %v7218_v56 = vpop.f32.mrb[201].mxu0  ;;  %v5717_v53 = vadd.f32 %v5706_v60, %v5695_v10 }
0x1877   :  { %v5662_v52 = vpop.f32.mrb[202].mxu0  ;;  %v5696_v22 = vld [vmem:[#allocation4 + $0x30] sm:$0xff] }
0x1878   :  { %5687 = vst.msk [vmem:[#allocation4 + $0x43] sm:$0xff] %vm77_vm0, %v5681_v61  ;;  %v5670_v2 = vadd.f32 %v5660_v4, %v10375_v19  ;;  %v5663_v12 = vadd.f32 %v5662_v52, %v5598_v9  ;;  %v7219_v28 = vpop.f32.mrb[203].mxu0  ;;  %v5725_v40 = vpack.c.bf16 %v5717_v53, %v5716_v27  ;;  %v5718_v18 = vadd.f32 %v5707_v57, %v5696_v22 }
0x187a   :  { %v5676_v58 = vmul.f32 0.5, %v5670_v2  ;;  %v5671_v42 = vadd.f32 %v5663_v12, %v10375_v19  ;;  %7232 = vmatprep.mubr.msk.bf16.mxu1 %vm77_vm0, %v5725_v40 }
0x187c   :  { %v5682_v55 = vmax.f32 %v5676_v58, 0.0  ;;  %v5677_v15 = vmul.f32 0.5, %v5671_v42 }
0x187d   :  { %v5697_v1 = vld [vmem:[#allocation4 + $0x38] sm:$0xff] }
0x187e   :  { %5688 = vst.msk [vmem:[#allocation4 + $0x4b] sm:$0xff] %vm77_vm0, %v5682_v55  ;;  %v5683_v59 = vmax.f32 %v5677_v15, 0.0  ;;  %v5719_v36 = vadd.f32 %v5708_v11, %v5697_v1 }
0x187f   :  { %v5698_v9 = vld [vmem:[#allocation4 + $0x40] sm:$0xff] }
0x1880   :  { %5689 = vst.msk [vmem:[#allocation4 + $0x53] sm:$0x7] %vm83_vm1, %v5683_v59  ;;  %v5726_v29 = vpack.c.bf16 %v5719_v36, %v5718_v18  ;;  %v5720_v24 = vadd.f32 %v5709_v43, %v5698_v9 }
0x1882   :  { %7233 = vmatmul.mubr.msk.bf16.gmra.mrb[188].mxu1 %vm77_vm0, %v5726_v29 }
0x1885   :  { %v5699_v19 = vld [vmem:[#allocation4 + $0x48] sm:$0xff] }
0x1886   :  { %v5721_v13 = vadd.f32 %v5710_v14, %v5699_v19 }
0x1887   :  { %v5700_v41 = vld [vmem:[#allocation4 + $0x50] sm:$0x3f] }
0x1888   :  { %v5727_v26 = vpack.c.bf16 %v5721_v13, %v5720_v24  ;;  %v5722_v34 = vadd.f32 %v5711_v17, %v5700_v41 }
0x188a   :  { %7236 = vmatprep.mubr.msk.bf16.mxu1 %vm77_vm0, %v5727_v26  ;;  %v5728_v25 = vpack.c.bf16 %v5722_v34, %v5722_v34 }
0x188c   :  { %7237 = vmatmul.mubr.msk.bf16.gmra.mrb[192].mxu1 %vm77_vm0, %v5728_v25 }
0x1942   :  { %v7230_v37 = vpop.f32.mrb[184].mxu1 }
0x1943   :  { %v5809_v33 = vadd.f32 %v7230_v37, %v6154_v31  ;;  %v5800_v16 = vpop.f32.mrb[185].mxu1 }
0x1944   :  { %v5801_v3 = vadd.f32 %v6154_v31, %v5800_v16  ;;  %v7231_v8 = vpop.f32.mrb[186].mxu1 }
0x1945   :  { %7625 = vtanh.f32 %v5809_v33  ;;  %v5812_v62 = vadd.f32 %v7231_v8, %v6154_v31  ;;  %v5803_v45 = vpop.f32.mrb[187].mxu1 }
0x1946   :  { %7627 = vtanh.f32 %v5801_v3  ;;  %v5804_v20 = vadd.f32 %v6154_v31, %v5803_v45 }
0x1947   :  { %7629 = vtanh.f32 %v5812_v62 }
0x1948   :  { %7631 = vtanh.f32 %v5804_v20 }
0x194f   :  { %v7626_v23 = vpop.eup %7625 }
0x1950   :  { %v7628_v38 = vpop.eup %7627  ;;  %5859 = vst.msk [vmem:[#allocation5 + $0x10] sm:$0xff] %vm77_vm0, %v7626_v23 }
0x1951   :  { %v7630_v0 = vpop.eup %7629  ;;  %5857 = vst.msk [vmem:[#allocation5] sm:$0xff] %vm77_vm0, %v7628_v38 }
0x1952   :  { %v7632_v35 = vpop.eup %7631  ;;  %5860 = vst.msk [vmem:[#allocation5 + $0x18] sm:$0xff] %vm77_vm0, %v7630_v0 }
0x1953   :  { %5858 = vst.msk [vmem:[#allocation5 + $0x8] sm:$0xff] %vm77_vm0, %v7632_v35 }
0x1955   :  { %v7234_v21 = vpop.f32.mrb[188].mxu1 }
0x1956   :  { %v5825_v5 = vadd.f32 %v7234_v21, %v6154_v31  ;;  %v5816_v6 = vpop.f32.mrb[189].mxu1 }
0x1957   :  { %v5817_v30 = vadd.f32 %v6154_v31, %v5816_v6  ;;  %v7235_v7 = vpop.f32.mrb[190].mxu1 }
0x1958   :  { %7633 = vtanh.f32 %v5825_v5  ;;  %v5828_v54 = vadd.f32 %v7235_v7, %v6154_v31  ;;  %v5819_v47 = vpop.f32.mrb[191].mxu1 }
0x1959   :  { %7635 = vtanh.f32 %v5817_v30  ;;  %v5820_v51 = vadd.f32 %v6154_v31, %v5819_v47 }
0x195a   :  { %7637 = vtanh.f32 %v5828_v54 }
0x195b   :  { %7639 = vtanh.f32 %v5820_v51 }
0x195f   :  { %v7238_v50 = vpop.f32.mrb[192].mxu1 }
0x1960   :  { %v5841_v63 = vadd.f32 %v7238_v50, %v6154_v31  ;;  %v5832_v48 = vpop.f32.mrb[193].mxu1 }
0x1961   :  { %v5833_v49 = vadd.f32 %v6154_v31, %v5832_v48  ;;  %v7239_v44 = vpop.f32.mrb[194].mxu1 }
0x1962   :  { %v7634_v39 = vpop.eup %7633  ;;  %7641 = vtanh.f32 %v5841_v63  ;;  %v5835_v46 = vpop.f32.mrb[195].mxu1 }
0x1963   :  { %v7636_v10 = vpop.eup %7635  ;;  %5865 = vst.msk [vmem:[#allocation5 + $0x85] sm:$0xff] %vm77_vm0, %v7634_v39  ;;  %7643 = vtanh.f32 %v5833_v49  ;;  %v5836_v32 = vadd.f32 %v6154_v31, %v5835_v46 }
0x1964   :  { %v7638_v60 = vpop.eup %7637  ;;  %5861 = vst.msk [vmem:[#allocation5 + $0x20] sm:$0xff] %vm77_vm0, %v7636_v10 }
0x1965   :  { %v7640_v61 = vpop.eup %7639  ;;  %5866 = vst.msk [vmem:[#allocation5 + $0x8d] sm:$0xff] %vm77_vm0, %v7638_v60  ;;  %7645 = vtanh.f32 %v5836_v32 }
0x1966   :  { %5862 = vst.msk [vmem:[#allocation5 + $0x28] sm:$0x7] %vm83_vm1, %v7640_v61 }
0x1967   :  { %5864 = vst.msk [vmem:[#allocation5 + $0x7d] sm:$0xf8] %vm5863_vm2, %v7640_v61 }
0x196c   :  { %v7642_v4 = vpop.eup %7641 }
0x196d   :  { %v7644_v56 = vpop.eup %7643  ;;  %5870 = vst.msk [vmem:[#allocation5 + $0xa5] sm:$0x3f] %vm5869_vm9, %v7642_v4 }
0x196e   :  { %5867 = vst.msk [vmem:[#allocation5 + $0x95] sm:$0xff] %vm77_vm0, %v7644_v56 }
0x196f   :  { %v7646_v27 = vpop.eup %7645 }
0x1970   :  { %5868 = vst.msk [vmem:[#allocation5 + $0x9d] sm:$0xff] %vm77_vm0, %v7646_v27 }
0x1971   :  { %7670 = shalt.err (!%p7667_p4)
}
0x1972   :  { %s7671_s27 = scalar_lea.hbm %s10459_s14, 4096 }
0x1973   :  { %p7672_p5 = scmp.ne.s32.totalorder %s10459_s14, %s7671_s27  ;;  %p7675_p6 = scmp.lt.u32.totalorder %s7671_s27, %s10459_s14 }
0x1975   :  { %p7677_p7 = pnand %p7675_p6, %p7672_p5 }
0x1977   :  { %7680 = shalt.err (!%p7677_p7)
}
0x1978   :  { %s7694_s6 = smov 128   ;;  %s7695_s15 = smov 8  }
0x1979   :  { %5882 = dma.vmem_to_hbm [thread:$0]  %s5877_s24, 4096, %s10459_s14, [#allocation6], %s7694_s6, %s7694_s6, %s7695_s15  }
0x197a   :  { %7681 = dma.done.wait [#allocation6], 4096  }
0x197b   :  { %7682 = vsyncadd [#allocation6], 4294963200 }
0x197c   :  { %5886 = vsyncpa [#allocation6], 1 }

</bundles_post_ra>
